<compile_context>
chip_gen: v7x
topology: tpu7x:2x2x1
jax: 0.10.0
libtpu: 0.0.40
codegen_flags: <defaults>
</compile_context>

<pallas_src>
import functools

import jax
import jax.numpy as jnp
from jax.experimental import pallas as pl
from jax.experimental.pallas import tpu as pltpu


# ----------------------------------------------------------------------------
# Fused kernel: all encoder blocks for `bs` images per grid step.
# ----------------------------------------------------------------------------
def _encoder_fused_kernel(block_dims, bs, compute_dtype, x_ref, *refs):
    """Ref layout (per grid step = `bs` images):

      x_ref              : (bs, H0*W0, C0)            flattened NHWC inputs
      refs[0:nb]         : w_b   (9, Cin_b, Cout_b)   conv taps, row-major dy*3+dx
      refs[nb:2nb]       : scale_b (1, Cout_b)        folded BN scale
      refs[2nb:3nb]      : shift_b (1, Cout_b)        folded BN shift (incl. conv bias)
      refs[3nb]          : out_ref (bs, Hout*Wout, C_last)
      refs[3nb+1:4nb+1]  : pad_b  (bs*(Hb+2)*(Wb+2), Cin_b)  zero-padded stacked inputs
      refs[4nb+1:5nb+1]  : conv_b (M_b, Cout_b)       stacked conv+BN+act results
    """
    nb = len(block_dims)
    w_refs = refs[0:nb]
    scale_refs = refs[nb:2 * nb]
    shift_refs = refs[2 * nb:3 * nb]
    out_ref = refs[3 * nb]
    pad_refs = refs[3 * nb + 1:4 * nb + 1]
    conv_refs = refs[4 * nb + 1:5 * nb + 1]

    # ---- Stage the input images into block 0's zero-padded scratch ----------
    H0, W0, _, _ = block_dims[0]
    Hp0, Wp0 = H0 + 2, W0 + 2
    pad0 = pad_refs[0]
    pad0[...] = jnp.zeros(pad0.shape, jnp.float32)
    for i in range(bs):
        base = i * Hp0 * Wp0
        for h in range(H0):
            pad0[pl.ds(base + (h + 1) * Wp0 + 1, W0), :] = x_ref[i, pl.ds(h * W0, W0), :]

    # ---- Blocks --------------------------------------------------------------
    for b, (Hb, Wb, Cin, Cout) in enumerate(block_dims):
        Hp, Wp = Hb + 2, Wb + 2
        # rows covering every valid output pixel of every image in the group
        M = (bs - 1) * Hp * Wp + Hb * Wp - 2
        pad = pad_refs[b]
        conv = conv_refs[b]
        w = w_refs[b]

        # 3x3 conv: 9 whole-group tap matmuls on the MXU.  The LHS for tap
        # (dy,dx) is one contiguous sublane window of the stacked padded images
        # (pad rows between images make the stacking safe; their result rows
        # are garbage but never read).
        acc = jnp.zeros((M, Cout), jnp.float32)
        for dy in range(3):
            for dx in range(3):
                lhs = pad[pl.ds(dy * Wp + dx, M), :].astype(compute_dtype)
                rhs = w[3 * dy + dx].astype(compute_dtype)
                acc += jnp.dot(lhs, rhs, preferred_element_type=jnp.float32)

        # BatchNorm (eval, folded) + LeakyReLU(0.01); Dropout = identity (eval).
        y = acc * scale_refs[b][...] + shift_refs[b][...]
        y = jnp.where(y > 0, y, 0.01 * y)
        conv[...] = y

        # 2x2/2 max-pool: 4 stride-2 sublane slices per pooled row, written
        # straight into the next block's padded input (or the kernel output).
        Hh, Wh = Hb // 2, Wb // 2
        last = (b == nb - 1)
        if not last:
            Hn, Wn, _, _ = block_dims[b + 1]          # Hn == Hh, Wn == Wh
            Hpn, Wpn = Hn + 2, Wn + 2
            nxt = pad_refs[b + 1]
            nxt[...] = jnp.zeros(nxt.shape, jnp.float32)
        for i in range(bs):
            cbase = i * Hp * Wp
            for j in range(Hh):
                p00 = conv[pl.ds(cbase + (2 * j) * Wp + 0, Wh, stride=2), :]
                p01 = conv[pl.ds(cbase + (2 * j) * Wp + 1, Wh, stride=2), :]
                p10 = conv[pl.ds(cbase + (2 * j + 1) * Wp + 0, Wh, stride=2), :]
                p11 = conv[pl.ds(cbase + (2 * j + 1) * Wp + 1, Wh, stride=2), :]
                pooled = jnp.maximum(jnp.maximum(p00, p01), jnp.maximum(p10, p11))
                if last:
                    out_ref[i, pl.ds(j * Wh, Wh), :] = pooled
                else:
                    nxt[pl.ds(i * Hpn * Wpn + (j + 1) * Wpn + 1, Wh), :] = pooled


def _pick_group_size(n, cap):
    """Largest divisor of n not exceeding cap (images per grid step)."""
    for bs in range(min(n, cap), 0, -1):
        if n % bs == 0:
            return bs
    return 1


# ----------------------------------------------------------------------------
# Wrapper: whole Encoder in one pallas_call.
# ----------------------------------------------------------------------------
def encoder_forward_pallas(x_nchw, params_list, eps=1e-5,
                           compute_dtype=jnp.float32, max_images_per_step=8):
    # PyTorch input is NCHW; kernel layout is channels-last (glue, not hot path).
    x = jnp.transpose(x_nchw, (0, 2, 3, 1)).astype(jnp.float32)
    N, H, W, C = x.shape

    block_dims = []
    ws, scales, shifts = [], [], []
    h, w_, cin = H, W, C
    for p in params_list:
        cout = p["w"].shape[-1]
        assert h % 2 == 0 and w_ % 2 == 0, "spatial dims must be divisible by 2 per block"
        block_dims.append((h, w_, cin, cout))
        scale = p["gamma"] / jnp.sqrt(p["var"] + eps)
        shift = p["beta"] - p["mean"] * scale + p["b"] * scale
        ws.append(p["w"].reshape(9, cin, cout).astype(jnp.float32))     # HWIO -> (9,Cin,Cout)
        scales.append(scale.reshape(1, cout).astype(jnp.float32))
        shifts.append(shift.reshape(1, cout).astype(jnp.float32))
        h, w_, cin = h // 2, w_ // 2, cout
    Hout, Wout, Cl = h, w_, cin

    bs = _pick_group_size(N, max_images_per_step)
    n_groups = N // bs

    in_specs = [pl.BlockSpec((bs, H * W, C), lambda g: (g, 0, 0))]
    for (hb, wb, ci, co) in block_dims:
        in_specs.append(pl.BlockSpec((9, ci, co), lambda g: (0, 0, 0)))
    for (hb, wb, ci, co) in block_dims:
        in_specs.append(pl.BlockSpec((1, co), lambda g: (0, 0)))
    for (hb, wb, ci, co) in block_dims:
        in_specs.append(pl.BlockSpec((1, co), lambda g: (0, 0)))

    scratch_shapes = []
    for (hb, wb, ci, co) in block_dims:                                   # padded stacked inputs
        scratch_shapes.append(pltpu.VMEM((bs * (hb + 2) * (wb + 2), ci), jnp.float32))
    for (hb, wb, ci, co) in block_dims:                                   # stacked conv results
        m = (bs - 1) * (hb + 2) * (wb + 2) + hb * (wb + 2) - 2
        scratch_shapes.append(pltpu.VMEM((m, co), jnp.float32))

    kernel = functools.partial(_encoder_fused_kernel, tuple(block_dims), bs, compute_dtype)

    out = pl.pallas_call(
        kernel,
        out_shape=jax.ShapeDtypeStruct((N, Hout * Wout, Cl), jnp.float32),
        grid=(n_groups,),
        in_specs=in_specs,
        out_specs=pl.BlockSpec((bs, Hout * Wout, Cl), lambda g: (g, 0, 0)),
        scratch_shapes=scratch_shapes,
        compiler_params=pltpu.CompilerParams(dimension_semantics=("parallel",)),
    )(x.reshape(N, H * W, C), *ws, *scales, *shifts)

    out = out.reshape(N, Hout, Wout, Cl)
    return jnp.transpose(out, (0, 3, 1, 2))          # back to NCHW


# ----------------------------------------------------------------------------
# Parameter init (matches the PyTorch module structure, eval-mode stats)
# ----------------------------------------------------------------------------
def init_encoder_params(key, in_channels, num_filters):
    couts = [num_filters // 2, num_filters // 2, num_filters, num_filters]
    params = []
    cin = in_channels
    for cout in couts:
        key, kw, kb, kg, kbe, km, kv = jax.random.split(key, 7)
        params.append(dict(
            w=0.1 * jax.random.normal(kw, (3, 3, cin, cout), jnp.float32),  # HWIO
            b=0.1 * jax.random.normal(kb, (cout,), jnp.float32),
            gamma=1.0 + 0.1 * jax.random.normal(kg, (cout,), jnp.float32),
            beta=0.1 * jax.random.normal(kbe, (cout,), jnp.float32),
            mean=0.1 * jax.random.normal(km, (cout,), jnp.float32),
            var=0.5 + 0.1 * jnp.abs(jax.random.normal(kv, (cout,), jnp.float32)),
        ))
        cin = cout
    return params


# ----------------------------------------------------------------------------
# Pure-JAX reference (verification only)
# ----------------------------------------------------------------------------
def _ref_block(x_nhwc, p, eps=1e-5):
    y = jax.lax.conv_general_dilated(
        x_nhwc, p["w"], window_strides=(1, 1), padding=((1, 1), (1, 1)),
        dimension_numbers=("NHWC", "HWIO", "NHWC"))
    y = y + p["b"]
    y = p["gamma"] * (y - p["mean"]) / jnp.sqrt(p["var"] + eps) + p["beta"]
    y = jnp.where(y > 0, y, 0.01 * y)
    y = jax.lax.reduce_window(y, -jnp.inf, jax.lax.max,
                              (1, 2, 2, 1), (1, 2, 2, 1), "VALID")
    return y


def _ref_forward(x_nchw, params_list):
    x = jnp.transpose(x_nchw, (0, 2, 3, 1))
    for p in params_list:
        x = _ref_block(x, p)
    return jnp.transpose(x, (0, 3, 1, 2))


if __name__ == "__main__":
    # Small synthetic config: OBSERVATION_DIM = (4, 16, 16), F = 16.
    N, C, H, W = 2, 4, 16, 16
    NUM_FILTERS = 16

    key = jax.random.PRNGKey(0)
    key, kx = jax.random.split(key)
    x = jax.random.normal(kx, (N, C, H, W), jnp.float32)   # NCHW, like PyTorch

    params = init_encoder_params(key, C, NUM_FILTERS)

    fwd = jax.jit(encoder_forward_pallas)
    out = jax.block_until_ready(fwd(x, params))
    ref = jax.block_until_ready(_ref_forward(x, params))

    assert out.shape == (N, NUM_FILTERS, H // 16, W // 16), out.shape
    assert jnp.allclose(out, ref, rtol=1e-4, atol=1e-4), (
        float(jnp.max(jnp.abs(out - ref))))

    print("KERNEL_OK")
</pallas_src>

<mosaic_0001>
module attributes {stable_mosaic.version = 11 : i64} {
  func.func @_encoder_fused_kernel(%arg0: i32, %arg1: memref<2x256x4xf32, #tpu.memory_space<vmem>>, %arg2: memref<9x4x8xf32, #tpu.memory_space<vmem>>, %arg3: memref<9x8x8xf32, #tpu.memory_space<vmem>>, %arg4: memref<9x8x16xf32, #tpu.memory_space<vmem>>, %arg5: memref<9x16x16xf32, #tpu.memory_space<vmem>>, %arg6: memref<1x8xf32, #tpu.memory_space<vmem>>, %arg7: memref<1x8xf32, #tpu.memory_space<vmem>>, %arg8: memref<1x16xf32, #tpu.memory_space<vmem>>, %arg9: memref<1x16xf32, #tpu.memory_space<vmem>>, %arg10: memref<1x8xf32, #tpu.memory_space<vmem>>, %arg11: memref<1x8xf32, #tpu.memory_space<vmem>>, %arg12: memref<1x16xf32, #tpu.memory_space<vmem>>, %arg13: memref<1x16xf32, #tpu.memory_space<vmem>>, %arg14: memref<2x1x16xf32, #tpu.memory_space<vmem>>, %arg15: memref<648x4xf32, #tpu.memory_space<vmem>>, %arg16: memref<200x8xf32, #tpu.memory_space<vmem>>, %arg17: memref<72x8xf32, #tpu.memory_space<vmem>>, %arg18: memref<32x16xf32, #tpu.memory_space<vmem>>, %arg19: memref<610x8xf32, #tpu.memory_space<vmem>>, %arg20: memref<178x8xf32, #tpu.memory_space<vmem>>, %arg21: memref<58x16xf32, #tpu.memory_space<vmem>>, %arg22: memref<22x16xf32, #tpu.memory_space<vmem>>) attributes {dimension_semantics = [#tpu.dimension_semantics<parallel>], iteration_bounds = array<i64: 1>, scalar_prefetch = 0 : i64, scratch_operands = 8 : i64, tpu.core_type = #tpu.core_type<tc>, window_params = [{transform_indices = @transform_0, window_bounds = array<i64: 2, 256, 4>}, {pipeline_mode = #tpu.pipeline_mode<synchronous>, transform_indices = @transform_1, window_bounds = array<i64: 9, 4, 8>}, {pipeline_mode = #tpu.pipeline_mode<synchronous>, transform_indices = @transform_2, window_bounds = array<i64: 9, 8, 8>}, {pipeline_mode = #tpu.pipeline_mode<synchronous>, transform_indices = @transform_3, window_bounds = array<i64: 9, 8, 16>}, {pipeline_mode = #tpu.pipeline_mode<synchronous>, transform_indices = @transform_4, window_bounds = array<i64: 9, 16, 16>}, {pipeline_mode = #tpu.pipeline_mode<synchronous>, transform_indices = @transform_5, window_bounds = array<i64: 1, 8>}, {pipeline_mode = #tpu.pipeline_mode<synchronous>, transform_indices = @transform_6, window_bounds = array<i64: 1, 8>}, {pipeline_mode = #tpu.pipeline_mode<synchronous>, transform_indices = @transform_7, window_bounds = array<i64: 1, 16>}, {pipeline_mode = #tpu.pipeline_mode<synchronous>, transform_indices = @transform_8, window_bounds = array<i64: 1, 16>}, {pipeline_mode = #tpu.pipeline_mode<synchronous>, transform_indices = @transform_9, window_bounds = array<i64: 1, 8>}, {pipeline_mode = #tpu.pipeline_mode<synchronous>, transform_indices = @transform_10, window_bounds = array<i64: 1, 8>}, {pipeline_mode = #tpu.pipeline_mode<synchronous>, transform_indices = @transform_11, window_bounds = array<i64: 1, 16>}, {pipeline_mode = #tpu.pipeline_mode<synchronous>, transform_indices = @transform_12, window_bounds = array<i64: 1, 16>}, {transform_indices = @transform_13, window_bounds = array<i64: 2, 1, 16>}]} {
    %cst = arith.constant 0.000000e+00 : f32
    %0 = vector.broadcast %cst : f32 to vector<648x4xf32>
    %c0 = arith.constant 0 : index
    %c0_0 = arith.constant 0 : index
    %1 = vector.load %arg15[%c0, %c0_0] : memref<648x4xf32, #tpu.memory_space<vmem>>, vector<648x4xf32>
    tpu.vector_store %arg15[%c0, %c0_0], %0 {strides = array<i32>} : memref<648x4xf32, #tpu.memory_space<vmem>>, vector<648x4xf32>,
    %c0_1 = arith.constant 0 : index
    %c0_2 = arith.constant 0 : index
    %c0_3 = arith.constant 0 : index
    %2 = vector.load %arg1[%c0_1, %c0_2, %c0_3] : memref<2x256x4xf32, #tpu.memory_space<vmem>>, vector<1x16x4xf32>
    %3 = vector.shape_cast %2 : vector<1x16x4xf32> to vector<16x4xf32>
    %c19 = arith.constant 19 : index
    %c0_4 = arith.constant 0 : index
    %4 = vector.load %arg15[%c19, %c0_4] : memref<648x4xf32, #tpu.memory_space<vmem>>, vector<16x4xf32>
    tpu.vector_store %arg15[%c19, %c0_4], %3 {strides = array<i32>} : memref<648x4xf32, #tpu.memory_space<vmem>>, vector<16x4xf32>,
    %c0_5 = arith.constant 0 : index
    %c16 = arith.constant 16 : index
    %c0_6 = arith.constant 0 : index
    %5 = vector.load %arg1[%c0_5, %c16, %c0_6] : memref<2x256x4xf32, #tpu.memory_space<vmem>>, vector<1x16x4xf32>
    %6 = vector.shape_cast %5 : vector<1x16x4xf32> to vector<16x4xf32>
    %c37 = arith.constant 37 : index
    %c0_7 = arith.constant 0 : index
    %7 = vector.load %arg15[%c37, %c0_7] : memref<648x4xf32, #tpu.memory_space<vmem>>, vector<16x4xf32>
    tpu.vector_store %arg15[%c37, %c0_7], %6 {strides = array<i32>} : memref<648x4xf32, #tpu.memory_space<vmem>>, vector<16x4xf32>,
    %c0_8 = arith.constant 0 : index
    %c32 = arith.constant 32 : index
    %c0_9 = arith.constant 0 : index
    %8 = vector.load %arg1[%c0_8, %c32, %c0_9] : memref<2x256x4xf32, #tpu.memory_space<vmem>>, vector<1x16x4xf32>
    %9 = vector.shape_cast %8 : vector<1x16x4xf32> to vector<16x4xf32>
    %c55 = arith.constant 55 : index
    %c0_10 = arith.constant 0 : index
    %10 = vector.load %arg15[%c55, %c0_10] : memref<648x4xf32, #tpu.memory_space<vmem>>, vector<16x4xf32>
    tpu.vector_store %arg15[%c55, %c0_10], %9 {strides = array<i32>} : memref<648x4xf32, #tpu.memory_space<vmem>>, vector<16x4xf32>,
    %c0_11 = arith.constant 0 : index
    %c48 = arith.constant 48 : index
    %c0_12 = arith.constant 0 : index
    %11 = vector.load %arg1[%c0_11, %c48, %c0_12] : memref<2x256x4xf32, #tpu.memory_space<vmem>>, vector<1x16x4xf32>
    %12 = vector.shape_cast %11 : vector<1x16x4xf32> to vector<16x4xf32>
    %c73 = arith.constant 73 : index
    %c0_13 = arith.constant 0 : index
    %13 = vector.load %arg15[%c73, %c0_13] : memref<648x4xf32, #tpu.memory_space<vmem>>, vector<16x4xf32>
    tpu.vector_store %arg15[%c73, %c0_13], %12 {strides = array<i32>} : memref<648x4xf32, #tpu.memory_space<vmem>>, vector<16x4xf32>,
    %c0_14 = arith.constant 0 : index
    %c64 = arith.constant 64 : index
    %c0_15 = arith.constant 0 : index
    %14 = vector.load %arg1[%c0_14, %c64, %c0_15] : memref<2x256x4xf32, #tpu.memory_space<vmem>>, vector<1x16x4xf32>
    %15 = vector.shape_cast %14 : vector<1x16x4xf32> to vector<16x4xf32>
    %c91 = arith.constant 91 : index
    %c0_16 = arith.constant 0 : index
    %16 = vector.load %arg15[%c91, %c0_16] : memref<648x4xf32, #tpu.memory_space<vmem>>, vector<16x4xf32>
    tpu.vector_store %arg15[%c91, %c0_16], %15 {strides = array<i32>} : memref<648x4xf32, #tpu.memory_space<vmem>>, vector<16x4xf32>,
    %c0_17 = arith.constant 0 : index
    %c80 = arith.constant 80 : index
    %c0_18 = arith.constant 0 : index
    %17 = vector.load %arg1[%c0_17, %c80, %c0_18] : memref<2x256x4xf32, #tpu.memory_space<vmem>>, vector<1x16x4xf32>
    %18 = vector.shape_cast %17 : vector<1x16x4xf32> to vector<16x4xf32>
    %c109 = arith.constant 109 : index
    %c0_19 = arith.constant 0 : index
    %19 = vector.load %arg15[%c109, %c0_19] : memref<648x4xf32, #tpu.memory_space<vmem>>, vector<16x4xf32>
    tpu.vector_store %arg15[%c109, %c0_19], %18 {strides = array<i32>} : memref<648x4xf32, #tpu.memory_space<vmem>>, vector<16x4xf32>,
    %c0_20 = arith.constant 0 : index
    %c96 = arith.constant 96 : index
    %c0_21 = arith.constant 0 : index
    %20 = vector.load %arg1[%c0_20, %c96, %c0_21] : memref<2x256x4xf32, #tpu.memory_space<vmem>>, vector<1x16x4xf32>
    %21 = vector.shape_cast %20 : vector<1x16x4xf32> to vector<16x4xf32>
    %c127 = arith.constant 127 : index
    %c0_22 = arith.constant 0 : index
    %22 = vector.load %arg15[%c127, %c0_22] : memref<648x4xf32, #tpu.memory_space<vmem>>, vector<16x4xf32>
    tpu.vector_store %arg15[%c127, %c0_22], %21 {strides = array<i32>} : memref<648x4xf32, #tpu.memory_space<vmem>>, vector<16x4xf32>,
    %c0_23 = arith.constant 0 : index
    %c112 = arith.constant 112 : index
    %c0_24 = arith.constant 0 : index
    %23 = vector.load %arg1[%c0_23, %c112, %c0_24] : memref<2x256x4xf32, #tpu.memory_space<vmem>>, vector<1x16x4xf32>
    %24 = vector.shape_cast %23 : vector<1x16x4xf32> to vector<16x4xf32>
    %c145 = arith.constant 145 : index
    %c0_25 = arith.constant 0 : index
    %25 = vector.load %arg15[%c145, %c0_25] : memref<648x4xf32, #tpu.memory_space<vmem>>, vector<16x4xf32>
    tpu.vector_store %arg15[%c145, %c0_25], %24 {strides = array<i32>} : memref<648x4xf32, #tpu.memory_space<vmem>>, vector<16x4xf32>,
    %c0_26 = arith.constant 0 : index
    %c128 = arith.constant 128 : index
    %c0_27 = arith.constant 0 : index
    %26 = vector.load %arg1[%c0_26, %c128, %c0_27] : memref<2x256x4xf32, #tpu.memory_space<vmem>>, vector<1x16x4xf32>
    %27 = vector.shape_cast %26 : vector<1x16x4xf32> to vector<16x4xf32>
    %c163 = arith.constant 163 : index
    %c0_28 = arith.constant 0 : index
    %28 = vector.load %arg15[%c163, %c0_28] : memref<648x4xf32, #tpu.memory_space<vmem>>, vector<16x4xf32>
    tpu.vector_store %arg15[%c163, %c0_28], %27 {strides = array<i32>} : memref<648x4xf32, #tpu.memory_space<vmem>>, vector<16x4xf32>,
    %c0_29 = arith.constant 0 : index
    %c144 = arith.constant 144 : index
    %c0_30 = arith.constant 0 : index
    %29 = vector.load %arg1[%c0_29, %c144, %c0_30] : memref<2x256x4xf32, #tpu.memory_space<vmem>>, vector<1x16x4xf32>
    %30 = vector.shape_cast %29 : vector<1x16x4xf32> to vector<16x4xf32>
    %c181 = arith.constant 181 : index
    %c0_31 = arith.constant 0 : index
    %31 = vector.load %arg15[%c181, %c0_31] : memref<648x4xf32, #tpu.memory_space<vmem>>, vector<16x4xf32>
    tpu.vector_store %arg15[%c181, %c0_31], %30 {strides = array<i32>} : memref<648x4xf32, #tpu.memory_space<vmem>>, vector<16x4xf32>,
    %c0_32 = arith.constant 0 : index
    %c160 = arith.constant 160 : index
    %c0_33 = arith.constant 0 : index
    %32 = vector.load %arg1[%c0_32, %c160, %c0_33] : memref<2x256x4xf32, #tpu.memory_space<vmem>>, vector<1x16x4xf32>
    %33 = vector.shape_cast %32 : vector<1x16x4xf32> to vector<16x4xf32>
    %c199 = arith.constant 199 : index
    %c0_34 = arith.constant 0 : index
    %34 = vector.load %arg15[%c199, %c0_34] : memref<648x4xf32, #tpu.memory_space<vmem>>, vector<16x4xf32>
    tpu.vector_store %arg15[%c199, %c0_34], %33 {strides = array<i32>} : memref<648x4xf32, #tpu.memory_space<vmem>>, vector<16x4xf32>,
    %c0_35 = arith.constant 0 : index
    %c176 = arith.constant 176 : index
    %c0_36 = arith.constant 0 : index
    %35 = vector.load %arg1[%c0_35, %c176, %c0_36] : memref<2x256x4xf32, #tpu.memory_space<vmem>>, vector<1x16x4xf32>
    %36 = vector.shape_cast %35 : vector<1x16x4xf32> to vector<16x4xf32>
    %c217 = arith.constant 217 : index
    %c0_37 = arith.constant 0 : index
    %37 = vector.load %arg15[%c217, %c0_37] : memref<648x4xf32, #tpu.memory_space<vmem>>, vector<16x4xf32>
    tpu.vector_store %arg15[%c217, %c0_37], %36 {strides = array<i32>} : memref<648x4xf32, #tpu.memory_space<vmem>>, vector<16x4xf32>,
    %c0_38 = arith.constant 0 : index
    %c192 = arith.constant 192 : index
    %c0_39 = arith.constant 0 : index
    %38 = vector.load %arg1[%c0_38, %c192, %c0_39] : memref<2x256x4xf32, #tpu.memory_space<vmem>>, vector<1x16x4xf32>
    %39 = vector.shape_cast %38 : vector<1x16x4xf32> to vector<16x4xf32>
    %c235 = arith.constant 235 : index
    %c0_40 = arith.constant 0 : index
    %40 = vector.load %arg15[%c235, %c0_40] : memref<648x4xf32, #tpu.memory_space<vmem>>, vector<16x4xf32>
    tpu.vector_store %arg15[%c235, %c0_40], %39 {strides = array<i32>} : memref<648x4xf32, #tpu.memory_space<vmem>>, vector<16x4xf32>,
    %c0_41 = arith.constant 0 : index
    %c208 = arith.constant 208 : index
    %c0_42 = arith.constant 0 : index
    %41 = vector.load %arg1[%c0_41, %c208, %c0_42] : memref<2x256x4xf32, #tpu.memory_space<vmem>>, vector<1x16x4xf32>
    %42 = vector.shape_cast %41 : vector<1x16x4xf32> to vector<16x4xf32>
    %c253 = arith.constant 253 : index
    %c0_43 = arith.constant 0 : index
    %43 = vector.load %arg15[%c253, %c0_43] : memref<648x4xf32, #tpu.memory_space<vmem>>, vector<16x4xf32>
    tpu.vector_store %arg15[%c253, %c0_43], %42 {strides = array<i32>} : memref<648x4xf32, #tpu.memory_space<vmem>>, vector<16x4xf32>,
    %c0_44 = arith.constant 0 : index
    %c224 = arith.constant 224 : index
    %c0_45 = arith.constant 0 : index
    %44 = vector.load %arg1[%c0_44, %c224, %c0_45] : memref<2x256x4xf32, #tpu.memory_space<vmem>>, vector<1x16x4xf32>
    %45 = vector.shape_cast %44 : vector<1x16x4xf32> to vector<16x4xf32>
    %c271 = arith.constant 271 : index
    %c0_46 = arith.constant 0 : index
    %46 = vector.load %arg15[%c271, %c0_46] : memref<648x4xf32, #tpu.memory_space<vmem>>, vector<16x4xf32>
    tpu.vector_store %arg15[%c271, %c0_46], %45 {strides = array<i32>} : memref<648x4xf32, #tpu.memory_space<vmem>>, vector<16x4xf32>,
    %c0_47 = arith.constant 0 : index
    %c240 = arith.constant 240 : index
    %c0_48 = arith.constant 0 : index
    %47 = vector.load %arg1[%c0_47, %c240, %c0_48] : memref<2x256x4xf32, #tpu.memory_space<vmem>>, vector<1x16x4xf32>
    %48 = vector.shape_cast %47 : vector<1x16x4xf32> to vector<16x4xf32>
    %c289 = arith.constant 289 : index
    %c0_49 = arith.constant 0 : index
    %49 = vector.load %arg15[%c289, %c0_49] : memref<648x4xf32, #tpu.memory_space<vmem>>, vector<16x4xf32>
    tpu.vector_store %arg15[%c289, %c0_49], %48 {strides = array<i32>} : memref<648x4xf32, #tpu.memory_space<vmem>>, vector<16x4xf32>,
    %c1 = arith.constant 1 : index
    %c0_50 = arith.constant 0 : index
    %c0_51 = arith.constant 0 : index
    %50 = vector.load %arg1[%c1, %c0_50, %c0_51] : memref<2x256x4xf32, #tpu.memory_space<vmem>>, vector<1x16x4xf32>
    %51 = vector.shape_cast %50 : vector<1x16x4xf32> to vector<16x4xf32>
    %c343 = arith.constant 343 : index
    %c0_52 = arith.constant 0 : index
    %52 = vector.load %arg15[%c343, %c0_52] : memref<648x4xf32, #tpu.memory_space<vmem>>, vector<16x4xf32>
    tpu.vector_store %arg15[%c343, %c0_52], %51 {strides = array<i32>} : memref<648x4xf32, #tpu.memory_space<vmem>>, vector<16x4xf32>,
    %c1_53 = arith.constant 1 : index
    %c16_54 = arith.constant 16 : index
    %c0_55 = arith.constant 0 : index
    %53 = vector.load %arg1[%c1_53, %c16_54, %c0_55] : memref<2x256x4xf32, #tpu.memory_space<vmem>>, vector<1x16x4xf32>
    %54 = vector.shape_cast %53 : vector<1x16x4xf32> to vector<16x4xf32>
    %c361 = arith.constant 361 : index
    %c0_56 = arith.constant 0 : index
    %55 = vector.load %arg15[%c361, %c0_56] : memref<648x4xf32, #tpu.memory_space<vmem>>, vector<16x4xf32>
    tpu.vector_store %arg15[%c361, %c0_56], %54 {strides = array<i32>} : memref<648x4xf32, #tpu.memory_space<vmem>>, vector<16x4xf32>,
    %c1_57 = arith.constant 1 : index
    %c32_58 = arith.constant 32 : index
    %c0_59 = arith.constant 0 : index
    %56 = vector.load %arg1[%c1_57, %c32_58, %c0_59] : memref<2x256x4xf32, #tpu.memory_space<vmem>>, vector<1x16x4xf32>
    %57 = vector.shape_cast %56 : vector<1x16x4xf32> to vector<16x4xf32>
    %c379 = arith.constant 379 : index
    %c0_60 = arith.constant 0 : index
    %58 = vector.load %arg15[%c379, %c0_60] : memref<648x4xf32, #tpu.memory_space<vmem>>, vector<16x4xf32>
    tpu.vector_store %arg15[%c379, %c0_60], %57 {strides = array<i32>} : memref<648x4xf32, #tpu.memory_space<vmem>>, vector<16x4xf32>,
    %c1_61 = arith.constant 1 : index
    %c48_62 = arith.constant 48 : index
    %c0_63 = arith.constant 0 : index
    %59 = vector.load %arg1[%c1_61, %c48_62, %c0_63] : memref<2x256x4xf32, #tpu.memory_space<vmem>>, vector<1x16x4xf32>
    %60 = vector.shape_cast %59 : vector<1x16x4xf32> to vector<16x4xf32>
    %c397 = arith.constant 397 : index
    %c0_64 = arith.constant 0 : index
    %61 = vector.load %arg15[%c397, %c0_64] : memref<648x4xf32, #tpu.memory_space<vmem>>, vector<16x4xf32>
    tpu.vector_store %arg15[%c397, %c0_64], %60 {strides = array<i32>} : memref<648x4xf32, #tpu.memory_space<vmem>>, vector<16x4xf32>,
    %c1_65 = arith.constant 1 : index
    %c64_66 = arith.constant 64 : index
    %c0_67 = arith.constant 0 : index
    %62 = vector.load %arg1[%c1_65, %c64_66, %c0_67] : memref<2x256x4xf32, #tpu.memory_space<vmem>>, vector<1x16x4xf32>
    %63 = vector.shape_cast %62 : vector<1x16x4xf32> to vector<16x4xf32>
    %c415 = arith.constant 415 : index
    %c0_68 = arith.constant 0 : index
    %64 = vector.load %arg15[%c415, %c0_68] : memref<648x4xf32, #tpu.memory_space<vmem>>, vector<16x4xf32>
    tpu.vector_store %arg15[%c415, %c0_68], %63 {strides = array<i32>} : memref<648x4xf32, #tpu.memory_space<vmem>>, vector<16x4xf32>,
    %c1_69 = arith.constant 1 : index
    %c80_70 = arith.constant 80 : index
    %c0_71 = arith.constant 0 : index
    %65 = vector.load %arg1[%c1_69, %c80_70, %c0_71] : memref<2x256x4xf32, #tpu.memory_space<vmem>>, vector<1x16x4xf32>
    %66 = vector.shape_cast %65 : vector<1x16x4xf32> to vector<16x4xf32>
    %c433 = arith.constant 433 : index
    %c0_72 = arith.constant 0 : index
    %67 = vector.load %arg15[%c433, %c0_72] : memref<648x4xf32, #tpu.memory_space<vmem>>, vector<16x4xf32>
    tpu.vector_store %arg15[%c433, %c0_72], %66 {strides = array<i32>} : memref<648x4xf32, #tpu.memory_space<vmem>>, vector<16x4xf32>,
    %c1_73 = arith.constant 1 : index
    %c96_74 = arith.constant 96 : index
    %c0_75 = arith.constant 0 : index
    %68 = vector.load %arg1[%c1_73, %c96_74, %c0_75] : memref<2x256x4xf32, #tpu.memory_space<vmem>>, vector<1x16x4xf32>
    %69 = vector.shape_cast %68 : vector<1x16x4xf32> to vector<16x4xf32>
    %c451 = arith.constant 451 : index
    %c0_76 = arith.constant 0 : index
    %70 = vector.load %arg15[%c451, %c0_76] : memref<648x4xf32, #tpu.memory_space<vmem>>, vector<16x4xf32>
    tpu.vector_store %arg15[%c451, %c0_76], %69 {strides = array<i32>} : memref<648x4xf32, #tpu.memory_space<vmem>>, vector<16x4xf32>,
    %c1_77 = arith.constant 1 : index
    %c112_78 = arith.constant 112 : index
    %c0_79 = arith.constant 0 : index
    %71 = vector.load %arg1[%c1_77, %c112_78, %c0_79] : memref<2x256x4xf32, #tpu.memory_space<vmem>>, vector<1x16x4xf32>
    %72 = vector.shape_cast %71 : vector<1x16x4xf32> to vector<16x4xf32>
    %c469 = arith.constant 469 : index
    %c0_80 = arith.constant 0 : index
    %73 = vector.load %arg15[%c469, %c0_80] : memref<648x4xf32, #tpu.memory_space<vmem>>, vector<16x4xf32>
    tpu.vector_store %arg15[%c469, %c0_80], %72 {strides = array<i32>} : memref<648x4xf32, #tpu.memory_space<vmem>>, vector<16x4xf32>,
    %c1_81 = arith.constant 1 : index
    %c128_82 = arith.constant 128 : index
    %c0_83 = arith.constant 0 : index
    %74 = vector.load %arg1[%c1_81, %c128_82, %c0_83] : memref<2x256x4xf32, #tpu.memory_space<vmem>>, vector<1x16x4xf32>
    %75 = vector.shape_cast %74 : vector<1x16x4xf32> to vector<16x4xf32>
    %c487 = arith.constant 487 : index
    %c0_84 = arith.constant 0 : index
    %76 = vector.load %arg15[%c487, %c0_84] : memref<648x4xf32, #tpu.memory_space<vmem>>, vector<16x4xf32>
    tpu.vector_store %arg15[%c487, %c0_84], %75 {strides = array<i32>} : memref<648x4xf32, #tpu.memory_space<vmem>>, vector<16x4xf32>,
    %c1_85 = arith.constant 1 : index
    %c144_86 = arith.constant 144 : index
    %c0_87 = arith.constant 0 : index
    %77 = vector.load %arg1[%c1_85, %c144_86, %c0_87] : memref<2x256x4xf32, #tpu.memory_space<vmem>>, vector<1x16x4xf32>
    %78 = vector.shape_cast %77 : vector<1x16x4xf32> to vector<16x4xf32>
    %c505 = arith.constant 505 : index
    %c0_88 = arith.constant 0 : index
    %79 = vector.load %arg15[%c505, %c0_88] : memref<648x4xf32, #tpu.memory_space<vmem>>, vector<16x4xf32>
    tpu.vector_store %arg15[%c505, %c0_88], %78 {strides = array<i32>} : memref<648x4xf32, #tpu.memory_space<vmem>>, vector<16x4xf32>,
    %c1_89 = arith.constant 1 : index
    %c160_90 = arith.constant 160 : index
    %c0_91 = arith.constant 0 : index
    %80 = vector.load %arg1[%c1_89, %c160_90, %c0_91] : memref<2x256x4xf32, #tpu.memory_space<vmem>>, vector<1x16x4xf32>
    %81 = vector.shape_cast %80 : vector<1x16x4xf32> to vector<16x4xf32>
    %c523 = arith.constant 523 : index
    %c0_92 = arith.constant 0 : index
    %82 = vector.load %arg15[%c523, %c0_92] : memref<648x4xf32, #tpu.memory_space<vmem>>, vector<16x4xf32>
    tpu.vector_store %arg15[%c523, %c0_92], %81 {strides = array<i32>} : memref<648x4xf32, #tpu.memory_space<vmem>>, vector<16x4xf32>,
    %c1_93 = arith.constant 1 : index
    %c176_94 = arith.constant 176 : index
    %c0_95 = arith.constant 0 : index
    %83 = vector.load %arg1[%c1_93, %c176_94, %c0_95] : memref<2x256x4xf32, #tpu.memory_space<vmem>>, vector<1x16x4xf32>
    %84 = vector.shape_cast %83 : vector<1x16x4xf32> to vector<16x4xf32>
    %c541 = arith.constant 541 : index
    %c0_96 = arith.constant 0 : index
    %85 = vector.load %arg15[%c541, %c0_96] : memref<648x4xf32, #tpu.memory_space<vmem>>, vector<16x4xf32>
    tpu.vector_store %arg15[%c541, %c0_96], %84 {strides = array<i32>} : memref<648x4xf32, #tpu.memory_space<vmem>>, vector<16x4xf32>,
    %c1_97 = arith.constant 1 : index
    %c192_98 = arith.constant 192 : index
    %c0_99 = arith.constant 0 : index
    %86 = vector.load %arg1[%c1_97, %c192_98, %c0_99] : memref<2x256x4xf32, #tpu.memory_space<vmem>>, vector<1x16x4xf32>
    %87 = vector.shape_cast %86 : vector<1x16x4xf32> to vector<16x4xf32>
    %c559 = arith.constant 559 : index
    %c0_100 = arith.constant 0 : index
    %88 = vector.load %arg15[%c559, %c0_100] : memref<648x4xf32, #tpu.memory_space<vmem>>, vector<16x4xf32>
    tpu.vector_store %arg15[%c559, %c0_100], %87 {strides = array<i32>} : memref<648x4xf32, #tpu.memory_space<vmem>>, vector<16x4xf32>,
    %c1_101 = arith.constant 1 : index
    %c208_102 = arith.constant 208 : index
    %c0_103 = arith.constant 0 : index
    %89 = vector.load %arg1[%c1_101, %c208_102, %c0_103] : memref<2x256x4xf32, #tpu.memory_space<vmem>>, vector<1x16x4xf32>
    %90 = vector.shape_cast %89 : vector<1x16x4xf32> to vector<16x4xf32>
    %c577 = arith.constant 577 : index
    %c0_104 = arith.constant 0 : index
    %91 = vector.load %arg15[%c577, %c0_104] : memref<648x4xf32, #tpu.memory_space<vmem>>, vector<16x4xf32>
    tpu.vector_store %arg15[%c577, %c0_104], %90 {strides = array<i32>} : memref<648x4xf32, #tpu.memory_space<vmem>>, vector<16x4xf32>,
    %c1_105 = arith.constant 1 : index
    %c224_106 = arith.constant 224 : index
    %c0_107 = arith.constant 0 : index
    %92 = vector.load %arg1[%c1_105, %c224_106, %c0_107] : memref<2x256x4xf32, #tpu.memory_space<vmem>>, vector<1x16x4xf32>
    %93 = vector.shape_cast %92 : vector<1x16x4xf32> to vector<16x4xf32>
    %c595 = arith.constant 595 : index
    %c0_108 = arith.constant 0 : index
    %94 = vector.load %arg15[%c595, %c0_108] : memref<648x4xf32, #tpu.memory_space<vmem>>, vector<16x4xf32>
    tpu.vector_store %arg15[%c595, %c0_108], %93 {strides = array<i32>} : memref<648x4xf32, #tpu.memory_space<vmem>>, vector<16x4xf32>,
    %c1_109 = arith.constant 1 : index
    %c240_110 = arith.constant 240 : index
    %c0_111 = arith.constant 0 : index
    %95 = vector.load %arg1[%c1_109, %c240_110, %c0_111] : memref<2x256x4xf32, #tpu.memory_space<vmem>>, vector<1x16x4xf32>
    %96 = vector.shape_cast %95 : vector<1x16x4xf32> to vector<16x4xf32>
    %c613 = arith.constant 613 : index
    %c0_112 = arith.constant 0 : index
    %97 = vector.load %arg15[%c613, %c0_112] : memref<648x4xf32, #tpu.memory_space<vmem>>, vector<16x4xf32>
    tpu.vector_store %arg15[%c613, %c0_112], %96 {strides = array<i32>} : memref<648x4xf32, #tpu.memory_space<vmem>>, vector<16x4xf32>,
    %cst_113 = arith.constant 0.000000e+00 : f32
    %98 = vector.broadcast %cst_113 : f32 to vector<610x8xf32>
    %c0_114 = arith.constant 0 : index
    %c0_115 = arith.constant 0 : index
    %99 = vector.load %arg15[%c0_114, %c0_115] : memref<648x4xf32, #tpu.memory_space<vmem>>, vector<610x4xf32>
    %c0_116 = arith.constant 0 : index
    %c0_117 = arith.constant 0 : index
    %c0_118 = arith.constant 0 : index
    %100 = vector.load %arg2[%c0_116, %c0_117, %c0_118] : memref<9x4x8xf32, #tpu.memory_space<vmem>>, vector<1x4x8xf32>
    %101 = vector.shape_cast %100 : vector<1x4x8xf32> to vector<4x8xf32>
    %cst_119 = arith.constant dense<0.000000e+00> : vector<610x8xf32>
    %102 = tpu.matmul %99, %101, %cst_119 {dimension_numbers = #tpu.dot_dimension_numbers<[1], [0], [0], [1], [0, 0, 1, 1], [], []>} : vector<610x4xf32>, vector<4x8xf32>, vector<610x8xf32> -> vector<610x8xf32>
    %103 = arith.addf %98, %102 : vector<610x8xf32>
    %c1_120 = arith.constant 1 : index
    %c0_121 = arith.constant 0 : index
    %104 = vector.load %arg15[%c1_120, %c0_121] : memref<648x4xf32, #tpu.memory_space<vmem>>, vector<610x4xf32>
    %c1_122 = arith.constant 1 : index
    %c0_123 = arith.constant 0 : index
    %c0_124 = arith.constant 0 : index
    %105 = vector.load %arg2[%c1_122, %c0_123, %c0_124] : memref<9x4x8xf32, #tpu.memory_space<vmem>>, vector<1x4x8xf32>
    %106 = vector.shape_cast %105 : vector<1x4x8xf32> to vector<4x8xf32>
    %cst_125 = arith.constant dense<0.000000e+00> : vector<610x8xf32>
    %107 = tpu.matmul %104, %106, %cst_125 {dimension_numbers = #tpu.dot_dimension_numbers<[1], [0], [0], [1], [0, 0, 1, 1], [], []>} : vector<610x4xf32>, vector<4x8xf32>, vector<610x8xf32> -> vector<610x8xf32>
    %108 = arith.addf %103, %107 : vector<610x8xf32>
    %c2 = arith.constant 2 : index
    %c0_126 = arith.constant 0 : index
    %109 = vector.load %arg15[%c2, %c0_126] : memref<648x4xf32, #tpu.memory_space<vmem>>, vector<610x4xf32>
    %c2_127 = arith.constant 2 : index
    %c0_128 = arith.constant 0 : index
    %c0_129 = arith.constant 0 : index
    %110 = vector.load %arg2[%c2_127, %c0_128, %c0_129] : memref<9x4x8xf32, #tpu.memory_space<vmem>>, vector<1x4x8xf32>
    %111 = vector.shape_cast %110 : vector<1x4x8xf32> to vector<4x8xf32>
    %cst_130 = arith.constant dense<0.000000e+00> : vector<610x8xf32>
    %112 = tpu.matmul %109, %111, %cst_130 {dimension_numbers = #tpu.dot_dimension_numbers<[1], [0], [0], [1], [0, 0, 1, 1], [], []>} : vector<610x4xf32>, vector<4x8xf32>, vector<610x8xf32> -> vector<610x8xf32>
    %113 = arith.addf %108, %112 : vector<610x8xf32>
    %c18 = arith.constant 18 : index
    %c0_131 = arith.constant 0 : index
    %114 = vector.load %arg15[%c18, %c0_131] : memref<648x4xf32, #tpu.memory_space<vmem>>, vector<610x4xf32>
    %c3 = arith.constant 3 : index
    %c0_132 = arith.constant 0 : index
    %c0_133 = arith.constant 0 : index
    %115 = vector.load %arg2[%c3, %c0_132, %c0_133] : memref<9x4x8xf32, #tpu.memory_space<vmem>>, vector<1x4x8xf32>
    %116 = vector.shape_cast %115 : vector<1x4x8xf32> to vector<4x8xf32>
    %cst_134 = arith.constant dense<0.000000e+00> : vector<610x8xf32>
    %117 = tpu.matmul %114, %116, %cst_134 {dimension_numbers = #tpu.dot_dimension_numbers<[1], [0], [0], [1], [0, 0, 1, 1], [], []>} : vector<610x4xf32>, vector<4x8xf32>, vector<610x8xf32> -> vector<610x8xf32>
    %118 = arith.addf %113, %117 : vector<610x8xf32>
    %c19_135 = arith.constant 19 : index
    %c0_136 = arith.constant 0 : index
    %119 = vector.load %arg15[%c19_135, %c0_136] : memref<648x4xf32, #tpu.memory_space<vmem>>, vector<610x4xf32>
    %c4 = arith.constant 4 : index
    %c0_137 = arith.constant 0 : index
    %c0_138 = arith.constant 0 : index
    %120 = vector.load %arg2[%c4, %c0_137, %c0_138] : memref<9x4x8xf32, #tpu.memory_space<vmem>>, vector<1x4x8xf32>
    %121 = vector.shape_cast %120 : vector<1x4x8xf32> to vector<4x8xf32>
    %cst_139 = arith.constant dense<0.000000e+00> : vector<610x8xf32>
    %122 = tpu.matmul %119, %121, %cst_139 {dimension_numbers = #tpu.dot_dimension_numbers<[1], [0], [0], [1], [0, 0, 1, 1], [], []>} : vector<610x4xf32>, vector<4x8xf32>, vector<610x8xf32> -> vector<610x8xf32>
    %123 = arith.addf %118, %122 : vector<610x8xf32>
    %c20 = arith.constant 20 : index
    %c0_140 = arith.constant 0 : index
    %124 = vector.load %arg15[%c20, %c0_140] : memref<648x4xf32, #tpu.memory_space<vmem>>, vector<610x4xf32>
    %c5 = arith.constant 5 : index
    %c0_141 = arith.constant 0 : index
    %c0_142 = arith.constant 0 : index
    %125 = vector.load %arg2[%c5, %c0_141, %c0_142] : memref<9x4x8xf32, #tpu.memory_space<vmem>>, vector<1x4x8xf32>
    %126 = vector.shape_cast %125 : vector<1x4x8xf32> to vector<4x8xf32>
    %cst_143 = arith.constant dense<0.000000e+00> : vector<610x8xf32>
    %127 = tpu.matmul %124, %126, %cst_143 {dimension_numbers = #tpu.dot_dimension_numbers<[1], [0], [0], [1], [0, 0, 1, 1], [], []>} : vector<610x4xf32>, vector<4x8xf32>, vector<610x8xf32> -> vector<610x8xf32>
    %128 = arith.addf %123, %127 : vector<610x8xf32>
    %c36 = arith.constant 36 : index
    %c0_144 = arith.constant 0 : index
    %129 = vector.load %arg15[%c36, %c0_144] : memref<648x4xf32, #tpu.memory_space<vmem>>, vector<610x4xf32>
    %c6 = arith.constant 6 : index
    %c0_145 = arith.constant 0 : index
    %c0_146 = arith.constant 0 : index
    %130 = vector.load %arg2[%c6, %c0_145, %c0_146] : memref<9x4x8xf32, #tpu.memory_space<vmem>>, vector<1x4x8xf32>
    %131 = vector.shape_cast %130 : vector<1x4x8xf32> to vector<4x8xf32>
    %cst_147 = arith.constant dense<0.000000e+00> : vector<610x8xf32>
    %132 = tpu.matmul %129, %131, %cst_147 {dimension_numbers = #tpu.dot_dimension_numbers<[1], [0], [0], [1], [0, 0, 1, 1], [], []>} : vector<610x4xf32>, vector<4x8xf32>, vector<610x8xf32> -> vector<610x8xf32>
    %133 = arith.addf %128, %132 : vector<610x8xf32>
    %c37_148 = arith.constant 37 : index
    %c0_149 = arith.constant 0 : index
    %134 = vector.load %arg15[%c37_148, %c0_149] : memref<648x4xf32, #tpu.memory_space<vmem>>, vector<610x4xf32>
    %c7 = arith.constant 7 : index
    %c0_150 = arith.constant 0 : index
    %c0_151 = arith.constant 0 : index
    %135 = vector.load %arg2[%c7, %c0_150, %c0_151] : memref<9x4x8xf32, #tpu.memory_space<vmem>>, vector<1x4x8xf32>
    %136 = vector.shape_cast %135 : vector<1x4x8xf32> to vector<4x8xf32>
    %cst_152 = arith.constant dense<0.000000e+00> : vector<610x8xf32>
    %137 = tpu.matmul %134, %136, %cst_152 {dimension_numbers = #tpu.dot_dimension_numbers<[1], [0], [0], [1], [0, 0, 1, 1], [], []>} : vector<610x4xf32>, vector<4x8xf32>, vector<610x8xf32> -> vector<610x8xf32>
    %138 = arith.addf %133, %137 : vector<610x8xf32>
    %c38 = arith.constant 38 : index
    %c0_153 = arith.constant 0 : index
    %139 = vector.load %arg15[%c38, %c0_153] : memref<648x4xf32, #tpu.memory_space<vmem>>, vector<610x4xf32>
    %c8 = arith.constant 8 : index
    %c0_154 = arith.constant 0 : index
    %c0_155 = arith.constant 0 : index
    %140 = vector.load %arg2[%c8, %c0_154, %c0_155] : memref<9x4x8xf32, #tpu.memory_space<vmem>>, vector<1x4x8xf32>
    %141 = vector.shape_cast %140 : vector<1x4x8xf32> to vector<4x8xf32>
    %cst_156 = arith.constant dense<0.000000e+00> : vector<610x8xf32>
    %142 = tpu.matmul %139, %141, %cst_156 {dimension_numbers = #tpu.dot_dimension_numbers<[1], [0], [0], [1], [0, 0, 1, 1], [], []>} : vector<610x4xf32>, vector<4x8xf32>, vector<610x8xf32> -> vector<610x8xf32>
    %143 = arith.addf %138, %142 : vector<610x8xf32>
    %c0_157 = arith.constant 0 : index
    %c0_158 = arith.constant 0 : index
    %144 = vector.load %arg6[%c0_157, %c0_158] : memref<1x8xf32, #tpu.memory_space<vmem>>, vector<1x8xf32>
    %145 = vector.broadcast %144 : vector<1x8xf32> to vector<610x8xf32>
    %146 = arith.mulf %143, %145 : vector<610x8xf32>
    %c0_159 = arith.constant 0 : index
    %c0_160 = arith.constant 0 : index
    %147 = vector.load %arg10[%c0_159, %c0_160] : memref<1x8xf32, #tpu.memory_space<vmem>>, vector<1x8xf32>
    %148 = vector.broadcast %147 : vector<1x8xf32> to vector<610x8xf32>
    %149 = arith.addf %146, %148 : vector<610x8xf32>
    %cst_161 = arith.constant 0.000000e+00 : f32
    %150 = vector.broadcast %cst_161 : f32 to vector<610x8xf32>
    %151 = arith.cmpf ogt, %149, %150 : vector<610x8xf32>
    %cst_162 = arith.constant 0.00999999977 : f32
    %152 = vector.broadcast %cst_162 : f32 to vector<610x8xf32>
    %153 = arith.mulf %152, %149 : vector<610x8xf32>
    %154 = arith.select %151, %149, %153 : vector<610x8xi1>, vector<610x8xf32>
    %c0_163 = arith.constant 0 : index
    %c0_164 = arith.constant 0 : index
    %155 = vector.load %arg19[%c0_163, %c0_164] : memref<610x8xf32, #tpu.memory_space<vmem>>, vector<610x8xf32>
    tpu.vector_store %arg19[%c0_163, %c0_164], %154 {strides = array<i32>} : memref<610x8xf32, #tpu.memory_space<vmem>>, vector<610x8xf32>,
    %cst_165 = arith.constant 0.000000e+00 : f32
    %156 = vector.broadcast %cst_165 : f32 to vector<200x8xf32>
    %c0_166 = arith.constant 0 : index
    %c0_167 = arith.constant 0 : index
    %157 = vector.load %arg16[%c0_166, %c0_167] : memref<200x8xf32, #tpu.memory_space<vmem>>, vector<200x8xf32>
    tpu.vector_store %arg16[%c0_166, %c0_167], %156 {strides = array<i32>} : memref<200x8xf32, #tpu.memory_space<vmem>>, vector<200x8xf32>,
    %c0_168 = arith.constant 0 : index
    %c0_169 = arith.constant 0 : index
    %158 = tpu.strided_load %arg19[%c0_168, %c0_169] {strides = array<i32: 2, 1>} : memref<610x8xf32, #tpu.memory_space<vmem>>, vector<8x8xf32>
    %c1_170 = arith.constant 1 : index
    %c0_171 = arith.constant 0 : index
    %159 = tpu.strided_load %arg19[%c1_170, %c0_171] {strides = array<i32: 2, 1>} : memref<610x8xf32, #tpu.memory_space<vmem>>, vector<8x8xf32>
    %c18_172 = arith.constant 18 : index
    %c0_173 = arith.constant 0 : index
    %160 = tpu.strided_load %arg19[%c18_172, %c0_173] {strides = array<i32: 2, 1>} : memref<610x8xf32, #tpu.memory_space<vmem>>, vector<8x8xf32>
    %c19_174 = arith.constant 19 : index
    %c0_175 = arith.constant 0 : index
    %161 = tpu.strided_load %arg19[%c19_174, %c0_175] {strides = array<i32: 2, 1>} : memref<610x8xf32, #tpu.memory_space<vmem>>, vector<8x8xf32>
    %162 = arith.maximumf %158, %159 : vector<8x8xf32>
    %163 = arith.maximumf %160, %161 : vector<8x8xf32>
    %164 = arith.maximumf %162, %163 : vector<8x8xf32>
    %c11 = arith.constant 11 : index
    %c0_176 = arith.constant 0 : index
    %165 = vector.load %arg16[%c11, %c0_176] : memref<200x8xf32, #tpu.memory_space<vmem>>, vector<8x8xf32>
    tpu.vector_store %arg16[%c11, %c0_176], %164 {strides = array<i32>} : memref<200x8xf32, #tpu.memory_space<vmem>>, vector<8x8xf32>,
    %c36_177 = arith.constant 36 : index
    %c0_178 = arith.constant 0 : index
    %166 = tpu.strided_load %arg19[%c36_177, %c0_178] {strides = array<i32: 2, 1>} : memref<610x8xf32, #tpu.memory_space<vmem>>, vector<8x8xf32>
    %c37_179 = arith.constant 37 : index
    %c0_180 = arith.constant 0 : index
    %167 = tpu.strided_load %arg19[%c37_179, %c0_180] {strides = array<i32: 2, 1>} : memref<610x8xf32, #tpu.memory_space<vmem>>, vector<8x8xf32>
    %c54 = arith.constant 54 : index
    %c0_181 = arith.constant 0 : index
    %168 = tpu.strided_load %arg19[%c54, %c0_181] {strides = array<i32: 2, 1>} : memref<610x8xf32, #tpu.memory_space<vmem>>, vector<8x8xf32>
    %c55_182 = arith.constant 55 : index
    %c0_183 = arith.constant 0 : index
    %169 = tpu.strided_load %arg19[%c55_182, %c0_183] {strides = array<i32: 2, 1>} : memref<610x8xf32, #tpu.memory_space<vmem>>, vector<8x8xf32>
    %170 = arith.maximumf %166, %167 : vector<8x8xf32>
    %171 = arith.maximumf %168, %169 : vector<8x8xf32>
    %172 = arith.maximumf %170, %171 : vector<8x8xf32>
    %c21 = arith.constant 21 : index
    %c0_184 = arith.constant 0 : index
    %173 = vector.load %arg16[%c21, %c0_184] : memref<200x8xf32, #tpu.memory_space<vmem>>, vector<8x8xf32>
    tpu.vector_store %arg16[%c21, %c0_184], %172 {strides = array<i32>} : memref<200x8xf32, #tpu.memory_space<vmem>>, vector<8x8xf32>,
    %c72 = arith.constant 72 : index
    %c0_185 = arith.constant 0 : index
    %174 = tpu.strided_load %arg19[%c72, %c0_185] {strides = array<i32: 2, 1>} : memref<610x8xf32, #tpu.memory_space<vmem>>, vector<8x8xf32>
    %c73_186 = arith.constant 73 : index
    %c0_187 = arith.constant 0 : index
    %175 = tpu.strided_load %arg19[%c73_186, %c0_187] {strides = array<i32: 2, 1>} : memref<610x8xf32, #tpu.memory_space<vmem>>, vector<8x8xf32>
    %c90 = arith.constant 90 : index
    %c0_188 = arith.constant 0 : index
    %176 = tpu.strided_load %arg19[%c90, %c0_188] {strides = array<i32: 2, 1>} : memref<610x8xf32, #tpu.memory_space<vmem>>, vector<8x8xf32>
    %c91_189 = arith.constant 91 : index
    %c0_190 = arith.constant 0 : index
    %177 = tpu.strided_load %arg19[%c91_189, %c0_190] {strides = array<i32: 2, 1>} : memref<610x8xf32, #tpu.memory_space<vmem>>, vector<8x8xf32>
    %178 = arith.maximumf %174, %175 : vector<8x8xf32>
    %179 = arith.maximumf %176, %177 : vector<8x8xf32>
    %180 = arith.maximumf %178, %179 : vector<8x8xf32>
    %c31 = arith.constant 31 : index
    %c0_191 = arith.constant 0 : index
    %181 = vector.load %arg16[%c31, %c0_191] : memref<200x8xf32, #tpu.memory_space<vmem>>, vector<8x8xf32>
    tpu.vector_store %arg16[%c31, %c0_191], %180 {strides = array<i32>} : memref<200x8xf32, #tpu.memory_space<vmem>>, vector<8x8xf32>,
    %c108 = arith.constant 108 : index
    %c0_192 = arith.constant 0 : index
    %182 = tpu.strided_load %arg19[%c108, %c0_192] {strides = array<i32: 2, 1>} : memref<610x8xf32, #tpu.memory_space<vmem>>, vector<8x8xf32>
    %c109_193 = arith.constant 109 : index
    %c0_194 = arith.constant 0 : index
    %183 = tpu.strided_load %arg19[%c109_193, %c0_194] {strides = array<i32: 2, 1>} : memref<610x8xf32, #tpu.memory_space<vmem>>, vector<8x8xf32>
    %c126 = arith.constant 126 : index
    %c0_195 = arith.constant 0 : index
    %184 = tpu.strided_load %arg19[%c126, %c0_195] {strides = array<i32: 2, 1>} : memref<610x8xf32, #tpu.memory_space<vmem>>, vector<8x8xf32>
    %c127_196 = arith.constant 127 : index
    %c0_197 = arith.constant 0 : index
    %185 = tpu.strided_load %arg19[%c127_196, %c0_197] {strides = array<i32: 2, 1>} : memref<610x8xf32, #tpu.memory_space<vmem>>, vector<8x8xf32>
    %186 = arith.maximumf %182, %183 : vector<8x8xf32>
    %187 = arith.maximumf %184, %185 : vector<8x8xf32>
    %188 = arith.maximumf %186, %187 : vector<8x8xf32>
    %c41 = arith.constant 41 : index
    %c0_198 = arith.constant 0 : index
    %189 = vector.load %arg16[%c41, %c0_198] : memref<200x8xf32, #tpu.memory_space<vmem>>, vector<8x8xf32>
    tpu.vector_store %arg16[%c41, %c0_198], %188 {strides = array<i32>} : memref<200x8xf32, #tpu.memory_space<vmem>>, vector<8x8xf32>,
    %c144_199 = arith.constant 144 : index
    %c0_200 = arith.constant 0 : index
    %190 = tpu.strided_load %arg19[%c144_199, %c0_200] {strides = array<i32: 2, 1>} : memref<610x8xf32, #tpu.memory_space<vmem>>, vector<8x8xf32>
    %c145_201 = arith.constant 145 : index
    %c0_202 = arith.constant 0 : index
    %191 = tpu.strided_load %arg19[%c145_201, %c0_202] {strides = array<i32: 2, 1>} : memref<610x8xf32, #tpu.memory_space<vmem>>, vector<8x8xf32>
    %c162 = arith.constant 162 : index
    %c0_203 = arith.constant 0 : index
    %192 = tpu.strided_load %arg19[%c162, %c0_203] {strides = array<i32: 2, 1>} : memref<610x8xf32, #tpu.memory_space<vmem>>, vector<8x8xf32>
    %c163_204 = arith.constant 163 : index
    %c0_205 = arith.constant 0 : index
    %193 = tpu.strided_load %arg19[%c163_204, %c0_205] {strides = array<i32: 2, 1>} : memref<610x8xf32, #tpu.memory_space<vmem>>, vector<8x8xf32>
    %194 = arith.maximumf %190, %191 : vector<8x8xf32>
    %195 = arith.maximumf %192, %193 : vector<8x8xf32>
    %196 = arith.maximumf %194, %195 : vector<8x8xf32>
    %c51 = arith.constant 51 : index
    %c0_206 = arith.constant 0 : index
    %197 = vector.load %arg16[%c51, %c0_206] : memref<200x8xf32, #tpu.memory_space<vmem>>, vector<8x8xf32>
    tpu.vector_store %arg16[%c51, %c0_206], %196 {strides = array<i32>} : memref<200x8xf32, #tpu.memory_space<vmem>>, vector<8x8xf32>,
    %c180 = arith.constant 180 : index
    %c0_207 = arith.constant 0 : index
    %198 = tpu.strided_load %arg19[%c180, %c0_207] {strides = array<i32: 2, 1>} : memref<610x8xf32, #tpu.memory_space<vmem>>, vector<8x8xf32>
    %c181_208 = arith.constant 181 : index
    %c0_209 = arith.constant 0 : index
    %199 = tpu.strided_load %arg19[%c181_208, %c0_209] {strides = array<i32: 2, 1>} : memref<610x8xf32, #tpu.memory_space<vmem>>, vector<8x8xf32>
    %c198 = arith.constant 198 : index
    %c0_210 = arith.constant 0 : index
    %200 = tpu.strided_load %arg19[%c198, %c0_210] {strides = array<i32: 2, 1>} : memref<610x8xf32, #tpu.memory_space<vmem>>, vector<8x8xf32>
    %c199_211 = arith.constant 199 : index
    %c0_212 = arith.constant 0 : index
    %201 = tpu.strided_load %arg19[%c199_211, %c0_212] {strides = array<i32: 2, 1>} : memref<610x8xf32, #tpu.memory_space<vmem>>, vector<8x8xf32>
    %202 = arith.maximumf %198, %199 : vector<8x8xf32>
    %203 = arith.maximumf %200, %201 : vector<8x8xf32>
    %204 = arith.maximumf %202, %203 : vector<8x8xf32>
    %c61 = arith.constant 61 : index
    %c0_213 = arith.constant 0 : index
    %205 = vector.load %arg16[%c61, %c0_213] : memref<200x8xf32, #tpu.memory_space<vmem>>, vector<8x8xf32>
    tpu.vector_store %arg16[%c61, %c0_213], %204 {strides = array<i32>} : memref<200x8xf32, #tpu.memory_space<vmem>>, vector<8x8xf32>,
    %c216 = arith.constant 216 : index
    %c0_214 = arith.constant 0 : index
    %206 = tpu.strided_load %arg19[%c216, %c0_214] {strides = array<i32: 2, 1>} : memref<610x8xf32, #tpu.memory_space<vmem>>, vector<8x8xf32>
    %c217_215 = arith.constant 217 : index
    %c0_216 = arith.constant 0 : index
    %207 = tpu.strided_load %arg19[%c217_215, %c0_216] {strides = array<i32: 2, 1>} : memref<610x8xf32, #tpu.memory_space<vmem>>, vector<8x8xf32>
    %c234 = arith.constant 234 : index
    %c0_217 = arith.constant 0 : index
    %208 = tpu.strided_load %arg19[%c234, %c0_217] {strides = array<i32: 2, 1>} : memref<610x8xf32, #tpu.memory_space<vmem>>, vector<8x8xf32>
    %c235_218 = arith.constant 235 : index
    %c0_219 = arith.constant 0 : index
    %209 = tpu.strided_load %arg19[%c235_218, %c0_219] {strides = array<i32: 2, 1>} : memref<610x8xf32, #tpu.memory_space<vmem>>, vector<8x8xf32>
    %210 = arith.maximumf %206, %207 : vector<8x8xf32>
    %211 = arith.maximumf %208, %209 : vector<8x8xf32>
    %212 = arith.maximumf %210, %211 : vector<8x8xf32>
    %c71 = arith.constant 71 : index
    %c0_220 = arith.constant 0 : index
    %213 = vector.load %arg16[%c71, %c0_220] : memref<200x8xf32, #tpu.memory_space<vmem>>, vector<8x8xf32>
    tpu.vector_store %arg16[%c71, %c0_220], %212 {strides = array<i32>} : memref<200x8xf32, #tpu.memory_space<vmem>>, vector<8x8xf32>,
    %c252 = arith.constant 252 : index
    %c0_221 = arith.constant 0 : index
    %214 = tpu.strided_load %arg19[%c252, %c0_221] {strides = array<i32: 2, 1>} : memref<610x8xf32, #tpu.memory_space<vmem>>, vector<8x8xf32>
    %c253_222 = arith.constant 253 : index
    %c0_223 = arith.constant 0 : index
    %215 = tpu.strided_load %arg19[%c253_222, %c0_223] {strides = array<i32: 2, 1>} : memref<610x8xf32, #tpu.memory_space<vmem>>, vector<8x8xf32>
    %c270 = arith.constant 270 : index
    %c0_224 = arith.constant 0 : index
    %216 = tpu.strided_load %arg19[%c270, %c0_224] {strides = array<i32: 2, 1>} : memref<610x8xf32, #tpu.memory_space<vmem>>, vector<8x8xf32>
    %c271_225 = arith.constant 271 : index
    %c0_226 = arith.constant 0 : index
    %217 = tpu.strided_load %arg19[%c271_225, %c0_226] {strides = array<i32: 2, 1>} : memref<610x8xf32, #tpu.memory_space<vmem>>, vector<8x8xf32>
    %218 = arith.maximumf %214, %215 : vector<8x8xf32>
    %219 = arith.maximumf %216, %217 : vector<8x8xf32>
    %220 = arith.maximumf %218, %219 : vector<8x8xf32>
    %c81 = arith.constant 81 : index
    %c0_227 = arith.constant 0 : index
    %221 = vector.load %arg16[%c81, %c0_227] : memref<200x8xf32, #tpu.memory_space<vmem>>, vector<8x8xf32>
    tpu.vector_store %arg16[%c81, %c0_227], %220 {strides = array<i32>} : memref<200x8xf32, #tpu.memory_space<vmem>>, vector<8x8xf32>,
    %c324 = arith.constant 324 : index
    %c0_228 = arith.constant 0 : index
    %222 = tpu.strided_load %arg19[%c324, %c0_228] {strides = array<i32: 2, 1>} : memref<610x8xf32, #tpu.memory_space<vmem>>, vector<8x8xf32>
    %c325 = arith.constant 325 : index
    %c0_229 = arith.constant 0 : index
    %223 = tpu.strided_load %arg19[%c325, %c0_229] {strides = array<i32: 2, 1>} : memref<610x8xf32, #tpu.memory_space<vmem>>, vector<8x8xf32>
    %c342 = arith.constant 342 : index
    %c0_230 = arith.constant 0 : index
    %224 = tpu.strided_load %arg19[%c342, %c0_230] {strides = array<i32: 2, 1>} : memref<610x8xf32, #tpu.memory_space<vmem>>, vector<8x8xf32>
    %c343_231 = arith.constant 343 : index
    %c0_232 = arith.constant 0 : index
    %225 = tpu.strided_load %arg19[%c343_231, %c0_232] {strides = array<i32: 2, 1>} : memref<610x8xf32, #tpu.memory_space<vmem>>, vector<8x8xf32>
    %226 = arith.maximumf %222, %223 : vector<8x8xf32>
    %227 = arith.maximumf %224, %225 : vector<8x8xf32>
    %228 = arith.maximumf %226, %227 : vector<8x8xf32>
    %c111 = arith.constant 111 : index
    %c0_233 = arith.constant 0 : index
    %229 = vector.load %arg16[%c111, %c0_233] : memref<200x8xf32, #tpu.memory_space<vmem>>, vector<8x8xf32>
    tpu.vector_store %arg16[%c111, %c0_233], %228 {strides = array<i32>} : memref<200x8xf32, #tpu.memory_space<vmem>>, vector<8x8xf32>,
    %c360 = arith.constant 360 : index
    %c0_234 = arith.constant 0 : index
    %230 = tpu.strided_load %arg19[%c360, %c0_234] {strides = array<i32: 2, 1>} : memref<610x8xf32, #tpu.memory_space<vmem>>, vector<8x8xf32>
    %c361_235 = arith.constant 361 : index
    %c0_236 = arith.constant 0 : index
    %231 = tpu.strided_load %arg19[%c361_235, %c0_236] {strides = array<i32: 2, 1>} : memref<610x8xf32, #tpu.memory_space<vmem>>, vector<8x8xf32>
    %c378 = arith.constant 378 : index
    %c0_237 = arith.constant 0 : index
    %232 = tpu.strided_load %arg19[%c378, %c0_237] {strides = array<i32: 2, 1>} : memref<610x8xf32, #tpu.memory_space<vmem>>, vector<8x8xf32>
    %c379_238 = arith.constant 379 : index
    %c0_239 = arith.constant 0 : index
    %233 = tpu.strided_load %arg19[%c379_238, %c0_239] {strides = array<i32: 2, 1>} : memref<610x8xf32, #tpu.memory_space<vmem>>, vector<8x8xf32>
    %234 = arith.maximumf %230, %231 : vector<8x8xf32>
    %235 = arith.maximumf %232, %233 : vector<8x8xf32>
    %236 = arith.maximumf %234, %235 : vector<8x8xf32>
    %c121 = arith.constant 121 : index
    %c0_240 = arith.constant 0 : index
    %237 = vector.load %arg16[%c121, %c0_240] : memref<200x8xf32, #tpu.memory_space<vmem>>, vector<8x8xf32>
    tpu.vector_store %arg16[%c121, %c0_240], %236 {strides = array<i32>} : memref<200x8xf32, #tpu.memory_space<vmem>>, vector<8x8xf32>,
    %c396 = arith.constant 396 : index
    %c0_241 = arith.constant 0 : index
    %238 = tpu.strided_load %arg19[%c396, %c0_241] {strides = array<i32: 2, 1>} : memref<610x8xf32, #tpu.memory_space<vmem>>, vector<8x8xf32>
    %c397_242 = arith.constant 397 : index
    %c0_243 = arith.constant 0 : index
    %239 = tpu.strided_load %arg19[%c397_242, %c0_243] {strides = array<i32: 2, 1>} : memref<610x8xf32, #tpu.memory_space<vmem>>, vector<8x8xf32>
    %c414 = arith.constant 414 : index
    %c0_244 = arith.constant 0 : index
    %240 = tpu.strided_load %arg19[%c414, %c0_244] {strides = array<i32: 2, 1>} : memref<610x8xf32, #tpu.memory_space<vmem>>, vector<8x8xf32>
    %c415_245 = arith.constant 415 : index
    %c0_246 = arith.constant 0 : index
    %241 = tpu.strided_load %arg19[%c415_245, %c0_246] {strides = array<i32: 2, 1>} : memref<610x8xf32, #tpu.memory_space<vmem>>, vector<8x8xf32>
    %242 = arith.maximumf %238, %239 : vector<8x8xf32>
    %243 = arith.maximumf %240, %241 : vector<8x8xf32>
    %244 = arith.maximumf %242, %243 : vector<8x8xf32>
    %c131 = arith.constant 131 : index
    %c0_247 = arith.constant 0 : index
    %245 = vector.load %arg16[%c131, %c0_247] : memref<200x8xf32, #tpu.memory_space<vmem>>, vector<8x8xf32>
    tpu.vector_store %arg16[%c131, %c0_247], %244 {strides = array<i32>} : memref<200x8xf32, #tpu.memory_space<vmem>>, vector<8x8xf32>,
    %c432 = arith.constant 432 : index
    %c0_248 = arith.constant 0 : index
    %246 = tpu.strided_load %arg19[%c432, %c0_248] {strides = array<i32: 2, 1>} : memref<610x8xf32, #tpu.memory_space<vmem>>, vector<8x8xf32>
    %c433_249 = arith.constant 433 : index
    %c0_250 = arith.constant 0 : index
    %247 = tpu.strided_load %arg19[%c433_249, %c0_250] {strides = array<i32: 2, 1>} : memref<610x8xf32, #tpu.memory_space<vmem>>, vector<8x8xf32>
    %c450 = arith.constant 450 : index
    %c0_251 = arith.constant 0 : index
    %248 = tpu.strided_load %arg19[%c450, %c0_251] {strides = array<i32: 2, 1>} : memref<610x8xf32, #tpu.memory_space<vmem>>, vector<8x8xf32>
    %c451_252 = arith.constant 451 : index
    %c0_253 = arith.constant 0 : index
    %249 = tpu.strided_load %arg19[%c451_252, %c0_253] {strides = array<i32: 2, 1>} : memref<610x8xf32, #tpu.memory_space<vmem>>, vector<8x8xf32>
    %250 = arith.maximumf %246, %247 : vector<8x8xf32>
    %251 = arith.maximumf %248, %249 : vector<8x8xf32>
    %252 = arith.maximumf %250, %251 : vector<8x8xf32>
    %c141 = arith.constant 141 : index
    %c0_254 = arith.constant 0 : index
    %253 = vector.load %arg16[%c141, %c0_254] : memref<200x8xf32, #tpu.memory_space<vmem>>, vector<8x8xf32>
    tpu.vector_store %arg16[%c141, %c0_254], %252 {strides = array<i32>} : memref<200x8xf32, #tpu.memory_space<vmem>>, vector<8x8xf32>,
    %c468 = arith.constant 468 : index
    %c0_255 = arith.constant 0 : index
    %254 = tpu.strided_load %arg19[%c468, %c0_255] {strides = array<i32: 2, 1>} : memref<610x8xf32, #tpu.memory_space<vmem>>, vector<8x8xf32>
    %c469_256 = arith.constant 469 : index
    %c0_257 = arith.constant 0 : index
    %255 = tpu.strided_load %arg19[%c469_256, %c0_257] {strides = array<i32: 2, 1>} : memref<610x8xf32, #tpu.memory_space<vmem>>, vector<8x8xf32>
    %c486 = arith.constant 486 : index
    %c0_258 = arith.constant 0 : index
    %256 = tpu.strided_load %arg19[%c486, %c0_258] {strides = array<i32: 2, 1>} : memref<610x8xf32, #tpu.memory_space<vmem>>, vector<8x8xf32>
    %c487_259 = arith.constant 487 : index
    %c0_260 = arith.constant 0 : index
    %257 = tpu.strided_load %arg19[%c487_259, %c0_260] {strides = array<i32: 2, 1>} : memref<610x8xf32, #tpu.memory_space<vmem>>, vector<8x8xf32>
    %258 = arith.maximumf %254, %255 : vector<8x8xf32>
    %259 = arith.maximumf %256, %257 : vector<8x8xf32>
    %260 = arith.maximumf %258, %259 : vector<8x8xf32>
    %c151 = arith.constant 151 : index
    %c0_261 = arith.constant 0 : index
    %261 = vector.load %arg16[%c151, %c0_261] : memref<200x8xf32, #tpu.memory_space<vmem>>, vector<8x8xf32>
    tpu.vector_store %arg16[%c151, %c0_261], %260 {strides = array<i32>} : memref<200x8xf32, #tpu.memory_space<vmem>>, vector<8x8xf32>,
    %c504 = arith.constant 504 : index
    %c0_262 = arith.constant 0 : index
    %262 = tpu.strided_load %arg19[%c504, %c0_262] {strides = array<i32: 2, 1>} : memref<610x8xf32, #tpu.memory_space<vmem>>, vector<8x8xf32>
    %c505_263 = arith.constant 505 : index
    %c0_264 = arith.constant 0 : index
    %263 = tpu.strided_load %arg19[%c505_263, %c0_264] {strides = array<i32: 2, 1>} : memref<610x8xf32, #tpu.memory_space<vmem>>, vector<8x8xf32>
    %c522 = arith.constant 522 : index
    %c0_265 = arith.constant 0 : index
    %264 = tpu.strided_load %arg19[%c522, %c0_265] {strides = array<i32: 2, 1>} : memref<610x8xf32, #tpu.memory_space<vmem>>, vector<8x8xf32>
    %c523_266 = arith.constant 523 : index
    %c0_267 = arith.constant 0 : index
    %265 = tpu.strided_load %arg19[%c523_266, %c0_267] {strides = array<i32: 2, 1>} : memref<610x8xf32, #tpu.memory_space<vmem>>, vector<8x8xf32>
    %266 = arith.maximumf %262, %263 : vector<8x8xf32>
    %267 = arith.maximumf %264, %265 : vector<8x8xf32>
    %268 = arith.maximumf %266, %267 : vector<8x8xf32>
    %c161 = arith.constant 161 : index
    %c0_268 = arith.constant 0 : index
    %269 = vector.load %arg16[%c161, %c0_268] : memref<200x8xf32, #tpu.memory_space<vmem>>, vector<8x8xf32>
    tpu.vector_store %arg16[%c161, %c0_268], %268 {strides = array<i32>} : memref<200x8xf32, #tpu.memory_space<vmem>>, vector<8x8xf32>,
    %c540 = arith.constant 540 : index
    %c0_269 = arith.constant 0 : index
    %270 = tpu.strided_load %arg19[%c540, %c0_269] {strides = array<i32: 2, 1>} : memref<610x8xf32, #tpu.memory_space<vmem>>, vector<8x8xf32>
    %c541_270 = arith.constant 541 : index
    %c0_271 = arith.constant 0 : index
    %271 = tpu.strided_load %arg19[%c541_270, %c0_271] {strides = array<i32: 2, 1>} : memref<610x8xf32, #tpu.memory_space<vmem>>, vector<8x8xf32>
    %c558 = arith.constant 558 : index
    %c0_272 = arith.constant 0 : index
    %272 = tpu.strided_load %arg19[%c558, %c0_272] {strides = array<i32: 2, 1>} : memref<610x8xf32, #tpu.memory_space<vmem>>, vector<8x8xf32>
    %c559_273 = arith.constant 559 : index
    %c0_274 = arith.constant 0 : index
    %273 = tpu.strided_load %arg19[%c559_273, %c0_274] {strides = array<i32: 2, 1>} : memref<610x8xf32, #tpu.memory_space<vmem>>, vector<8x8xf32>
    %274 = arith.maximumf %270, %271 : vector<8x8xf32>
    %275 = arith.maximumf %272, %273 : vector<8x8xf32>
    %276 = arith.maximumf %274, %275 : vector<8x8xf32>
    %c171 = arith.constant 171 : index
    %c0_275 = arith.constant 0 : index
    %277 = vector.load %arg16[%c171, %c0_275] : memref<200x8xf32, #tpu.memory_space<vmem>>, vector<8x8xf32>
    tpu.vector_store %arg16[%c171, %c0_275], %276 {strides = array<i32>} : memref<200x8xf32, #tpu.memory_space<vmem>>, vector<8x8xf32>,
    %c576 = arith.constant 576 : index
    %c0_276 = arith.constant 0 : index
    %278 = tpu.strided_load %arg19[%c576, %c0_276] {strides = array<i32: 2, 1>} : memref<610x8xf32, #tpu.memory_space<vmem>>, vector<8x8xf32>
    %c577_277 = arith.constant 577 : index
    %c0_278 = arith.constant 0 : index
    %279 = tpu.strided_load %arg19[%c577_277, %c0_278] {strides = array<i32: 2, 1>} : memref<610x8xf32, #tpu.memory_space<vmem>>, vector<8x8xf32>
    %c594 = arith.constant 594 : index
    %c0_279 = arith.constant 0 : index
    %280 = tpu.strided_load %arg19[%c594, %c0_279] {strides = array<i32: 2, 1>} : memref<610x8xf32, #tpu.memory_space<vmem>>, vector<8x8xf32>
    %c595_280 = arith.constant 595 : index
    %c0_281 = arith.constant 0 : index
    %281 = tpu.strided_load %arg19[%c595_280, %c0_281] {strides = array<i32: 2, 1>} : memref<610x8xf32, #tpu.memory_space<vmem>>, vector<8x8xf32>
    %282 = arith.maximumf %278, %279 : vector<8x8xf32>
    %283 = arith.maximumf %280, %281 : vector<8x8xf32>
    %284 = arith.maximumf %282, %283 : vector<8x8xf32>
    %c181_282 = arith.constant 181 : index
    %c0_283 = arith.constant 0 : index
    %285 = vector.load %arg16[%c181_282, %c0_283] : memref<200x8xf32, #tpu.memory_space<vmem>>, vector<8x8xf32>
    tpu.vector_store %arg16[%c181_282, %c0_283], %284 {strides = array<i32>} : memref<200x8xf32, #tpu.memory_space<vmem>>, vector<8x8xf32>,
    %cst_284 = arith.constant 0.000000e+00 : f32
    %286 = vector.broadcast %cst_284 : f32 to vector<178x8xf32>
    %c0_285 = arith.constant 0 : index
    %c0_286 = arith.constant 0 : index
    %287 = vector.load %arg16[%c0_285, %c0_286] : memref<200x8xf32, #tpu.memory_space<vmem>>, vector<178x8xf32>
    %c0_287 = arith.constant 0 : index
    %c0_288 = arith.constant 0 : index
    %c0_289 = arith.constant 0 : index
    %288 = vector.load %arg3[%c0_287, %c0_288, %c0_289] : memref<9x8x8xf32, #tpu.memory_space<vmem>>, vector<1x8x8xf32>
    %289 = vector.shape_cast %288 : vector<1x8x8xf32> to vector<8x8xf32>
    %cst_290 = arith.constant dense<0.000000e+00> : vector<178x8xf32>
    %290 = tpu.matmul %287, %289, %cst_290 {dimension_numbers = #tpu.dot_dimension_numbers<[1], [0], [0], [1], [0, 0, 1, 1], [], []>} : vector<178x8xf32>, vector<8x8xf32>, vector<178x8xf32> -> vector<178x8xf32>
    %291 = arith.addf %286, %290 : vector<178x8xf32>
    %c1_291 = arith.constant 1 : index
    %c0_292 = arith.constant 0 : index
    %292 = vector.load %arg16[%c1_291, %c0_292] : memref<200x8xf32, #tpu.memory_space<vmem>>, vector<178x8xf32>
    %c1_293 = arith.constant 1 : index
    %c0_294 = arith.constant 0 : index
    %c0_295 = arith.constant 0 : index
    %293 = vector.load %arg3[%c1_293, %c0_294, %c0_295] : memref<9x8x8xf32, #tpu.memory_space<vmem>>, vector<1x8x8xf32>
    %294 = vector.shape_cast %293 : vector<1x8x8xf32> to vector<8x8xf32>
    %cst_296 = arith.constant dense<0.000000e+00> : vector<178x8xf32>
    %295 = tpu.matmul %292, %294, %cst_296 {dimension_numbers = #tpu.dot_dimension_numbers<[1], [0], [0], [1], [0, 0, 1, 1], [], []>} : vector<178x8xf32>, vector<8x8xf32>, vector<178x8xf32> -> vector<178x8xf32>
    %296 = arith.addf %291, %295 : vector<178x8xf32>
    %c2_297 = arith.constant 2 : index
    %c0_298 = arith.constant 0 : index
    %297 = vector.load %arg16[%c2_297, %c0_298] : memref<200x8xf32, #tpu.memory_space<vmem>>, vector<178x8xf32>
    %c2_299 = arith.constant 2 : index
    %c0_300 = arith.constant 0 : index
    %c0_301 = arith.constant 0 : index
    %298 = vector.load %arg3[%c2_299, %c0_300, %c0_301] : memref<9x8x8xf32, #tpu.memory_space<vmem>>, vector<1x8x8xf32>
    %299 = vector.shape_cast %298 : vector<1x8x8xf32> to vector<8x8xf32>
    %cst_302 = arith.constant dense<0.000000e+00> : vector<178x8xf32>
    %300 = tpu.matmul %297, %299, %cst_302 {dimension_numbers = #tpu.dot_dimension_numbers<[1], [0], [0], [1], [0, 0, 1, 1], [], []>} : vector<178x8xf32>, vector<8x8xf32>, vector<178x8xf32> -> vector<178x8xf32>
    %301 = arith.addf %296, %300 : vector<178x8xf32>
    %c10 = arith.constant 10 : index
    %c0_303 = arith.constant 0 : index
    %302 = vector.load %arg16[%c10, %c0_303] : memref<200x8xf32, #tpu.memory_space<vmem>>, vector<178x8xf32>
    %c3_304 = arith.constant 3 : index
    %c0_305 = arith.constant 0 : index
    %c0_306 = arith.constant 0 : index
    %303 = vector.load %arg3[%c3_304, %c0_305, %c0_306] : memref<9x8x8xf32, #tpu.memory_space<vmem>>, vector<1x8x8xf32>
    %304 = vector.shape_cast %303 : vector<1x8x8xf32> to vector<8x8xf32>
    %cst_307 = arith.constant dense<0.000000e+00> : vector<178x8xf32>
    %305 = tpu.matmul %302, %304, %cst_307 {dimension_numbers = #tpu.dot_dimension_numbers<[1], [0], [0], [1], [0, 0, 1, 1], [], []>} : vector<178x8xf32>, vector<8x8xf32>, vector<178x8xf32> -> vector<178x8xf32>
    %306 = arith.addf %301, %305 : vector<178x8xf32>
    %c11_308 = arith.constant 11 : index
    %c0_309 = arith.constant 0 : index
    %307 = vector.load %arg16[%c11_308, %c0_309] : memref<200x8xf32, #tpu.memory_space<vmem>>, vector<178x8xf32>
    %c4_310 = arith.constant 4 : index
    %c0_311 = arith.constant 0 : index
    %c0_312 = arith.constant 0 : index
    %308 = vector.load %arg3[%c4_310, %c0_311, %c0_312] : memref<9x8x8xf32, #tpu.memory_space<vmem>>, vector<1x8x8xf32>
    %309 = vector.shape_cast %308 : vector<1x8x8xf32> to vector<8x8xf32>
    %cst_313 = arith.constant dense<0.000000e+00> : vector<178x8xf32>
    %310 = tpu.matmul %307, %309, %cst_313 {dimension_numbers = #tpu.dot_dimension_numbers<[1], [0], [0], [1], [0, 0, 1, 1], [], []>} : vector<178x8xf32>, vector<8x8xf32>, vector<178x8xf32> -> vector<178x8xf32>
    %311 = arith.addf %306, %310 : vector<178x8xf32>
    %c12 = arith.constant 12 : index
    %c0_314 = arith.constant 0 : index
    %312 = vector.load %arg16[%c12, %c0_314] : memref<200x8xf32, #tpu.memory_space<vmem>>, vector<178x8xf32>
    %c5_315 = arith.constant 5 : index
    %c0_316 = arith.constant 0 : index
    %c0_317 = arith.constant 0 : index
    %313 = vector.load %arg3[%c5_315, %c0_316, %c0_317] : memref<9x8x8xf32, #tpu.memory_space<vmem>>, vector<1x8x8xf32>
    %314 = vector.shape_cast %313 : vector<1x8x8xf32> to vector<8x8xf32>
    %cst_318 = arith.constant dense<0.000000e+00> : vector<178x8xf32>
    %315 = tpu.matmul %312, %314, %cst_318 {dimension_numbers = #tpu.dot_dimension_numbers<[1], [0], [0], [1], [0, 0, 1, 1], [], []>} : vector<178x8xf32>, vector<8x8xf32>, vector<178x8xf32> -> vector<178x8xf32>
    %316 = arith.addf %311, %315 : vector<178x8xf32>
    %c20_319 = arith.constant 20 : index
    %c0_320 = arith.constant 0 : index
    %317 = vector.load %arg16[%c20_319, %c0_320] : memref<200x8xf32, #tpu.memory_space<vmem>>, vector<178x8xf32>
    %c6_321 = arith.constant 6 : index
    %c0_322 = arith.constant 0 : index
    %c0_323 = arith.constant 0 : index
    %318 = vector.load %arg3[%c6_321, %c0_322, %c0_323] : memref<9x8x8xf32, #tpu.memory_space<vmem>>, vector<1x8x8xf32>
    %319 = vector.shape_cast %318 : vector<1x8x8xf32> to vector<8x8xf32>
    %cst_324 = arith.constant dense<0.000000e+00> : vector<178x8xf32>
    %320 = tpu.matmul %317, %319, %cst_324 {dimension_numbers = #tpu.dot_dimension_numbers<[1], [0], [0], [1], [0, 0, 1, 1], [], []>} : vector<178x8xf32>, vector<8x8xf32>, vector<178x8xf32> -> vector<178x8xf32>
    %321 = arith.addf %316, %320 : vector<178x8xf32>
    %c21_325 = arith.constant 21 : index
    %c0_326 = arith.constant 0 : index
    %322 = vector.load %arg16[%c21_325, %c0_326] : memref<200x8xf32, #tpu.memory_space<vmem>>, vector<178x8xf32>
    %c7_327 = arith.constant 7 : index
    %c0_328 = arith.constant 0 : index
    %c0_329 = arith.constant 0 : index
    %323 = vector.load %arg3[%c7_327, %c0_328, %c0_329] : memref<9x8x8xf32, #tpu.memory_space<vmem>>, vector<1x8x8xf32>
    %324 = vector.shape_cast %323 : vector<1x8x8xf32> to vector<8x8xf32>
    %cst_330 = arith.constant dense<0.000000e+00> : vector<178x8xf32>
    %325 = tpu.matmul %322, %324, %cst_330 {dimension_numbers = #tpu.dot_dimension_numbers<[1], [0], [0], [1], [0, 0, 1, 1], [], []>} : vector<178x8xf32>, vector<8x8xf32>, vector<178x8xf32> -> vector<178x8xf32>
    %326 = arith.addf %321, %325 : vector<178x8xf32>
    %c22 = arith.constant 22 : index
    %c0_331 = arith.constant 0 : index
    %327 = vector.load %arg16[%c22, %c0_331] : memref<200x8xf32, #tpu.memory_space<vmem>>, vector<178x8xf32>
    %c8_332 = arith.constant 8 : index
    %c0_333 = arith.constant 0 : index
    %c0_334 = arith.constant 0 : index
    %328 = vector.load %arg3[%c8_332, %c0_333, %c0_334] : memref<9x8x8xf32, #tpu.memory_space<vmem>>, vector<1x8x8xf32>
    %329 = vector.shape_cast %328 : vector<1x8x8xf32> to vector<8x8xf32>
    %cst_335 = arith.constant dense<0.000000e+00> : vector<178x8xf32>
    %330 = tpu.matmul %327, %329, %cst_335 {dimension_numbers = #tpu.dot_dimension_numbers<[1], [0], [0], [1], [0, 0, 1, 1], [], []>} : vector<178x8xf32>, vector<8x8xf32>, vector<178x8xf32> -> vector<178x8xf32>
    %331 = arith.addf %326, %330 : vector<178x8xf32>
    %c0_336 = arith.constant 0 : index
    %c0_337 = arith.constant 0 : index
    %332 = vector.load %arg7[%c0_336, %c0_337] : memref<1x8xf32, #tpu.memory_space<vmem>>, vector<1x8xf32>
    %333 = vector.broadcast %332 : vector<1x8xf32> to vector<178x8xf32>
    %334 = arith.mulf %331, %333 : vector<178x8xf32>
    %c0_338 = arith.constant 0 : index
    %c0_339 = arith.constant 0 : index
    %335 = vector.load %arg11[%c0_338, %c0_339] : memref<1x8xf32, #tpu.memory_space<vmem>>, vector<1x8xf32>
    %336 = vector.broadcast %335 : vector<1x8xf32> to vector<178x8xf32>
    %337 = arith.addf %334, %336 : vector<178x8xf32>
    %cst_340 = arith.constant 0.000000e+00 : f32
    %338 = vector.broadcast %cst_340 : f32 to vector<178x8xf32>
    %339 = arith.cmpf ogt, %337, %338 : vector<178x8xf32>
    %cst_341 = arith.constant 0.00999999977 : f32
    %340 = vector.broadcast %cst_341 : f32 to vector<178x8xf32>
    %341 = arith.mulf %340, %337 : vector<178x8xf32>
    %342 = arith.select %339, %337, %341 : vector<178x8xi1>, vector<178x8xf32>
    %c0_342 = arith.constant 0 : index
    %c0_343 = arith.constant 0 : index
    %343 = vector.load %arg20[%c0_342, %c0_343] : memref<178x8xf32, #tpu.memory_space<vmem>>, vector<178x8xf32>
    tpu.vector_store %arg20[%c0_342, %c0_343], %342 {strides = array<i32>} : memref<178x8xf32, #tpu.memory_space<vmem>>, vector<178x8xf32>,
    %cst_344 = arith.constant 0.000000e+00 : f32
    %344 = vector.broadcast %cst_344 : f32 to vector<72x8xf32>
    %c0_345 = arith.constant 0 : index
    %c0_346 = arith.constant 0 : index
    %345 = vector.load %arg17[%c0_345, %c0_346] : memref<72x8xf32, #tpu.memory_space<vmem>>, vector<72x8xf32>
    tpu.vector_store %arg17[%c0_345, %c0_346], %344 {strides = array<i32>} : memref<72x8xf32, #tpu.memory_space<vmem>>, vector<72x8xf32>,
    %c0_347 = arith.constant 0 : index
    %c0_348 = arith.constant 0 : index
    %346 = tpu.strided_load %arg20[%c0_347, %c0_348] {strides = array<i32: 2, 1>} : memref<178x8xf32, #tpu.memory_space<vmem>>, vector<4x8xf32>
    %c1_349 = arith.constant 1 : index
    %c0_350 = arith.constant 0 : index
    %347 = tpu.strided_load %arg20[%c1_349, %c0_350] {strides = array<i32: 2, 1>} : memref<178x8xf32, #tpu.memory_space<vmem>>, vector<4x8xf32>
    %c10_351 = arith.constant 10 : index
    %c0_352 = arith.constant 0 : index
    %348 = tpu.strided_load %arg20[%c10_351, %c0_352] {strides = array<i32: 2, 1>} : memref<178x8xf32, #tpu.memory_space<vmem>>, vector<4x8xf32>
    %c11_353 = arith.constant 11 : index
    %c0_354 = arith.constant 0 : index
    %349 = tpu.strided_load %arg20[%c11_353, %c0_354] {strides = array<i32: 2, 1>} : memref<178x8xf32, #tpu.memory_space<vmem>>, vector<4x8xf32>
    %350 = arith.maximumf %346, %347 : vector<4x8xf32>
    %351 = arith.maximumf %348, %349 : vector<4x8xf32>
    %352 = arith.maximumf %350, %351 : vector<4x8xf32>
    %c7_355 = arith.constant 7 : index
    %c0_356 = arith.constant 0 : index
    %353 = vector.load %arg17[%c7_355, %c0_356] : memref<72x8xf32, #tpu.memory_space<vmem>>, vector<4x8xf32>
    tpu.vector_store %arg17[%c7_355, %c0_356], %352 {strides = array<i32>} : memref<72x8xf32, #tpu.memory_space<vmem>>, vector<4x8xf32>,
    %c20_357 = arith.constant 20 : index
    %c0_358 = arith.constant 0 : index
    %354 = tpu.strided_load %arg20[%c20_357, %c0_358] {strides = array<i32: 2, 1>} : memref<178x8xf32, #tpu.memory_space<vmem>>, vector<4x8xf32>
    %c21_359 = arith.constant 21 : index
    %c0_360 = arith.constant 0 : index
    %355 = tpu.strided_load %arg20[%c21_359, %c0_360] {strides = array<i32: 2, 1>} : memref<178x8xf32, #tpu.memory_space<vmem>>, vector<4x8xf32>
    %c30 = arith.constant 30 : index
    %c0_361 = arith.constant 0 : index
    %356 = tpu.strided_load %arg20[%c30, %c0_361] {strides = array<i32: 2, 1>} : memref<178x8xf32, #tpu.memory_space<vmem>>, vector<4x8xf32>
    %c31_362 = arith.constant 31 : index
    %c0_363 = arith.constant 0 : index
    %357 = tpu.strided_load %arg20[%c31_362, %c0_363] {strides = array<i32: 2, 1>} : memref<178x8xf32, #tpu.memory_space<vmem>>, vector<4x8xf32>
    %358 = arith.maximumf %354, %355 : vector<4x8xf32>
    %359 = arith.maximumf %356, %357 : vector<4x8xf32>
    %360 = arith.maximumf %358, %359 : vector<4x8xf32>
    %c13 = arith.constant 13 : index
    %c0_364 = arith.constant 0 : index
    %361 = vector.load %arg17[%c13, %c0_364] : memref<72x8xf32, #tpu.memory_space<vmem>>, vector<4x8xf32>
    tpu.vector_store %arg17[%c13, %c0_364], %360 {strides = array<i32>} : memref<72x8xf32, #tpu.memory_space<vmem>>, vector<4x8xf32>,
    %c40 = arith.constant 40 : index
    %c0_365 = arith.constant 0 : index
    %362 = tpu.strided_load %arg20[%c40, %c0_365] {strides = array<i32: 2, 1>} : memref<178x8xf32, #tpu.memory_space<vmem>>, vector<4x8xf32>
    %c41_366 = arith.constant 41 : index
    %c0_367 = arith.constant 0 : index
    %363 = tpu.strided_load %arg20[%c41_366, %c0_367] {strides = array<i32: 2, 1>} : memref<178x8xf32, #tpu.memory_space<vmem>>, vector<4x8xf32>
    %c50 = arith.constant 50 : index
    %c0_368 = arith.constant 0 : index
    %364 = tpu.strided_load %arg20[%c50, %c0_368] {strides = array<i32: 2, 1>} : memref<178x8xf32, #tpu.memory_space<vmem>>, vector<4x8xf32>
    %c51_369 = arith.constant 51 : index
    %c0_370 = arith.constant 0 : index
    %365 = tpu.strided_load %arg20[%c51_369, %c0_370] {strides = array<i32: 2, 1>} : memref<178x8xf32, #tpu.memory_space<vmem>>, vector<4x8xf32>
    %366 = arith.maximumf %362, %363 : vector<4x8xf32>
    %367 = arith.maximumf %364, %365 : vector<4x8xf32>
    %368 = arith.maximumf %366, %367 : vector<4x8xf32>
    %c19_371 = arith.constant 19 : index
    %c0_372 = arith.constant 0 : index
    %369 = vector.load %arg17[%c19_371, %c0_372] : memref<72x8xf32, #tpu.memory_space<vmem>>, vector<4x8xf32>
    tpu.vector_store %arg17[%c19_371, %c0_372], %368 {strides = array<i32>} : memref<72x8xf32, #tpu.memory_space<vmem>>, vector<4x8xf32>,
    %c60 = arith.constant 60 : index
    %c0_373 = arith.constant 0 : index
    %370 = tpu.strided_load %arg20[%c60, %c0_373] {strides = array<i32: 2, 1>} : memref<178x8xf32, #tpu.memory_space<vmem>>, vector<4x8xf32>
    %c61_374 = arith.constant 61 : index
    %c0_375 = arith.constant 0 : index
    %371 = tpu.strided_load %arg20[%c61_374, %c0_375] {strides = array<i32: 2, 1>} : memref<178x8xf32, #tpu.memory_space<vmem>>, vector<4x8xf32>
    %c70 = arith.constant 70 : index
    %c0_376 = arith.constant 0 : index
    %372 = tpu.strided_load %arg20[%c70, %c0_376] {strides = array<i32: 2, 1>} : memref<178x8xf32, #tpu.memory_space<vmem>>, vector<4x8xf32>
    %c71_377 = arith.constant 71 : index
    %c0_378 = arith.constant 0 : index
    %373 = tpu.strided_load %arg20[%c71_377, %c0_378] {strides = array<i32: 2, 1>} : memref<178x8xf32, #tpu.memory_space<vmem>>, vector<4x8xf32>
    %374 = arith.maximumf %370, %371 : vector<4x8xf32>
    %375 = arith.maximumf %372, %373 : vector<4x8xf32>
    %376 = arith.maximumf %374, %375 : vector<4x8xf32>
    %c25 = arith.constant 25 : index
    %c0_379 = arith.constant 0 : index
    %377 = vector.load %arg17[%c25, %c0_379] : memref<72x8xf32, #tpu.memory_space<vmem>>, vector<4x8xf32>
    tpu.vector_store %arg17[%c25, %c0_379], %376 {strides = array<i32>} : memref<72x8xf32, #tpu.memory_space<vmem>>, vector<4x8xf32>,
    %c100 = arith.constant 100 : index
    %c0_380 = arith.constant 0 : index
    %378 = tpu.strided_load %arg20[%c100, %c0_380] {strides = array<i32: 2, 1>} : memref<178x8xf32, #tpu.memory_space<vmem>>, vector<4x8xf32>
    %c101 = arith.constant 101 : index
    %c0_381 = arith.constant 0 : index
    %379 = tpu.strided_load %arg20[%c101, %c0_381] {strides = array<i32: 2, 1>} : memref<178x8xf32, #tpu.memory_space<vmem>>, vector<4x8xf32>
    %c110 = arith.constant 110 : index
    %c0_382 = arith.constant 0 : index
    %380 = tpu.strided_load %arg20[%c110, %c0_382] {strides = array<i32: 2, 1>} : memref<178x8xf32, #tpu.memory_space<vmem>>, vector<4x8xf32>
    %c111_383 = arith.constant 111 : index
    %c0_384 = arith.constant 0 : index
    %381 = tpu.strided_load %arg20[%c111_383, %c0_384] {strides = array<i32: 2, 1>} : memref<178x8xf32, #tpu.memory_space<vmem>>, vector<4x8xf32>
    %382 = arith.maximumf %378, %379 : vector<4x8xf32>
    %383 = arith.maximumf %380, %381 : vector<4x8xf32>
    %384 = arith.maximumf %382, %383 : vector<4x8xf32>
    %c43 = arith.constant 43 : index
    %c0_385 = arith.constant 0 : index
    %385 = vector.load %arg17[%c43, %c0_385] : memref<72x8xf32, #tpu.memory_space<vmem>>, vector<4x8xf32>
    tpu.vector_store %arg17[%c43, %c0_385], %384 {strides = array<i32>} : memref<72x8xf32, #tpu.memory_space<vmem>>, vector<4x8xf32>,
    %c120 = arith.constant 120 : index
    %c0_386 = arith.constant 0 : index
    %386 = tpu.strided_load %arg20[%c120, %c0_386] {strides = array<i32: 2, 1>} : memref<178x8xf32, #tpu.memory_space<vmem>>, vector<4x8xf32>
    %c121_387 = arith.constant 121 : index
    %c0_388 = arith.constant 0 : index
    %387 = tpu.strided_load %arg20[%c121_387, %c0_388] {strides = array<i32: 2, 1>} : memref<178x8xf32, #tpu.memory_space<vmem>>, vector<4x8xf32>
    %c130 = arith.constant 130 : index
    %c0_389 = arith.constant 0 : index
    %388 = tpu.strided_load %arg20[%c130, %c0_389] {strides = array<i32: 2, 1>} : memref<178x8xf32, #tpu.memory_space<vmem>>, vector<4x8xf32>
    %c131_390 = arith.constant 131 : index
    %c0_391 = arith.constant 0 : index
    %389 = tpu.strided_load %arg20[%c131_390, %c0_391] {strides = array<i32: 2, 1>} : memref<178x8xf32, #tpu.memory_space<vmem>>, vector<4x8xf32>
    %390 = arith.maximumf %386, %387 : vector<4x8xf32>
    %391 = arith.maximumf %388, %389 : vector<4x8xf32>
    %392 = arith.maximumf %390, %391 : vector<4x8xf32>
    %c49 = arith.constant 49 : index
    %c0_392 = arith.constant 0 : index
    %393 = vector.load %arg17[%c49, %c0_392] : memref<72x8xf32, #tpu.memory_space<vmem>>, vector<4x8xf32>
    tpu.vector_store %arg17[%c49, %c0_392], %392 {strides = array<i32>} : memref<72x8xf32, #tpu.memory_space<vmem>>, vector<4x8xf32>,
    %c140 = arith.constant 140 : index
    %c0_393 = arith.constant 0 : index
    %394 = tpu.strided_load %arg20[%c140, %c0_393] {strides = array<i32: 2, 1>} : memref<178x8xf32, #tpu.memory_space<vmem>>, vector<4x8xf32>
    %c141_394 = arith.constant 141 : index
    %c0_395 = arith.constant 0 : index
    %395 = tpu.strided_load %arg20[%c141_394, %c0_395] {strides = array<i32: 2, 1>} : memref<178x8xf32, #tpu.memory_space<vmem>>, vector<4x8xf32>
    %c150 = arith.constant 150 : index
    %c0_396 = arith.constant 0 : index
    %396 = tpu.strided_load %arg20[%c150, %c0_396] {strides = array<i32: 2, 1>} : memref<178x8xf32, #tpu.memory_space<vmem>>, vector<4x8xf32>
    %c151_397 = arith.constant 151 : index
    %c0_398 = arith.constant 0 : index
    %397 = tpu.strided_load %arg20[%c151_397, %c0_398] {strides = array<i32: 2, 1>} : memref<178x8xf32, #tpu.memory_space<vmem>>, vector<4x8xf32>
    %398 = arith.maximumf %394, %395 : vector<4x8xf32>
    %399 = arith.maximumf %396, %397 : vector<4x8xf32>
    %400 = arith.maximumf %398, %399 : vector<4x8xf32>
    %c55_399 = arith.constant 55 : index
    %c0_400 = arith.constant 0 : index
    %401 = vector.load %arg17[%c55_399, %c0_400] : memref<72x8xf32, #tpu.memory_space<vmem>>, vector<4x8xf32>
    tpu.vector_store %arg17[%c55_399, %c0_400], %400 {strides = array<i32>} : memref<72x8xf32, #tpu.memory_space<vmem>>, vector<4x8xf32>,
    %c160_401 = arith.constant 160 : index
    %c0_402 = arith.constant 0 : index
    %402 = tpu.strided_load %arg20[%c160_401, %c0_402] {strides = array<i32: 2, 1>} : memref<178x8xf32, #tpu.memory_space<vmem>>, vector<4x8xf32>
    %c161_403 = arith.constant 161 : index
    %c0_404 = arith.constant 0 : index
    %403 = tpu.strided_load %arg20[%c161_403, %c0_404] {strides = array<i32: 2, 1>} : memref<178x8xf32, #tpu.memory_space<vmem>>, vector<4x8xf32>
    %c170 = arith.constant 170 : index
    %c0_405 = arith.constant 0 : index
    %404 = tpu.strided_load %arg20[%c170, %c0_405] {strides = array<i32: 2, 1>} : memref<178x8xf32, #tpu.memory_space<vmem>>, vector<4x8xf32>
    %c171_406 = arith.constant 171 : index
    %c0_407 = arith.constant 0 : index
    %405 = tpu.strided_load %arg20[%c171_406, %c0_407] {strides = array<i32: 2, 1>} : memref<178x8xf32, #tpu.memory_space<vmem>>, vector<4x8xf32>
    %406 = arith.maximumf %402, %403 : vector<4x8xf32>
    %407 = arith.maximumf %404, %405 : vector<4x8xf32>
    %408 = arith.maximumf %406, %407 : vector<4x8xf32>
    %c61_408 = arith.constant 61 : index
    %c0_409 = arith.constant 0 : index
    %409 = vector.load %arg17[%c61_408, %c0_409] : memref<72x8xf32, #tpu.memory_space<vmem>>, vector<4x8xf32>
    tpu.vector_store %arg17[%c61_408, %c0_409], %408 {strides = array<i32>} : memref<72x8xf32, #tpu.memory_space<vmem>>, vector<4x8xf32>,
    %cst_410 = arith.constant 0.000000e+00 : f32
    %410 = vector.broadcast %cst_410 : f32 to vector<58x16xf32>
    %c0_411 = arith.constant 0 : index
    %c0_412 = arith.constant 0 : index
    %411 = vector.load %arg17[%c0_411, %c0_412] : memref<72x8xf32, #tpu.memory_space<vmem>>, vector<58x8xf32>
    %c0_413 = arith.constant 0 : index
    %c0_414 = arith.constant 0 : index
    %c0_415 = arith.constant 0 : index
    %412 = vector.load %arg4[%c0_413, %c0_414, %c0_415] : memref<9x8x16xf32, #tpu.memory_space<vmem>>, vector<1x8x16xf32>
    %413 = vector.shape_cast %412 : vector<1x8x16xf32> to vector<8x16xf32>
    %cst_416 = arith.constant dense<0.000000e+00> : vector<58x16xf32>
    %414 = tpu.matmul %411, %413, %cst_416 {dimension_numbers = #tpu.dot_dimension_numbers<[1], [0], [0], [1], [0, 0, 1, 1], [], []>} : vector<58x8xf32>, vector<8x16xf32>, vector<58x16xf32> -> vector<58x16xf32>
    %415 = arith.addf %410, %414 : vector<58x16xf32>
    %c1_417 = arith.constant 1 : index
    %c0_418 = arith.constant 0 : index
    %416 = vector.load %arg17[%c1_417, %c0_418] : memref<72x8xf32, #tpu.memory_space<vmem>>, vector<58x8xf32>
    %c1_419 = arith.constant 1 : index
    %c0_420 = arith.constant 0 : index
    %c0_421 = arith.constant 0 : index
    %417 = vector.load %arg4[%c1_419, %c0_420, %c0_421] : memref<9x8x16xf32, #tpu.memory_space<vmem>>, vector<1x8x16xf32>
    %418 = vector.shape_cast %417 : vector<1x8x16xf32> to vector<8x16xf32>
    %cst_422 = arith.constant dense<0.000000e+00> : vector<58x16xf32>
    %419 = tpu.matmul %416, %418, %cst_422 {dimension_numbers = #tpu.dot_dimension_numbers<[1], [0], [0], [1], [0, 0, 1, 1], [], []>} : vector<58x8xf32>, vector<8x16xf32>, vector<58x16xf32> -> vector<58x16xf32>
    %420 = arith.addf %415, %419 : vector<58x16xf32>
    %c2_423 = arith.constant 2 : index
    %c0_424 = arith.constant 0 : index
    %421 = vector.load %arg17[%c2_423, %c0_424] : memref<72x8xf32, #tpu.memory_space<vmem>>, vector<58x8xf32>
    %c2_425 = arith.constant 2 : index
    %c0_426 = arith.constant 0 : index
    %c0_427 = arith.constant 0 : index
    %422 = vector.load %arg4[%c2_425, %c0_426, %c0_427] : memref<9x8x16xf32, #tpu.memory_space<vmem>>, vector<1x8x16xf32>
    %423 = vector.shape_cast %422 : vector<1x8x16xf32> to vector<8x16xf32>
    %cst_428 = arith.constant dense<0.000000e+00> : vector<58x16xf32>
    %424 = tpu.matmul %421, %423, %cst_428 {dimension_numbers = #tpu.dot_dimension_numbers<[1], [0], [0], [1], [0, 0, 1, 1], [], []>} : vector<58x8xf32>, vector<8x16xf32>, vector<58x16xf32> -> vector<58x16xf32>
    %425 = arith.addf %420, %424 : vector<58x16xf32>
    %c6_429 = arith.constant 6 : index
    %c0_430 = arith.constant 0 : index
    %426 = vector.load %arg17[%c6_429, %c0_430] : memref<72x8xf32, #tpu.memory_space<vmem>>, vector<58x8xf32>
    %c3_431 = arith.constant 3 : index
    %c0_432 = arith.constant 0 : index
    %c0_433 = arith.constant 0 : index
    %427 = vector.load %arg4[%c3_431, %c0_432, %c0_433] : memref<9x8x16xf32, #tpu.memory_space<vmem>>, vector<1x8x16xf32>
    %428 = vector.shape_cast %427 : vector<1x8x16xf32> to vector<8x16xf32>
    %cst_434 = arith.constant dense<0.000000e+00> : vector<58x16xf32>
    %429 = tpu.matmul %426, %428, %cst_434 {dimension_numbers = #tpu.dot_dimension_numbers<[1], [0], [0], [1], [0, 0, 1, 1], [], []>} : vector<58x8xf32>, vector<8x16xf32>, vector<58x16xf32> -> vector<58x16xf32>
    %430 = arith.addf %425, %429 : vector<58x16xf32>
    %c7_435 = arith.constant 7 : index
    %c0_436 = arith.constant 0 : index
    %431 = vector.load %arg17[%c7_435, %c0_436] : memref<72x8xf32, #tpu.memory_space<vmem>>, vector<58x8xf32>
    %c4_437 = arith.constant 4 : index
    %c0_438 = arith.constant 0 : index
    %c0_439 = arith.constant 0 : index
    %432 = vector.load %arg4[%c4_437, %c0_438, %c0_439] : memref<9x8x16xf32, #tpu.memory_space<vmem>>, vector<1x8x16xf32>
    %433 = vector.shape_cast %432 : vector<1x8x16xf32> to vector<8x16xf32>
    %cst_440 = arith.constant dense<0.000000e+00> : vector<58x16xf32>
    %434 = tpu.matmul %431, %433, %cst_440 {dimension_numbers = #tpu.dot_dimension_numbers<[1], [0], [0], [1], [0, 0, 1, 1], [], []>} : vector<58x8xf32>, vector<8x16xf32>, vector<58x16xf32> -> vector<58x16xf32>
    %435 = arith.addf %430, %434 : vector<58x16xf32>
    %c8_441 = arith.constant 8 : index
    %c0_442 = arith.constant 0 : index
    %436 = vector.load %arg17[%c8_441, %c0_442] : memref<72x8xf32, #tpu.memory_space<vmem>>, vector<58x8xf32>
    %c5_443 = arith.constant 5 : index
    %c0_444 = arith.constant 0 : index
    %c0_445 = arith.constant 0 : index
    %437 = vector.load %arg4[%c5_443, %c0_444, %c0_445] : memref<9x8x16xf32, #tpu.memory_space<vmem>>, vector<1x8x16xf32>
    %438 = vector.shape_cast %437 : vector<1x8x16xf32> to vector<8x16xf32>
    %cst_446 = arith.constant dense<0.000000e+00> : vector<58x16xf32>
    %439 = tpu.matmul %436, %438, %cst_446 {dimension_numbers = #tpu.dot_dimension_numbers<[1], [0], [0], [1], [0, 0, 1, 1], [], []>} : vector<58x8xf32>, vector<8x16xf32>, vector<58x16xf32> -> vector<58x16xf32>
    %440 = arith.addf %435, %439 : vector<58x16xf32>
    %c12_447 = arith.constant 12 : index
    %c0_448 = arith.constant 0 : index
    %441 = vector.load %arg17[%c12_447, %c0_448] : memref<72x8xf32, #tpu.memory_space<vmem>>, vector<58x8xf32>
    %c6_449 = arith.constant 6 : index
    %c0_450 = arith.constant 0 : index
    %c0_451 = arith.constant 0 : index
    %442 = vector.load %arg4[%c6_449, %c0_450, %c0_451] : memref<9x8x16xf32, #tpu.memory_space<vmem>>, vector<1x8x16xf32>
    %443 = vector.shape_cast %442 : vector<1x8x16xf32> to vector<8x16xf32>
    %cst_452 = arith.constant dense<0.000000e+00> : vector<58x16xf32>
    %444 = tpu.matmul %441, %443, %cst_452 {dimension_numbers = #tpu.dot_dimension_numbers<[1], [0], [0], [1], [0, 0, 1, 1], [], []>} : vector<58x8xf32>, vector<8x16xf32>, vector<58x16xf32> -> vector<58x16xf32>
    %445 = arith.addf %440, %444 : vector<58x16xf32>
    %c13_453 = arith.constant 13 : index
    %c0_454 = arith.constant 0 : index
    %446 = vector.load %arg17[%c13_453, %c0_454] : memref<72x8xf32, #tpu.memory_space<vmem>>, vector<58x8xf32>
    %c7_455 = arith.constant 7 : index
    %c0_456 = arith.constant 0 : index
    %c0_457 = arith.constant 0 : index
    %447 = vector.load %arg4[%c7_455, %c0_456, %c0_457] : memref<9x8x16xf32, #tpu.memory_space<vmem>>, vector<1x8x16xf32>
    %448 = vector.shape_cast %447 : vector<1x8x16xf32> to vector<8x16xf32>
    %cst_458 = arith.constant dense<0.000000e+00> : vector<58x16xf32>
    %449 = tpu.matmul %446, %448, %cst_458 {dimension_numbers = #tpu.dot_dimension_numbers<[1], [0], [0], [1], [0, 0, 1, 1], [], []>} : vector<58x8xf32>, vector<8x16xf32>, vector<58x16xf32> -> vector<58x16xf32>
    %450 = arith.addf %445, %449 : vector<58x16xf32>
    %c14 = arith.constant 14 : index
    %c0_459 = arith.constant 0 : index
    %451 = vector.load %arg17[%c14, %c0_459] : memref<72x8xf32, #tpu.memory_space<vmem>>, vector<58x8xf32>
    %c8_460 = arith.constant 8 : index
    %c0_461 = arith.constant 0 : index
    %c0_462 = arith.constant 0 : index
    %452 = vector.load %arg4[%c8_460, %c0_461, %c0_462] : memref<9x8x16xf32, #tpu.memory_space<vmem>>, vector<1x8x16xf32>
    %453 = vector.shape_cast %452 : vector<1x8x16xf32> to vector<8x16xf32>
    %cst_463 = arith.constant dense<0.000000e+00> : vector<58x16xf32>
    %454 = tpu.matmul %451, %453, %cst_463 {dimension_numbers = #tpu.dot_dimension_numbers<[1], [0], [0], [1], [0, 0, 1, 1], [], []>} : vector<58x8xf32>, vector<8x16xf32>, vector<58x16xf32> -> vector<58x16xf32>
    %455 = arith.addf %450, %454 : vector<58x16xf32>
    %c0_464 = arith.constant 0 : index
    %c0_465 = arith.constant 0 : index
    %456 = vector.load %arg8[%c0_464, %c0_465] : memref<1x16xf32, #tpu.memory_space<vmem>>, vector<1x16xf32>
    %457 = vector.broadcast %456 : vector<1x16xf32> to vector<58x16xf32>
    %458 = arith.mulf %455, %457 : vector<58x16xf32>
    %c0_466 = arith.constant 0 : index
    %c0_467 = arith.constant 0 : index
    %459 = vector.load %arg12[%c0_466, %c0_467] : memref<1x16xf32, #tpu.memory_space<vmem>>, vector<1x16xf32>
    %460 = vector.broadcast %459 : vector<1x16xf32> to vector<58x16xf32>
    %461 = arith.addf %458, %460 : vector<58x16xf32>
    %cst_468 = arith.constant 0.000000e+00 : f32
    %462 = vector.broadcast %cst_468 : f32 to vector<58x16xf32>
    %463 = arith.cmpf ogt, %461, %462 : vector<58x16xf32>
    %cst_469 = arith.constant 0.00999999977 : f32
    %464 = vector.broadcast %cst_469 : f32 to vector<58x16xf32>
    %465 = arith.mulf %464, %461 : vector<58x16xf32>
    %466 = arith.select %463, %461, %465 : vector<58x16xi1>, vector<58x16xf32>
    %c0_470 = arith.constant 0 : index
    %c0_471 = arith.constant 0 : index
    %467 = vector.load %arg21[%c0_470, %c0_471] : memref<58x16xf32, #tpu.memory_space<vmem>>, vector<58x16xf32>
    tpu.vector_store %arg21[%c0_470, %c0_471], %466 {strides = array<i32>} : memref<58x16xf32, #tpu.memory_space<vmem>>, vector<58x16xf32>,
    %cst_472 = arith.constant 0.000000e+00 : f32
    %468 = vector.broadcast %cst_472 : f32 to vector<32x16xf32>
    %c0_473 = arith.constant 0 : index
    %c0_474 = arith.constant 0 : index
    %469 = vector.load %arg18[%c0_473, %c0_474] : memref<32x16xf32, #tpu.memory_space<vmem>>, vector<32x16xf32>
    tpu.vector_store %arg18[%c0_473, %c0_474], %468 {strides = array<i32>} : memref<32x16xf32, #tpu.memory_space<vmem>>, vector<32x16xf32>,
    %c0_475 = arith.constant 0 : index
    %c0_476 = arith.constant 0 : index
    %470 = tpu.strided_load %arg21[%c0_475, %c0_476] {strides = array<i32: 2, 1>} : memref<58x16xf32, #tpu.memory_space<vmem>>, vector<2x16xf32>
    %c1_477 = arith.constant 1 : index
    %c0_478 = arith.constant 0 : index
    %471 = tpu.strided_load %arg21[%c1_477, %c0_478] {strides = array<i32: 2, 1>} : memref<58x16xf32, #tpu.memory_space<vmem>>, vector<2x16xf32>
    %c6_479 = arith.constant 6 : index
    %c0_480 = arith.constant 0 : index
    %472 = tpu.strided_load %arg21[%c6_479, %c0_480] {strides = array<i32: 2, 1>} : memref<58x16xf32, #tpu.memory_space<vmem>>, vector<2x16xf32>
    %c7_481 = arith.constant 7 : index
    %c0_482 = arith.constant 0 : index
    %473 = tpu.strided_load %arg21[%c7_481, %c0_482] {strides = array<i32: 2, 1>} : memref<58x16xf32, #tpu.memory_space<vmem>>, vector<2x16xf32>
    %474 = arith.maximumf %470, %471 : vector<2x16xf32>
    %475 = arith.maximumf %472, %473 : vector<2x16xf32>
    %476 = arith.maximumf %474, %475 : vector<2x16xf32>
    %c5_483 = arith.constant 5 : index
    %c0_484 = arith.constant 0 : index
    %477 = vector.load %arg18[%c5_483, %c0_484] : memref<32x16xf32, #tpu.memory_space<vmem>>, vector<2x16xf32>
    tpu.vector_store %arg18[%c5_483, %c0_484], %476 {strides = array<i32>} : memref<32x16xf32, #tpu.memory_space<vmem>>, vector<2x16xf32>,
    %c12_485 = arith.constant 12 : index
    %c0_486 = arith.constant 0 : index
    %478 = tpu.strided_load %arg21[%c12_485, %c0_486] {strides = array<i32: 2, 1>} : memref<58x16xf32, #tpu.memory_space<vmem>>, vector<2x16xf32>
    %c13_487 = arith.constant 13 : index
    %c0_488 = arith.constant 0 : index
    %479 = tpu.strided_load %arg21[%c13_487, %c0_488] {strides = array<i32: 2, 1>} : memref<58x16xf32, #tpu.memory_space<vmem>>, vector<2x16xf32>
    %c18_489 = arith.constant 18 : index
    %c0_490 = arith.constant 0 : index
    %480 = tpu.strided_load %arg21[%c18_489, %c0_490] {strides = array<i32: 2, 1>} : memref<58x16xf32, #tpu.memory_space<vmem>>, vector<2x16xf32>
    %c19_491 = arith.constant 19 : index
    %c0_492 = arith.constant 0 : index
    %481 = tpu.strided_load %arg21[%c19_491, %c0_492] {strides = array<i32: 2, 1>} : memref<58x16xf32, #tpu.memory_space<vmem>>, vector<2x16xf32>
    %482 = arith.maximumf %478, %479 : vector<2x16xf32>
    %483 = arith.maximumf %480, %481 : vector<2x16xf32>
    %484 = arith.maximumf %482, %483 : vector<2x16xf32>
    %c9 = arith.constant 9 : index
    %c0_493 = arith.constant 0 : index
    %485 = vector.load %arg18[%c9, %c0_493] : memref<32x16xf32, #tpu.memory_space<vmem>>, vector<2x16xf32>
    tpu.vector_store %arg18[%c9, %c0_493], %484 {strides = array<i32>} : memref<32x16xf32, #tpu.memory_space<vmem>>, vector<2x16xf32>,
    %c36_494 = arith.constant 36 : index
    %c0_495 = arith.constant 0 : index
    %486 = tpu.strided_load %arg21[%c36_494, %c0_495] {strides = array<i32: 2, 1>} : memref<58x16xf32, #tpu.memory_space<vmem>>, vector<2x16xf32>
    %c37_496 = arith.constant 37 : index
    %c0_497 = arith.constant 0 : index
    %487 = tpu.strided_load %arg21[%c37_496, %c0_497] {strides = array<i32: 2, 1>} : memref<58x16xf32, #tpu.memory_space<vmem>>, vector<2x16xf32>
    %c42 = arith.constant 42 : index
    %c0_498 = arith.constant 0 : index
    %488 = tpu.strided_load %arg21[%c42, %c0_498] {strides = array<i32: 2, 1>} : memref<58x16xf32, #tpu.memory_space<vmem>>, vector<2x16xf32>
    %c43_499 = arith.constant 43 : index
    %c0_500 = arith.constant 0 : index
    %489 = tpu.strided_load %arg21[%c43_499, %c0_500] {strides = array<i32: 2, 1>} : memref<58x16xf32, #tpu.memory_space<vmem>>, vector<2x16xf32>
    %490 = arith.maximumf %486, %487 : vector<2x16xf32>
    %491 = arith.maximumf %488, %489 : vector<2x16xf32>
    %492 = arith.maximumf %490, %491 : vector<2x16xf32>
    %c21_501 = arith.constant 21 : index
    %c0_502 = arith.constant 0 : index
    %493 = vector.load %arg18[%c21_501, %c0_502] : memref<32x16xf32, #tpu.memory_space<vmem>>, vector<2x16xf32>
    tpu.vector_store %arg18[%c21_501, %c0_502], %492 {strides = array<i32>} : memref<32x16xf32, #tpu.memory_space<vmem>>, vector<2x16xf32>,
    %c48_503 = arith.constant 48 : index
    %c0_504 = arith.constant 0 : index
    %494 = tpu.strided_load %arg21[%c48_503, %c0_504] {strides = array<i32: 2, 1>} : memref<58x16xf32, #tpu.memory_space<vmem>>, vector<2x16xf32>
    %c49_505 = arith.constant 49 : index
    %c0_506 = arith.constant 0 : index
    %495 = tpu.strided_load %arg21[%c49_505, %c0_506] {strides = array<i32: 2, 1>} : memref<58x16xf32, #tpu.memory_space<vmem>>, vector<2x16xf32>
    %c54_507 = arith.constant 54 : index
    %c0_508 = arith.constant 0 : index
    %496 = tpu.strided_load %arg21[%c54_507, %c0_508] {strides = array<i32: 2, 1>} : memref<58x16xf32, #tpu.memory_space<vmem>>, vector<2x16xf32>
    %c55_509 = arith.constant 55 : index
    %c0_510 = arith.constant 0 : index
    %497 = tpu.strided_load %arg21[%c55_509, %c0_510] {strides = array<i32: 2, 1>} : memref<58x16xf32, #tpu.memory_space<vmem>>, vector<2x16xf32>
    %498 = arith.maximumf %494, %495 : vector<2x16xf32>
    %499 = arith.maximumf %496, %497 : vector<2x16xf32>
    %500 = arith.maximumf %498, %499 : vector<2x16xf32>
    %c25_511 = arith.constant 25 : index
    %c0_512 = arith.constant 0 : index
    %501 = vector.load %arg18[%c25_511, %c0_512] : memref<32x16xf32, #tpu.memory_space<vmem>>, vector<2x16xf32>
    tpu.vector_store %arg18[%c25_511, %c0_512], %500 {strides = array<i32>} : memref<32x16xf32, #tpu.memory_space<vmem>>, vector<2x16xf32>,
    %cst_513 = arith.constant 0.000000e+00 : f32
    %502 = vector.broadcast %cst_513 : f32 to vector<22x16xf32>
    %c0_514 = arith.constant 0 : index
    %c0_515 = arith.constant 0 : index
    %503 = vector.load %arg18[%c0_514, %c0_515] : memref<32x16xf32, #tpu.memory_space<vmem>>, vector<22x16xf32>
    %c0_516 = arith.constant 0 : index
    %c0_517 = arith.constant 0 : index
    %c0_518 = arith.constant 0 : index
    %504 = vector.load %arg5[%c0_516, %c0_517, %c0_518] : memref<9x16x16xf32, #tpu.memory_space<vmem>>, vector<1x16x16xf32>
    %505 = vector.shape_cast %504 : vector<1x16x16xf32> to vector<16x16xf32>
    %cst_519 = arith.constant dense<0.000000e+00> : vector<22x16xf32>
    %506 = tpu.matmul %503, %505, %cst_519 {dimension_numbers = #tpu.dot_dimension_numbers<[1], [0], [0], [1], [0, 0, 1, 1], [], []>} : vector<22x16xf32>, vector<16x16xf32>, vector<22x16xf32> -> vector<22x16xf32>
    %507 = arith.addf %502, %506 : vector<22x16xf32>
    %c1_520 = arith.constant 1 : index
    %c0_521 = arith.constant 0 : index
    %508 = vector.load %arg18[%c1_520, %c0_521] : memref<32x16xf32, #tpu.memory_space<vmem>>, vector<22x16xf32>
    %c1_522 = arith.constant 1 : index
    %c0_523 = arith.constant 0 : index
    %c0_524 = arith.constant 0 : index
    %509 = vector.load %arg5[%c1_522, %c0_523, %c0_524] : memref<9x16x16xf32, #tpu.memory_space<vmem>>, vector<1x16x16xf32>
    %510 = vector.shape_cast %509 : vector<1x16x16xf32> to vector<16x16xf32>
    %cst_525 = arith.constant dense<0.000000e+00> : vector<22x16xf32>
    %511 = tpu.matmul %508, %510, %cst_525 {dimension_numbers = #tpu.dot_dimension_numbers<[1], [0], [0], [1], [0, 0, 1, 1], [], []>} : vector<22x16xf32>, vector<16x16xf32>, vector<22x16xf32> -> vector<22x16xf32>
    %512 = arith.addf %507, %511 : vector<22x16xf32>
    %c2_526 = arith.constant 2 : index
    %c0_527 = arith.constant 0 : index
    %513 = vector.load %arg18[%c2_526, %c0_527] : memref<32x16xf32, #tpu.memory_space<vmem>>, vector<22x16xf32>
    %c2_528 = arith.constant 2 : index
    %c0_529 = arith.constant 0 : index
    %c0_530 = arith.constant 0 : index
    %514 = vector.load %arg5[%c2_528, %c0_529, %c0_530] : memref<9x16x16xf32, #tpu.memory_space<vmem>>, vector<1x16x16xf32>
    %515 = vector.shape_cast %514 : vector<1x16x16xf32> to vector<16x16xf32>
    %cst_531 = arith.constant dense<0.000000e+00> : vector<22x16xf32>
    %516 = tpu.matmul %513, %515, %cst_531 {dimension_numbers = #tpu.dot_dimension_numbers<[1], [0], [0], [1], [0, 0, 1, 1], [], []>} : vector<22x16xf32>, vector<16x16xf32>, vector<22x16xf32> -> vector<22x16xf32>
    %517 = arith.addf %512, %516 : vector<22x16xf32>
    %c4_532 = arith.constant 4 : index
    %c0_533 = arith.constant 0 : index
    %518 = vector.load %arg18[%c4_532, %c0_533] : memref<32x16xf32, #tpu.memory_space<vmem>>, vector<22x16xf32>
    %c3_534 = arith.constant 3 : index
    %c0_535 = arith.constant 0 : index
    %c0_536 = arith.constant 0 : index
    %519 = vector.load %arg5[%c3_534, %c0_535, %c0_536] : memref<9x16x16xf32, #tpu.memory_space<vmem>>, vector<1x16x16xf32>
    %520 = vector.shape_cast %519 : vector<1x16x16xf32> to vector<16x16xf32>
    %cst_537 = arith.constant dense<0.000000e+00> : vector<22x16xf32>
    %521 = tpu.matmul %518, %520, %cst_537 {dimension_numbers = #tpu.dot_dimension_numbers<[1], [0], [0], [1], [0, 0, 1, 1], [], []>} : vector<22x16xf32>, vector<16x16xf32>, vector<22x16xf32> -> vector<22x16xf32>
    %522 = arith.addf %517, %521 : vector<22x16xf32>
    %c5_538 = arith.constant 5 : index
    %c0_539 = arith.constant 0 : index
    %523 = vector.load %arg18[%c5_538, %c0_539] : memref<32x16xf32, #tpu.memory_space<vmem>>, vector<22x16xf32>
    %c4_540 = arith.constant 4 : index
    %c0_541 = arith.constant 0 : index
    %c0_542 = arith.constant 0 : index
    %524 = vector.load %arg5[%c4_540, %c0_541, %c0_542] : memref<9x16x16xf32, #tpu.memory_space<vmem>>, vector<1x16x16xf32>
    %525 = vector.shape_cast %524 : vector<1x16x16xf32> to vector<16x16xf32>
    %cst_543 = arith.constant dense<0.000000e+00> : vector<22x16xf32>
    %526 = tpu.matmul %523, %525, %cst_543 {dimension_numbers = #tpu.dot_dimension_numbers<[1], [0], [0], [1], [0, 0, 1, 1], [], []>} : vector<22x16xf32>, vector<16x16xf32>, vector<22x16xf32> -> vector<22x16xf32>
    %527 = arith.addf %522, %526 : vector<22x16xf32>
    %c6_544 = arith.constant 6 : index
    %c0_545 = arith.constant 0 : index
    %528 = vector.load %arg18[%c6_544, %c0_545] : memref<32x16xf32, #tpu.memory_space<vmem>>, vector<22x16xf32>
    %c5_546 = arith.constant 5 : index
    %c0_547 = arith.constant 0 : index
    %c0_548 = arith.constant 0 : index
    %529 = vector.load %arg5[%c5_546, %c0_547, %c0_548] : memref<9x16x16xf32, #tpu.memory_space<vmem>>, vector<1x16x16xf32>
    %530 = vector.shape_cast %529 : vector<1x16x16xf32> to vector<16x16xf32>
    %cst_549 = arith.constant dense<0.000000e+00> : vector<22x16xf32>
    %531 = tpu.matmul %528, %530, %cst_549 {dimension_numbers = #tpu.dot_dimension_numbers<[1], [0], [0], [1], [0, 0, 1, 1], [], []>} : vector<22x16xf32>, vector<16x16xf32>, vector<22x16xf32> -> vector<22x16xf32>
    %532 = arith.addf %527, %531 : vector<22x16xf32>
    %c8_550 = arith.constant 8 : index
    %c0_551 = arith.constant 0 : index
    %533 = vector.load %arg18[%c8_550, %c0_551] : memref<32x16xf32, #tpu.memory_space<vmem>>, vector<22x16xf32>
    %c6_552 = arith.constant 6 : index
    %c0_553 = arith.constant 0 : index
    %c0_554 = arith.constant 0 : index
    %534 = vector.load %arg5[%c6_552, %c0_553, %c0_554] : memref<9x16x16xf32, #tpu.memory_space<vmem>>, vector<1x16x16xf32>
    %535 = vector.shape_cast %534 : vector<1x16x16xf32> to vector<16x16xf32>
    %cst_555 = arith.constant dense<0.000000e+00> : vector<22x16xf32>
    %536 = tpu.matmul %533, %535, %cst_555 {dimension_numbers = #tpu.dot_dimension_numbers<[1], [0], [0], [1], [0, 0, 1, 1], [], []>} : vector<22x16xf32>, vector<16x16xf32>, vector<22x16xf32> -> vector<22x16xf32>
    %537 = arith.addf %532, %536 : vector<22x16xf32>
    %c9_556 = arith.constant 9 : index
    %c0_557 = arith.constant 0 : index
    %538 = vector.load %arg18[%c9_556, %c0_557] : memref<32x16xf32, #tpu.memory_space<vmem>>, vector<22x16xf32>
    %c7_558 = arith.constant 7 : index
    %c0_559 = arith.constant 0 : index
    %c0_560 = arith.constant 0 : index
    %539 = vector.load %arg5[%c7_558, %c0_559, %c0_560] : memref<9x16x16xf32, #tpu.memory_space<vmem>>, vector<1x16x16xf32>
    %540 = vector.shape_cast %539 : vector<1x16x16xf32> to vector<16x16xf32>
    %cst_561 = arith.constant dense<0.000000e+00> : vector<22x16xf32>
    %541 = tpu.matmul %538, %540, %cst_561 {dimension_numbers = #tpu.dot_dimension_numbers<[1], [0], [0], [1], [0, 0, 1, 1], [], []>} : vector<22x16xf32>, vector<16x16xf32>, vector<22x16xf32> -> vector<22x16xf32>
    %542 = arith.addf %537, %541 : vector<22x16xf32>
    %c10_562 = arith.constant 10 : index
    %c0_563 = arith.constant 0 : index
    %543 = vector.load %arg18[%c10_562, %c0_563] : memref<32x16xf32, #tpu.memory_space<vmem>>, vector<22x16xf32>
    %c8_564 = arith.constant 8 : index
    %c0_565 = arith.constant 0 : index
    %c0_566 = arith.constant 0 : index
    %544 = vector.load %arg5[%c8_564, %c0_565, %c0_566] : memref<9x16x16xf32, #tpu.memory_space<vmem>>, vector<1x16x16xf32>
    %545 = vector.shape_cast %544 : vector<1x16x16xf32> to vector<16x16xf32>
    %cst_567 = arith.constant dense<0.000000e+00> : vector<22x16xf32>
    %546 = tpu.matmul %543, %545, %cst_567 {dimension_numbers = #tpu.dot_dimension_numbers<[1], [0], [0], [1], [0, 0, 1, 1], [], []>} : vector<22x16xf32>, vector<16x16xf32>, vector<22x16xf32> -> vector<22x16xf32>
    %547 = arith.addf %542, %546 : vector<22x16xf32>
    %c0_568 = arith.constant 0 : index
    %c0_569 = arith.constant 0 : index
    %548 = vector.load %arg9[%c0_568, %c0_569] : memref<1x16xf32, #tpu.memory_space<vmem>>, vector<1x16xf32>
    %549 = vector.broadcast %548 : vector<1x16xf32> to vector<22x16xf32>
    %550 = arith.mulf %547, %549 : vector<22x16xf32>
    %c0_570 = arith.constant 0 : index
    %c0_571 = arith.constant 0 : index
    %551 = vector.load %arg13[%c0_570, %c0_571] : memref<1x16xf32, #tpu.memory_space<vmem>>, vector<1x16xf32>
    %552 = vector.broadcast %551 : vector<1x16xf32> to vector<22x16xf32>
    %553 = arith.addf %550, %552 : vector<22x16xf32>
    %cst_572 = arith.constant 0.000000e+00 : f32
    %554 = vector.broadcast %cst_572 : f32 to vector<22x16xf32>
    %555 = arith.cmpf ogt, %553, %554 : vector<22x16xf32>
    %cst_573 = arith.constant 0.00999999977 : f32
    %556 = vector.broadcast %cst_573 : f32 to vector<22x16xf32>
    %557 = arith.mulf %556, %553 : vector<22x16xf32>
    %558 = arith.select %555, %553, %557 : vector<22x16xi1>, vector<22x16xf32>
    %c0_574 = arith.constant 0 : index
    %c0_575 = arith.constant 0 : index
    %559 = vector.load %arg22[%c0_574, %c0_575] : memref<22x16xf32, #tpu.memory_space<vmem>>, vector<22x16xf32>
    tpu.vector_store %arg22[%c0_574, %c0_575], %558 {strides = array<i32>} : memref<22x16xf32, #tpu.memory_space<vmem>>, vector<22x16xf32>,
    %c0_576 = arith.constant 0 : index
    %c0_577 = arith.constant 0 : index
    %560 = tpu.strided_load %arg22[%c0_576, %c0_577] {strides = array<i32: 2, 1>} : memref<22x16xf32, #tpu.memory_space<vmem>>, vector<1x16xf32>
    %c1_578 = arith.constant 1 : index
    %c0_579 = arith.constant 0 : index
    %561 = tpu.strided_load %arg22[%c1_578, %c0_579] {strides = array<i32: 2, 1>} : memref<22x16xf32, #tpu.memory_space<vmem>>, vector<1x16xf32>
    %c4_580 = arith.constant 4 : index
    %c0_581 = arith.constant 0 : index
    %562 = tpu.strided_load %arg22[%c4_580, %c0_581] {strides = array<i32: 2, 1>} : memref<22x16xf32, #tpu.memory_space<vmem>>, vector<1x16xf32>
    %c5_582 = arith.constant 5 : index
    %c0_583 = arith.constant 0 : index
    %563 = tpu.strided_load %arg22[%c5_582, %c0_583] {strides = array<i32: 2, 1>} : memref<22x16xf32, #tpu.memory_space<vmem>>, vector<1x16xf32>
    %564 = arith.maximumf %560, %561 : vector<1x16xf32>
    %565 = arith.maximumf %562, %563 : vector<1x16xf32>
    %566 = arith.maximumf %564, %565 : vector<1x16xf32>
    %c0_584 = arith.constant 0 : index
    %c0_585 = arith.constant 0 : index
    %c0_586 = arith.constant 0 : index
    %567 = vector.load %arg14[%c0_584, %c0_585, %c0_586] : memref<2x1x16xf32, #tpu.memory_space<vmem>>, vector<1x1x16xf32>
    %568 = vector.shape_cast %567 : vector<1x1x16xf32> to vector<1x16xf32>
    %569 = vector.shape_cast %566 : vector<1x16xf32> to vector<1x1x16xf32>
    tpu.vector_store %arg14[%c0_584, %c0_585, %c0_586], %569 {strides = array<i32>} : memref<2x1x16xf32, #tpu.memory_space<vmem>>, vector<1x1x16xf32>,
    %c16_587 = arith.constant 16 : index
    %c0_588 = arith.constant 0 : index
    %570 = tpu.strided_load %arg22[%c16_587, %c0_588] {strides = array<i32: 2, 1>} : memref<22x16xf32, #tpu.memory_space<vmem>>, vector<1x16xf32>
    %c17 = arith.constant 17 : index
    %c0_589 = arith.constant 0 : index
    %571 = tpu.strided_load %arg22[%c17, %c0_589] {strides = array<i32: 2, 1>} : memref<22x16xf32, #tpu.memory_space<vmem>>, vector<1x16xf32>
    %c20_590 = arith.constant 20 : index
    %c0_591 = arith.constant 0 : index
    %572 = tpu.strided_load %arg22[%c20_590, %c0_591] {strides = array<i32: 2, 1>} : memref<22x16xf32, #tpu.memory_space<vmem>>, vector<1x16xf32>
    %c21_592 = arith.constant 21 : index
    %c0_593 = arith.constant 0 : index
    %573 = tpu.strided_load %arg22[%c21_592, %c0_593] {strides = array<i32: 2, 1>} : memref<22x16xf32, #tpu.memory_space<vmem>>, vector<1x16xf32>
    %574 = arith.maximumf %570, %571 : vector<1x16xf32>
    %575 = arith.maximumf %572, %573 : vector<1x16xf32>
    %576 = arith.maximumf %574, %575 : vector<1x16xf32>
    %c1_594 = arith.constant 1 : index
    %c0_595 = arith.constant 0 : index
    %c0_596 = arith.constant 0 : index
    %577 = vector.load %arg14[%c1_594, %c0_595, %c0_596] : memref<2x1x16xf32, #tpu.memory_space<vmem>>, vector<1x1x16xf32>
    %578 = vector.shape_cast %577 : vector<1x1x16xf32> to vector<1x16xf32>
    %579 = vector.shape_cast %576 : vector<1x16xf32> to vector<1x1x16xf32>
    tpu.vector_store %arg14[%c1_594, %c0_595, %c0_596], %579 {strides = array<i32>} : memref<2x1x16xf32, #tpu.memory_space<vmem>>, vector<1x1x16xf32>,
    return
  }
  func.func @transform_0(%arg0: i32) -> (i32, i32, i32) {
    %c0_i32 = arith.constant 0 : i32
    %c0_i32_0 = arith.constant 0 : i32
    %c0_i32_1 = arith.constant 0 : i32
    return %arg0, %c0_i32, %c0_i32_0 : i32, i32, i32
  }
  func.func @transform_1(%arg0: i32) -> (i32, i32, i32) {
    %c0_i32 = arith.constant 0 : i32
    %c0_i32_0 = arith.constant 0 : i32
    %c0_i32_1 = arith.constant 0 : i32
    %c0_i32_2 = arith.constant 0 : i32
    return %c0_i32, %c0_i32_0, %c0_i32_1 : i32, i32, i32
  }
  func.func @transform_2(%arg0: i32) -> (i32, i32, i32) {
    %c0_i32 = arith.constant 0 : i32
    %c0_i32_0 = arith.constant 0 : i32
    %c0_i32_1 = arith.constant 0 : i32
    %c0_i32_2 = arith.constant 0 : i32
    return %c0_i32, %c0_i32_0, %c0_i32_1 : i32, i32, i32
  }
  func.func @transform_3(%arg0: i32) -> (i32, i32, i32) {
    %c0_i32 = arith.constant 0 : i32
    %c0_i32_0 = arith.constant 0 : i32
    %c0_i32_1 = arith.constant 0 : i32
    %c0_i32_2 = arith.constant 0 : i32
    return %c0_i32, %c0_i32_0, %c0_i32_1 : i32, i32, i32
  }
  func.func @transform_4(%arg0: i32) -> (i32, i32, i32) {
    %c0_i32 = arith.constant 0 : i32
    %c0_i32_0 = arith.constant 0 : i32
    %c0_i32_1 = arith.constant 0 : i32
    %c0_i32_2 = arith.constant 0 : i32
    return %c0_i32, %c0_i32_0, %c0_i32_1 : i32, i32, i32
  }
  func.func @transform_5(%arg0: i32) -> (i32, i32) {
    %c0_i32 = arith.constant 0 : i32
    %c0_i32_0 = arith.constant 0 : i32
    %c0_i32_1 = arith.constant 0 : i32
    return %c0_i32, %c0_i32_0 : i32, i32
  }
  func.func @transform_6(%arg0: i32) -> (i32, i32) {
    %c0_i32 = arith.constant 0 : i32
    %c0_i32_0 = arith.constant 0 : i32
    %c0_i32_1 = arith.constant 0 : i32
    return %c0_i32, %c0_i32_0 : i32, i32
  }
  func.func @transform_7(%arg0: i32) -> (i32, i32) {
    %c0_i32 = arith.constant 0 : i32
    %c0_i32_0 = arith.constant 0 : i32
    %c0_i32_1 = arith.constant 0 : i32
    return %c0_i32, %c0_i32_0 : i32, i32
  }
  func.func @transform_8(%arg0: i32) -> (i32, i32) {
    %c0_i32 = arith.constant 0 : i32
    %c0_i32_0 = arith.constant 0 : i32
    %c0_i32_1 = arith.constant 0 : i32
    return %c0_i32, %c0_i32_0 : i32, i32
  }
  func.func @transform_9(%arg0: i32) -> (i32, i32) {
    %c0_i32 = arith.constant 0 : i32
    %c0_i32_0 = arith.constant 0 : i32
    %c0_i32_1 = arith.constant 0 : i32
    return %c0_i32, %c0_i32_0 : i32, i32
  }
  func.func @transform_10(%arg0: i32) -> (i32, i32) {
    %c0_i32 = arith.constant 0 : i32
    %c0_i32_0 = arith.constant 0 : i32
    %c0_i32_1 = arith.constant 0 : i32
    return %c0_i32, %c0_i32_0 : i32, i32
  }
  func.func @transform_11(%arg0: i32) -> (i32, i32) {
    %c0_i32 = arith.constant 0 : i32
    %c0_i32_0 = arith.constant 0 : i32
    %c0_i32_1 = arith.constant 0 : i32
    return %c0_i32, %c0_i32_0 : i32, i32
  }
  func.func @transform_12(%arg0: i32) -> (i32, i32) {
    %c0_i32 = arith.constant 0 : i32
    %c0_i32_0 = arith.constant 0 : i32
    %c0_i32_1 = arith.constant 0 : i32
    return %c0_i32, %c0_i32_0 : i32, i32
  }
  func.func @transform_13(%arg0: i32) -> (i32, i32, i32) {
    %c0_i32 = arith.constant 0 : i32
    %c0_i32_0 = arith.constant 0 : i32
    %c0_i32_1 = arith.constant 0 : i32
    return %arg0, %c0_i32, %c0_i32_0 : i32, i32, i32
  }
}

</mosaic_0001>

<bundles_post_ra>
// kernel: encoder_forward_pallas.1
= control target key start
LH: loop header
LB: loop body
LE: loop exit
PB: predicated region body
PF: predicated region fallthrough
CT: control target
= control target key end

     0   :  { %vm644_vm0 = vcmask 1043456   ;;  %vm45_vm1 = vcmask 31744   ;;  %v20417_v1 = vmov 0.0   ;;  %vm20418_vm2 = vmmov 0   ;;  %s25102_s0 = inlined_call_operand.vmem [shape: f32[2,256,4], index: 0, kind: input, shape index: {}]   ;;  %s25103_s1 = inlined_call_operand.vmem [shape: f32[9,4,8], index: 1, kind: input, shape index: {}]   ;;  %s25104_s2 = inlined_call_operand.vmem [shape: f32[9,8,8], index: 2, kind: input, shape index: {}]   ;;  %s25105_s3 = inlined_call_operand.vmem [shape: f32[9,8,16], index: 3, kind: input, shape index: {}]   ;;  %s25106_s4 = inlined_call_operand.vmem [shape: f32[9,16,16], index: 4, kind: input, shape index: {}]   ;;  %s25107_s5 = inlined_call_operand.vmem [shape: f32[1,8], index: 5, kind: input, shape index: {}]   ;;  %s25108_s6 = inlined_call_operand.vmem [shape: f32[1,8], index: 6, kind: input, shape index: {}]   ;;  %s25109_s7 = inlined_call_operand.vmem [shape: f32[1,16], index: 7, kind: input, shape index: {}]   ;;  %s25110_s8 = inlined_call_operand.vmem [shape: f32[1,16], index: 8, kind: input, shape index: {}]   ;;  %s25111_s9 = inlined_call_operand.vmem [shape: f32[1,8], index: 9, kind: input, shape index: {}]   ;;  %s25112_s10 = inlined_call_operand.vmem [shape: f32[1,8], index: 10, kind: input, shape index: {}]   ;;  %s25113_s11 = inlined_call_operand.vmem [shape: f32[1,16], index: 11, kind: input, shape index: {}]   ;;  %s25114_s12 = inlined_call_operand.vmem [shape: f32[1,16], index: 12, kind: input, shape index: {}]   ;;  %s25115_s13 = inlined_call_operand.hbm [shape: f32[2,1,16], index: 13, kind: output, shape index: {}]  }
   0x1   :  { %v20496_v0 = vld [vmem:[%s25103_s1 + $0x8] sm:$0xf]  ;;  %16207 = vmatprep.subr.mxu0 %v20417_v1  ;;  %16209 = vmatprep.mubr.msk.f32.mxu0 %vm20418_vm2, %v20417_v1  ;;  %46 = vst.msk [vmem:[#allocation2] sm:$0xff] %vm45_vm1, %v20417_v1  ;;  %47 = vst.msk [vmem:[#allocation2 + $0x8] sm:$0xff] %vm45_vm1, %v20417_v1  ;;  %v127_v2 = vld [vmem:[%s25102_s0] sm:$0xff] }
   0x2   :  { %48 = vst.msk [vmem:[#allocation2 + $0x10] sm:$0xff] %vm45_vm1, %v20417_v1  ;;  %49 = vst.msk [vmem:[#allocation2 + $0x18] sm:$0xff] %vm45_vm1, %v20417_v1  ;;  %v128_v3 = vld [vmem:[%s25102_s0 + $0x8] sm:$0xff]  ;;  %16208 = vmatpush3.msk.msra.mxu0 %vm644_vm0, %v20496_v0  ;;  %v131_v4 = vld [vmem:[%s25102_s0 + $0x10] sm:$0xff]  ;;  %15741 = vmatprep.subr.mxu1 %v20417_v1 }
   0x3   :  { %50 = vst.msk [vmem:[#allocation2 + $0x20] sm:$0xff] %vm45_vm1, %v20417_v1  ;;  %51 = vst.msk [vmem:[#allocation2 + $0x28] sm:$0xff] %vm45_vm1, %v20417_v1  ;;  %v132_v5 = vld [vmem:[%s25102_s0 + $0x18] sm:$0xff]  ;;  %v135_v6 = vld [vmem:[%s25102_s0 + $0x20] sm:$0xff]  ;;  %16440 = vmatprep.subr.mxu0 %v20417_v1  ;;  %15743 = vmatprep.mubr.msk.f32.mxu1 %vm20418_vm2, %v20417_v1 }
   0x4   :  { %52 = vst.msk [vmem:[#allocation2 + $0x30] sm:$0xff] %vm45_vm1, %v20417_v1  ;;  %53 = vst.msk [vmem:[#allocation2 + $0x38] sm:$0xff] %vm45_vm1, %v20417_v1  ;;  %v136_v7 = vld [vmem:[%s25102_s0 + $0x28] sm:$0xff]  ;;  %v139_v8 = vld [vmem:[%s25102_s0 + $0x30] sm:$0xff] }
   0x5   :  { %54 = vst.msk [vmem:[#allocation2 + $0x40] sm:$0xff] %vm45_vm1, %v20417_v1  ;;  %55 = vst.msk [vmem:[#allocation2 + $0x48] sm:$0xff] %vm45_vm1, %v20417_v1  ;;  %v140_v9 = vld [vmem:[%s25102_s0 + $0x38] sm:$0xff]  ;;  %v143_v10 = vld [vmem:[%s25102_s0 + $0x40] sm:$0xff] }
   0x6   :  { %56 = vst.msk [vmem:[#allocation2 + $0x50] sm:$0xff] %vm45_vm1, %v20417_v1  ;;  %57 = vst.msk [vmem:[#allocation2 + $0x58] sm:$0xff] %vm45_vm1, %v20417_v1  ;;  %v144_v11 = vld [vmem:[%s25102_s0 + $0x48] sm:$0xff]  ;;  %v147_v12 = vld [vmem:[%s25102_s0 + $0x50] sm:$0xff] }
   0x7   :  { %58 = vst.msk [vmem:[#allocation2 + $0x60] sm:$0xff] %vm45_vm1, %v20417_v1  ;;  %59 = vst.msk [vmem:[#allocation2 + $0x68] sm:$0xff] %vm45_vm1, %v20417_v1  ;;  %v148_v13 = vld [vmem:[%s25102_s0 + $0x58] sm:$0xff]  ;;  %v151_v14 = vld [vmem:[%s25102_s0 + $0x60] sm:$0xff] }
   0x8   :  { %60 = vst.msk [vmem:[#allocation2 + $0x70] sm:$0xff] %vm45_vm1, %v20417_v1  ;;  %61 = vst.msk [vmem:[#allocation2 + $0x78] sm:$0xff] %vm45_vm1, %v20417_v1  ;;  %v152_v15 = vld [vmem:[%s25102_s0 + $0x68] sm:$0xff]  ;;  %v155_v16 = vld [vmem:[%s25102_s0 + $0x70] sm:$0xff] }
   0x9   :  { %62 = vst.msk [vmem:[#allocation2 + $0x80] sm:$0xff] %vm45_vm1, %v20417_v1  ;;  %63 = vst.msk [vmem:[#allocation2 + $0x88] sm:$0xff] %vm45_vm1, %v20417_v1  ;;  %v156_v17 = vld [vmem:[%s25102_s0 + $0x78] sm:$0xff]  ;;  %v13877_v18 = vld [vmem:[%s25103_s1 + $0xc] sm:$0xf] }
   0xa   :  { %64 = vst.msk [vmem:[#allocation2 + $0x90] sm:$0xff] %vm45_vm1, %v20417_v1  ;;  %65 = vst.msk [vmem:[#allocation2 + $0x98] sm:$0xff] %vm45_vm1, %v20417_v1 }
   0xb   :  { %66 = vst.msk [vmem:[#allocation2 + $0xa0] sm:$0xff] %vm45_vm1, %v20417_v1  ;;  %67 = vst.msk [vmem:[#allocation2 + $0xa8] sm:$0xff] %vm45_vm1, %v20417_v1 }
   0xc   :  { %68 = vst.msk [vmem:[#allocation2 + $0xb0] sm:$0xff] %vm45_vm1, %v20417_v1  ;;  %69 = vst.msk [vmem:[#allocation2 + $0xb8] sm:$0xff] %vm45_vm1, %v20417_v1 }
   0xd   :  { %70 = vst.msk [vmem:[#allocation2 + $0xc0] sm:$0xff] %vm45_vm1, %v20417_v1  ;;  %71 = vst.msk [vmem:[#allocation2 + $0xc8] sm:$0xff] %vm45_vm1, %v20417_v1 }
   0xe   :  { %72 = vst.msk [vmem:[#allocation2 + $0xd0] sm:$0xff] %vm45_vm1, %v20417_v1  ;;  %73 = vst.msk [vmem:[#allocation2 + $0xd8] sm:$0xff] %vm45_vm1, %v20417_v1 }
   0xf   :  { %74 = vst.msk [vmem:[#allocation2 + $0xe0] sm:$0xff] %vm45_vm1, %v20417_v1  ;;  %75 = vst.msk [vmem:[#allocation2 + $0xe8] sm:$0xff] %vm45_vm1, %v20417_v1 }
  0x10   :  { %76 = vst.msk [vmem:[#allocation2 + $0xf0] sm:$0xff] %vm45_vm1, %v20417_v1  ;;  %77 = vst.msk [vmem:[#allocation2 + $0xf8] sm:$0xff] %vm45_vm1, %v20417_v1 }
  0x11   :  { %78 = vst.msk [vmem:[#allocation2 + $0x100] sm:$0xff] %vm45_vm1, %v20417_v1  ;;  %79 = vst.msk [vmem:[#allocation2 + $0x108] sm:$0xff] %vm45_vm1, %v20417_v1 }
  0x12   :  { %80 = vst.msk [vmem:[#allocation2 + $0x110] sm:$0xff] %vm45_vm1, %v20417_v1  ;;  %81 = vst.msk [vmem:[#allocation2 + $0x118] sm:$0xff] %vm45_vm1, %v20417_v1 }
  0x13   :  { %82 = vst.msk [vmem:[#allocation2 + $0x120] sm:$0xff] %vm45_vm1, %v20417_v1  ;;  %83 = vst.msk [vmem:[#allocation2 + $0x128] sm:$0xff] %vm45_vm1, %v20417_v1 }
  0x14   :  { %84 = vst.msk [vmem:[#allocation2 + $0x130] sm:$0xff] %vm45_vm1, %v20417_v1  ;;  %85 = vst.msk [vmem:[#allocation2 + $0x138] sm:$0xff] %vm45_vm1, %v20417_v1 }
  0x15   :  { %86 = vst.msk [vmem:[#allocation2 + $0x140] sm:$0xff] %vm45_vm1, %v20417_v1  ;;  %87 = vst.msk [vmem:[#allocation2 + $0x148] sm:$0xff] %vm45_vm1, %v20417_v1 }
  0x16   :  { %88 = vst.msk [vmem:[#allocation2 + $0x150] sm:$0xff] %vm45_vm1, %v20417_v1  ;;  %89 = vst.msk [vmem:[#allocation2 + $0x158] sm:$0xff] %vm45_vm1, %v20417_v1 }
  0x17   :  { %90 = vst.msk [vmem:[#allocation2 + $0x160] sm:$0xff] %vm45_vm1, %v20417_v1  ;;  %91 = vst.msk [vmem:[#allocation2 + $0x168] sm:$0xff] %vm45_vm1, %v20417_v1 }
  0x18   :  { %92 = vst.msk [vmem:[#allocation2 + $0x170] sm:$0xff] %vm45_vm1, %v20417_v1  ;;  %93 = vst.msk [vmem:[#allocation2 + $0x178] sm:$0xff] %vm45_vm1, %v20417_v1 }
  0x19   :  { %94 = vst.msk [vmem:[#allocation2 + $0x180] sm:$0xff] %vm45_vm1, %v20417_v1  ;;  %95 = vst.msk [vmem:[#allocation2 + $0x188] sm:$0xff] %vm45_vm1, %v20417_v1 }
  0x1a   :  { %96 = vst.msk [vmem:[#allocation2 + $0x190] sm:$0xff] %vm45_vm1, %v20417_v1  ;;  %97 = vst.msk [vmem:[#allocation2 + $0x198] sm:$0xff] %vm45_vm1, %v20417_v1 }
  0x1b   :  { %98 = vst.msk [vmem:[#allocation2 + $0x1a0] sm:$0xff] %vm45_vm1, %v20417_v1  ;;  %99 = vst.msk [vmem:[#allocation2 + $0x1a8] sm:$0xff] %vm45_vm1, %v20417_v1 }
  0x1c   :  { %100 = vst.msk [vmem:[#allocation2 + $0x1b0] sm:$0xff] %vm45_vm1, %v20417_v1  ;;  %101 = vst.msk [vmem:[#allocation2 + $0x1b8] sm:$0xff] %vm45_vm1, %v20417_v1 }
  0x1d   :  { %102 = vst.msk [vmem:[#allocation2 + $0x1c0] sm:$0xff] %vm45_vm1, %v20417_v1  ;;  %103 = vst.msk [vmem:[#allocation2 + $0x1c8] sm:$0xff] %vm45_vm1, %v20417_v1 }
  0x1e   :  { %104 = vst.msk [vmem:[#allocation2 + $0x1d0] sm:$0xff] %vm45_vm1, %v20417_v1  ;;  %105 = vst.msk [vmem:[#allocation2 + $0x1d8] sm:$0xff] %vm45_vm1, %v20417_v1 }
  0x1f   :  { %106 = vst.msk [vmem:[#allocation2 + $0x1e0] sm:$0xff] %vm45_vm1, %v20417_v1  ;;  %107 = vst.msk [vmem:[#allocation2 + $0x1e8] sm:$0xff] %vm45_vm1, %v20417_v1 }
  0x20   :  { %108 = vst.msk [vmem:[#allocation2 + $0x1f0] sm:$0xff] %vm45_vm1, %v20417_v1  ;;  %109 = vst.msk [vmem:[#allocation2 + $0x1f8] sm:$0xff] %vm45_vm1, %v20417_v1 }
  0x21   :  { %110 = vst.msk [vmem:[#allocation2 + $0x200] sm:$0xff] %vm45_vm1, %v20417_v1  ;;  %111 = vst.msk [vmem:[#allocation2 + $0x208] sm:$0xff] %vm45_vm1, %v20417_v1 }
  0x22   :  { %112 = vst.msk [vmem:[#allocation2 + $0x210] sm:$0xff] %vm45_vm1, %v20417_v1  ;;  %113 = vst.msk [vmem:[#allocation2 + $0x218] sm:$0xff] %vm45_vm1, %v20417_v1 }
  0x23   :  { %114 = vst.msk [vmem:[#allocation2 + $0x220] sm:$0xff] %vm45_vm1, %v20417_v1  ;;  %115 = vst.msk [vmem:[#allocation2 + $0x228] sm:$0xff] %vm45_vm1, %v20417_v1 }
  0x24   :  { %116 = vst.msk [vmem:[#allocation2 + $0x230] sm:$0xff] %vm45_vm1, %v20417_v1  ;;  %117 = vst.msk [vmem:[#allocation2 + $0x238] sm:$0xff] %vm45_vm1, %v20417_v1 }
  0x25   :  { %118 = vst.msk [vmem:[#allocation2 + $0x240] sm:$0xff] %vm45_vm1, %v20417_v1  ;;  %119 = vst.msk [vmem:[#allocation2 + $0x248] sm:$0xff] %vm45_vm1, %v20417_v1 }
  0x26   :  { %120 = vst.msk [vmem:[#allocation2 + $0x250] sm:$0xff] %vm45_vm1, %v20417_v1  ;;  %121 = vst.msk [vmem:[#allocation2 + $0x258] sm:$0xff] %vm45_vm1, %v20417_v1 }
  0x27   :  { %122 = vst.msk [vmem:[#allocation2 + $0x260] sm:$0xff] %vm45_vm1, %v20417_v1  ;;  %123 = vst.msk [vmem:[#allocation2 + $0x268] sm:$0xff] %vm45_vm1, %v20417_v1 }
  0x28   :  { %124 = vst.msk [vmem:[#allocation2 + $0x270] sm:$0xff] %vm45_vm1, %v20417_v1  ;;  %125 = vst.msk [vmem:[#allocation2 + $0x278] sm:$0xff] %vm45_vm1, %v20417_v1 }
  0x29   :  { %126 = vst.msk [vmem:[#allocation2 + $0x280] sm:$0xff] %vm45_vm1, %v20417_v1  ;;  %129 = vst.msk [vmem:[#allocation2 + $0x13] sm:$0xff] %vm45_vm1, %v127_v2 }
  0x2a   :  { %130 = vst.msk [vmem:[#allocation2 + $0x1b] sm:$0xff] %vm45_vm1, %v128_v3  ;;  %133 = vst.msk [vmem:[#allocation2 + $0x25] sm:$0xff] %vm45_vm1, %v131_v4 }
  0x2b   :  { %134 = vst.msk [vmem:[#allocation2 + $0x2d] sm:$0xff] %vm45_vm1, %v132_v5  ;;  %137 = vst.msk [vmem:[#allocation2 + $0x37] sm:$0xff] %vm45_vm1, %v135_v6 }
  0x2c   :  { %138 = vst.msk [vmem:[#allocation2 + $0x3f] sm:$0xff] %vm45_vm1, %v136_v7  ;;  %141 = vst.msk [vmem:[#allocation2 + $0x49] sm:$0xff] %vm45_vm1, %v139_v8 }
  0x2d   :  { %142 = vst.msk [vmem:[#allocation2 + $0x51] sm:$0xff] %vm45_vm1, %v140_v9  ;;  %145 = vst.msk [vmem:[#allocation2 + $0x5b] sm:$0xff] %vm45_vm1, %v143_v10 }
  0x2e   :  { %146 = vst.msk [vmem:[#allocation2 + $0x63] sm:$0xff] %vm45_vm1, %v144_v11  ;;  %149 = vst.msk [vmem:[#allocation2 + $0x6d] sm:$0xff] %vm45_vm1, %v147_v12 }
  0x2f   :  { %150 = vst.msk [vmem:[#allocation2 + $0x75] sm:$0xff] %vm45_vm1, %v148_v13  ;;  %153 = vst.msk [vmem:[#allocation2 + $0x7f] sm:$0xff] %vm45_vm1, %v151_v14 }
  0x30   :  { %154 = vst.msk [vmem:[#allocation2 + $0x87] sm:$0xff] %vm45_vm1, %v152_v15  ;;  %157 = vst.msk [vmem:[#allocation2 + $0x91] sm:$0xff] %vm45_vm1, %v155_v16 }
  0x31   :  { %158 = vst.msk [vmem:[#allocation2 + $0x99] sm:$0xff] %vm45_vm1, %v156_v17 }
  0x32   :  { %18 = vsyncpa [#allocation11], 0  ;;  %v1782_v19 = vld [vmem:[#allocation2 + $0x2] sm:$0xff]  ;;  %v1783_v20 = vld [vmem:[#allocation2 + $0xa] sm:$0xff]  ;;  %vm8061_vm3 = vcmask 64512  }
  0x33   :  { %16210 = vmatmul.mubr.msk.f32.vlgmr.msra.gmra.mrb[0].mxu0 %vm45_vm1, %v1782_v19  ;;  %v20744_v21 = vld [vmem:[#allocation2 + $0x12] sm:$0xff]  ;;  %v20750_v22 = vld [vmem:[#allocation2 + $0x1a] sm:$0xff]  ;;  %v20756_v23 = vld [vmem:[#allocation2 + $0x22] sm:$0xff]  ;;  %8140 = vst.msk [vmem:[#allocation3] sm:$0xff] %vm8061_vm3, %v20417_v1 }
  0x34   :  { %16441 = vmatpush3.msk.msra.mxu0 %vm644_vm0, %v13877_v18  ;;  %16212 = vmatprep.mubr.msk.f32.mxu0 %vm20418_vm2, %v20417_v1  ;;  %v159_v24 = vld [vmem:[%s25102_s0 + $0x80] sm:$0xff]  ;;  %v20766_v25 = vld [vmem:[#allocation2 + $0x2a] sm:$0xff]  ;;  %v20776_v27 = vld [vmem:[#allocation2 + $0x32] sm:$0xff]  ;;  %8141 = vst.msk [vmem:[#allocation3 + $0x8] sm:$0xff] %vm8061_vm3, %v20417_v1 }
  0x35   :  { %16673 = vmatprep.subr.mxu0 %v20417_v1  ;;  %161 = vst.msk [vmem:[#allocation2 + $0xa3] sm:$0xff] %vm45_vm1, %v159_v24  ;;  %v160_v26 = vld [vmem:[%s25102_s0 + $0x88] sm:$0xff]  ;;  %v163_v28 = vld [vmem:[%s25102_s0 + $0x90] sm:$0xff]  ;;  %v20786_v29 = vld [vmem:[#allocation2 + $0x3a] sm:$0xff] }
  0x36   :  { %162 = vst.msk [vmem:[#allocation2 + $0xab] sm:$0xff] %vm45_vm1, %v160_v26  ;;  %165 = vst.msk [vmem:[#allocation2 + $0xb5] sm:$0xff] %vm45_vm1, %v163_v28  ;;  %v164_v30 = vld [vmem:[%s25102_s0 + $0x98] sm:$0xff]  ;;  %v20796_v31 = vld [vmem:[#allocation2 + $0x42] sm:$0xff] }
  0x37   :  { %16213 = vmatmul.mubr.msk.f32.gmra.mrb[2].mxu0 %vm45_vm1, %v1783_v20  ;;  %166 = vst.msk [vmem:[#allocation2 + $0xbd] sm:$0xff] %vm45_vm1, %v164_v30  ;;  %v167_v32 = vld [vmem:[%s25102_s0 + $0xa0] sm:$0xff]  ;;  %v20806_v33 = vld [vmem:[#allocation2 + $0x4a] sm:$0xff]  ;;  %v20816_v35 = vld [vmem:[#allocation2 + $0x52] sm:$0xff] }
  0x38   :  { %16215 = vmatprep.mubr.msk.f32.mxu0 %vm20418_vm2, %v20417_v1  ;;  %169 = vst.msk [vmem:[#allocation2 + $0xc7] sm:$0xff] %vm45_vm1, %v167_v32  ;;  %v168_v34 = vld [vmem:[%s25102_s0 + $0xa8] sm:$0xff]  ;;  %v171_v36 = vld [vmem:[%s25102_s0 + $0xb0] sm:$0xff]  ;;  %v20826_v37 = vld [vmem:[#allocation2 + $0x5a] sm:$0xff] }
  0x39   :  { %170 = vst.msk [vmem:[#allocation2 + $0xcf] sm:$0xff] %vm45_vm1, %v168_v34  ;;  %173 = vst.msk [vmem:[#allocation2 + $0xd9] sm:$0xff] %vm45_vm1, %v171_v36  ;;  %v172_v38 = vld [vmem:[%s25102_s0 + $0xb8] sm:$0xff]  ;;  %v20836_v39 = vld [vmem:[#allocation2 + $0x62] sm:$0xff] }
  0x3a   :  { %174 = vst.msk [vmem:[#allocation2 + $0xe1] sm:$0xff] %vm45_vm1, %v172_v38  ;;  %v20842_v40 = vld [vmem:[#allocation2 + $0x6a] sm:$0xff]  ;;  %v175_v41 = vld [vmem:[%s25102_s0 + $0xc0] sm:$0xff]  ;;  %v20852_v42 = vld [vmem:[#allocation2 + $0x72] sm:$0xff] }
  0x3b   :  { %16216 = vmatmul.mubr.msk.f32.gmra.mrb[4].mxu0 %vm45_vm1, %v20744_v21  ;;  %177 = vst.msk [vmem:[#allocation2 + $0xeb] sm:$0xff] %vm45_vm1, %v175_v41  ;;  %v176_v43 = vld [vmem:[%s25102_s0 + $0xc8] sm:$0xff]  ;;  %v20862_v44 = vld [vmem:[#allocation2 + $0x7a] sm:$0xff]  ;;  %v179_v45 = vld [vmem:[%s25102_s0 + $0xd0] sm:$0xff] }
  0x3c   :  { %16218 = vmatprep.mubr.msk.f32.mxu0 %vm20418_vm2, %v20417_v1  ;;  %178 = vst.msk [vmem:[#allocation2 + $0xf3] sm:$0xff] %vm45_vm1, %v176_v43  ;;  %181 = vst.msk [vmem:[#allocation2 + $0xfd] sm:$0xff] %vm45_vm1, %v179_v45  ;;  %v20872_v46 = vld [vmem:[#allocation2 + $0x82] sm:$0xff]  ;;  %v180_v47 = vld [vmem:[%s25102_s0 + $0xd8] sm:$0xff] }
  0x3d   :  { %182 = vst.msk [vmem:[#allocation2 + $0x105] sm:$0xff] %vm45_vm1, %v180_v47  ;;  %v20882_v48 = vld [vmem:[#allocation2 + $0x8a] sm:$0xff]  ;;  %v183_v49 = vld [vmem:[%s25102_s0 + $0xe0] sm:$0xff]  ;;  %v20892_v50 = vld [vmem:[#allocation2 + $0x92] sm:$0xff] }
  0x3e   :  { %185 = vst.msk [vmem:[#allocation2 + $0x10f] sm:$0xff] %vm45_vm1, %v183_v49  ;;  %v184_v51 = vld [vmem:[%s25102_s0 + $0xe8] sm:$0xff]  ;;  %v20902_v52 = vld [vmem:[#allocation2 + $0x9a] sm:$0xff]  ;;  %v187_v53 = vld [vmem:[%s25102_s0 + $0xf0] sm:$0xff] }
  0x3f   :  { %16219 = vmatmul.mubr.msk.f32.gmra.mrb[6].mxu0 %vm45_vm1, %v20750_v22  ;;  %186 = vst.msk [vmem:[#allocation2 + $0x117] sm:$0xff] %vm45_vm1, %v184_v51  ;;  %189 = vst.msk [vmem:[#allocation2 + $0x121] sm:$0xff] %vm45_vm1, %v187_v53  ;;  %v13956_v54 = vld [vmem:[%s25103_s1 + $0x10] sm:$0xf]  ;;  %v188_v55 = vld [vmem:[%s25102_s0 + $0xf8] sm:$0xff] }
  0x40   :  { %16221 = vmatprep.mubr.msk.f32.mxu0 %vm20418_vm2, %v20417_v1  ;;  %190 = vst.msk [vmem:[#allocation2 + $0x129] sm:$0xff] %vm45_vm1, %v188_v55  ;;  %v13609_v56 = vld [vmem:[%s25102_s0 + $0x100] sm:$0xff]  ;;  %v13610_v57 = vld [vmem:[%s25102_s0 + $0x108] sm:$0xff]  ;;  %v13611_v58 = vld [vmem:[%s25102_s0 + $0x110] sm:$0xff] }
  0x41   :  { %194 = vst.msk [vmem:[#allocation2 + $0x157] sm:$0xff] %vm45_vm1, %v13609_v56  ;;  %195 = vst.msk [vmem:[#allocation2 + $0x15f] sm:$0xff] %vm45_vm1, %v13610_v57  ;;  %v13612_v59 = vld [vmem:[%s25102_s0 + $0x118] sm:$0xff]  ;;  %v13613_v60 = vld [vmem:[%s25102_s0 + $0x120] sm:$0xff] }
  0x42   :  { %198 = vst.msk [vmem:[#allocation2 + $0x169] sm:$0xff] %vm45_vm1, %v13611_v58  ;;  %199 = vst.msk [vmem:[#allocation2 + $0x171] sm:$0xff] %vm45_vm1, %v13612_v59  ;;  %v13614_v61 = vld [vmem:[%s25102_s0 + $0x128] sm:$0xff]  ;;  %v13615_v62 = vld [vmem:[%s25102_s0 + $0x130] sm:$0xff] }
  0x43   :  { %16222 = vmatmul.mubr.msk.f32.gmra.mrb[8].mxu0 %vm45_vm1, %v20756_v23  ;;  %202 = vst.msk [vmem:[#allocation2 + $0x17b] sm:$0xff] %vm45_vm1, %v13613_v60  ;;  %203 = vst.msk [vmem:[#allocation2 + $0x183] sm:$0xff] %vm45_vm1, %v13614_v61  ;;  %v13616_v63 = vld [vmem:[%s25102_s0 + $0x138] sm:$0xff]  ;;  %v13617_v0 = vld [vmem:[%s25102_s0 + $0x140] sm:$0xff] }
  0x44   :  { %16224 = vmatprep.mubr.msk.f32.mxu0 %vm20418_vm2, %v20417_v1  ;;  %206 = vst.msk [vmem:[#allocation2 + $0x18d] sm:$0xff] %vm45_vm1, %v13615_v62  ;;  %207 = vst.msk [vmem:[#allocation2 + $0x195] sm:$0xff] %vm45_vm1, %v13616_v63  ;;  %v13618_v2 = vld [vmem:[%s25102_s0 + $0x148] sm:$0xff]  ;;  %v13619_v3 = vld [vmem:[%s25102_s0 + $0x150] sm:$0xff] }
  0x45   :  { %210 = vst.msk [vmem:[#allocation2 + $0x19f] sm:$0xff] %vm45_vm1, %v13617_v0  ;;  %211 = vst.msk [vmem:[#allocation2 + $0x1a7] sm:$0xff] %vm45_vm1, %v13618_v2  ;;  %v2640_v4 = vld [vmem:[#allocation2 + $0xa2] sm:$0xff]  ;;  %v13620_v5 = vld [vmem:[%s25102_s0 + $0x158] sm:$0xff] }
  0x46   :  { %214 = vst.msk [vmem:[#allocation2 + $0x1b1] sm:$0xff] %vm45_vm1, %v13619_v3  ;;  %215 = vst.msk [vmem:[#allocation2 + $0x1b9] sm:$0xff] %vm45_vm1, %v13620_v5  ;;  %v2641_v6 = vld [vmem:[#allocation2 + $0xaa] sm:$0xff]  ;;  %v2642_v7 = vld [vmem:[#allocation2 + $0xb2] sm:$0xff] }
  0x47   :  { %16225 = vmatmul.mubr.msk.f32.gmra.mrb[10].mxu0 %vm45_vm1, %v20766_v25  ;;  %v13621_v8 = vld [vmem:[%s25102_s0 + $0x160] sm:$0xff]  ;;  %v13622_v10 = vld [vmem:[%s25102_s0 + $0x168] sm:$0xff]  ;;  %v13623_v12 = vld [vmem:[%s25102_s0 + $0x170] sm:$0xff]  ;;  %8142 = vst.msk [vmem:[#allocation3 + $0x10] sm:$0xff] %vm8061_vm3, %v20417_v1 }
  0x48   :  { %16227 = vmatprep.mubr.msk.f32.mxu0 %vm20418_vm2, %v20417_v1  ;;  %218 = vst.msk [vmem:[#allocation2 + $0x1c3] sm:$0xff] %vm45_vm1, %v13621_v8  ;;  %v2643_v9 = vld [vmem:[#allocation2 + $0xba] sm:$0xff]  ;;  %219 = vst.msk [vmem:[#allocation2 + $0x1cb] sm:$0xff] %vm45_vm1, %v13622_v10  ;;  %v2644_v11 = vld [vmem:[#allocation2 + $0xc2] sm:$0xff] }
  0x49   :  { %222 = vst.msk [vmem:[#allocation2 + $0x1d5] sm:$0xff] %vm45_vm1, %v13623_v12  ;;  %v2645_v13 = vld [vmem:[#allocation2 + $0xca] sm:$0xff]  ;;  %v13624_v14 = vld [vmem:[%s25102_s0 + $0x178] sm:$0xff]  ;;  %v13625_v16 = vld [vmem:[%s25102_s0 + $0x180] sm:$0xff] }
  0x4a   :  { %223 = vst.msk [vmem:[#allocation2 + $0x1dd] sm:$0xff] %vm45_vm1, %v13624_v14  ;;  %v2646_v15 = vld [vmem:[#allocation2 + $0xd2] sm:$0xff]  ;;  %226 = vst.msk [vmem:[#allocation2 + $0x1e7] sm:$0xff] %vm45_vm1, %v13625_v16  ;;  %v2647_v17 = vld [vmem:[#allocation2 + $0xda] sm:$0xff] }
  0x4b   :  { %16228 = vmatmul.mubr.msk.f32.gmra.mrb[12].mxu0 %vm45_vm1, %v20776_v27  ;;  %v13626_v18 = vld [vmem:[%s25102_s0 + $0x188] sm:$0xff]  ;;  %v13627_v20 = vld [vmem:[%s25102_s0 + $0x190] sm:$0xff]  ;;  %v2651_v24 = vld [vmem:[#allocation2 + $0xfa] sm:$0xff]  ;;  %8143 = vst.msk [vmem:[#allocation3 + $0x18] sm:$0xff] %vm8061_vm3, %v20417_v1 }
  0x4c   :  { %16230 = vmatprep.mubr.msk.f32.mxu0 %vm20418_vm2, %v20417_v1  ;;  %227 = vst.msk [vmem:[#allocation2 + $0x1ef] sm:$0xff] %vm45_vm1, %v13626_v18  ;;  %v2648_v19 = vld [vmem:[#allocation2 + $0xe2] sm:$0xff]  ;;  %230 = vst.msk [vmem:[#allocation2 + $0x1f9] sm:$0xff] %vm45_vm1, %v13627_v20  ;;  %v2653_v28 = vld [vmem:[#allocation2 + $0x10a] sm:$0xff] }
  0x4d   :  { %v2652_v26 = vld [vmem:[#allocation2 + $0x102] sm:$0xff]  ;;  %v2654_v30 = vld [vmem:[#allocation2 + $0x112] sm:$0xff]  ;;  %v2655_v32 = vld [vmem:[#allocation2 + $0x11a] sm:$0xff]  ;;  %8144 = vst.msk [vmem:[#allocation3 + $0x20] sm:$0xff] %vm8061_vm3, %v20417_v1 }
  0x4e   :  { %v2656_v34 = vld [vmem:[#allocation2 + $0x122] sm:$0xff]  ;;  %v2657_v36 = vld [vmem:[#allocation2 + $0x12a] sm:$0xff]  ;;  %v2658_v38 = vld [vmem:[#allocation2 + $0x132] sm:$0xff]  ;;  %8145 = vst.msk [vmem:[#allocation3 + $0x28] sm:$0xff] %vm8061_vm3, %v20417_v1 }
  0x4f   :  { %16231 = vmatmul.mubr.msk.f32.gmra.mrb[14].mxu0 %vm45_vm1, %v20786_v29  ;;  %v2660_v41 = vld [vmem:[#allocation2 + $0x142] sm:$0xff]  ;;  %v2661_v43 = vld [vmem:[#allocation2 + $0x14a] sm:$0xff]  ;;  %v2662_v45 = vld [vmem:[#allocation2 + $0x152] sm:$0xff]  ;;  %8146 = vst.msk [vmem:[#allocation3 + $0x30] sm:$0xff] %vm8061_vm3, %v20417_v1 }
  0x50   :  { %16233 = vmatprep.mubr.msk.f32.mxu0 %vm20418_vm2, %v20417_v1  ;;  %v2663_v47 = vld [vmem:[#allocation2 + $0x15a] sm:$0xff]  ;;  %v2664_v49 = vld [vmem:[#allocation2 + $0x162] sm:$0xff]  ;;  %v2666_v51 = vld [vmem:[#allocation2 + $0x172] sm:$0xff]  ;;  %8147 = vst.msk [vmem:[#allocation3 + $0x38] sm:$0xff] %vm8061_vm3, %v20417_v1 }
  0x51   :  { %v2668_v53 = vld [vmem:[#allocation2 + $0x182] sm:$0xff]  ;;  %v2670_v55 = vld [vmem:[#allocation2 + $0x192] sm:$0xff]  ;;  %v2671_v56 = vld [vmem:[#allocation2 + $0x19a] sm:$0xff]  ;;  %8148 = vst.msk [vmem:[#allocation3 + $0x40] sm:$0xff] %vm8061_vm3, %v20417_v1 }
  0x52   :  { %v2672_v57 = vld [vmem:[#allocation2 + $0x1a2] sm:$0xff]  ;;  %v2673_v58 = vld [vmem:[#allocation2 + $0x1aa] sm:$0xff]  ;;  %v2674_v59 = vld [vmem:[#allocation2 + $0x1b2] sm:$0xff]  ;;  %8149 = vst.msk [vmem:[#allocation3 + $0x48] sm:$0xff] %vm8061_vm3, %v20417_v1 }
  0x53   :  { %16234 = vmatmul.mubr.msk.f32.gmra.mrb[16].mxu0 %vm45_vm1, %v20796_v31  ;;  %v2675_v60 = vld [vmem:[#allocation2 + $0x1ba] sm:$0xff]  ;;  %v2676_v61 = vld [vmem:[#allocation2 + $0x1c2] sm:$0xff]  ;;  %v2677_v62 = vld [vmem:[#allocation2 + $0x1ca] sm:$0xff]  ;;  %8150 = vst.msk [vmem:[#allocation3 + $0x50] sm:$0xff] %vm8061_vm3, %v20417_v1 }
  0x54   :  { %16236 = vmatprep.mubr.msk.f32.mxu0 %vm20418_vm2, %v20417_v1  ;;  %v2678_v63 = vld [vmem:[#allocation2 + $0x1d2] sm:$0xff]  ;;  %v2679_v0 = vld [vmem:[#allocation2 + $0x1da] sm:$0xff]  ;;  %v2680_v2 = vld [vmem:[#allocation2 + $0x1e2] sm:$0xff]  ;;  %8151 = vst.msk [vmem:[#allocation3 + $0x58] sm:$0xff] %vm8061_vm3, %v20417_v1 }
  0x55   :  { %v2681_v3 = vld [vmem:[#allocation2 + $0x1ea] sm:$0xff]  ;;  %8152 = vst.msk [vmem:[#allocation3 + $0x60] sm:$0xff] %vm8061_vm3, %v20417_v1  ;;  %8153 = vst.msk [vmem:[#allocation3 + $0x68] sm:$0xff] %vm8061_vm3, %v20417_v1 }
  0x56   :  { %8154 = vst.msk [vmem:[#allocation3 + $0x70] sm:$0xff] %vm8061_vm3, %v20417_v1  ;;  %8155 = vst.msk [vmem:[#allocation3 + $0x78] sm:$0xff] %vm8061_vm3, %v20417_v1 }
  0x57   :  { %16237 = vmatmul.mubr.msk.f32.gmra.mrb[18].mxu0 %vm45_vm1, %v20806_v33  ;;  %8156 = vst.msk [vmem:[#allocation3 + $0x80] sm:$0xff] %vm8061_vm3, %v20417_v1  ;;  %8157 = vst.msk [vmem:[#allocation3 + $0x88] sm:$0xff] %vm8061_vm3, %v20417_v1 }
  0x58   :  { %16239 = vmatprep.mubr.msk.f32.mxu0 %vm20418_vm2, %v20417_v1  ;;  %8158 = vst.msk [vmem:[#allocation3 + $0x90] sm:$0xff] %vm8061_vm3, %v20417_v1  ;;  %8159 = vst.msk [vmem:[#allocation3 + $0x98] sm:$0xff] %vm8061_vm3, %v20417_v1 }
  0x59   :  { %8160 = vst.msk [vmem:[#allocation3 + $0xa0] sm:$0xff] %vm8061_vm3, %v20417_v1  ;;  %8161 = vst.msk [vmem:[#allocation3 + $0xa8] sm:$0xff] %vm8061_vm3, %v20417_v1 }
  0x5a   :  { %8162 = vst.msk [vmem:[#allocation3 + $0xb0] sm:$0xff] %vm8061_vm3, %v20417_v1  ;;  %8163 = vst.msk [vmem:[#allocation3 + $0xb8] sm:$0xff] %vm8061_vm3, %v20417_v1 }
  0x5b   :  { %16240 = vmatmul.mubr.msk.f32.gmra.mrb[20].mxu0 %vm45_vm1, %v20816_v35  ;;  %8164 = vst.msk [vmem:[#allocation3 + $0xc0] sm:$0xff] %vm8061_vm3, %v20417_v1  ;;  %11134 = vst.msk [vmem:[#allocation4] sm:$0xff] %vm8061_vm3, %v20417_v1 }
  0x5c   :  { %16242 = vmatprep.mubr.msk.f32.mxu0 %vm20418_vm2, %v20417_v1  ;;  %11135 = vst.msk [vmem:[#allocation4 + $0x8] sm:$0xff] %vm8061_vm3, %v20417_v1  ;;  %11136 = vst.msk [vmem:[#allocation4 + $0x10] sm:$0xff] %vm8061_vm3, %v20417_v1 }
  0x5d   :  { %11137 = vst.msk [vmem:[#allocation4 + $0x18] sm:$0xff] %vm8061_vm3, %v20417_v1  ;;  %11138 = vst.msk [vmem:[#allocation4 + $0x20] sm:$0xff] %vm8061_vm3, %v20417_v1 }
  0x5e   :  { %11139 = vst.msk [vmem:[#allocation4 + $0x28] sm:$0xff] %vm8061_vm3, %v20417_v1  ;;  %11140 = vst.msk [vmem:[#allocation4 + $0x30] sm:$0xff] %vm8061_vm3, %v20417_v1 }
  0x5f   :  { %16243 = vmatmul.mubr.msk.f32.gmra.mrb[22].mxu0 %vm45_vm1, %v20826_v37  ;;  %11141 = vst.msk [vmem:[#allocation4 + $0x38] sm:$0xff] %vm8061_vm3, %v20417_v1  ;;  %11142 = vst.msk [vmem:[#allocation4 + $0x40] sm:$0xff] %vm8061_vm3, %v20417_v1 }
  0x60   :  { %16245 = vmatprep.mubr.msk.f32.mxu0 %vm20418_vm2, %v20417_v1 }
  0x63   :  { %16246 = vmatmul.mubr.msk.f32.gmra.mrb[24].mxu0 %vm45_vm1, %v20836_v39 }
  0x64   :  { %16248 = vmatprep.mubr.msk.f32.mxu0 %vm20418_vm2, %v20417_v1 }
  0x67   :  { %16249 = vmatmul.mubr.msk.f32.gmra.mrb[26].mxu0 %vm45_vm1, %v20842_v40 }
  0x68   :  { %16251 = vmatprep.mubr.msk.f32.mxu0 %vm20418_vm2, %v20417_v1 }
  0x6b   :  { %16252 = vmatmul.mubr.msk.f32.gmra.mrb[28].mxu0 %vm45_vm1, %v20852_v42 }
  0x6c   :  { %16254 = vmatprep.mubr.msk.f32.mxu0 %vm20418_vm2, %v20417_v1 }
  0x6f   :  { %16255 = vmatmul.mubr.msk.f32.gmra.mrb[30].mxu0 %vm45_vm1, %v20862_v44 }
  0x70   :  { %16257 = vmatprep.mubr.msk.f32.mxu0 %vm20418_vm2, %v20417_v1 }
  0x73   :  { %16258 = vmatmul.mubr.msk.f32.gmra.mrb[32].mxu0 %vm45_vm1, %v20872_v46 }
  0x74   :  { %16260 = vmatprep.mubr.msk.f32.mxu0 %vm20418_vm2, %v20417_v1 }
  0x77   :  { %16261 = vmatmul.mubr.msk.f32.gmra.mrb[34].mxu0 %vm45_vm1, %v20882_v48 }
  0x78   :  { %16263 = vmatprep.mubr.msk.f32.mxu0 %vm20418_vm2, %v20417_v1 }
  0x7b   :  { %16264 = vmatmul.mubr.msk.f32.gmra.mrb[36].mxu0 %vm45_vm1, %v20892_v50 }
  0x7c   :  { %16266 = vmatprep.mubr.msk.f32.mxu0 %vm20418_vm2, %v20417_v1 }
  0x7f   :  { %16267 = vmatmul.mubr.msk.f32.gmra.mrb[38].mxu0 %vm45_vm1, %v20902_v52 }
  0x80   :  { %16442 = vmatprep.mubr.msk.f32.mxu0 %vm20418_vm2, %v20417_v1 }
  0x83   :  { %16443 = vmatmul.mubr.msk.f32.vlgmr.msra.gmra.mrb[0].mxu0 %vm45_vm1, %v20744_v21  ;;  %v2649_v21 = vld [vmem:[#allocation2 + $0xea] sm:$0xff] }
  0x84   :  { %16674 = vmatpush3.msk.msra.mxu0 %vm644_vm0, %v13956_v54  ;;  %16445 = vmatprep.mubr.msk.f32.mxu0 %vm20418_vm2, %v20417_v1  ;;  %v2669_v54 = vld [vmem:[#allocation2 + $0x18a] sm:$0xff] }
  0x85   :  { %16906 = vmatprep.subr.mxu0 %v20417_v1 }
  0x87   :  { %16446 = vmatmul.mubr.msk.f32.gmra.mrb[2].mxu0 %vm45_vm1, %v20750_v22  ;;  %v13628_v22 = vld [vmem:[%s25102_s0 + $0x198] sm:$0xff] }
  0x88   :  { %16448 = vmatprep.mubr.msk.f32.mxu0 %vm20418_vm2, %v20417_v1  ;;  %231 = vst.msk [vmem:[#allocation2 + $0x201] sm:$0xff] %vm45_vm1, %v13628_v22  ;;  %v14035_v22 = vld [vmem:[%s25103_s1 + $0x14] sm:$0xf] }
  0x8b   :  { %16449 = vmatmul.mubr.msk.f32.gmra.mrb[4].mxu0 %vm45_vm1, %v20756_v23  ;;  %v2650_v23 = vld [vmem:[#allocation2 + $0xf2] sm:$0xff] }
  0x8c   :  { %16451 = vmatprep.mubr.msk.f32.mxu0 %vm20418_vm2, %v20417_v1 }
  0x8f   :  { %16452 = vmatmul.mubr.msk.f32.gmra.mrb[6].mxu0 %vm45_vm1, %v20766_v25  ;;  %v13629_v25 = vld [vmem:[%s25102_s0 + $0x1a0] sm:$0xff] }
  0x90   :  { %16454 = vmatprep.mubr.msk.f32.mxu0 %vm20418_vm2, %v20417_v1  ;;  %234 = vst.msk [vmem:[#allocation2 + $0x20b] sm:$0xff] %vm45_vm1, %v13629_v25  ;;  %v2683_v5 = vld [vmem:[#allocation2 + $0x1fa] sm:$0xff]  ;;  %v3465_v25 = vld [vmem:[#allocation2 + $0x2b] sm:$0xff] }
  0x93   :  { %16455 = vmatmul.mubr.msk.f32.gmra.mrb[8].mxu0 %vm45_vm1, %v20776_v27  ;;  %v13630_v27 = vld [vmem:[%s25102_s0 + $0x1a8] sm:$0xff] }
  0x94   :  { %16457 = vmatprep.mubr.msk.f32.mxu0 %vm20418_vm2, %v20417_v1  ;;  %235 = vst.msk [vmem:[#allocation2 + $0x213] sm:$0xff] %vm45_vm1, %v13630_v27  ;;  %v3467_v27 = vld [vmem:[#allocation2 + $0x3b] sm:$0xff] }
  0x97   :  { %16458 = vmatmul.mubr.msk.f32.gmra.mrb[10].mxu0 %vm45_vm1, %v20786_v29  ;;  %v13631_v29 = vld [vmem:[%s25102_s0 + $0x1b0] sm:$0xff] }
  0x98   :  { %16460 = vmatprep.mubr.msk.f32.mxu0 %vm20418_vm2, %v20417_v1  ;;  %238 = vst.msk [vmem:[#allocation2 + $0x21d] sm:$0xff] %vm45_vm1, %v13631_v29  ;;  %v3469_v29 = vld [vmem:[#allocation2 + $0x4b] sm:$0xff] }
  0x9b   :  { %16461 = vmatmul.mubr.msk.f32.gmra.mrb[12].mxu0 %vm45_vm1, %v20796_v31  ;;  %v13632_v31 = vld [vmem:[%s25102_s0 + $0x1b8] sm:$0xff] }
  0x9c   :  { %16463 = vmatprep.mubr.msk.f32.mxu0 %vm20418_vm2, %v20417_v1  ;;  %239 = vst.msk [vmem:[#allocation2 + $0x225] sm:$0xff] %vm45_vm1, %v13632_v31  ;;  %v2686_v8 = vld [vmem:[#allocation2 + $0x212] sm:$0xff]  ;;  %v334_v31 = vld [vmem:[#allocation2 + $0x1] sm:$0xff] }
  0x9f   :  { %16464 = vmatmul.mubr.msk.f32.gmra.mrb[14].mxu0 %vm45_vm1, %v20806_v33  ;;  %v13633_v33 = vld [vmem:[%s25102_s0 + $0x1c0] sm:$0xff] }
  0xa0   :  { %16466 = vmatprep.mubr.msk.f32.mxu0 %vm20418_vm2, %v20417_v1  ;;  %242 = vst.msk [vmem:[#allocation2 + $0x22f] sm:$0xff] %vm45_vm1, %v13633_v33  ;;  %v335_v33 = vld [vmem:[#allocation2 + $0x9] sm:$0xff] }
  0xa3   :  { %16467 = vmatmul.mubr.msk.f32.gmra.mrb[16].mxu0 %vm45_vm1, %v20816_v35  ;;  %v13634_v35 = vld [vmem:[%s25102_s0 + $0x1c8] sm:$0xff] }
  0xa4   :  { %16469 = vmatprep.mubr.msk.f32.mxu0 %vm20418_vm2, %v20417_v1  ;;  %243 = vst.msk [vmem:[#allocation2 + $0x237] sm:$0xff] %vm45_vm1, %v13634_v35  ;;  %v2688_v10 = vld [vmem:[#allocation2 + $0x222] sm:$0xff]  ;;  %v336_v35 = vld [vmem:[#allocation2 + $0x11] sm:$0xff] }
  0xa7   :  { %16470 = vmatmul.mubr.msk.f32.gmra.mrb[18].mxu0 %vm45_vm1, %v20826_v37  ;;  %v13635_v37 = vld [vmem:[%s25102_s0 + $0x1d0] sm:$0xff] }
  0xa8   :  { %16472 = vmatprep.mubr.msk.f32.mxu0 %vm20418_vm2, %v20417_v1  ;;  %246 = vst.msk [vmem:[#allocation2 + $0x241] sm:$0xff] %vm45_vm1, %v13635_v37  ;;  %v337_v37 = vld [vmem:[#allocation2 + $0x19] sm:$0xff] }
  0xab   :  { %16473 = vmatmul.mubr.msk.f32.gmra.mrb[20].mxu0 %vm45_vm1, %v20836_v39  ;;  %v13636_v39 = vld [vmem:[%s25102_s0 + $0x1d8] sm:$0xff] }
  0xac   :  { %16475 = vmatprep.mubr.msk.f32.mxu0 %vm20418_vm2, %v20417_v1  ;;  %247 = vst.msk [vmem:[#allocation2 + $0x249] sm:$0xff] %vm45_vm1, %v13636_v39  ;;  %v2690_v12 = vld [vmem:[#allocation2 + $0x232] sm:$0xff]  ;;  %v338_v39 = vld [vmem:[#allocation2 + $0x21] sm:$0xff] }
  0xaf   :  { %16476 = vmatmul.mubr.msk.f32.gmra.mrb[22].mxu0 %vm45_vm1, %v20842_v40  ;;  %v2659_v40 = vld [vmem:[#allocation2 + $0x13a] sm:$0xff] }
  0xb0   :  { %16478 = vmatprep.mubr.msk.f32.mxu0 %vm20418_vm2, %v20417_v1 }
  0xb3   :  { %16479 = vmatmul.mubr.msk.f32.gmra.mrb[24].mxu0 %vm45_vm1, %v20852_v42  ;;  %v13637_v42 = vld [vmem:[%s25102_s0 + $0x1e0] sm:$0xff] }
  0xb4   :  { %16481 = vmatprep.mubr.msk.f32.mxu0 %vm20418_vm2, %v20417_v1  ;;  %250 = vst.msk [vmem:[#allocation2 + $0x253] sm:$0xff] %vm45_vm1, %v13637_v42  ;;  %v2692_v14 = vld [vmem:[#allocation2 + $0x242] sm:$0xff] }
  0xb5   :  { %v3475_v42 = vld [vmem:[#allocation2 + $0x7b] sm:$0xff] }
  0xb7   :  { %16482 = vmatmul.mubr.msk.f32.gmra.mrb[26].mxu0 %vm45_vm1, %v20862_v44  ;;  %v13638_v44 = vld [vmem:[%s25102_s0 + $0x1e8] sm:$0xff] }
  0xb8   :  { %16484 = vmatprep.mubr.msk.f32.mxu0 %vm20418_vm2, %v20417_v1  ;;  %251 = vst.msk [vmem:[#allocation2 + $0x25b] sm:$0xff] %vm45_vm1, %v13638_v44  ;;  %v3476_v44 = vld [vmem:[#allocation2 + $0x83] sm:$0xff] }
  0xbb   :  { %16485 = vmatmul.mubr.msk.f32.gmra.mrb[28].mxu0 %vm45_vm1, %v20872_v46  ;;  %v13639_v46 = vld [vmem:[%s25102_s0 + $0x1f0] sm:$0xff] }
  0xbc   :  { %16487 = vmatprep.mubr.msk.f32.mxu0 %vm20418_vm2, %v20417_v1  ;;  %254 = vst.msk [vmem:[#allocation2 + $0x265] sm:$0xff] %vm45_vm1, %v13639_v46  ;;  %v2694_v16 = vld [vmem:[#allocation2 + $0x252] sm:$0xff] }
  0xbd   :  { %v3477_v46 = vld [vmem:[#allocation2 + $0x8b] sm:$0xff] }
  0xbf   :  { %16488 = vmatmul.mubr.msk.f32.gmra.mrb[30].mxu0 %vm45_vm1, %v20882_v48  ;;  %v13640_v48 = vld [vmem:[%s25102_s0 + $0x1f8] sm:$0xff] }
  0xc0   :  { %16490 = vmatprep.mubr.msk.f32.mxu0 %vm20418_vm2, %v20417_v1  ;;  %255 = vst.msk [vmem:[#allocation2 + $0x26d] sm:$0xff] %vm45_vm1, %v13640_v48  ;;  %v3478_v48 = vld [vmem:[#allocation2 + $0x93] sm:$0xff] }
  0xc3   :  { %16491 = vmatmul.mubr.msk.f32.gmra.mrb[32].mxu0 %vm45_vm1, %v20892_v50  ;;  %v2665_v50 = vld [vmem:[#allocation2 + $0x16a] sm:$0xff]  ;;  %v2696_v18 = vld [vmem:[#allocation2 + $0x262] sm:$0xff] }
  0xc4   :  { %16493 = vmatprep.mubr.msk.f32.mxu0 %vm20418_vm2, %v20417_v1 }
  0xc7   :  { %16494 = vmatmul.mubr.msk.f32.gmra.mrb[34].mxu0 %vm45_vm1, %v20902_v52  ;;  %v2667_v52 = vld [vmem:[#allocation2 + $0x17a] sm:$0xff]  ;;  %v2698_v20 = vld [vmem:[#allocation2 + $0x272] sm:$0x3] }
  0xc8   :  { %16496 = vmatprep.mubr.msk.f32.mxu0 %vm20418_vm2, %v20417_v1 }
  0xcb   :  { %16497 = vmatmul.mubr.msk.f32.gmra.mrb[36].mxu0 %vm45_vm1, %v2640_v4  ;;  %v2682_v4 = vld [vmem:[#allocation2 + $0x1f2] sm:$0xff] }
  0xcc   :  { %16499 = vmatprep.mubr.msk.f32.mxu0 %vm20418_vm2, %v20417_v1 }
  0xcf   :  { %16500 = vmatmul.mubr.msk.f32.gmra.mrb[38].mxu0 %vm45_vm1, %v2641_v6  ;;  %v2684_v6 = vld [vmem:[#allocation2 + $0x202] sm:$0xff] }
  0xd0   :  { %16502 = vmatprep.mubr.msk.f32.mxu0 %vm20418_vm2, %v20417_v1 }
  0xd3   :  { %16503 = vmatmul.mubr.msk.f32.gmra.mrb[40].mxu0 %vm45_vm1, %v2642_v7  ;;  %v2685_v7 = vld [vmem:[#allocation2 + $0x20a] sm:$0xff] }
  0xd4   :  { %16505 = vmatprep.mubr.msk.f32.mxu0 %vm20418_vm2, %v20417_v1 }
  0xd7   :  { %16506 = vmatmul.mubr.msk.f32.gmra.mrb[42].mxu0 %vm45_vm1, %v2643_v9  ;;  %v2687_v9 = vld [vmem:[#allocation2 + $0x21a] sm:$0xff] }
  0xd8   :  { %16508 = vmatprep.mubr.msk.f32.mxu0 %vm20418_vm2, %v20417_v1 }
  0xdb   :  { %16509 = vmatmul.mubr.msk.f32.gmra.mrb[44].mxu0 %vm45_vm1, %v2644_v11  ;;  %v2689_v11 = vld [vmem:[#allocation2 + $0x22a] sm:$0xff] }
  0xdc   :  { %16511 = vmatprep.mubr.msk.f32.mxu0 %vm20418_vm2, %v20417_v1 }
  0xdf   :  { %16512 = vmatmul.mubr.msk.f32.gmra.mrb[46].mxu0 %vm45_vm1, %v2645_v13  ;;  %v2691_v13 = vld [vmem:[#allocation2 + $0x23a] sm:$0xff] }
  0xe0   :  { %16514 = vmatprep.mubr.msk.f32.mxu0 %vm20418_vm2, %v20417_v1 }
  0xe3   :  { %16515 = vmatmul.mubr.msk.f32.gmra.mrb[48].mxu0 %vm45_vm1, %v2646_v15  ;;  %v2693_v15 = vld [vmem:[#allocation2 + $0x24a] sm:$0xff] }
  0xe4   :  { %16517 = vmatprep.mubr.msk.f32.mxu0 %vm20418_vm2, %v20417_v1 }
  0xe7   :  { %16518 = vmatmul.mubr.msk.f32.gmra.mrb[50].mxu0 %vm45_vm1, %v2647_v17  ;;  %v2695_v17 = vld [vmem:[#allocation2 + $0x25a] sm:$0xff] }
  0xe8   :  { %16520 = vmatprep.mubr.msk.f32.mxu0 %vm20418_vm2, %v20417_v1 }
  0xeb   :  { %16521 = vmatmul.mubr.msk.f32.gmra.mrb[52].mxu0 %vm45_vm1, %v2648_v19  ;;  %v2697_v19 = vld [vmem:[#allocation2 + $0x26a] sm:$0xff] }
  0xec   :  { %16523 = vmatprep.mubr.msk.f32.mxu0 %vm20418_vm2, %v20417_v1 }
  0xef   :  { %16524 = vmatmul.mubr.msk.f32.gmra.mrb[54].mxu0 %vm45_vm1, %v2649_v21  ;;  %v3462_v21 = vld [vmem:[#allocation2 + $0x13] sm:$0xff] }
  0xf0   :  { %16526 = vmatprep.mubr.msk.f32.mxu0 %vm20418_vm2, %v20417_v1 }
  0xf3   :  { %16527 = vmatmul.mubr.msk.f32.gmra.mrb[56].mxu0 %vm45_vm1, %v2650_v23  ;;  %v3463_v23 = vld [vmem:[#allocation2 + $0x1b] sm:$0xff] }
  0xf4   :  { %16529 = vmatprep.mubr.msk.f32.mxu0 %vm20418_vm2, %v20417_v1 }
  0xf7   :  { %16530 = vmatmul.mubr.msk.f32.gmra.mrb[58].mxu0 %vm45_vm1, %v2651_v24  ;;  %v3464_v24 = vld [vmem:[#allocation2 + $0x23] sm:$0xff] }
  0xf8   :  { %16532 = vmatprep.mubr.msk.f32.mxu0 %vm20418_vm2, %v20417_v1 }
  0xfb   :  { %16533 = vmatmul.mubr.msk.f32.gmra.mrb[60].mxu0 %vm45_vm1, %v2652_v26  ;;  %v3466_v26 = vld [vmem:[#allocation2 + $0x33] sm:$0xff] }
  0xfc   :  { %16535 = vmatprep.mubr.msk.f32.mxu0 %vm20418_vm2, %v20417_v1 }
  0xff   :  { %16536 = vmatmul.mubr.msk.f32.gmra.mrb[62].mxu0 %vm45_vm1, %v2653_v28  ;;  %v3468_v28 = vld [vmem:[#allocation2 + $0x43] sm:$0xff] }
 0x100   :  { %16538 = vmatprep.mubr.msk.f32.mxu0 %vm20418_vm2, %v20417_v1 }
 0x103   :  { %16539 = vmatmul.mubr.msk.f32.gmra.mrb[64].mxu0 %vm45_vm1, %v2654_v30  ;;  %v13641_v30 = vld [vmem:[%s25103_s1 + $0x4] sm:$0xf] }
 0x104   :  { %16541 = vmatprep.mubr.msk.f32.mxu0 %vm20418_vm2, %v20417_v1  ;;  %15742 = vmatpush3.msk.msra.mxu1 %vm644_vm0, %v13641_v30  ;;  %v365_v30 = vld [vmem:[#allocation2 + $0xf9] sm:$0xff] }
 0x105   :  { %15744 = vmatmul.mubr.msk.f32.vlgmr.msra.gmra.mrb[0].mxu1 %vm45_vm1, %v334_v31  ;;  %15974 = vmatprep.subr.mxu1 %v20417_v1  ;;  %v3501_v31 = vld [vmem:[#allocation2 + $0x14b] sm:$0xff] }
 0x106   :  { %15746 = vmatprep.mubr.msk.f32.mxu1 %vm20418_vm2, %v20417_v1 }
 0x107   :  { %16542 = vmatmul.mubr.msk.f32.gmra.mrb[66].mxu0 %vm45_vm1, %v2655_v32  ;;  %v3470_v32 = vld [vmem:[#allocation2 + $0x53] sm:$0xff] }
 0x108   :  { %16544 = vmatprep.mubr.msk.f32.mxu0 %vm20418_vm2, %v20417_v1 }
 0x109   :  { %15747 = vmatmul.mubr.msk.f32.gmra.mrb[2].mxu1 %vm45_vm1, %v335_v33  ;;  %v3502_v33 = vld [vmem:[#allocation2 + $0x153] sm:$0xff] }
 0x10a   :  { %15749 = vmatprep.mubr.msk.f32.mxu1 %vm20418_vm2, %v20417_v1 }
 0x10b   :  { %16545 = vmatmul.mubr.msk.f32.gmra.mrb[68].mxu0 %vm45_vm1, %v2656_v34  ;;  %v3471_v34 = vld [vmem:[#allocation2 + $0x5b] sm:$0xff] }
 0x10c   :  { %16547 = vmatprep.mubr.msk.f32.mxu0 %vm20418_vm2, %v20417_v1 }
 0x10d   :  { %15750 = vmatmul.mubr.msk.f32.gmra.mrb[4].mxu1 %vm45_vm1, %v336_v35  ;;  %v3503_v35 = vld [vmem:[#allocation2 + $0x15b] sm:$0xff] }
 0x10e   :  { %15752 = vmatprep.mubr.msk.f32.mxu1 %vm20418_vm2, %v20417_v1 }
 0x10f   :  { %16548 = vmatmul.mubr.msk.f32.gmra.mrb[70].mxu0 %vm45_vm1, %v2657_v36  ;;  %v3472_v36 = vld [vmem:[#allocation2 + $0x63] sm:$0xff] }
 0x110   :  { %16550 = vmatprep.mubr.msk.f32.mxu0 %vm20418_vm2, %v20417_v1 }
 0x111   :  { %15753 = vmatmul.mubr.msk.f32.gmra.mrb[6].mxu1 %vm45_vm1, %v337_v37  ;;  %v3504_v37 = vld [vmem:[#allocation2 + $0x163] sm:$0xff] }
 0x112   :  { %15755 = vmatprep.mubr.msk.f32.mxu1 %vm20418_vm2, %v20417_v1 }
 0x113   :  { %16551 = vmatmul.mubr.msk.f32.gmra.mrb[72].mxu0 %vm45_vm1, %v2658_v38  ;;  %v3473_v38 = vld [vmem:[#allocation2 + $0x6b] sm:$0xff] }
 0x114   :  { %16553 = vmatprep.mubr.msk.f32.mxu0 %vm20418_vm2, %v20417_v1 }
 0x115   :  { %15756 = vmatmul.mubr.msk.f32.gmra.mrb[8].mxu1 %vm45_vm1, %v338_v39  ;;  %v3505_v39 = vld [vmem:[#allocation2 + $0x16b] sm:$0xff] }
 0x116   :  { %15758 = vmatprep.mubr.msk.f32.mxu1 %vm20418_vm2, %v20417_v1 }
 0x117   :  { %16554 = vmatmul.mubr.msk.f32.gmra.mrb[74].mxu0 %vm45_vm1, %v2659_v40  ;;  %v3474_v40 = vld [vmem:[#allocation2 + $0x73] sm:$0xff] }
 0x118   :  { %16556 = vmatprep.mubr.msk.f32.mxu0 %vm20418_vm2, %v20417_v1 }
 0x11b   :  { %16557 = vmatmul.mubr.msk.f32.gmra.mrb[76].mxu0 %vm45_vm1, %v2660_v41  ;;  %v339_v41 = vld [vmem:[#allocation2 + $0x29] sm:$0xff] }
 0x11c   :  { %16559 = vmatprep.mubr.msk.f32.mxu0 %vm20418_vm2, %v20417_v1  ;;  %15759 = vmatmul.mubr.msk.f32.gmra.mrb[10].mxu1 %vm45_vm1, %v339_v41  ;;  %v3506_v41 = vld [vmem:[#allocation2 + $0x173] sm:$0xff] }
 0x11d   :  { %15761 = vmatprep.mubr.msk.f32.mxu1 %vm20418_vm2, %v20417_v1 }
 0x11f   :  { %16560 = vmatmul.mubr.msk.f32.gmra.mrb[78].mxu0 %vm45_vm1, %v2661_v43  ;;  %v340_v43 = vld [vmem:[#allocation2 + $0x31] sm:$0xff] }
 0x120   :  { %16562 = vmatprep.mubr.msk.f32.mxu0 %vm20418_vm2, %v20417_v1  ;;  %15762 = vmatmul.mubr.msk.f32.gmra.mrb[12].mxu1 %vm45_vm1, %v340_v43  ;;  %v3507_v43 = vld [vmem:[#allocation2 + $0x17b] sm:$0xff] }
 0x121   :  { %15764 = vmatprep.mubr.msk.f32.mxu1 %vm20418_vm2, %v20417_v1 }
 0x123   :  { %16563 = vmatmul.mubr.msk.f32.gmra.mrb[80].mxu0 %vm45_vm1, %v2662_v45  ;;  %v341_v45 = vld [vmem:[#allocation2 + $0x39] sm:$0xff] }
 0x124   :  { %16565 = vmatprep.mubr.msk.f32.mxu0 %vm20418_vm2, %v20417_v1  ;;  %15765 = vmatmul.mubr.msk.f32.gmra.mrb[14].mxu1 %vm45_vm1, %v341_v45  ;;  %v372_v45 = vld [vmem:[#allocation2 + $0x131] sm:$0xff] }
 0x125   :  { %15767 = vmatprep.mubr.msk.f32.mxu1 %vm20418_vm2, %v20417_v1 }
 0x127   :  { %16566 = vmatmul.mubr.msk.f32.gmra.mrb[82].mxu0 %vm45_vm1, %v2663_v47  ;;  %v342_v47 = vld [vmem:[#allocation2 + $0x41] sm:$0xff] }
 0x128   :  { %16568 = vmatprep.mubr.msk.f32.mxu0 %vm20418_vm2, %v20417_v1  ;;  %15768 = vmatmul.mubr.msk.f32.gmra.mrb[16].mxu1 %vm45_vm1, %v342_v47  ;;  %v3509_v47 = vld [vmem:[#allocation2 + $0x18b] sm:$0xff] }
 0x129   :  { %15770 = vmatprep.mubr.msk.f32.mxu1 %vm20418_vm2, %v20417_v1 }
 0x12b   :  { %16569 = vmatmul.mubr.msk.f32.gmra.mrb[84].mxu0 %vm45_vm1, %v2664_v49  ;;  %v343_v49 = vld [vmem:[#allocation2 + $0x49] sm:$0xff] }
 0x12c   :  { %16571 = vmatprep.mubr.msk.f32.mxu0 %vm20418_vm2, %v20417_v1  ;;  %15771 = vmatmul.mubr.msk.f32.gmra.mrb[18].mxu1 %vm45_vm1, %v343_v49  ;;  %v3510_v49 = vld [vmem:[#allocation2 + $0x193] sm:$0xff] }
 0x12d   :  { %15773 = vmatprep.mubr.msk.f32.mxu1 %vm20418_vm2, %v20417_v1 }
 0x12f   :  { %16572 = vmatmul.mubr.msk.f32.gmra.mrb[86].mxu0 %vm45_vm1, %v2665_v50  ;;  %v3479_v50 = vld [vmem:[#allocation2 + $0x9b] sm:$0xff] }
 0x130   :  { %16574 = vmatprep.mubr.msk.f32.mxu0 %vm20418_vm2, %v20417_v1 }
 0x133   :  { %16575 = vmatmul.mubr.msk.f32.gmra.mrb[88].mxu0 %vm45_vm1, %v2666_v51  ;;  %v344_v51 = vld [vmem:[#allocation2 + $0x51] sm:$0xff] }
 0x134   :  { %16577 = vmatprep.mubr.msk.f32.mxu0 %vm20418_vm2, %v20417_v1  ;;  %15774 = vmatmul.mubr.msk.f32.gmra.mrb[20].mxu1 %vm45_vm1, %v344_v51  ;;  %v3511_v51 = vld [vmem:[#allocation2 + $0x19b] sm:$0xff] }
 0x135   :  { %15776 = vmatprep.mubr.msk.f32.mxu1 %vm20418_vm2, %v20417_v1 }
 0x137   :  { %16578 = vmatmul.mubr.msk.f32.gmra.mrb[90].mxu0 %vm45_vm1, %v2667_v52  ;;  %v3480_v52 = vld [vmem:[#allocation2 + $0xa3] sm:$0xff] }
 0x138   :  { %16580 = vmatprep.mubr.msk.f32.mxu0 %vm20418_vm2, %v20417_v1 }
 0x13b   :  { %16581 = vmatmul.mubr.msk.f32.gmra.mrb[92].mxu0 %vm45_vm1, %v2668_v53  ;;  %v345_v53 = vld [vmem:[#allocation2 + $0x59] sm:$0xff] }
 0x13c   :  { %16583 = vmatprep.mubr.msk.f32.mxu0 %vm20418_vm2, %v20417_v1  ;;  %15777 = vmatmul.mubr.msk.f32.gmra.mrb[22].mxu1 %vm45_vm1, %v345_v53  ;;  %v3512_v53 = vld [vmem:[#allocation2 + $0x1a3] sm:$0xff] }
 0x13d   :  { %15779 = vmatprep.mubr.msk.f32.mxu1 %vm20418_vm2, %v20417_v1 }
 0x13f   :  { %16584 = vmatmul.mubr.msk.f32.gmra.mrb[94].mxu0 %vm45_vm1, %v2669_v54  ;;  %v3481_v54 = vld [vmem:[#allocation2 + $0xab] sm:$0xff] }
 0x140   :  { %16586 = vmatprep.mubr.msk.f32.mxu0 %vm20418_vm2, %v20417_v1 }
 0x143   :  { %16587 = vmatmul.mubr.msk.f32.gmra.mrb[96].mxu0 %vm45_vm1, %v2670_v55  ;;  %v346_v55 = vld [vmem:[#allocation2 + $0x61] sm:$0xff] }
 0x144   :  { %16589 = vmatprep.mubr.msk.f32.mxu0 %vm20418_vm2, %v20417_v1  ;;  %15780 = vmatmul.mubr.msk.f32.gmra.mrb[24].mxu1 %vm45_vm1, %v346_v55  ;;  %v3513_v55 = vld [vmem:[#allocation2 + $0x1ab] sm:$0xff] }
 0x145   :  { %15782 = vmatprep.mubr.msk.f32.mxu1 %vm20418_vm2, %v20417_v1 }
 0x147   :  { %16590 = vmatmul.mubr.msk.f32.gmra.mrb[98].mxu0 %vm45_vm1, %v2671_v56  ;;  %v3482_v56 = vld [vmem:[#allocation2 + $0xb3] sm:$0xff] }
 0x148   :  { %16592 = vmatprep.mubr.msk.f32.mxu0 %vm20418_vm2, %v20417_v1 }
 0x14b   :  { %16593 = vmatmul.mubr.msk.f32.gmra.mrb[100].mxu0 %vm45_vm1, %v2672_v57  ;;  %v347_v57 = vld [vmem:[#allocation2 + $0x69] sm:$0xff] }
 0x14c   :  { %16595 = vmatprep.mubr.msk.f32.mxu0 %vm20418_vm2, %v20417_v1  ;;  %15783 = vmatmul.mubr.msk.f32.gmra.mrb[26].mxu1 %vm45_vm1, %v347_v57  ;;  %v3514_v57 = vld [vmem:[#allocation2 + $0x1b3] sm:$0xff] }
 0x14d   :  { %15785 = vmatprep.mubr.msk.f32.mxu1 %vm20418_vm2, %v20417_v1 }
 0x14f   :  { %16596 = vmatmul.mubr.msk.f32.gmra.mrb[102].mxu0 %vm45_vm1, %v2673_v58  ;;  %v3483_v58 = vld [vmem:[#allocation2 + $0xbb] sm:$0xff] }
 0x150   :  { %16598 = vmatprep.mubr.msk.f32.mxu0 %vm20418_vm2, %v20417_v1 }
 0x153   :  { %16599 = vmatmul.mubr.msk.f32.gmra.mrb[104].mxu0 %vm45_vm1, %v2674_v59  ;;  %v348_v59 = vld [vmem:[#allocation2 + $0x71] sm:$0xff] }
 0x154   :  { %16601 = vmatprep.mubr.msk.f32.mxu0 %vm20418_vm2, %v20417_v1  ;;  %15786 = vmatmul.mubr.msk.f32.gmra.mrb[28].mxu1 %vm45_vm1, %v348_v59  ;;  %v3515_v59 = vld [vmem:[#allocation2 + $0x1bb] sm:$0xff] }
 0x155   :  { %15788 = vmatprep.mubr.msk.f32.mxu1 %vm20418_vm2, %v20417_v1 }
 0x157   :  { %16602 = vmatmul.mubr.msk.f32.gmra.mrb[106].mxu0 %vm45_vm1, %v2675_v60  ;;  %v3484_v60 = vld [vmem:[#allocation2 + $0xc3] sm:$0xff] }
 0x158   :  { %16604 = vmatprep.mubr.msk.f32.mxu0 %vm20418_vm2, %v20417_v1 }
 0x15b   :  { %16605 = vmatmul.mubr.msk.f32.gmra.mrb[108].mxu0 %vm45_vm1, %v2676_v61  ;;  %v349_v61 = vld [vmem:[#allocation2 + $0x79] sm:$0xff] }
 0x15c   :  { %16607 = vmatprep.mubr.msk.f32.mxu0 %vm20418_vm2, %v20417_v1  ;;  %15789 = vmatmul.mubr.msk.f32.gmra.mrb[30].mxu1 %vm45_vm1, %v349_v61  ;;  %v3516_v61 = vld [vmem:[#allocation2 + $0x1c3] sm:$0xff] }
 0x15d   :  { %15791 = vmatprep.mubr.msk.f32.mxu1 %vm20418_vm2, %v20417_v1 }
 0x15f   :  { %16608 = vmatmul.mubr.msk.f32.gmra.mrb[110].mxu0 %vm45_vm1, %v2677_v62  ;;  %v3485_v62 = vld [vmem:[#allocation2 + $0xcb] sm:$0xff] }
 0x160   :  { %16610 = vmatprep.mubr.msk.f32.mxu0 %vm20418_vm2, %v20417_v1 }
 0x163   :  { %16611 = vmatmul.mubr.msk.f32.gmra.mrb[112].mxu0 %vm45_vm1, %v2678_v63  ;;  %v350_v63 = vld [vmem:[#allocation2 + $0x81] sm:$0xff] }
 0x164   :  { %16613 = vmatprep.mubr.msk.f32.mxu0 %vm20418_vm2, %v20417_v1  ;;  %15792 = vmatmul.mubr.msk.f32.gmra.mrb[32].mxu1 %vm45_vm1, %v350_v63  ;;  %v3517_v63 = vld [vmem:[#allocation2 + $0x1cb] sm:$0xff] }
 0x165   :  { %15794 = vmatprep.mubr.msk.f32.mxu1 %vm20418_vm2, %v20417_v1 }
 0x167   :  { %16614 = vmatmul.mubr.msk.f32.gmra.mrb[114].mxu0 %vm45_vm1, %v2679_v0  ;;  %v3486_v0 = vld [vmem:[#allocation2 + $0xd3] sm:$0xff] }
 0x168   :  { %16616 = vmatprep.mubr.msk.f32.mxu0 %vm20418_vm2, %v20417_v1 }
 0x16b   :  { %16617 = vmatmul.mubr.msk.f32.gmra.mrb[116].mxu0 %vm45_vm1, %v2680_v2  ;;  %v351_v2 = vld [vmem:[#allocation2 + $0x89] sm:$0xff] }
 0x16c   :  { %16619 = vmatprep.mubr.msk.f32.mxu0 %vm20418_vm2, %v20417_v1  ;;  %15795 = vmatmul.mubr.msk.f32.gmra.mrb[34].mxu1 %vm45_vm1, %v351_v2  ;;  %v3518_v2 = vld [vmem:[#allocation2 + $0x1d3] sm:$0xff] }
 0x16d   :  { %15797 = vmatprep.mubr.msk.f32.mxu1 %vm20418_vm2, %v20417_v1 }
 0x16f   :  { %16620 = vmatmul.mubr.msk.f32.gmra.mrb[118].mxu0 %vm45_vm1, %v2681_v3  ;;  %v3487_v3 = vld [vmem:[#allocation2 + $0xdb] sm:$0xff] }
 0x170   :  { %16622 = vmatprep.mubr.msk.f32.mxu0 %vm20418_vm2, %v20417_v1 }
 0x173   :  { %16623 = vmatmul.mubr.msk.f32.gmra.mrb[120].mxu0 %vm45_vm1, %v2682_v4  ;;  %v352_v4 = vld [vmem:[#allocation2 + $0x91] sm:$0xff] }
 0x174   :  { %16625 = vmatprep.mubr.msk.f32.mxu0 %vm20418_vm2, %v20417_v1  ;;  %15798 = vmatmul.mubr.msk.f32.gmra.mrb[36].mxu1 %vm45_vm1, %v352_v4  ;;  %v3519_v4 = vld [vmem:[#allocation2 + $0x1db] sm:$0xff] }
 0x175   :  { %15800 = vmatprep.mubr.msk.f32.mxu1 %vm20418_vm2, %v20417_v1 }
 0x177   :  { %16626 = vmatmul.mubr.msk.f32.gmra.mrb[122].mxu0 %vm45_vm1, %v2683_v5  ;;  %v3488_v5 = vld [vmem:[#allocation2 + $0xe3] sm:$0xff] }
 0x178   :  { %16628 = vmatprep.mubr.msk.f32.mxu0 %vm20418_vm2, %v20417_v1 }
 0x17b   :  { %16629 = vmatmul.mubr.msk.f32.gmra.mrb[124].mxu0 %vm45_vm1, %v2684_v6  ;;  %v353_v6 = vld [vmem:[#allocation2 + $0x99] sm:$0xff] }
 0x17c   :  { %16631 = vmatprep.mubr.msk.f32.mxu0 %vm20418_vm2, %v20417_v1  ;;  %15801 = vmatmul.mubr.msk.f32.gmra.mrb[38].mxu1 %vm45_vm1, %v353_v6  ;;  %v3520_v6 = vld [vmem:[#allocation2 + $0x1e3] sm:$0xff] }
 0x17d   :  { %15803 = vmatprep.mubr.msk.f32.mxu1 %vm20418_vm2, %v20417_v1 }
 0x17f   :  { %16632 = vmatmul.mubr.msk.f32.gmra.mrb[126].mxu0 %vm45_vm1, %v2685_v7  ;;  %v3489_v7 = vld [vmem:[#allocation2 + $0xeb] sm:$0xff] }
 0x180   :  { %16634 = vmatprep.mubr.msk.f32.mxu0 %vm20418_vm2, %v20417_v1 }
 0x183   :  { %16635 = vmatmul.mubr.msk.f32.gmra.mrb[128].mxu0 %vm45_vm1, %v2686_v8  ;;  %v354_v8 = vld [vmem:[#allocation2 + $0xa1] sm:$0xff] }
 0x184   :  { %16637 = vmatprep.mubr.msk.f32.mxu0 %vm20418_vm2, %v20417_v1  ;;  %15804 = vmatmul.mubr.msk.f32.gmra.mrb[40].mxu1 %vm45_vm1, %v354_v8  ;;  %v3521_v8 = vld [vmem:[#allocation2 + $0x1eb] sm:$0xff] }
 0x185   :  { %15806 = vmatprep.mubr.msk.f32.mxu1 %vm20418_vm2, %v20417_v1 }
 0x187   :  { %16638 = vmatmul.mubr.msk.f32.gmra.mrb[130].mxu0 %vm45_vm1, %v2687_v9  ;;  %v3490_v9 = vld [vmem:[#allocation2 + $0xf3] sm:$0xff] }
 0x188   :  { %16640 = vmatprep.mubr.msk.f32.mxu0 %vm20418_vm2, %v20417_v1 }
 0x18b   :  { %16641 = vmatmul.mubr.msk.f32.gmra.mrb[132].mxu0 %vm45_vm1, %v2688_v10  ;;  %v355_v10 = vld [vmem:[#allocation2 + $0xa9] sm:$0xff] }
 0x18c   :  { %16643 = vmatprep.mubr.msk.f32.mxu0 %vm20418_vm2, %v20417_v1  ;;  %15807 = vmatmul.mubr.msk.f32.gmra.mrb[42].mxu1 %vm45_vm1, %v355_v10  ;;  %v3522_v10 = vld [vmem:[#allocation2 + $0x1f3] sm:$0xff] }
 0x18d   :  { %15809 = vmatprep.mubr.msk.f32.mxu1 %vm20418_vm2, %v20417_v1 }
 0x18f   :  { %16644 = vmatmul.mubr.msk.f32.gmra.mrb[134].mxu0 %vm45_vm1, %v2689_v11  ;;  %v3491_v11 = vld [vmem:[#allocation2 + $0xfb] sm:$0xff] }
 0x190   :  { %16646 = vmatprep.mubr.msk.f32.mxu0 %vm20418_vm2, %v20417_v1 }
 0x193   :  { %16647 = vmatmul.mubr.msk.f32.gmra.mrb[136].mxu0 %vm45_vm1, %v2690_v12  ;;  %v356_v12 = vld [vmem:[#allocation2 + $0xb1] sm:$0xff] }
 0x194   :  { %16649 = vmatprep.mubr.msk.f32.mxu0 %vm20418_vm2, %v20417_v1  ;;  %15810 = vmatmul.mubr.msk.f32.gmra.mrb[44].mxu1 %vm45_vm1, %v356_v12  ;;  %v3523_v12 = vld [vmem:[#allocation2 + $0x1fb] sm:$0xff] }
 0x195   :  { %15812 = vmatprep.mubr.msk.f32.mxu1 %vm20418_vm2, %v20417_v1 }
 0x197   :  { %16650 = vmatmul.mubr.msk.f32.gmra.mrb[138].mxu0 %vm45_vm1, %v2691_v13  ;;  %v3492_v13 = vld [vmem:[#allocation2 + $0x103] sm:$0xff] }
 0x198   :  { %16652 = vmatprep.mubr.msk.f32.mxu0 %vm20418_vm2, %v20417_v1 }
 0x19b   :  { %16653 = vmatmul.mubr.msk.f32.gmra.mrb[140].mxu0 %vm45_vm1, %v2692_v14  ;;  %v357_v14 = vld [vmem:[#allocation2 + $0xb9] sm:$0xff] }
 0x19c   :  { %16655 = vmatprep.mubr.msk.f32.mxu0 %vm20418_vm2, %v20417_v1  ;;  %15813 = vmatmul.mubr.msk.f32.gmra.mrb[46].mxu1 %vm45_vm1, %v357_v14  ;;  %v3524_v14 = vld [vmem:[#allocation2 + $0x203] sm:$0xff] }
 0x19d   :  { %15815 = vmatprep.mubr.msk.f32.mxu1 %vm20418_vm2, %v20417_v1 }
 0x19f   :  { %16656 = vmatmul.mubr.msk.f32.gmra.mrb[142].mxu0 %vm45_vm1, %v2693_v15  ;;  %v3493_v15 = vld [vmem:[#allocation2 + $0x10b] sm:$0xff] }
 0x1a0   :  { %16658 = vmatprep.mubr.msk.f32.mxu0 %vm20418_vm2, %v20417_v1 }
 0x1a3   :  { %16659 = vmatmul.mubr.msk.f32.gmra.mrb[144].mxu0 %vm45_vm1, %v2694_v16  ;;  %v358_v16 = vld [vmem:[#allocation2 + $0xc1] sm:$0xff] }
 0x1a4   :  { %16661 = vmatprep.mubr.msk.f32.mxu0 %vm20418_vm2, %v20417_v1  ;;  %15816 = vmatmul.mubr.msk.f32.gmra.mrb[48].mxu1 %vm45_vm1, %v358_v16  ;;  %v3525_v16 = vld [vmem:[#allocation2 + $0x20b] sm:$0xff] }
 0x1a5   :  { %15818 = vmatprep.mubr.msk.f32.mxu1 %vm20418_vm2, %v20417_v1 }
 0x1a7   :  { %16662 = vmatmul.mubr.msk.f32.gmra.mrb[146].mxu0 %vm45_vm1, %v2695_v17  ;;  %v3494_v17 = vld [vmem:[#allocation2 + $0x113] sm:$0xff] }
 0x1a8   :  { %16664 = vmatprep.mubr.msk.f32.mxu0 %vm20418_vm2, %v20417_v1 }
 0x1ab   :  { %16665 = vmatmul.mubr.msk.f32.gmra.mrb[148].mxu0 %vm45_vm1, %v2696_v18  ;;  %v359_v18 = vld [vmem:[#allocation2 + $0xc9] sm:$0xff] }
 0x1ac   :  { %16667 = vmatprep.mubr.msk.f32.mxu0 %vm20418_vm2, %v20417_v1  ;;  %15819 = vmatmul.mubr.msk.f32.gmra.mrb[50].mxu1 %vm45_vm1, %v359_v18  ;;  %v3526_v18 = vld [vmem:[#allocation2 + $0x213] sm:$0xff] }
 0x1ad   :  { %15821 = vmatprep.mubr.msk.f32.mxu1 %vm20418_vm2, %v20417_v1 }
 0x1af   :  { %16668 = vmatmul.mubr.msk.f32.gmra.mrb[150].mxu0 %vm45_vm1, %v2697_v19  ;;  %v3495_v19 = vld [vmem:[#allocation2 + $0x11b] sm:$0xff] }
 0x1b0   :  { %16670 = vmatprep.mubr.msk.f32.mxu0 %vm20418_vm2, %v20417_v1 }
 0x1b3   :  { %16671 = vmatmul.mubr.msk.f32.gmra.mrb[152].mxu0 %vm45_vm1, %v2698_v20  ;;  %v360_v20 = vld [vmem:[#allocation2 + $0xd1] sm:$0xff] }
 0x1b4   :  { %16675 = vmatprep.mubr.msk.f32.mxu0 %vm20418_vm2, %v20417_v1  ;;  %15822 = vmatmul.mubr.msk.f32.gmra.mrb[52].mxu1 %vm45_vm1, %v360_v20  ;;  %v3527_v20 = vld [vmem:[#allocation2 + $0x21b] sm:$0xff] }
 0x1b5   :  { %15824 = vmatprep.mubr.msk.f32.mxu1 %vm20418_vm2, %v20417_v1 }
 0x1b7   :  { %16676 = vmatmul.mubr.msk.f32.vlgmr.msra.gmra.mrb[0].mxu0 %vm45_vm1, %v3462_v21  ;;  %v3496_v21 = vld [vmem:[#allocation2 + $0x123] sm:$0xff] }
 0x1b8   :  { %16907 = vmatpush3.msk.msra.mxu0 %vm644_vm0, %v14035_v22  ;;  %16678 = vmatprep.mubr.msk.f32.mxu0 %vm20418_vm2, %v20417_v1  ;;  %v361_v22 = vld [vmem:[#allocation2 + $0xd9] sm:$0xff] }
 0x1b9   :  { %17139 = vmatprep.subr.mxu0 %v20417_v1  ;;  %15825 = vmatmul.mubr.msk.f32.gmra.mrb[54].mxu1 %vm45_vm1, %v361_v22  ;;  %v3528_v22 = vld [vmem:[#allocation2 + $0x223] sm:$0xff] }
 0x1ba   :  { %15827 = vmatprep.mubr.msk.f32.mxu1 %vm20418_vm2, %v20417_v1 }
 0x1bb   :  { %16679 = vmatmul.mubr.msk.f32.gmra.mrb[2].mxu0 %vm45_vm1, %v3463_v23  ;;  %v3497_v23 = vld [vmem:[#allocation2 + $0x12b] sm:$0xff] }
 0x1bc   :  { %16681 = vmatprep.mubr.msk.f32.mxu0 %vm20418_vm2, %v20417_v1 }
 0x1bf   :  { %16682 = vmatmul.mubr.msk.f32.gmra.mrb[4].mxu0 %vm45_vm1, %v3464_v24  ;;  %v362_v24 = vld [vmem:[#allocation2 + $0xe1] sm:$0xff] }
 0x1c0   :  { %16684 = vmatprep.mubr.msk.f32.mxu0 %vm20418_vm2, %v20417_v1  ;;  %15828 = vmatmul.mubr.msk.f32.gmra.mrb[56].mxu1 %vm45_vm1, %v362_v24  ;;  %v3529_v24 = vld [vmem:[#allocation2 + $0x22b] sm:$0xff] }
 0x1c1   :  { %15830 = vmatprep.mubr.msk.f32.mxu1 %vm20418_vm2, %v20417_v1 }
 0x1c3   :  { %16685 = vmatmul.mubr.msk.f32.gmra.mrb[6].mxu0 %vm45_vm1, %v3465_v25  ;;  %v3498_v25 = vld [vmem:[#allocation2 + $0x133] sm:$0xff] }
 0x1c4   :  { %16687 = vmatprep.mubr.msk.f32.mxu0 %vm20418_vm2, %v20417_v1 }
 0x1c7   :  { %16688 = vmatmul.mubr.msk.f32.gmra.mrb[8].mxu0 %vm45_vm1, %v3466_v26  ;;  %v363_v26 = vld [vmem:[#allocation2 + $0xe9] sm:$0xff] }
 0x1c8   :  { %16690 = vmatprep.mubr.msk.f32.mxu0 %vm20418_vm2, %v20417_v1  ;;  %15831 = vmatmul.mubr.msk.f32.gmra.mrb[58].mxu1 %vm45_vm1, %v363_v26  ;;  %v3530_v26 = vld [vmem:[#allocation2 + $0x233] sm:$0xff] }
 0x1c9   :  { %15833 = vmatprep.mubr.msk.f32.mxu1 %vm20418_vm2, %v20417_v1 }
 0x1cb   :  { %16691 = vmatmul.mubr.msk.f32.gmra.mrb[10].mxu0 %vm45_vm1, %v3467_v27  ;;  %v3499_v27 = vld [vmem:[#allocation2 + $0x13b] sm:$0xff] }
 0x1cc   :  { %16693 = vmatprep.mubr.msk.f32.mxu0 %vm20418_vm2, %v20417_v1 }
 0x1cf   :  { %16694 = vmatmul.mubr.msk.f32.gmra.mrb[12].mxu0 %vm45_vm1, %v3468_v28  ;;  %v364_v28 = vld [vmem:[#allocation2 + $0xf1] sm:$0xff] }
 0x1d0   :  { %16696 = vmatprep.mubr.msk.f32.mxu0 %vm20418_vm2, %v20417_v1  ;;  %15834 = vmatmul.mubr.msk.f32.gmra.mrb[60].mxu1 %vm45_vm1, %v364_v28  ;;  %v3531_v28 = vld [vmem:[#allocation2 + $0x23b] sm:$0xff] }
 0x1d1   :  { %15836 = vmatprep.mubr.msk.f32.mxu1 %vm20418_vm2, %v20417_v1 }
 0x1d3   :  { %16697 = vmatmul.mubr.msk.f32.gmra.mrb[14].mxu0 %vm45_vm1, %v3469_v29  ;;  %v3500_v29 = vld [vmem:[#allocation2 + $0x143] sm:$0xff] }
 0x1d4   :  { %16699 = vmatprep.mubr.msk.f32.mxu0 %vm20418_vm2, %v20417_v1  ;;  %15837 = vmatmul.mubr.msk.f32.gmra.mrb[62].mxu1 %vm45_vm1, %v365_v30  ;;  %v3532_v30 = vld [vmem:[#allocation2 + $0x243] sm:$0xff] }
 0x1d5   :  { %15839 = vmatprep.mubr.msk.f32.mxu1 %vm20418_vm2, %v20417_v1 }
 0x1d7   :  { %16700 = vmatmul.mubr.msk.f32.gmra.mrb[16].mxu0 %vm45_vm1, %v3470_v32  ;;  %v366_v32 = vld [vmem:[#allocation2 + $0x101] sm:$0xff] }
 0x1d8   :  { %16702 = vmatprep.mubr.msk.f32.mxu0 %vm20418_vm2, %v20417_v1  ;;  %15840 = vmatmul.mubr.msk.f32.gmra.mrb[64].mxu1 %vm45_vm1, %v366_v32  ;;  %v3533_v32 = vld [vmem:[#allocation2 + $0x24b] sm:$0xff] }
 0x1d9   :  { %15842 = vmatprep.mubr.msk.f32.mxu1 %vm20418_vm2, %v20417_v1 }
 0x1db   :  { %16703 = vmatmul.mubr.msk.f32.gmra.mrb[18].mxu0 %vm45_vm1, %v3471_v34  ;;  %v367_v34 = vld [vmem:[#allocation2 + $0x109] sm:$0xff] }
 0x1dc   :  { %16705 = vmatprep.mubr.msk.f32.mxu0 %vm20418_vm2, %v20417_v1  ;;  %15843 = vmatmul.mubr.msk.f32.gmra.mrb[66].mxu1 %vm45_vm1, %v367_v34  ;;  %v3534_v34 = vld [vmem:[#allocation2 + $0x253] sm:$0xff] }
 0x1dd   :  { %15845 = vmatprep.mubr.msk.f32.mxu1 %vm20418_vm2, %v20417_v1 }
 0x1df   :  { %16706 = vmatmul.mubr.msk.f32.gmra.mrb[20].mxu0 %vm45_vm1, %v3472_v36  ;;  %v368_v36 = vld [vmem:[#allocation2 + $0x111] sm:$0xff] }
 0x1e0   :  { %16708 = vmatprep.mubr.msk.f32.mxu0 %vm20418_vm2, %v20417_v1  ;;  %15846 = vmatmul.mubr.msk.f32.gmra.mrb[68].mxu1 %vm45_vm1, %v368_v36  ;;  %v3535_v36 = vld [vmem:[#allocation2 + $0x25b] sm:$0xff] }
 0x1e1   :  { %15848 = vmatprep.mubr.msk.f32.mxu1 %vm20418_vm2, %v20417_v1 }
 0x1e3   :  { %16709 = vmatmul.mubr.msk.f32.gmra.mrb[22].mxu0 %vm45_vm1, %v3473_v38  ;;  %v369_v38 = vld [vmem:[#allocation2 + $0x119] sm:$0xff] }
 0x1e4   :  { %16711 = vmatprep.mubr.msk.f32.mxu0 %vm20418_vm2, %v20417_v1  ;;  %15849 = vmatmul.mubr.msk.f32.gmra.mrb[70].mxu1 %vm45_vm1, %v369_v38  ;;  %v3536_v38 = vld [vmem:[#allocation2 + $0x263] sm:$0xff] }
 0x1e5   :  { %15851 = vmatprep.mubr.msk.f32.mxu1 %vm20418_vm2, %v20417_v1 }
 0x1e7   :  { %16712 = vmatmul.mubr.msk.f32.gmra.mrb[24].mxu0 %vm45_vm1, %v3474_v40  ;;  %v370_v40 = vld [vmem:[#allocation2 + $0x121] sm:$0xff] }
 0x1e8   :  { %16714 = vmatprep.mubr.msk.f32.mxu0 %vm20418_vm2, %v20417_v1  ;;  %15852 = vmatmul.mubr.msk.f32.gmra.mrb[72].mxu1 %vm45_vm1, %v370_v40  ;;  %v3537_v40 = vld [vmem:[#allocation2 + $0x26b] sm:$0xff] }
 0x1e9   :  { %15854 = vmatprep.mubr.msk.f32.mxu1 %vm20418_vm2, %v20417_v1 }
 0x1eb   :  { %16715 = vmatmul.mubr.msk.f32.gmra.mrb[26].mxu0 %vm45_vm1, %v3475_v42  ;;  %v371_v42 = vld [vmem:[#allocation2 + $0x129] sm:$0xff] }
 0x1ec   :  { %16717 = vmatprep.mubr.msk.f32.mxu0 %vm20418_vm2, %v20417_v1  ;;  %15855 = vmatmul.mubr.msk.f32.gmra.mrb[74].mxu1 %vm45_vm1, %v371_v42  ;;  %v3538_v42 = vld [vmem:[#allocation2 + $0x273] sm:$0x3] }
 0x1ed   :  { %15857 = vmatprep.mubr.msk.f32.mxu1 %vm20418_vm2, %v20417_v1 }
 0x1ef   :  { %16718 = vmatmul.mubr.msk.f32.gmra.mrb[28].mxu0 %vm45_vm1, %v3476_v44  ;;  %v3508_v44 = vld [vmem:[#allocation2 + $0x183] sm:$0xff] }
 0x1f0   :  { %16720 = vmatprep.mubr.msk.f32.mxu0 %vm20418_vm2, %v20417_v1  ;;  %15858 = vmatmul.mubr.msk.f32.gmra.mrb[76].mxu1 %vm45_vm1, %v372_v45  ;;  %v14114_v45 = vld [vmem:[%s25103_s1 + $0x18] sm:$0xf] }
 0x1f1   :  { %15860 = vmatprep.mubr.msk.f32.mxu1 %vm20418_vm2, %v20417_v1 }
 0x1f3   :  { %16721 = vmatmul.mubr.msk.f32.gmra.mrb[30].mxu0 %vm45_vm1, %v3477_v46  ;;  %v373_v46 = vld [vmem:[#allocation2 + $0x139] sm:$0xff] }
 0x1f4   :  { %16723 = vmatprep.mubr.msk.f32.mxu0 %vm20418_vm2, %v20417_v1  ;;  %15861 = vmatmul.mubr.msk.f32.gmra.mrb[78].mxu1 %vm45_vm1, %v373_v46  ;;  %v404_v46 = vld [vmem:[#allocation2 + $0x231] sm:$0xff] }
 0x1f5   :  { %15863 = vmatprep.mubr.msk.f32.mxu1 %vm20418_vm2, %v20417_v1 }
 0x1f7   :  { %16724 = vmatmul.mubr.msk.f32.gmra.mrb[32].mxu0 %vm45_vm1, %v3478_v48  ;;  %v374_v48 = vld [vmem:[#allocation2 + $0x141] sm:$0xff] }
 0x1f8   :  { %16726 = vmatprep.mubr.msk.f32.mxu0 %vm20418_vm2, %v20417_v1  ;;  %15864 = vmatmul.mubr.msk.f32.gmra.mrb[80].mxu1 %vm45_vm1, %v374_v48  ;;  %v405_v48 = vld [vmem:[#allocation2 + $0x239] sm:$0xff] }
 0x1f9   :  { %15866 = vmatprep.mubr.msk.f32.mxu1 %vm20418_vm2, %v20417_v1 }
 0x1fb   :  { %16727 = vmatmul.mubr.msk.f32.gmra.mrb[34].mxu0 %vm45_vm1, %v3479_v50  ;;  %v375_v50 = vld [vmem:[#allocation2 + $0x149] sm:$0xff] }
 0x1fc   :  { %16729 = vmatprep.mubr.msk.f32.mxu0 %vm20418_vm2, %v20417_v1  ;;  %15867 = vmatmul.mubr.msk.f32.gmra.mrb[82].mxu1 %vm45_vm1, %v375_v50  ;;  %v406_v50 = vld [vmem:[#allocation2 + $0x241] sm:$0xff] }
 0x1fd   :  { %15869 = vmatprep.mubr.msk.f32.mxu1 %vm20418_vm2, %v20417_v1 }
 0x1ff   :  { %16730 = vmatmul.mubr.msk.f32.gmra.mrb[36].mxu0 %vm45_vm1, %v3480_v52  ;;  %v376_v52 = vld [vmem:[#allocation2 + $0x151] sm:$0xff] }
 0x200   :  { %16732 = vmatprep.mubr.msk.f32.mxu0 %vm20418_vm2, %v20417_v1  ;;  %15870 = vmatmul.mubr.msk.f32.gmra.mrb[84].mxu1 %vm45_vm1, %v376_v52  ;;  %v407_v52 = vld [vmem:[#allocation2 + $0x249] sm:$0xff] }
 0x201   :  { %15872 = vmatprep.mubr.msk.f32.mxu1 %vm20418_vm2, %v20417_v1 }
 0x203   :  { %16733 = vmatmul.mubr.msk.f32.gmra.mrb[38].mxu0 %vm45_vm1, %v3481_v54  ;;  %v377_v54 = vld [vmem:[#allocation2 + $0x159] sm:$0xff] }
 0x204   :  { %16735 = vmatprep.mubr.msk.f32.mxu0 %vm20418_vm2, %v20417_v1  ;;  %15873 = vmatmul.mubr.msk.f32.gmra.mrb[86].mxu1 %vm45_vm1, %v377_v54  ;;  %v408_v54 = vld [vmem:[#allocation2 + $0x251] sm:$0xff] }
 0x205   :  { %15875 = vmatprep.mubr.msk.f32.mxu1 %vm20418_vm2, %v20417_v1 }
 0x207   :  { %16736 = vmatmul.mubr.msk.f32.gmra.mrb[40].mxu0 %vm45_vm1, %v3482_v56  ;;  %v378_v56 = vld [vmem:[#allocation2 + $0x161] sm:$0xff] }
 0x208   :  { %16738 = vmatprep.mubr.msk.f32.mxu0 %vm20418_vm2, %v20417_v1  ;;  %15876 = vmatmul.mubr.msk.f32.gmra.mrb[88].mxu1 %vm45_vm1, %v378_v56  ;;  %v409_v56 = vld [vmem:[#allocation2 + $0x259] sm:$0xff] }
 0x209   :  { %15878 = vmatprep.mubr.msk.f32.mxu1 %vm20418_vm2, %v20417_v1 }
 0x20b   :  { %16739 = vmatmul.mubr.msk.f32.gmra.mrb[42].mxu0 %vm45_vm1, %v3483_v58  ;;  %v379_v58 = vld [vmem:[#allocation2 + $0x169] sm:$0xff] }
 0x20c   :  { %16741 = vmatprep.mubr.msk.f32.mxu0 %vm20418_vm2, %v20417_v1  ;;  %15879 = vmatmul.mubr.msk.f32.gmra.mrb[90].mxu1 %vm45_vm1, %v379_v58  ;;  %v410_v58 = vld [vmem:[#allocation2 + $0x261] sm:$0x3] }
 0x20d   :  { %15881 = vmatprep.mubr.msk.f32.mxu1 %vm20418_vm2, %v20417_v1 }
 0x20f   :  { %16742 = vmatmul.mubr.msk.f32.gmra.mrb[44].mxu0 %vm45_vm1, %v3484_v60  ;;  %v380_v60 = vld [vmem:[#allocation2 + $0x171] sm:$0xff] }
 0x210   :  { %16744 = vmatprep.mubr.msk.f32.mxu0 %vm20418_vm2, %v20417_v1  ;;  %15882 = vmatmul.mubr.msk.f32.gmra.mrb[92].mxu1 %vm45_vm1, %v380_v60  ;;  %v333_v60 = vld [vmem:[%s25103_s1] sm:$0xf] }
 0x211   :  { %15884 = vmatprep.mubr.msk.f32.mxu1 %vm20418_vm2, %v20417_v1  ;;  %15975 = vmatpush3.msk.msra.mxu1 %vm644_vm0, %v333_v60  ;;  %v22070_v60 = vld [vmem:[#allocation2 + $0x12c] sm:$0xff] }
 0x212   :  { %18747 = vmatprep.subr.mxu1 %v20417_v1 }
 0x213   :  { %16745 = vmatmul.mubr.msk.f32.gmra.mrb[46].mxu0 %vm45_vm1, %v3485_v62  ;;  %v381_v62 = vld [vmem:[#allocation2 + $0x179] sm:$0xff] }
 0x214   :  { %16747 = vmatprep.mubr.msk.f32.mxu0 %vm20418_vm2, %v20417_v1  ;;  %15885 = vmatmul.mubr.msk.f32.gmra.mrb[94].mxu1 %vm45_vm1, %v381_v62  ;;  %v21820_v62 = vld [vmem:[#allocation2 + $0x54] sm:$0xff] }
 0x215   :  { %15887 = vmatprep.mubr.msk.f32.mxu1 %vm20418_vm2, %v20417_v1 }
 0x217   :  { %16748 = vmatmul.mubr.msk.f32.gmra.mrb[48].mxu0 %vm45_vm1, %v3486_v0  ;;  %v382_v0 = vld [vmem:[#allocation2 + $0x181] sm:$0xff] }
 0x218   :  { %16750 = vmatprep.mubr.msk.f32.mxu0 %vm20418_vm2, %v20417_v1  ;;  %15888 = vmatmul.mubr.msk.f32.gmra.mrb[96].mxu1 %vm45_vm1, %v382_v0  ;;  %v257_v0 = vld [vmem:[#allocation2 + $0x8] sm:$0xff] }
 0x219   :  { %15890 = vmatprep.mubr.msk.f32.mxu1 %vm20418_vm2, %v20417_v1 }
 0x21b   :  { %16751 = vmatmul.mubr.msk.f32.gmra.mrb[50].mxu0 %vm45_vm1, %v3487_v3  ;;  %v383_v3 = vld [vmem:[#allocation2 + $0x189] sm:$0xff] }
 0x21c   :  { %16753 = vmatprep.mubr.msk.f32.mxu0 %vm20418_vm2, %v20417_v1  ;;  %15891 = vmatmul.mubr.msk.f32.gmra.mrb[98].mxu1 %vm45_vm1, %v383_v3  ;;  %v258_v3 = vld [vmem:[#allocation2 + $0x10] sm:$0xff] }
 0x21d   :  { %15893 = vmatprep.mubr.msk.f32.mxu1 %vm20418_vm2, %v20417_v1 }
 0x21f   :  { %16754 = vmatmul.mubr.msk.f32.gmra.mrb[52].mxu0 %vm45_vm1, %v3488_v5  ;;  %v384_v5 = vld [vmem:[#allocation2 + $0x191] sm:$0xff] }
 0x220   :  { %16756 = vmatprep.mubr.msk.f32.mxu0 %vm20418_vm2, %v20417_v1  ;;  %15894 = vmatmul.mubr.msk.f32.gmra.mrb[100].mxu1 %vm45_vm1, %v384_v5  ;;  %v259_v5 = vld [vmem:[#allocation2 + $0x18] sm:$0xff] }
 0x221   :  { %15896 = vmatprep.mubr.msk.f32.mxu1 %vm20418_vm2, %v20417_v1 }
 0x223   :  { %16757 = vmatmul.mubr.msk.f32.gmra.mrb[54].mxu0 %vm45_vm1, %v3489_v7  ;;  %v385_v7 = vld [vmem:[#allocation2 + $0x199] sm:$0xff] }
 0x224   :  { %16759 = vmatprep.mubr.msk.f32.mxu0 %vm20418_vm2, %v20417_v1  ;;  %15897 = vmatmul.mubr.msk.f32.gmra.mrb[102].mxu1 %vm45_vm1, %v385_v7  ;;  %v260_v7 = vld [vmem:[#allocation2 + $0x20] sm:$0xff] }
 0x225   :  { %15899 = vmatprep.mubr.msk.f32.mxu1 %vm20418_vm2, %v20417_v1 }
 0x227   :  { %16760 = vmatmul.mubr.msk.f32.gmra.mrb[56].mxu0 %vm45_vm1, %v3490_v9  ;;  %v386_v9 = vld [vmem:[#allocation2 + $0x1a1] sm:$0xff] }
 0x228   :  { %16762 = vmatprep.mubr.msk.f32.mxu0 %vm20418_vm2, %v20417_v1  ;;  %15900 = vmatmul.mubr.msk.f32.gmra.mrb[104].mxu1 %vm45_vm1, %v386_v9  ;;  %v261_v9 = vld [vmem:[#allocation2 + $0x28] sm:$0xff] }
 0x229   :  { %15902 = vmatprep.mubr.msk.f32.mxu1 %vm20418_vm2, %v20417_v1 }
 0x22b   :  { %16763 = vmatmul.mubr.msk.f32.gmra.mrb[58].mxu0 %vm45_vm1, %v3491_v11  ;;  %v387_v11 = vld [vmem:[#allocation2 + $0x1a9] sm:$0xff] }
 0x22c   :  { %16765 = vmatprep.mubr.msk.f32.mxu0 %vm20418_vm2, %v20417_v1  ;;  %15903 = vmatmul.mubr.msk.f32.gmra.mrb[106].mxu1 %vm45_vm1, %v387_v11  ;;  %v262_v11 = vld [vmem:[#allocation2 + $0x30] sm:$0xff] }
 0x22d   :  { %15905 = vmatprep.mubr.msk.f32.mxu1 %vm20418_vm2, %v20417_v1 }
 0x22f   :  { %16766 = vmatmul.mubr.msk.f32.gmra.mrb[60].mxu0 %vm45_vm1, %v3492_v13  ;;  %v388_v13 = vld [vmem:[#allocation2 + $0x1b1] sm:$0xff] }
 0x230   :  { %16768 = vmatprep.mubr.msk.f32.mxu0 %vm20418_vm2, %v20417_v1  ;;  %15906 = vmatmul.mubr.msk.f32.gmra.mrb[108].mxu1 %vm45_vm1, %v388_v13  ;;  %v263_v13 = vld [vmem:[#allocation2 + $0x38] sm:$0xff] }
 0x231   :  { %15908 = vmatprep.mubr.msk.f32.mxu1 %vm20418_vm2, %v20417_v1 }
 0x233   :  { %16769 = vmatmul.mubr.msk.f32.gmra.mrb[62].mxu0 %vm45_vm1, %v3493_v15  ;;  %v389_v15 = vld [vmem:[#allocation2 + $0x1b9] sm:$0xff] }
 0x234   :  { %16771 = vmatprep.mubr.msk.f32.mxu0 %vm20418_vm2, %v20417_v1  ;;  %15909 = vmatmul.mubr.msk.f32.gmra.mrb[110].mxu1 %vm45_vm1, %v389_v15  ;;  %v264_v15 = vld [vmem:[#allocation2 + $0x40] sm:$0xff] }
 0x235   :  { %15911 = vmatprep.mubr.msk.f32.mxu1 %vm20418_vm2, %v20417_v1 }
 0x237   :  { %16772 = vmatmul.mubr.msk.f32.gmra.mrb[64].mxu0 %vm45_vm1, %v3494_v17  ;;  %v390_v17 = vld [vmem:[#allocation2 + $0x1c1] sm:$0xff] }
 0x238   :  { %16774 = vmatprep.mubr.msk.f32.mxu0 %vm20418_vm2, %v20417_v1  ;;  %15912 = vmatmul.mubr.msk.f32.gmra.mrb[112].mxu1 %vm45_vm1, %v390_v17  ;;  %v265_v17 = vld [vmem:[#allocation2 + $0x48] sm:$0xff] }
 0x239   :  { %15914 = vmatprep.mubr.msk.f32.mxu1 %vm20418_vm2, %v20417_v1 }
 0x23b   :  { %16775 = vmatmul.mubr.msk.f32.gmra.mrb[66].mxu0 %vm45_vm1, %v3495_v19  ;;  %v391_v19 = vld [vmem:[#allocation2 + $0x1c9] sm:$0xff] }
 0x23c   :  { %16777 = vmatprep.mubr.msk.f32.mxu0 %vm20418_vm2, %v20417_v1  ;;  %15915 = vmatmul.mubr.msk.f32.gmra.mrb[114].mxu1 %vm45_vm1, %v391_v19  ;;  %v266_v19 = vld [vmem:[#allocation2 + $0x50] sm:$0xff] }
 0x23d   :  { %15917 = vmatprep.mubr.msk.f32.mxu1 %vm20418_vm2, %v20417_v1 }
 0x23f   :  { %16778 = vmatmul.mubr.msk.f32.gmra.mrb[68].mxu0 %vm45_vm1, %v3496_v21  ;;  %v392_v21 = vld [vmem:[#allocation2 + $0x1d1] sm:$0xff] }
 0x240   :  { %16780 = vmatprep.mubr.msk.f32.mxu0 %vm20418_vm2, %v20417_v1  ;;  %15918 = vmatmul.mubr.msk.f32.gmra.mrb[116].mxu1 %vm45_vm1, %v392_v21  ;;  %v267_v21 = vld [vmem:[#allocation2 + $0x58] sm:$0xff] }
 0x241   :  { %15920 = vmatprep.mubr.msk.f32.mxu1 %vm20418_vm2, %v20417_v1 }
 0x243   :  { %16781 = vmatmul.mubr.msk.f32.gmra.mrb[70].mxu0 %vm45_vm1, %v3497_v23  ;;  %v393_v23 = vld [vmem:[#allocation2 + $0x1d9] sm:$0xff] }
 0x244   :  { %16783 = vmatprep.mubr.msk.f32.mxu0 %vm20418_vm2, %v20417_v1  ;;  %15921 = vmatmul.mubr.msk.f32.gmra.mrb[118].mxu1 %vm45_vm1, %v393_v23  ;;  %v268_v23 = vld [vmem:[#allocation2 + $0x60] sm:$0xff] }
 0x245   :  { %15923 = vmatprep.mubr.msk.f32.mxu1 %vm20418_vm2, %v20417_v1 }
 0x247   :  { %16784 = vmatmul.mubr.msk.f32.gmra.mrb[72].mxu0 %vm45_vm1, %v3498_v25  ;;  %v394_v25 = vld [vmem:[#allocation2 + $0x1e1] sm:$0xff] }
 0x248   :  { %16786 = vmatprep.mubr.msk.f32.mxu0 %vm20418_vm2, %v20417_v1  ;;  %15924 = vmatmul.mubr.msk.f32.gmra.mrb[120].mxu1 %vm45_vm1, %v394_v25  ;;  %v269_v25 = vld [vmem:[#allocation2 + $0x68] sm:$0xff] }
 0x249   :  { %15926 = vmatprep.mubr.msk.f32.mxu1 %vm20418_vm2, %v20417_v1 }
 0x24b   :  { %16787 = vmatmul.mubr.msk.f32.gmra.mrb[74].mxu0 %vm45_vm1, %v3499_v27  ;;  %v395_v27 = vld [vmem:[#allocation2 + $0x1e9] sm:$0xff] }
 0x24c   :  { %16789 = vmatprep.mubr.msk.f32.mxu0 %vm20418_vm2, %v20417_v1  ;;  %15927 = vmatmul.mubr.msk.f32.gmra.mrb[122].mxu1 %vm45_vm1, %v395_v27  ;;  %v270_v27 = vld [vmem:[#allocation2 + $0x70] sm:$0xff] }
 0x24d   :  { %15929 = vmatprep.mubr.msk.f32.mxu1 %vm20418_vm2, %v20417_v1 }
 0x24f   :  { %16790 = vmatmul.mubr.msk.f32.gmra.mrb[76].mxu0 %vm45_vm1, %v3500_v29  ;;  %v396_v29 = vld [vmem:[#allocation2 + $0x1f1] sm:$0xff] }
 0x250   :  { %16792 = vmatprep.mubr.msk.f32.mxu0 %vm20418_vm2, %v20417_v1  ;;  %15930 = vmatmul.mubr.msk.f32.gmra.mrb[124].mxu1 %vm45_vm1, %v396_v29  ;;  %v271_v29 = vld [vmem:[#allocation2 + $0x78] sm:$0xff] }
 0x251   :  { %15932 = vmatprep.mubr.msk.f32.mxu1 %vm20418_vm2, %v20417_v1 }
 0x253   :  { %16793 = vmatmul.mubr.msk.f32.gmra.mrb[78].mxu0 %vm45_vm1, %v3501_v31  ;;  %v397_v31 = vld [vmem:[#allocation2 + $0x1f9] sm:$0xff] }
 0x254   :  { %16795 = vmatprep.mubr.msk.f32.mxu0 %vm20418_vm2, %v20417_v1  ;;  %15933 = vmatmul.mubr.msk.f32.gmra.mrb[126].mxu1 %vm45_vm1, %v397_v31  ;;  %v272_v31 = vld [vmem:[#allocation2 + $0x80] sm:$0xff] }
 0x255   :  { %15935 = vmatprep.mubr.msk.f32.mxu1 %vm20418_vm2, %v20417_v1 }
 0x257   :  { %16796 = vmatmul.mubr.msk.f32.gmra.mrb[80].mxu0 %vm45_vm1, %v3502_v33  ;;  %v398_v33 = vld [vmem:[#allocation2 + $0x201] sm:$0xff] }
 0x258   :  { %16798 = vmatprep.mubr.msk.f32.mxu0 %vm20418_vm2, %v20417_v1  ;;  %15936 = vmatmul.mubr.msk.f32.gmra.mrb[128].mxu1 %vm45_vm1, %v398_v33  ;;  %v273_v33 = vld [vmem:[#allocation2 + $0x88] sm:$0xff] }
 0x259   :  { %15938 = vmatprep.mubr.msk.f32.mxu1 %vm20418_vm2, %v20417_v1 }
 0x25b   :  { %16799 = vmatmul.mubr.msk.f32.gmra.mrb[82].mxu0 %vm45_vm1, %v3503_v35  ;;  %v399_v35 = vld [vmem:[#allocation2 + $0x209] sm:$0xff] }
 0x25c   :  { %16801 = vmatprep.mubr.msk.f32.mxu0 %vm20418_vm2, %v20417_v1  ;;  %15939 = vmatmul.mubr.msk.f32.gmra.mrb[130].mxu1 %vm45_vm1, %v399_v35  ;;  %v274_v35 = vld [vmem:[#allocation2 + $0x90] sm:$0xff] }
 0x25d   :  { %15941 = vmatprep.mubr.msk.f32.mxu1 %vm20418_vm2, %v20417_v1 }
 0x25f   :  { %16802 = vmatmul.mubr.msk.f32.gmra.mrb[84].mxu0 %vm45_vm1, %v3504_v37  ;;  %v400_v37 = vld [vmem:[#allocation2 + $0x211] sm:$0xff] }
 0x260   :  { %16804 = vmatprep.mubr.msk.f32.mxu0 %vm20418_vm2, %v20417_v1  ;;  %15942 = vmatmul.mubr.msk.f32.gmra.mrb[132].mxu1 %vm45_vm1, %v400_v37  ;;  %v275_v37 = vld [vmem:[#allocation2 + $0x98] sm:$0xff] }
 0x261   :  { %15944 = vmatprep.mubr.msk.f32.mxu1 %vm20418_vm2, %v20417_v1 }
 0x263   :  { %16805 = vmatmul.mubr.msk.f32.gmra.mrb[86].mxu0 %vm45_vm1, %v3505_v39  ;;  %v401_v39 = vld [vmem:[#allocation2 + $0x219] sm:$0xff] }
 0x264   :  { %16807 = vmatprep.mubr.msk.f32.mxu0 %vm20418_vm2, %v20417_v1  ;;  %15945 = vmatmul.mubr.msk.f32.gmra.mrb[134].mxu1 %vm45_vm1, %v401_v39  ;;  %v276_v39 = vld [vmem:[#allocation2 + $0xa0] sm:$0xff] }
 0x265   :  { %15947 = vmatprep.mubr.msk.f32.mxu1 %vm20418_vm2, %v20417_v1 }
 0x267   :  { %16808 = vmatmul.mubr.msk.f32.gmra.mrb[88].mxu0 %vm45_vm1, %v3506_v41  ;;  %v402_v41 = vld [vmem:[#allocation2 + $0x221] sm:$0xff] }
 0x268   :  { %16810 = vmatprep.mubr.msk.f32.mxu0 %vm20418_vm2, %v20417_v1  ;;  %15948 = vmatmul.mubr.msk.f32.gmra.mrb[136].mxu1 %vm45_vm1, %v402_v41  ;;  %v277_v41 = vld [vmem:[#allocation2 + $0xa8] sm:$0xff] }
 0x269   :  { %15950 = vmatprep.mubr.msk.f32.mxu1 %vm20418_vm2, %v20417_v1 }
 0x26b   :  { %16811 = vmatmul.mubr.msk.f32.gmra.mrb[90].mxu0 %vm45_vm1, %v3507_v43  ;;  %v403_v43 = vld [vmem:[#allocation2 + $0x229] sm:$0xff] }
 0x26c   :  { %16813 = vmatprep.mubr.msk.f32.mxu0 %vm20418_vm2, %v20417_v1  ;;  %15951 = vmatmul.mubr.msk.f32.gmra.mrb[138].mxu1 %vm45_vm1, %v403_v43  ;;  %v278_v43 = vld [vmem:[#allocation2 + $0xb0] sm:$0xff] }
 0x26d   :  { %15953 = vmatprep.mubr.msk.f32.mxu1 %vm20418_vm2, %v20417_v1 }
 0x26f   :  { %16814 = vmatmul.mubr.msk.f32.gmra.mrb[92].mxu0 %vm45_vm1, %v3508_v44  ;;  %v4302_v44 = vld [vmem:[#allocation2 + $0x14] sm:$0xff] }
 0x270   :  { %16816 = vmatprep.mubr.msk.f32.mxu0 %vm20418_vm2, %v20417_v1  ;;  %15954 = vmatmul.mubr.msk.f32.gmra.mrb[140].mxu1 %vm45_vm1, %v404_v46  ;;  %v22034_v46 = vld [vmem:[#allocation2 + $0x10c] sm:$0xff] }
 0x271   :  { %15956 = vmatprep.mubr.msk.f32.mxu1 %vm20418_vm2, %v20417_v1 }
 0x273   :  { %16817 = vmatmul.mubr.msk.f32.gmra.mrb[94].mxu0 %vm45_vm1, %v3509_v47  ;;  %v4303_v47 = vld [vmem:[#allocation2 + $0x1c] sm:$0xff] }
 0x274   :  { %16819 = vmatprep.mubr.msk.f32.mxu0 %vm20418_vm2, %v20417_v1  ;;  %15957 = vmatmul.mubr.msk.f32.gmra.mrb[142].mxu1 %vm45_vm1, %v405_v48  ;;  %v22043_v48 = vld [vmem:[#allocation2 + $0x114] sm:$0xff] }
 0x275   :  { %15959 = vmatprep.mubr.msk.f32.mxu1 %vm20418_vm2, %v20417_v1 }
 0x277   :  { %16820 = vmatmul.mubr.msk.f32.gmra.mrb[96].mxu0 %vm45_vm1, %v3510_v49  ;;  %v21763_v49 = vld [vmem:[#allocation2 + $0x24] sm:$0xff] }
 0x278   :  { %16822 = vmatprep.mubr.msk.f32.mxu0 %vm20418_vm2, %v20417_v1  ;;  %15960 = vmatmul.mubr.msk.f32.gmra.mrb[144].mxu1 %vm45_vm1, %v406_v50  ;;  %v281_v50 = vld [vmem:[#allocation2 + $0xc8] sm:$0xff] }
 0x279   :  { %15962 = vmatprep.mubr.msk.f32.mxu1 %vm20418_vm2, %v20417_v1 }
 0x27b   :  { %16823 = vmatmul.mubr.msk.f32.gmra.mrb[98].mxu0 %vm45_vm1, %v3511_v51  ;;  %v21772_v51 = vld [vmem:[#allocation2 + $0x2c] sm:$0xff] }
 0x27c   :  { %16825 = vmatprep.mubr.msk.f32.mxu0 %vm20418_vm2, %v20417_v1  ;;  %15963 = vmatmul.mubr.msk.f32.gmra.mrb[146].mxu1 %vm45_vm1, %v407_v52  ;;  %v22052_v52 = vld [vmem:[#allocation2 + $0x11c] sm:$0xff] }
 0x27d   :  { %15965 = vmatprep.mubr.msk.f32.mxu1 %vm20418_vm2, %v20417_v1 }
 0x27f   :  { %16826 = vmatmul.mubr.msk.f32.gmra.mrb[100].mxu0 %vm45_vm1, %v3512_v53  ;;  %v21781_v53 = vld [vmem:[#allocation2 + $0x34] sm:$0xff] }
 0x280   :  { %16828 = vmatprep.mubr.msk.f32.mxu0 %vm20418_vm2, %v20417_v1  ;;  %15966 = vmatmul.mubr.msk.f32.gmra.mrb[148].mxu1 %vm45_vm1, %v408_v54  ;;  %v282_v54 = vld [vmem:[#allocation2 + $0xd0] sm:$0xff] }
 0x281   :  { %15968 = vmatprep.mubr.msk.f32.mxu1 %vm20418_vm2, %v20417_v1 }
 0x283   :  { %16829 = vmatmul.mubr.msk.f32.gmra.mrb[102].mxu0 %vm45_vm1, %v3513_v55  ;;  %v21790_v55 = vld [vmem:[#allocation2 + $0x3c] sm:$0xff] }
 0x284   :  { %16831 = vmatprep.mubr.msk.f32.mxu0 %vm20418_vm2, %v20417_v1  ;;  %15969 = vmatmul.mubr.msk.f32.gmra.mrb[150].mxu1 %vm45_vm1, %v409_v56  ;;  %v22061_v56 = vld [vmem:[#allocation2 + $0x124] sm:$0xff] }
 0x285   :  { %15971 = vmatprep.mubr.msk.f32.mxu1 %vm20418_vm2, %v20417_v1 }
 0x287   :  { %16832 = vmatmul.mubr.msk.f32.gmra.mrb[104].mxu0 %vm45_vm1, %v3514_v57  ;;  %v21799_v57 = vld [vmem:[#allocation2 + $0x44] sm:$0xff] }
 0x288   :  { %16834 = vmatprep.mubr.msk.f32.mxu0 %vm20418_vm2, %v20417_v1  ;;  %15972 = vmatmul.mubr.msk.f32.gmra.mrb[152].mxu1 %vm45_vm1, %v410_v58  ;;  %v283_v58 = vld [vmem:[#allocation2 + $0xd8] sm:$0xff] }
 0x289   :  { %15976 = vmatprep.mubr.msk.f32.mxu1 %vm20418_vm2, %v20417_v1 }
 0x28b   :  { %16835 = vmatmul.mubr.msk.f32.gmra.mrb[106].mxu0 %vm45_vm1, %v3515_v59  ;;  %v21808_v59 = vld [vmem:[#allocation2 + $0x4c] sm:$0xff] }
 0x28c   :  { %16837 = vmatprep.mubr.msk.f32.mxu0 %vm20418_vm2, %v20417_v1 }
 0x28f   :  { %16838 = vmatmul.mubr.msk.f32.gmra.mrb[108].mxu0 %vm45_vm1, %v3516_v61  ;;  %v256_v61 = vld [vmem:[#allocation2] sm:$0xff] }
 0x290   :  { %16840 = vmatprep.mubr.msk.f32.mxu0 %vm20418_vm2, %v20417_v1  ;;  %15977 = vmatmul.mubr.msk.f32.vlgmr.msra.gmra.mrb[0].mxu1 %vm45_vm1, %v256_v61  ;;  %v284_v61 = vld [vmem:[#allocation2 + $0xe0] sm:$0xff] }
 0x291   :  { %15979 = vmatprep.mubr.msk.f32.mxu1 %vm20418_vm2, %v20417_v1 }
 0x293   :  { %16841 = vmatmul.mubr.msk.f32.gmra.mrb[110].mxu0 %vm45_vm1, %v3517_v63  ;;  %v20390_v63 = vld [vmem:[%s25103_s1 + $0x8] sm:$0xf] }
 0x294   :  { %16843 = vmatprep.mubr.msk.f32.mxu0 %vm20418_vm2, %v20417_v1  ;;  %18748 = vmatpush3.msk.msra.mxu1 %vm644_vm0, %v20390_v63  ;;  %v22079_v63 = vld [vmem:[#allocation2 + $0x134] sm:$0xff] }
 0x295   :  { %17838 = vmatprep.subr.mxu1 %v20417_v1  ;;  %15980 = vmatmul.mubr.msk.f32.gmra.mrb[2].mxu1 %vm45_vm1, %v257_v0  ;;  %v285_v0 = vld [vmem:[#allocation2 + $0xe8] sm:$0xff] }
 0x296   :  { %15982 = vmatprep.mubr.msk.f32.mxu1 %vm20418_vm2, %v20417_v1 }
 0x297   :  { %16844 = vmatmul.mubr.msk.f32.gmra.mrb[112].mxu0 %vm45_vm1, %v3518_v2  ;;  %v21836_v2 = vld [vmem:[#allocation2 + $0x5c] sm:$0xff] }
 0x298   :  { %16846 = vmatprep.mubr.msk.f32.mxu0 %vm20418_vm2, %v20417_v1 }
 0x299   :  { %15983 = vmatmul.mubr.msk.f32.gmra.mrb[4].mxu1 %vm45_vm1, %v258_v3  ;;  %v22088_v3 = vld [vmem:[#allocation2 + $0x13c] sm:$0xff] }
 0x29a   :  { %15985 = vmatprep.mubr.msk.f32.mxu1 %vm20418_vm2, %v20417_v1 }
 0x29b   :  { %16847 = vmatmul.mubr.msk.f32.gmra.mrb[114].mxu0 %vm45_vm1, %v3519_v4  ;;  %v21845_v4 = vld [vmem:[#allocation2 + $0x64] sm:$0xff] }
 0x29c   :  { %16849 = vmatprep.mubr.msk.f32.mxu0 %vm20418_vm2, %v20417_v1 }
 0x29d   :  { %15986 = vmatmul.mubr.msk.f32.gmra.mrb[6].mxu1 %vm45_vm1, %v259_v5  ;;  %v286_v5 = vld [vmem:[#allocation2 + $0xf0] sm:$0xff] }
 0x29e   :  { %15988 = vmatprep.mubr.msk.f32.mxu1 %vm20418_vm2, %v20417_v1 }
 0x29f   :  { %16850 = vmatmul.mubr.msk.f32.gmra.mrb[116].mxu0 %vm45_vm1, %v3520_v6  ;;  %v21854_v6 = vld [vmem:[#allocation2 + $0x6c] sm:$0xff] }
 0x2a0   :  { %16852 = vmatprep.mubr.msk.f32.mxu0 %vm20418_vm2, %v20417_v1 }
 0x2a1   :  { %15989 = vmatmul.mubr.msk.f32.gmra.mrb[8].mxu1 %vm45_vm1, %v260_v7  ;;  %v22097_v7 = vld [vmem:[#allocation2 + $0x144] sm:$0xff] }
 0x2a2   :  { %15991 = vmatprep.mubr.msk.f32.mxu1 %vm20418_vm2, %v20417_v1 }
 0x2a3   :  { %16853 = vmatmul.mubr.msk.f32.gmra.mrb[118].mxu0 %vm45_vm1, %v3521_v8  ;;  %v21863_v8 = vld [vmem:[#allocation2 + $0x74] sm:$0xff] }
 0x2a4   :  { %16855 = vmatprep.mubr.msk.f32.mxu0 %vm20418_vm2, %v20417_v1 }
 0x2a5   :  { %15992 = vmatmul.mubr.msk.f32.gmra.mrb[10].mxu1 %vm45_vm1, %v261_v9  ;;  %v287_v9 = vld [vmem:[#allocation2 + $0xf8] sm:$0xff] }
 0x2a6   :  { %15994 = vmatprep.mubr.msk.f32.mxu1 %vm20418_vm2, %v20417_v1 }
 0x2a7   :  { %16856 = vmatmul.mubr.msk.f32.gmra.mrb[120].mxu0 %vm45_vm1, %v3522_v10  ;;  %v21872_v10 = vld [vmem:[#allocation2 + $0x7c] sm:$0xff] }
 0x2a8   :  { %16858 = vmatprep.mubr.msk.f32.mxu0 %vm20418_vm2, %v20417_v1 }
 0x2a9   :  { %15995 = vmatmul.mubr.msk.f32.gmra.mrb[12].mxu1 %vm45_vm1, %v262_v11  ;;  %v22106_v11 = vld [vmem:[#allocation2 + $0x14c] sm:$0xff] }
 0x2aa   :  { %15997 = vmatprep.mubr.msk.f32.mxu1 %vm20418_vm2, %v20417_v1 }
 0x2ab   :  { %16859 = vmatmul.mubr.msk.f32.gmra.mrb[122].mxu0 %vm45_vm1, %v3523_v12  ;;  %v21881_v12 = vld [vmem:[#allocation2 + $0x84] sm:$0xff] }
 0x2ac   :  { %16861 = vmatprep.mubr.msk.f32.mxu0 %vm20418_vm2, %v20417_v1 }
 0x2ad   :  { %15998 = vmatmul.mubr.msk.f32.gmra.mrb[14].mxu1 %vm45_vm1, %v263_v13  ;;  %v288_v13 = vld [vmem:[#allocation2 + $0x100] sm:$0xff] }
 0x2ae   :  { %16000 = vmatprep.mubr.msk.f32.mxu1 %vm20418_vm2, %v20417_v1 }
 0x2af   :  { %16862 = vmatmul.mubr.msk.f32.gmra.mrb[124].mxu0 %vm45_vm1, %v3524_v14  ;;  %v21890_v14 = vld [vmem:[#allocation2 + $0x8c] sm:$0xff] }
 0x2b0   :  { %16864 = vmatprep.mubr.msk.f32.mxu0 %vm20418_vm2, %v20417_v1 }
 0x2b1   :  { %16001 = vmatmul.mubr.msk.f32.gmra.mrb[16].mxu1 %vm45_vm1, %v264_v15  ;;  %v22115_v15 = vld [vmem:[#allocation2 + $0x154] sm:$0xff] }
 0x2b2   :  { %16003 = vmatprep.mubr.msk.f32.mxu1 %vm20418_vm2, %v20417_v1 }
 0x2b3   :  { %16865 = vmatmul.mubr.msk.f32.gmra.mrb[126].mxu0 %vm45_vm1, %v3525_v16  ;;  %v21899_v16 = vld [vmem:[#allocation2 + $0x94] sm:$0xff] }
 0x2b4   :  { %16867 = vmatprep.mubr.msk.f32.mxu0 %vm20418_vm2, %v20417_v1 }
 0x2b5   :  { %16004 = vmatmul.mubr.msk.f32.gmra.mrb[18].mxu1 %vm45_vm1, %v265_v17  ;;  %v289_v17 = vld [vmem:[#allocation2 + $0x108] sm:$0xff] }
 0x2b6   :  { %16006 = vmatprep.mubr.msk.f32.mxu1 %vm20418_vm2, %v20417_v1 }
 0x2b7   :  { %16868 = vmatmul.mubr.msk.f32.gmra.mrb[128].mxu0 %vm45_vm1, %v3526_v18  ;;  %v21908_v18 = vld [vmem:[#allocation2 + $0x9c] sm:$0xff] }
 0x2b8   :  { %16870 = vmatprep.mubr.msk.f32.mxu0 %vm20418_vm2, %v20417_v1 }
 0x2b9   :  { %16007 = vmatmul.mubr.msk.f32.gmra.mrb[20].mxu1 %vm45_vm1, %v266_v19  ;;  %v22124_v19 = vld [vmem:[#allocation2 + $0x15c] sm:$0xff] }
 0x2ba   :  { %16009 = vmatprep.mubr.msk.f32.mxu1 %vm20418_vm2, %v20417_v1 }
 0x2bb   :  { %16871 = vmatmul.mubr.msk.f32.gmra.mrb[130].mxu0 %vm45_vm1, %v3527_v20  ;;  %v21917_v20 = vld [vmem:[#allocation2 + $0xa4] sm:$0xff] }
 0x2bc   :  { %16873 = vmatprep.mubr.msk.f32.mxu0 %vm20418_vm2, %v20417_v1 }
 0x2bd   :  { %16010 = vmatmul.mubr.msk.f32.gmra.mrb[22].mxu1 %vm45_vm1, %v267_v21  ;;  %v290_v21 = vld [vmem:[#allocation2 + $0x110] sm:$0xff] }
 0x2be   :  { %16012 = vmatprep.mubr.msk.f32.mxu1 %vm20418_vm2, %v20417_v1 }
 0x2bf   :  { %16874 = vmatmul.mubr.msk.f32.gmra.mrb[132].mxu0 %vm45_vm1, %v3528_v22  ;;  %v21926_v22 = vld [vmem:[#allocation2 + $0xac] sm:$0xff] }
 0x2c0   :  { %16876 = vmatprep.mubr.msk.f32.mxu0 %vm20418_vm2, %v20417_v1 }
 0x2c1   :  { %16013 = vmatmul.mubr.msk.f32.gmra.mrb[24].mxu1 %vm45_vm1, %v268_v23  ;;  %v22133_v23 = vld [vmem:[#allocation2 + $0x164] sm:$0xff] }
 0x2c2   :  { %16015 = vmatprep.mubr.msk.f32.mxu1 %vm20418_vm2, %v20417_v1 }
 0x2c3   :  { %16877 = vmatmul.mubr.msk.f32.gmra.mrb[134].mxu0 %vm45_vm1, %v3529_v24  ;;  %v21935_v24 = vld [vmem:[#allocation2 + $0xb4] sm:$0xff] }
 0x2c4   :  { %16879 = vmatprep.mubr.msk.f32.mxu0 %vm20418_vm2, %v20417_v1 }
 0x2c5   :  { %16016 = vmatmul.mubr.msk.f32.gmra.mrb[26].mxu1 %vm45_vm1, %v269_v25  ;;  %v291_v25 = vld [vmem:[#allocation2 + $0x118] sm:$0xff] }
 0x2c6   :  { %16018 = vmatprep.mubr.msk.f32.mxu1 %vm20418_vm2, %v20417_v1 }
 0x2c7   :  { %16880 = vmatmul.mubr.msk.f32.gmra.mrb[136].mxu0 %vm45_vm1, %v3530_v26  ;;  %v21944_v26 = vld [vmem:[#allocation2 + $0xbc] sm:$0xff] }
 0x2c8   :  { %16882 = vmatprep.mubr.msk.f32.mxu0 %vm20418_vm2, %v20417_v1 }
 0x2c9   :  { %16019 = vmatmul.mubr.msk.f32.gmra.mrb[28].mxu1 %vm45_vm1, %v270_v27  ;;  %v22142_v27 = vld [vmem:[#allocation2 + $0x16c] sm:$0xff] }
 0x2ca   :  { %16021 = vmatprep.mubr.msk.f32.mxu1 %vm20418_vm2, %v20417_v1 }
 0x2cb   :  { %16883 = vmatmul.mubr.msk.f32.gmra.mrb[138].mxu0 %vm45_vm1, %v3531_v28  ;;  %v21953_v28 = vld [vmem:[#allocation2 + $0xc4] sm:$0xff] }
 0x2cc   :  { %16885 = vmatprep.mubr.msk.f32.mxu0 %vm20418_vm2, %v20417_v1 }
 0x2cd   :  { %16022 = vmatmul.mubr.msk.f32.gmra.mrb[30].mxu1 %vm45_vm1, %v271_v29  ;;  %v292_v29 = vld [vmem:[#allocation2 + $0x120] sm:$0xff] }
 0x2ce   :  { %16024 = vmatprep.mubr.msk.f32.mxu1 %vm20418_vm2, %v20417_v1 }
 0x2cf   :  { %16886 = vmatmul.mubr.msk.f32.gmra.mrb[140].mxu0 %vm45_vm1, %v3532_v30  ;;  %v21962_v30 = vld [vmem:[#allocation2 + $0xcc] sm:$0xff] }
 0x2d0   :  { %16888 = vmatprep.mubr.msk.f32.mxu0 %vm20418_vm2, %v20417_v1 }
 0x2d1   :  { %16025 = vmatmul.mubr.msk.f32.gmra.mrb[32].mxu1 %vm45_vm1, %v272_v31  ;;  %v22151_v31 = vld [vmem:[#allocation2 + $0x174] sm:$0xff] }
 0x2d2   :  { %16027 = vmatprep.mubr.msk.f32.mxu1 %vm20418_vm2, %v20417_v1 }
 0x2d3   :  { %16889 = vmatmul.mubr.msk.f32.gmra.mrb[142].mxu0 %vm45_vm1, %v3533_v32  ;;  %v21971_v32 = vld [vmem:[#allocation2 + $0xd4] sm:$0xff] }
 0x2d4   :  { %16891 = vmatprep.mubr.msk.f32.mxu0 %vm20418_vm2, %v20417_v1 }
 0x2d5   :  { %16028 = vmatmul.mubr.msk.f32.gmra.mrb[34].mxu1 %vm45_vm1, %v273_v33  ;;  %v293_v33 = vld [vmem:[#allocation2 + $0x128] sm:$0xff] }
 0x2d6   :  { %16030 = vmatprep.mubr.msk.f32.mxu1 %vm20418_vm2, %v20417_v1 }
 0x2d7   :  { %16892 = vmatmul.mubr.msk.f32.gmra.mrb[144].mxu0 %vm45_vm1, %v3534_v34  ;;  %v21980_v34 = vld [vmem:[#allocation2 + $0xdc] sm:$0xff] }
 0x2d8   :  { %16894 = vmatprep.mubr.msk.f32.mxu0 %vm20418_vm2, %v20417_v1 }
 0x2d9   :  { %16031 = vmatmul.mubr.msk.f32.gmra.mrb[36].mxu1 %vm45_vm1, %v274_v35  ;;  %v22160_v35 = vld [vmem:[#allocation2 + $0x17c] sm:$0xff] }
 0x2da   :  { %16033 = vmatprep.mubr.msk.f32.mxu1 %vm20418_vm2, %v20417_v1 }
 0x2db   :  { %16895 = vmatmul.mubr.msk.f32.gmra.mrb[146].mxu0 %vm45_vm1, %v3535_v36  ;;  %v21989_v36 = vld [vmem:[#allocation2 + $0xe4] sm:$0xff] }
 0x2dc   :  { %16897 = vmatprep.mubr.msk.f32.mxu0 %vm20418_vm2, %v20417_v1 }
 0x2dd   :  { %16034 = vmatmul.mubr.msk.f32.gmra.mrb[38].mxu1 %vm45_vm1, %v275_v37  ;;  %v22169_v37 = vld [vmem:[#allocation2 + $0x184] sm:$0xff] }
 0x2de   :  { %16036 = vmatprep.mubr.msk.f32.mxu1 %vm20418_vm2, %v20417_v1 }
 0x2df   :  { %16898 = vmatmul.mubr.msk.f32.gmra.mrb[148].mxu0 %vm45_vm1, %v3536_v38  ;;  %v21998_v38 = vld [vmem:[#allocation2 + $0xec] sm:$0xff] }
 0x2e0   :  { %16900 = vmatprep.mubr.msk.f32.mxu0 %vm20418_vm2, %v20417_v1 }
 0x2e1   :  { %16037 = vmatmul.mubr.msk.f32.gmra.mrb[40].mxu1 %vm45_vm1, %v276_v39  ;;  %v294_v39 = vld [vmem:[#allocation2 + $0x130] sm:$0xff] }
 0x2e2   :  { %16039 = vmatprep.mubr.msk.f32.mxu1 %vm20418_vm2, %v20417_v1 }
 0x2e3   :  { %16901 = vmatmul.mubr.msk.f32.gmra.mrb[150].mxu0 %vm45_vm1, %v3537_v40  ;;  %v22007_v40 = vld [vmem:[#allocation2 + $0xf4] sm:$0xff] }
 0x2e4   :  { %16903 = vmatprep.mubr.msk.f32.mxu0 %vm20418_vm2, %v20417_v1 }
 0x2e5   :  { %16040 = vmatmul.mubr.msk.f32.gmra.mrb[42].mxu1 %vm45_vm1, %v277_v41  ;;  %v295_v41 = vld [vmem:[#allocation2 + $0x138] sm:$0xff] }
 0x2e6   :  { %16042 = vmatprep.mubr.msk.f32.mxu1 %vm20418_vm2, %v20417_v1 }
 0x2e7   :  { %16904 = vmatmul.mubr.msk.f32.gmra.mrb[152].mxu0 %vm45_vm1, %v3538_v42  ;;  %v22016_v42 = vld [vmem:[#allocation2 + $0xfc] sm:$0xff] }
 0x2e8   :  { %16908 = vmatprep.mubr.msk.f32.mxu0 %vm20418_vm2, %v20417_v1 }
 0x2e9   :  { %16043 = vmatmul.mubr.msk.f32.gmra.mrb[44].mxu1 %vm45_vm1, %v278_v43  ;;  %v22178_v43 = vld [vmem:[#allocation2 + $0x18c] sm:$0xff] }
 0x2ea   :  { %16045 = vmatprep.mubr.msk.f32.mxu1 %vm20418_vm2, %v20417_v1 }
 0x2eb   :  { %16909 = vmatmul.mubr.msk.f32.vlgmr.msra.gmra.mrb[0].mxu0 %vm45_vm1, %v4302_v44  ;;  %v22025_v44 = vld [vmem:[#allocation2 + $0x104] sm:$0xff] }
 0x2ec   :  { %17140 = vmatpush3.msk.msra.mxu0 %vm644_vm0, %v14114_v45  ;;  %16911 = vmatprep.mubr.msk.f32.mxu0 %vm20418_vm2, %v20417_v1  ;;  %v279_v45 = vld [vmem:[#allocation2 + $0xb8] sm:$0xff] }
 0x2ed   :  { %17372 = vmatprep.subr.mxu0 %v20417_v1  ;;  %16046 = vmatmul.mubr.msk.f32.gmra.mrb[46].mxu1 %vm45_vm1, %v279_v45  ;;  %v296_v45 = vld [vmem:[#allocation2 + $0x140] sm:$0xff] }
 0x2ee   :  { %16048 = vmatprep.mubr.msk.f32.mxu1 %vm20418_vm2, %v20417_v1 }
 0x2ef   :  { %16912 = vmatmul.mubr.msk.f32.gmra.mrb[2].mxu0 %vm45_vm1, %v4303_v47  ;;  %v280_v47 = vld [vmem:[#allocation2 + $0xc0] sm:$0xff] }
 0x2f0   :  { %16914 = vmatprep.mubr.msk.f32.mxu0 %vm20418_vm2, %v20417_v1 }
 0x2f1   :  { %16049 = vmatmul.mubr.msk.f32.gmra.mrb[48].mxu1 %vm45_vm1, %v280_v47  ;;  %v22187_v47 = vld [vmem:[#allocation2 + $0x194] sm:$0xff] }
 0x2f2   :  { %16051 = vmatprep.mubr.msk.f32.mxu1 %vm20418_vm2, %v20417_v1 }
 0x2f3   :  { %16915 = vmatmul.mubr.msk.f32.gmra.mrb[4].mxu0 %vm45_vm1, %v21763_v49 }
 0x2f4   :  { %16917 = vmatprep.mubr.msk.f32.mxu0 %vm20418_vm2, %v20417_v1 }
 0x2f5   :  { %16052 = vmatmul.mubr.msk.f32.gmra.mrb[50].mxu1 %vm45_vm1, %v281_v50  ;;  %v297_v50 = vld [vmem:[#allocation2 + $0x148] sm:$0xff] }
 0x2f6   :  { %16054 = vmatprep.mubr.msk.f32.mxu1 %vm20418_vm2, %v20417_v1 }
 0x2f7   :  { %16918 = vmatmul.mubr.msk.f32.gmra.mrb[6].mxu0 %vm45_vm1, %v21772_v51 }
 0x2f8   :  { %16920 = vmatprep.mubr.msk.f32.mxu0 %vm20418_vm2, %v20417_v1 }
 0x2f9   :  { %16055 = vmatmul.mubr.msk.f32.gmra.mrb[52].mxu1 %vm45_vm1, %v282_v54  ;;  %v22196_v54 = vld [vmem:[#allocation2 + $0x19c] sm:$0xff] }
 0x2fa   :  { %16057 = vmatprep.mubr.msk.f32.mxu1 %vm20418_vm2, %v20417_v1 }
 0x2fb   :  { %16921 = vmatmul.mubr.msk.f32.gmra.mrb[8].mxu0 %vm45_vm1, %v21781_v53 }
 0x2fc   :  { %16923 = vmatprep.mubr.msk.f32.mxu0 %vm20418_vm2, %v20417_v1 }
 0x2fd   :  { %16058 = vmatmul.mubr.msk.f32.gmra.mrb[54].mxu1 %vm45_vm1, %v283_v58  ;;  %v298_v58 = vld [vmem:[#allocation2 + $0x150] sm:$0xff] }
 0x2fe   :  { %16060 = vmatprep.mubr.msk.f32.mxu1 %vm20418_vm2, %v20417_v1 }
 0x2ff   :  { %16924 = vmatmul.mubr.msk.f32.gmra.mrb[10].mxu0 %vm45_vm1, %v21790_v55 }
 0x300   :  { %16926 = vmatprep.mubr.msk.f32.mxu0 %vm20418_vm2, %v20417_v1 }
 0x301   :  { %16061 = vmatmul.mubr.msk.f32.gmra.mrb[56].mxu1 %vm45_vm1, %v284_v61  ;;  %v22205_v61 = vld [vmem:[#allocation2 + $0x1a4] sm:$0xff] }
 0x302   :  { %16063 = vmatprep.mubr.msk.f32.mxu1 %vm20418_vm2, %v20417_v1 }
 0x303   :  { %16927 = vmatmul.mubr.msk.f32.gmra.mrb[12].mxu0 %vm45_vm1, %v21799_v57 }
 0x304   :  { %16929 = vmatprep.mubr.msk.f32.mxu0 %vm20418_vm2, %v20417_v1 }
 0x305   :  { %16064 = vmatmul.mubr.msk.f32.gmra.mrb[58].mxu1 %vm45_vm1, %v285_v0  ;;  %v299_v0 = vld [vmem:[#allocation2 + $0x158] sm:$0xff] }
 0x306   :  { %16066 = vmatprep.mubr.msk.f32.mxu1 %vm20418_vm2, %v20417_v1 }
 0x307   :  { %16930 = vmatmul.mubr.msk.f32.gmra.mrb[14].mxu0 %vm45_vm1, %v21808_v59 }
 0x308   :  { %16932 = vmatprep.mubr.msk.f32.mxu0 %vm20418_vm2, %v20417_v1 }
 0x309   :  { %16067 = vmatmul.mubr.msk.f32.gmra.mrb[60].mxu1 %vm45_vm1, %v286_v5  ;;  %v22214_v5 = vld [vmem:[#allocation2 + $0x1ac] sm:$0xff] }
 0x30a   :  { %16069 = vmatprep.mubr.msk.f32.mxu1 %vm20418_vm2, %v20417_v1 }
 0x30b   :  { %16933 = vmatmul.mubr.msk.f32.gmra.mrb[16].mxu0 %vm45_vm1, %v21820_v62 }
 0x30c   :  { %16935 = vmatprep.mubr.msk.f32.mxu0 %vm20418_vm2, %v20417_v1 }
 0x30d   :  { %16070 = vmatmul.mubr.msk.f32.gmra.mrb[62].mxu1 %vm45_vm1, %v287_v9  ;;  %v300_v9 = vld [vmem:[#allocation2 + $0x160] sm:$0xff] }
 0x30e   :  { %16072 = vmatprep.mubr.msk.f32.mxu1 %vm20418_vm2, %v20417_v1 }
 0x30f   :  { %16936 = vmatmul.mubr.msk.f32.gmra.mrb[18].mxu0 %vm45_vm1, %v21836_v2 }
 0x310   :  { %16938 = vmatprep.mubr.msk.f32.mxu0 %vm20418_vm2, %v20417_v1 }
 0x311   :  { %16073 = vmatmul.mubr.msk.f32.gmra.mrb[64].mxu1 %vm45_vm1, %v288_v13  ;;  %v22223_v13 = vld [vmem:[#allocation2 + $0x1b4] sm:$0xff] }
 0x312   :  { %16075 = vmatprep.mubr.msk.f32.mxu1 %vm20418_vm2, %v20417_v1 }
 0x313   :  { %16939 = vmatmul.mubr.msk.f32.gmra.mrb[20].mxu0 %vm45_vm1, %v21845_v4 }
 0x314   :  { %16941 = vmatprep.mubr.msk.f32.mxu0 %vm20418_vm2, %v20417_v1 }
 0x315   :  { %16076 = vmatmul.mubr.msk.f32.gmra.mrb[66].mxu1 %vm45_vm1, %v289_v17  ;;  %v301_v17 = vld [vmem:[#allocation2 + $0x168] sm:$0xff] }
 0x316   :  { %16078 = vmatprep.mubr.msk.f32.mxu1 %vm20418_vm2, %v20417_v1 }
 0x317   :  { %16942 = vmatmul.mubr.msk.f32.gmra.mrb[22].mxu0 %vm45_vm1, %v21854_v6 }
 0x318   :  { %16944 = vmatprep.mubr.msk.f32.mxu0 %vm20418_vm2, %v20417_v1 }
 0x319   :  { %16079 = vmatmul.mubr.msk.f32.gmra.mrb[68].mxu1 %vm45_vm1, %v290_v21  ;;  %v22232_v21 = vld [vmem:[#allocation2 + $0x1bc] sm:$0xff] }
 0x31a   :  { %16081 = vmatprep.mubr.msk.f32.mxu1 %vm20418_vm2, %v20417_v1 }
 0x31b   :  { %16945 = vmatmul.mubr.msk.f32.gmra.mrb[24].mxu0 %vm45_vm1, %v21863_v8 }
 0x31c   :  { %16947 = vmatprep.mubr.msk.f32.mxu0 %vm20418_vm2, %v20417_v1 }
 0x31d   :  { %16082 = vmatmul.mubr.msk.f32.gmra.mrb[70].mxu1 %vm45_vm1, %v291_v25  ;;  %v302_v25 = vld [vmem:[#allocation2 + $0x170] sm:$0xff] }
 0x31e   :  { %16084 = vmatprep.mubr.msk.f32.mxu1 %vm20418_vm2, %v20417_v1 }
 0x31f   :  { %16948 = vmatmul.mubr.msk.f32.gmra.mrb[26].mxu0 %vm45_vm1, %v21872_v10 }
 0x320   :  { %16950 = vmatprep.mubr.msk.f32.mxu0 %vm20418_vm2, %v20417_v1 }
 0x321   :  { %16085 = vmatmul.mubr.msk.f32.gmra.mrb[72].mxu1 %vm45_vm1, %v292_v29  ;;  %v22241_v29 = vld [vmem:[#allocation2 + $0x1c4] sm:$0xff] }
 0x322   :  { %16087 = vmatprep.mubr.msk.f32.mxu1 %vm20418_vm2, %v20417_v1 }
 0x323   :  { %16951 = vmatmul.mubr.msk.f32.gmra.mrb[28].mxu0 %vm45_vm1, %v21881_v12 }
 0x324   :  { %16953 = vmatprep.mubr.msk.f32.mxu0 %vm20418_vm2, %v20417_v1 }
 0x325   :  { %16088 = vmatmul.mubr.msk.f32.gmra.mrb[74].mxu1 %vm45_vm1, %v293_v33  ;;  %v303_v33 = vld [vmem:[#allocation2 + $0x178] sm:$0xff] }
 0x326   :  { %16090 = vmatprep.mubr.msk.f32.mxu1 %vm20418_vm2, %v20417_v1 }
 0x327   :  { %16954 = vmatmul.mubr.msk.f32.gmra.mrb[30].mxu0 %vm45_vm1, %v21890_v14 }
 0x328   :  { %16956 = vmatprep.mubr.msk.f32.mxu0 %vm20418_vm2, %v20417_v1 }
 0x329   :  { %16091 = vmatmul.mubr.msk.f32.gmra.mrb[76].mxu1 %vm45_vm1, %v294_v39  ;;  %v22250_v39 = vld [vmem:[#allocation2 + $0x1cc] sm:$0xff] }
 0x32a   :  { %16093 = vmatprep.mubr.msk.f32.mxu1 %vm20418_vm2, %v20417_v1 }
 0x32b   :  { %16957 = vmatmul.mubr.msk.f32.gmra.mrb[32].mxu0 %vm45_vm1, %v21899_v16 }
 0x32c   :  { %16959 = vmatprep.mubr.msk.f32.mxu0 %vm20418_vm2, %v20417_v1 }
 0x32d   :  { %16094 = vmatmul.mubr.msk.f32.gmra.mrb[78].mxu1 %vm45_vm1, %v295_v41  ;;  %v304_v41 = vld [vmem:[#allocation2 + $0x180] sm:$0xff] }
 0x32e   :  { %16096 = vmatprep.mubr.msk.f32.mxu1 %vm20418_vm2, %v20417_v1 }
 0x32f   :  { %16960 = vmatmul.mubr.msk.f32.gmra.mrb[34].mxu0 %vm45_vm1, %v21908_v18 }
 0x330   :  { %16962 = vmatprep.mubr.msk.f32.mxu0 %vm20418_vm2, %v20417_v1 }
 0x331   :  { %16097 = vmatmul.mubr.msk.f32.gmra.mrb[80].mxu1 %vm45_vm1, %v296_v45  ;;  %v22259_v45 = vld [vmem:[#allocation2 + $0x1d4] sm:$0xff] }
 0x332   :  { %16099 = vmatprep.mubr.msk.f32.mxu1 %vm20418_vm2, %v20417_v1 }
 0x333   :  { %16963 = vmatmul.mubr.msk.f32.gmra.mrb[36].mxu0 %vm45_vm1, %v21917_v20 }
 0x334   :  { %16965 = vmatprep.mubr.msk.f32.mxu0 %vm20418_vm2, %v20417_v1 }
 0x335   :  { %16100 = vmatmul.mubr.msk.f32.gmra.mrb[82].mxu1 %vm45_vm1, %v297_v50  ;;  %v305_v50 = vld [vmem:[#allocation2 + $0x188] sm:$0xff] }
 0x336   :  { %16102 = vmatprep.mubr.msk.f32.mxu1 %vm20418_vm2, %v20417_v1 }
 0x337   :  { %16966 = vmatmul.mubr.msk.f32.gmra.mrb[38].mxu0 %vm45_vm1, %v21926_v22 }
 0x338   :  { %16968 = vmatprep.mubr.msk.f32.mxu0 %vm20418_vm2, %v20417_v1 }
 0x339   :  { %16103 = vmatmul.mubr.msk.f32.gmra.mrb[84].mxu1 %vm45_vm1, %v298_v58  ;;  %v22268_v58 = vld [vmem:[#allocation2 + $0x1dc] sm:$0xff] }
 0x33a   :  { %16105 = vmatprep.mubr.msk.f32.mxu1 %vm20418_vm2, %v20417_v1 }
 0x33b   :  { %16969 = vmatmul.mubr.msk.f32.gmra.mrb[40].mxu0 %vm45_vm1, %v21935_v24 }
 0x33c   :  { %16971 = vmatprep.mubr.msk.f32.mxu0 %vm20418_vm2, %v20417_v1 }
 0x33d   :  { %16106 = vmatmul.mubr.msk.f32.gmra.mrb[86].mxu1 %vm45_vm1, %v299_v0  ;;  %v306_v0 = vld [vmem:[#allocation2 + $0x190] sm:$0xff] }
 0x33e   :  { %16108 = vmatprep.mubr.msk.f32.mxu1 %vm20418_vm2, %v20417_v1 }
 0x33f   :  { %16972 = vmatmul.mubr.msk.f32.gmra.mrb[42].mxu0 %vm45_vm1, %v21944_v26 }
 0x340   :  { %16974 = vmatprep.mubr.msk.f32.mxu0 %vm20418_vm2, %v20417_v1 }
 0x341   :  { %16109 = vmatmul.mubr.msk.f32.gmra.mrb[88].mxu1 %vm45_vm1, %v300_v9  ;;  %v22277_v9 = vld [vmem:[#allocation2 + $0x1e4] sm:$0xff] }
 0x342   :  { %16111 = vmatprep.mubr.msk.f32.mxu1 %vm20418_vm2, %v20417_v1 }
 0x343   :  { %16975 = vmatmul.mubr.msk.f32.gmra.mrb[44].mxu0 %vm45_vm1, %v21953_v28 }
 0x344   :  { %16977 = vmatprep.mubr.msk.f32.mxu0 %vm20418_vm2, %v20417_v1 }
 0x345   :  { %16112 = vmatmul.mubr.msk.f32.gmra.mrb[90].mxu1 %vm45_vm1, %v301_v17  ;;  %v307_v17 = vld [vmem:[#allocation2 + $0x198] sm:$0xff] }
 0x346   :  { %16114 = vmatprep.mubr.msk.f32.mxu1 %vm20418_vm2, %v20417_v1 }
 0x347   :  { %16978 = vmatmul.mubr.msk.f32.gmra.mrb[46].mxu0 %vm45_vm1, %v21962_v30 }
 0x348   :  { %16980 = vmatprep.mubr.msk.f32.mxu0 %vm20418_vm2, %v20417_v1 }
 0x349   :  { %16115 = vmatmul.mubr.msk.f32.gmra.mrb[92].mxu1 %vm45_vm1, %v302_v25  ;;  %v22286_v25 = vld [vmem:[#allocation2 + $0x1ec] sm:$0xff] }
 0x34a   :  { %16117 = vmatprep.mubr.msk.f32.mxu1 %vm20418_vm2, %v20417_v1 }
 0x34b   :  { %16981 = vmatmul.mubr.msk.f32.gmra.mrb[48].mxu0 %vm45_vm1, %v21971_v32 }
 0x34c   :  { %16983 = vmatprep.mubr.msk.f32.mxu0 %vm20418_vm2, %v20417_v1 }
 0x34d   :  { %16118 = vmatmul.mubr.msk.f32.gmra.mrb[94].mxu1 %vm45_vm1, %v303_v33  ;;  %v308_v33 = vld [vmem:[#allocation2 + $0x1a0] sm:$0xff] }
 0x34e   :  { %16120 = vmatprep.mubr.msk.f32.mxu1 %vm20418_vm2, %v20417_v1 }
 0x34f   :  { %16984 = vmatmul.mubr.msk.f32.gmra.mrb[50].mxu0 %vm45_vm1, %v21980_v34 }
 0x350   :  { %16986 = vmatprep.mubr.msk.f32.mxu0 %vm20418_vm2, %v20417_v1 }
 0x351   :  { %16121 = vmatmul.mubr.msk.f32.gmra.mrb[96].mxu1 %vm45_vm1, %v304_v41  ;;  %v22295_v41 = vld [vmem:[#allocation2 + $0x1f4] sm:$0xff] }
 0x352   :  { %16123 = vmatprep.mubr.msk.f32.mxu1 %vm20418_vm2, %v20417_v1  ;;  %25131 = vst [vmem:[#allocation13_spill] sm:$0xff] %v22295_v41 }
 0x353   :  { %16987 = vmatmul.mubr.msk.f32.gmra.mrb[52].mxu0 %vm45_vm1, %v21989_v36 }
 0x354   :  { %16989 = vmatprep.mubr.msk.f32.mxu0 %vm20418_vm2, %v20417_v1 }
 0x355   :  { %16124 = vmatmul.mubr.msk.f32.gmra.mrb[98].mxu1 %vm45_vm1, %v305_v50  ;;  %v309_v50 = vld [vmem:[#allocation2 + $0x1a8] sm:$0xff] }
 0x356   :  { %16126 = vmatprep.mubr.msk.f32.mxu1 %vm20418_vm2, %v20417_v1 }
 0x357   :  { %16990 = vmatmul.mubr.msk.f32.gmra.mrb[54].mxu0 %vm45_vm1, %v21998_v38 }
 0x358   :  { %16992 = vmatprep.mubr.msk.f32.mxu0 %vm20418_vm2, %v20417_v1 }
 0x359   :  { %16127 = vmatmul.mubr.msk.f32.gmra.mrb[100].mxu1 %vm45_vm1, %v306_v0  ;;  %v22304_v0 = vld [vmem:[#allocation2 + $0x1fc] sm:$0xff] }
 0x35a   :  { %16129 = vmatprep.mubr.msk.f32.mxu1 %vm20418_vm2, %v20417_v1  ;;  %25132 = vst [vmem:[#allocation14_spill] sm:$0xff] %v22304_v0 }
 0x35b   :  { %16993 = vmatmul.mubr.msk.f32.gmra.mrb[56].mxu0 %vm45_vm1, %v22007_v40 }
 0x35c   :  { %16995 = vmatprep.mubr.msk.f32.mxu0 %vm20418_vm2, %v20417_v1 }
 0x35d   :  { %16130 = vmatmul.mubr.msk.f32.gmra.mrb[102].mxu1 %vm45_vm1, %v307_v17  ;;  %v310_v17 = vld [vmem:[#allocation2 + $0x1b0] sm:$0xff] }
 0x35e   :  { %16132 = vmatprep.mubr.msk.f32.mxu1 %vm20418_vm2, %v20417_v1 }
 0x35f   :  { %16996 = vmatmul.mubr.msk.f32.gmra.mrb[58].mxu0 %vm45_vm1, %v22016_v42 }
 0x360   :  { %16998 = vmatprep.mubr.msk.f32.mxu0 %vm20418_vm2, %v20417_v1 }
 0x361   :  { %16133 = vmatmul.mubr.msk.f32.gmra.mrb[104].mxu1 %vm45_vm1, %v308_v33  ;;  %v22313_v33 = vld [vmem:[#allocation2 + $0x204] sm:$0xff] }
 0x362   :  { %16135 = vmatprep.mubr.msk.f32.mxu1 %vm20418_vm2, %v20417_v1  ;;  %25133 = vst [vmem:[#allocation15_spill] sm:$0xff] %v22313_v33 }
 0x363   :  { %16999 = vmatmul.mubr.msk.f32.gmra.mrb[60].mxu0 %vm45_vm1, %v22025_v44 }
 0x364   :  { %17001 = vmatprep.mubr.msk.f32.mxu0 %vm20418_vm2, %v20417_v1 }
 0x365   :  { %16136 = vmatmul.mubr.msk.f32.gmra.mrb[106].mxu1 %vm45_vm1, %v309_v50  ;;  %v311_v50 = vld [vmem:[#allocation2 + $0x1b8] sm:$0xff] }
 0x366   :  { %16138 = vmatprep.mubr.msk.f32.mxu1 %vm20418_vm2, %v20417_v1 }
 0x367   :  { %17002 = vmatmul.mubr.msk.f32.gmra.mrb[62].mxu0 %vm45_vm1, %v22034_v46 }
 0x368   :  { %17004 = vmatprep.mubr.msk.f32.mxu0 %vm20418_vm2, %v20417_v1 }
 0x369   :  { %16139 = vmatmul.mubr.msk.f32.gmra.mrb[108].mxu1 %vm45_vm1, %v310_v17  ;;  %v312_v17 = vld [vmem:[#allocation2 + $0x1c0] sm:$0xff] }
 0x36a   :  { %16141 = vmatprep.mubr.msk.f32.mxu1 %vm20418_vm2, %v20417_v1 }
 0x36b   :  { %17005 = vmatmul.mubr.msk.f32.gmra.mrb[64].mxu0 %vm45_vm1, %v22043_v48 }
 0x36c   :  { %17007 = vmatprep.mubr.msk.f32.mxu0 %vm20418_vm2, %v20417_v1 }
 0x36d   :  { %16142 = vmatmul.mubr.msk.f32.gmra.mrb[110].mxu1 %vm45_vm1, %v311_v50  ;;  %v313_v50 = vld [vmem:[#allocation2 + $0x1c8] sm:$0xff] }
 0x36e   :  { %16144 = vmatprep.mubr.msk.f32.mxu1 %vm20418_vm2, %v20417_v1 }
 0x36f   :  { %17008 = vmatmul.mubr.msk.f32.gmra.mrb[66].mxu0 %vm45_vm1, %v22052_v52 }
 0x370   :  { %17010 = vmatprep.mubr.msk.f32.mxu0 %vm20418_vm2, %v20417_v1 }
 0x371   :  { %16145 = vmatmul.mubr.msk.f32.gmra.mrb[112].mxu1 %vm45_vm1, %v312_v17  ;;  %v314_v17 = vld [vmem:[#allocation2 + $0x1d0] sm:$0xff] }
 0x372   :  { %16147 = vmatprep.mubr.msk.f32.mxu1 %vm20418_vm2, %v20417_v1 }
 0x373   :  { %17011 = vmatmul.mubr.msk.f32.gmra.mrb[68].mxu0 %vm45_vm1, %v22061_v56 }
 0x374   :  { %17013 = vmatprep.mubr.msk.f32.mxu0 %vm20418_vm2, %v20417_v1 }
 0x375   :  { %16148 = vmatmul.mubr.msk.f32.gmra.mrb[114].mxu1 %vm45_vm1, %v313_v50  ;;  %v315_v50 = vld [vmem:[#allocation2 + $0x1d8] sm:$0xff] }
 0x376   :  { %16150 = vmatprep.mubr.msk.f32.mxu1 %vm20418_vm2, %v20417_v1 }
 0x377   :  { %17014 = vmatmul.mubr.msk.f32.gmra.mrb[70].mxu0 %vm45_vm1, %v22070_v60 }
 0x378   :  { %17016 = vmatprep.mubr.msk.f32.mxu0 %vm20418_vm2, %v20417_v1 }
 0x379   :  { %16151 = vmatmul.mubr.msk.f32.gmra.mrb[116].mxu1 %vm45_vm1, %v314_v17  ;;  %v316_v17 = vld [vmem:[#allocation2 + $0x1e0] sm:$0xff] }
 0x37a   :  { %16153 = vmatprep.mubr.msk.f32.mxu1 %vm20418_vm2, %v20417_v1 }
 0x37b   :  { %17017 = vmatmul.mubr.msk.f32.gmra.mrb[72].mxu0 %vm45_vm1, %v22079_v63 }
 0x37c   :  { %17019 = vmatprep.mubr.msk.f32.mxu0 %vm20418_vm2, %v20417_v1 }
 0x37d   :  { %16154 = vmatmul.mubr.msk.f32.gmra.mrb[118].mxu1 %vm45_vm1, %v315_v50  ;;  %v317_v50 = vld [vmem:[#allocation2 + $0x1e8] sm:$0xff] }
 0x37e   :  { %16156 = vmatprep.mubr.msk.f32.mxu1 %vm20418_vm2, %v20417_v1 }
 0x37f   :  { %17020 = vmatmul.mubr.msk.f32.gmra.mrb[74].mxu0 %vm45_vm1, %v22088_v3 }
 0x380   :  { %17022 = vmatprep.mubr.msk.f32.mxu0 %vm20418_vm2, %v20417_v1 }
 0x381   :  { %16157 = vmatmul.mubr.msk.f32.gmra.mrb[120].mxu1 %vm45_vm1, %v316_v17  ;;  %v318_v17 = vld [vmem:[#allocation2 + $0x1f0] sm:$0xff] }
 0x382   :  { %16159 = vmatprep.mubr.msk.f32.mxu1 %vm20418_vm2, %v20417_v1 }
 0x383   :  { %17023 = vmatmul.mubr.msk.f32.gmra.mrb[76].mxu0 %vm45_vm1, %v22097_v7 }
 0x384   :  { %17025 = vmatprep.mubr.msk.f32.mxu0 %vm20418_vm2, %v20417_v1 }
 0x385   :  { %16160 = vmatmul.mubr.msk.f32.gmra.mrb[122].mxu1 %vm45_vm1, %v317_v50  ;;  %v319_v50 = vld [vmem:[#allocation2 + $0x1f8] sm:$0xff] }
 0x386   :  { %16162 = vmatprep.mubr.msk.f32.mxu1 %vm20418_vm2, %v20417_v1 }
 0x387   :  { %17026 = vmatmul.mubr.msk.f32.gmra.mrb[78].mxu0 %vm45_vm1, %v22106_v11 }
 0x388   :  { %17028 = vmatprep.mubr.msk.f32.mxu0 %vm20418_vm2, %v20417_v1 }
 0x389   :  { %16163 = vmatmul.mubr.msk.f32.gmra.mrb[124].mxu1 %vm45_vm1, %v318_v17  ;;  %v320_v17 = vld [vmem:[#allocation2 + $0x200] sm:$0xff] }
 0x38a   :  { %16165 = vmatprep.mubr.msk.f32.mxu1 %vm20418_vm2, %v20417_v1 }
 0x38b   :  { %17029 = vmatmul.mubr.msk.f32.gmra.mrb[80].mxu0 %vm45_vm1, %v22115_v15 }
 0x38c   :  { %17031 = vmatprep.mubr.msk.f32.mxu0 %vm20418_vm2, %v20417_v1 }
 0x38d   :  { %16166 = vmatmul.mubr.msk.f32.gmra.mrb[126].mxu1 %vm45_vm1, %v319_v50  ;;  %v321_v50 = vld [vmem:[#allocation2 + $0x208] sm:$0xff] }
 0x38e   :  { %16168 = vmatprep.mubr.msk.f32.mxu1 %vm20418_vm2, %v20417_v1 }
 0x38f   :  { %17032 = vmatmul.mubr.msk.f32.gmra.mrb[82].mxu0 %vm45_vm1, %v22124_v19 }
 0x390   :  { %17034 = vmatprep.mubr.msk.f32.mxu0 %vm20418_vm2, %v20417_v1 }
 0x391   :  { %16169 = vmatmul.mubr.msk.f32.gmra.mrb[128].mxu1 %vm45_vm1, %v320_v17  ;;  %v322_v17 = vld [vmem:[#allocation2 + $0x210] sm:$0xff] }
 0x392   :  { %16171 = vmatprep.mubr.msk.f32.mxu1 %vm20418_vm2, %v20417_v1 }
 0x393   :  { %17035 = vmatmul.mubr.msk.f32.gmra.mrb[84].mxu0 %vm45_vm1, %v22133_v23 }
 0x394   :  { %17037 = vmatprep.mubr.msk.f32.mxu0 %vm20418_vm2, %v20417_v1 }
 0x395   :  { %16172 = vmatmul.mubr.msk.f32.gmra.mrb[130].mxu1 %vm45_vm1, %v321_v50  ;;  %v323_v50 = vld [vmem:[#allocation2 + $0x218] sm:$0xff] }
 0x396   :  { %16174 = vmatprep.mubr.msk.f32.mxu1 %vm20418_vm2, %v20417_v1 }
 0x397   :  { %17038 = vmatmul.mubr.msk.f32.gmra.mrb[86].mxu0 %vm45_vm1, %v22142_v27 }
 0x398   :  { %17040 = vmatprep.mubr.msk.f32.mxu0 %vm20418_vm2, %v20417_v1 }
 0x399   :  { %16175 = vmatmul.mubr.msk.f32.gmra.mrb[132].mxu1 %vm45_vm1, %v322_v17  ;;  %v324_v17 = vld [vmem:[#allocation2 + $0x220] sm:$0xff] }
 0x39a   :  { %16177 = vmatprep.mubr.msk.f32.mxu1 %vm20418_vm2, %v20417_v1 }
 0x39b   :  { %17041 = vmatmul.mubr.msk.f32.gmra.mrb[88].mxu0 %vm45_vm1, %v22151_v31 }
 0x39c   :  { %17043 = vmatprep.mubr.msk.f32.mxu0 %vm20418_vm2, %v20417_v1 }
 0x39d   :  { %16178 = vmatmul.mubr.msk.f32.gmra.mrb[134].mxu1 %vm45_vm1, %v323_v50  ;;  %v14193_v50 = vld [vmem:[%s25103_s1 + $0x1c] sm:$0xf] }
 0x39e   :  { %16180 = vmatprep.mubr.msk.f32.mxu1 %vm20418_vm2, %v20417_v1 }
 0x39f   :  { %17044 = vmatmul.mubr.msk.f32.gmra.mrb[90].mxu0 %vm45_vm1, %v22160_v35 }
 0x3a0   :  { %17046 = vmatprep.mubr.msk.f32.mxu0 %vm20418_vm2, %v20417_v1 }
 0x3a1   :  { %16181 = vmatmul.mubr.msk.f32.gmra.mrb[136].mxu1 %vm45_vm1, %v324_v17  ;;  %v326_v17 = vld [vmem:[#allocation2 + $0x230] sm:$0xff] }
 0x3a2   :  { %16183 = vmatprep.mubr.msk.f32.mxu1 %vm20418_vm2, %v20417_v1 }
 0x3a3   :  { %17047 = vmatmul.mubr.msk.f32.gmra.mrb[92].mxu0 %vm45_vm1, %v22169_v37 }
 0x3a4   :  { %17049 = vmatprep.mubr.msk.f32.mxu0 %vm20418_vm2, %v20417_v1 }
 0x3a7   :  { %17050 = vmatmul.mubr.msk.f32.gmra.mrb[94].mxu0 %vm45_vm1, %v22178_v43 }
 0x3a8   :  { %17052 = vmatprep.mubr.msk.f32.mxu0 %vm20418_vm2, %v20417_v1 }
 0x3ab   :  { %17053 = vmatmul.mubr.msk.f32.gmra.mrb[96].mxu0 %vm45_vm1, %v22187_v47 }
 0x3ac   :  { %17055 = vmatprep.mubr.msk.f32.mxu0 %vm20418_vm2, %v20417_v1 }
 0x3af   :  { %17056 = vmatmul.mubr.msk.f32.gmra.mrb[98].mxu0 %vm45_vm1, %v22196_v54 }
 0x3b0   :  { %17058 = vmatprep.mubr.msk.f32.mxu0 %vm20418_vm2, %v20417_v1 }
 0x3b3   :  { %17059 = vmatmul.mubr.msk.f32.gmra.mrb[100].mxu0 %vm45_vm1, %v22205_v61 }
 0x3b4   :  { %17061 = vmatprep.mubr.msk.f32.mxu0 %vm20418_vm2, %v20417_v1 }
 0x3b7   :  { %17062 = vmatmul.mubr.msk.f32.gmra.mrb[102].mxu0 %vm45_vm1, %v22214_v5 }
 0x3b8   :  { %17064 = vmatprep.mubr.msk.f32.mxu0 %vm20418_vm2, %v20417_v1 }
 0x3bb   :  { %17065 = vmatmul.mubr.msk.f32.gmra.mrb[104].mxu0 %vm45_vm1, %v22223_v13 }
 0x3bc   :  { %17067 = vmatprep.mubr.msk.f32.mxu0 %vm20418_vm2, %v20417_v1 }
 0x3bf   :  { %17068 = vmatmul.mubr.msk.f32.gmra.mrb[106].mxu0 %vm45_vm1, %v22232_v21 }
 0x3c0   :  { %17070 = vmatprep.mubr.msk.f32.mxu0 %vm20418_vm2, %v20417_v1 }
 0x3c3   :  { %17071 = vmatmul.mubr.msk.f32.gmra.mrb[108].mxu0 %vm45_vm1, %v22241_v29 }
 0x3c4   :  { %17073 = vmatprep.mubr.msk.f32.mxu0 %vm20418_vm2, %v20417_v1 }
 0x3c7   :  { %17074 = vmatmul.mubr.msk.f32.gmra.mrb[110].mxu0 %vm45_vm1, %v22250_v39 }
 0x3c8   :  { %17076 = vmatprep.mubr.msk.f32.mxu0 %vm20418_vm2, %v20417_v1 }
 0x3cb   :  { %17077 = vmatmul.mubr.msk.f32.gmra.mrb[112].mxu0 %vm45_vm1, %v22259_v45 }
 0x3cc   :  { %17079 = vmatprep.mubr.msk.f32.mxu0 %vm20418_vm2, %v20417_v1 }
 0x3cf   :  { %17080 = vmatmul.mubr.msk.f32.gmra.mrb[114].mxu0 %vm45_vm1, %v22268_v58 }
 0x3d0   :  { %17082 = vmatprep.mubr.msk.f32.mxu0 %vm20418_vm2, %v20417_v1 }
 0x3d3   :  { %17083 = vmatmul.mubr.msk.f32.gmra.mrb[116].mxu0 %vm45_vm1, %v22277_v9 }
 0x3d4   :  { %17085 = vmatprep.mubr.msk.f32.mxu0 %vm20418_vm2, %v20417_v1 }
 0x3d7   :  { %17086 = vmatmul.mubr.msk.f32.gmra.mrb[118].mxu0 %vm45_vm1, %v22286_v25 }
 0x3d8   :  { %17088 = vmatprep.mubr.msk.f32.mxu0 %vm20418_vm2, %v20417_v1 }
 0x3db   :  { %17089 = vmatmul.mubr.msk.f32.gmra.mrb[120].mxu0 %vm45_vm1, %v22295_v41  ;;  %v22322_v41 = vld [vmem:[#allocation2 + $0x20c] sm:$0xff] }
 0x3dc   :  { %17091 = vmatprep.mubr.msk.f32.mxu0 %vm20418_vm2, %v20417_v1  ;;  %25134 = vst [vmem:[#allocation16_spill] sm:$0xff] %v22322_v41 }
 0x3df   :  { %17092 = vmatmul.mubr.msk.f32.gmra.mrb[122].mxu0 %vm45_vm1, %v22304_v0  ;;  %v22331_v0 = vld [vmem:[#allocation2 + $0x214] sm:$0xff] }
 0x3e0   :  { %17094 = vmatprep.mubr.msk.f32.mxu0 %vm20418_vm2, %v20417_v1  ;;  %25135 = vst [vmem:[#allocation17_spill] sm:$0xff] %v22331_v0 }
 0x3e3   :  { %17095 = vmatmul.mubr.msk.f32.gmra.mrb[124].mxu0 %vm45_vm1, %v22313_v33  ;;  %v22340_v33 = vld [vmem:[#allocation2 + $0x21c] sm:$0xff] }
 0x3e4   :  { %17097 = vmatprep.mubr.msk.f32.mxu0 %vm20418_vm2, %v20417_v1  ;;  %25136 = vst [vmem:[#allocation18_spill] sm:$0xff] %v22340_v33 }
 0x3e7   :  { %17098 = vmatmul.mubr.msk.f32.gmra.mrb[126].mxu0 %vm45_vm1, %v22322_v41  ;;  %v22349_v41 = vld [vmem:[#allocation2 + $0x224] sm:$0xff] }
 0x3e8   :  { %17100 = vmatprep.mubr.msk.f32.mxu0 %vm20418_vm2, %v20417_v1  ;;  %25137 = vst [vmem:[#allocation19_spill] sm:$0xff] %v22349_v41 }
 0x3eb   :  { %17101 = vmatmul.mubr.msk.f32.gmra.mrb[128].mxu0 %vm45_vm1, %v22331_v0  ;;  %v22358_v0 = vld [vmem:[#allocation2 + $0x22c] sm:$0xff] }
 0x3ec   :  { %17103 = vmatprep.mubr.msk.f32.mxu0 %vm20418_vm2, %v20417_v1  ;;  %25138 = vst [vmem:[#allocation20_spill] sm:$0xff] %v22358_v0 }
 0x3ef   :  { %17104 = vmatmul.mubr.msk.f32.gmra.mrb[130].mxu0 %vm45_vm1, %v22340_v33  ;;  %v22367_v33 = vld [vmem:[#allocation2 + $0x234] sm:$0xff] }
 0x3f0   :  { %17106 = vmatprep.mubr.msk.f32.mxu0 %vm20418_vm2, %v20417_v1  ;;  %25139 = vst [vmem:[#allocation21_spill] sm:$0xff] %v22367_v33 }
 0x3f3   :  { %17107 = vmatmul.mubr.msk.f32.gmra.mrb[132].mxu0 %vm45_vm1, %v22349_v41  ;;  %v22376_v41 = vld [vmem:[#allocation2 + $0x23c] sm:$0xff] }
 0x3f4   :  { %17109 = vmatprep.mubr.msk.f32.mxu0 %vm20418_vm2, %v20417_v1  ;;  %25140 = vst [vmem:[#allocation22_spill] sm:$0xff] %v22376_v41 }
 0x3f7   :  { %17110 = vmatmul.mubr.msk.f32.gmra.mrb[134].mxu0 %vm45_vm1, %v22358_v0  ;;  %v22385_v0 = vld [vmem:[#allocation2 + $0x244] sm:$0xff] }
 0x3f8   :  { %17112 = vmatprep.mubr.msk.f32.mxu0 %vm20418_vm2, %v20417_v1  ;;  %25141 = vst [vmem:[#allocation23_spill] sm:$0xff] %v22385_v0 }
 0x3fb   :  { %17113 = vmatmul.mubr.msk.f32.gmra.mrb[136].mxu0 %vm45_vm1, %v22367_v33  ;;  %v22394_v33 = vld [vmem:[#allocation2 + $0x24c] sm:$0xff] }
 0x3fc   :  { %17115 = vmatprep.mubr.msk.f32.mxu0 %vm20418_vm2, %v20417_v1  ;;  %25142 = vst [vmem:[#allocation24_spill] sm:$0xff] %v22394_v33 }
 0x3ff   :  { %17116 = vmatmul.mubr.msk.f32.gmra.mrb[138].mxu0 %vm45_vm1, %v22376_v41  ;;  %v22403_v41 = vld [vmem:[#allocation2 + $0x254] sm:$0xff] }
 0x400   :  { %17118 = vmatprep.mubr.msk.f32.mxu0 %vm20418_vm2, %v20417_v1  ;;  %25143 = vst [vmem:[#allocation25_spill] sm:$0xff] %v22403_v41 }
 0x403   :  { %17119 = vmatmul.mubr.msk.f32.gmra.mrb[140].mxu0 %vm45_vm1, %v22385_v0  ;;  %v22412_v0 = vld [vmem:[#allocation2 + $0x25c] sm:$0xff] }
 0x404   :  { %17121 = vmatprep.mubr.msk.f32.mxu0 %vm20418_vm2, %v20417_v1  ;;  %25144 = vst [vmem:[#allocation26_spill] sm:$0xff] %v22412_v0 }
 0x407   :  { %17122 = vmatmul.mubr.msk.f32.gmra.mrb[142].mxu0 %vm45_vm1, %v22394_v33  ;;  %v22421_v33 = vld [vmem:[#allocation2 + $0x264] sm:$0xff] }
 0x408   :  { %17124 = vmatprep.mubr.msk.f32.mxu0 %vm20418_vm2, %v20417_v1  ;;  %25145 = vst [vmem:[#allocation27_spill] sm:$0xff] %v22421_v33 }
 0x40b   :  { %17125 = vmatmul.mubr.msk.f32.gmra.mrb[144].mxu0 %vm45_vm1, %v22403_v41  ;;  %v22430_v41 = vld [vmem:[#allocation2 + $0x26c] sm:$0xff] }
 0x40c   :  { %17127 = vmatprep.mubr.msk.f32.mxu0 %vm20418_vm2, %v20417_v1 }
 0x40f   :  { %17128 = vmatmul.mubr.msk.f32.gmra.mrb[146].mxu0 %vm45_vm1, %v22412_v0  ;;  %v4378_v0 = vld [vmem:[#allocation2 + $0x274] sm:$0x3] }
 0x410   :  { %17130 = vmatprep.mubr.msk.f32.mxu0 %vm20418_vm2, %v20417_v1 }
 0x413   :  { %17131 = vmatmul.mubr.msk.f32.gmra.mrb[148].mxu0 %vm45_vm1, %v22421_v33  ;;  %v325_v33 = vld [vmem:[#allocation2 + $0x228] sm:$0xff] }
 0x414   :  { %17133 = vmatprep.mubr.msk.f32.mxu0 %vm20418_vm2, %v20417_v1  ;;  %16184 = vmatmul.mubr.msk.f32.gmra.mrb[138].mxu1 %vm45_vm1, %v325_v33  ;;  %v1835_v33 = vld [vmem:[#allocation2 + $0x1aa] sm:$0xff] }
 0x415   :  { %16186 = vmatprep.mubr.msk.f32.mxu1 %vm20418_vm2, %v20417_v1 }
 0x417   :  { %17134 = vmatmul.mubr.msk.f32.gmra.mrb[150].mxu0 %vm45_vm1, %v22430_v41 }
 0x418   :  { %17136 = vmatprep.mubr.msk.f32.mxu0 %vm20418_vm2, %v20417_v1  ;;  %16187 = vmatmul.mubr.msk.f32.gmra.mrb[140].mxu1 %vm45_vm1, %v326_v17  ;;  %v1836_v17 = vld [vmem:[#allocation2 + $0x1b2] sm:$0xff] }
 0x419   :  { %16189 = vmatprep.mubr.msk.f32.mxu1 %vm20418_vm2, %v20417_v1 }
 0x41b   :  { %17137 = vmatmul.mubr.msk.f32.gmra.mrb[152].mxu0 %vm45_vm1, %v4378_v0  ;;  %v327_v0 = vld [vmem:[#allocation2 + $0x238] sm:$0xff] }
 0x41c   :  { %17141 = vmatprep.mubr.msk.f32.mxu0 %vm20418_vm2, %v20417_v1  ;;  %16190 = vmatmul.mubr.msk.f32.gmra.mrb[142].mxu1 %vm45_vm1, %v327_v0 }
 0x41d   :  { %16192 = vmatprep.mubr.msk.f32.mxu1 %vm20418_vm2, %v20417_v1 }
 0x41f   :  { %17142 = vmatmul.mubr.msk.f32.vlgmr.msra.gmra.mrb[0].mxu0 %vm45_vm1, %v21763_v49  ;;  %v328_v49 = vld [vmem:[#allocation2 + $0x240] sm:$0xff] }
 0x420   :  { %17373 = vmatpush3.msk.msra.mxu0 %vm644_vm0, %v14193_v50  ;;  %17144 = vmatprep.mubr.msk.f32.mxu0 %vm20418_vm2, %v20417_v1 }
 0x421   :  { %17605 = vmatprep.subr.mxu0 %v20417_v1  ;;  %16193 = vmatmul.mubr.msk.f32.gmra.mrb[144].mxu1 %vm45_vm1, %v328_v49  ;;  %v1837_v49 = vld [vmem:[#allocation2 + $0x1ba] sm:$0xff] }
 0x422   :  { %16195 = vmatprep.mubr.msk.f32.mxu1 %vm20418_vm2, %v20417_v1 }
 0x423   :  { %17145 = vmatmul.mubr.msk.f32.gmra.mrb[2].mxu0 %vm45_vm1, %v21772_v51  ;;  %v329_v51 = vld [vmem:[#allocation2 + $0x248] sm:$0xff] }
 0x424   :  { %17147 = vmatprep.mubr.msk.f32.mxu0 %vm20418_vm2, %v20417_v1 }
 0x425   :  { %16196 = vmatmul.mubr.msk.f32.gmra.mrb[146].mxu1 %vm45_vm1, %v329_v51 }
 0x426   :  { %16198 = vmatprep.mubr.msk.f32.mxu1 %vm20418_vm2, %v20417_v1 }
 0x427   :  { %17148 = vmatmul.mubr.msk.f32.gmra.mrb[4].mxu0 %vm45_vm1, %v21781_v53  ;;  %v330_v53 = vld [vmem:[#allocation2 + $0x250] sm:$0xff] }
 0x428   :  { %17150 = vmatprep.mubr.msk.f32.mxu0 %vm20418_vm2, %v20417_v1 }
 0x429   :  { %16199 = vmatmul.mubr.msk.f32.gmra.mrb[148].mxu1 %vm45_vm1, %v330_v53  ;;  %v1838_v53 = vld [vmem:[#allocation2 + $0x1c2] sm:$0xff] }
 0x42a   :  { %16201 = vmatprep.mubr.msk.f32.mxu1 %vm20418_vm2, %v20417_v1 }
 0x42b   :  { %17151 = vmatmul.mubr.msk.f32.gmra.mrb[6].mxu0 %vm45_vm1, %v21790_v55  ;;  %v331_v55 = vld [vmem:[#allocation2 + $0x258] sm:$0xff] }
 0x42c   :  { %17153 = vmatprep.mubr.msk.f32.mxu0 %vm20418_vm2, %v20417_v1 }
 0x42d   :  { %16202 = vmatmul.mubr.msk.f32.gmra.mrb[150].mxu1 %vm45_vm1, %v331_v55 }
 0x42e   :  { %16204 = vmatprep.mubr.msk.f32.mxu1 %vm20418_vm2, %v20417_v1 }
 0x42f   :  { %17154 = vmatmul.mubr.msk.f32.gmra.mrb[8].mxu0 %vm45_vm1, %v21799_v57  ;;  %v332_v57 = vld [vmem:[#allocation2 + $0x260] sm:$0x3] }
 0x430   :  { %17156 = vmatprep.mubr.msk.f32.mxu0 %vm20418_vm2, %v20417_v1 }
 0x431   :  { %16205 = vmatmul.mubr.msk.f32.gmra.mrb[152].mxu1 %vm45_vm1, %v332_v57  ;;  %v1839_v57 = vld [vmem:[#allocation2 + $0x1ca] sm:$0xff] }
 0x432   :  { %16269 = vmatprep.mubr.msk.f32.mxu1 %vm20418_vm2, %v20417_v1 }
 0x433   :  { %17157 = vmatmul.mubr.msk.f32.gmra.mrb[10].mxu0 %vm45_vm1, %v21808_v59  ;;  %v1802_v59 = vld [vmem:[#allocation2 + $0xa2] sm:$0xff] }
 0x434   :  { %17159 = vmatprep.mubr.msk.f32.mxu0 %vm20418_vm2, %v20417_v1 }
 0x435   :  { %16270 = vmatmul.mubr.msk.f32.vlgmr.msra.gmra.mrb[40].mxu1 %vm45_vm1, %v1802_v59 }
 0x436   :  { %16272 = vmatprep.mubr.msk.f32.mxu1 %vm20418_vm2, %v20417_v1 }
 0x437   :  { %17160 = vmatmul.mubr.msk.f32.gmra.mrb[12].mxu0 %vm45_vm1, %v21820_v62  ;;  %v1803_v62 = vld [vmem:[#allocation2 + $0xaa] sm:$0xff] }
 0x438   :  { %17162 = vmatprep.mubr.msk.f32.mxu0 %vm20418_vm2, %v20417_v1 }
 0x439   :  { %16273 = vmatmul.mubr.msk.f32.gmra.mrb[42].mxu1 %vm45_vm1, %v1803_v62 }
 0x43a   :  { %16275 = vmatprep.mubr.msk.f32.mxu1 %vm20418_vm2, %v20417_v1 }
 0x43b   :  { %17163 = vmatmul.mubr.msk.f32.gmra.mrb[14].mxu0 %vm45_vm1, %v21836_v2  ;;  %v1804_v2 = vld [vmem:[#allocation2 + $0xb2] sm:$0xff] }
 0x43c   :  { %17165 = vmatprep.mubr.msk.f32.mxu0 %vm20418_vm2, %v20417_v1 }
 0x43d   :  { %16276 = vmatmul.mubr.msk.f32.gmra.mrb[44].mxu1 %vm45_vm1, %v1804_v2 }
 0x43e   :  { %16278 = vmatprep.mubr.msk.f32.mxu1 %vm20418_vm2, %v20417_v1 }
 0x43f   :  { %17166 = vmatmul.mubr.msk.f32.gmra.mrb[16].mxu0 %vm45_vm1, %v21845_v4  ;;  %v1805_v4 = vld [vmem:[#allocation2 + $0xba] sm:$0xff] }
 0x440   :  { %17168 = vmatprep.mubr.msk.f32.mxu0 %vm20418_vm2, %v20417_v1 }
 0x441   :  { %16279 = vmatmul.mubr.msk.f32.gmra.mrb[46].mxu1 %vm45_vm1, %v1805_v4  ;;  %v1841_v4 = vld [vmem:[#allocation2 + $0x1da] sm:$0xff] }
 0x442   :  { %16281 = vmatprep.mubr.msk.f32.mxu1 %vm20418_vm2, %v20417_v1 }
 0x443   :  { %17169 = vmatmul.mubr.msk.f32.gmra.mrb[18].mxu0 %vm45_vm1, %v21854_v6  ;;  %v1806_v6 = vld [vmem:[#allocation2 + $0xc2] sm:$0xff] }
 0x444   :  { %17171 = vmatprep.mubr.msk.f32.mxu0 %vm20418_vm2, %v20417_v1 }
 0x445   :  { %16282 = vmatmul.mubr.msk.f32.gmra.mrb[48].mxu1 %vm45_vm1, %v1806_v6 }
 0x446   :  { %16284 = vmatprep.mubr.msk.f32.mxu1 %vm20418_vm2, %v20417_v1 }
 0x447   :  { %17172 = vmatmul.mubr.msk.f32.gmra.mrb[20].mxu0 %vm45_vm1, %v21863_v8  ;;  %v1807_v8 = vld [vmem:[#allocation2 + $0xca] sm:$0xff] }
 0x448   :  { %17174 = vmatprep.mubr.msk.f32.mxu0 %vm20418_vm2, %v20417_v1 }
 0x449   :  { %16285 = vmatmul.mubr.msk.f32.gmra.mrb[50].mxu1 %vm45_vm1, %v1807_v8  ;;  %v1842_v8 = vld [vmem:[#allocation2 + $0x1e2] sm:$0xff] }
 0x44a   :  { %16287 = vmatprep.mubr.msk.f32.mxu1 %vm20418_vm2, %v20417_v1 }
 0x44b   :  { %17175 = vmatmul.mubr.msk.f32.gmra.mrb[22].mxu0 %vm45_vm1, %v21872_v10  ;;  %v1808_v10 = vld [vmem:[#allocation2 + $0xd2] sm:$0xff] }
 0x44c   :  { %17177 = vmatprep.mubr.msk.f32.mxu0 %vm20418_vm2, %v20417_v1 }
 0x44d   :  { %16288 = vmatmul.mubr.msk.f32.gmra.mrb[52].mxu1 %vm45_vm1, %v1808_v10 }
 0x44e   :  { %16290 = vmatprep.mubr.msk.f32.mxu1 %vm20418_vm2, %v20417_v1 }
 0x44f   :  { %17178 = vmatmul.mubr.msk.f32.gmra.mrb[24].mxu0 %vm45_vm1, %v21881_v12  ;;  %v1809_v12 = vld [vmem:[#allocation2 + $0xda] sm:$0xff] }
 0x450   :  { %17180 = vmatprep.mubr.msk.f32.mxu0 %vm20418_vm2, %v20417_v1 }
 0x451   :  { %16291 = vmatmul.mubr.msk.f32.gmra.mrb[54].mxu1 %vm45_vm1, %v1809_v12  ;;  %v1843_v12 = vld [vmem:[#allocation2 + $0x1ea] sm:$0xff] }
 0x452   :  { %16293 = vmatprep.mubr.msk.f32.mxu1 %vm20418_vm2, %v20417_v1 }
 0x453   :  { %17181 = vmatmul.mubr.msk.f32.gmra.mrb[26].mxu0 %vm45_vm1, %v21890_v14  ;;  %v1810_v14 = vld [vmem:[#allocation2 + $0xe2] sm:$0xff] }
 0x454   :  { %17183 = vmatprep.mubr.msk.f32.mxu0 %vm20418_vm2, %v20417_v1 }
 0x455   :  { %16294 = vmatmul.mubr.msk.f32.gmra.mrb[56].mxu1 %vm45_vm1, %v1810_v14 }
 0x456   :  { %16296 = vmatprep.mubr.msk.f32.mxu1 %vm20418_vm2, %v20417_v1 }
 0x457   :  { %17184 = vmatmul.mubr.msk.f32.gmra.mrb[28].mxu0 %vm45_vm1, %v21899_v16  ;;  %v1811_v16 = vld [vmem:[#allocation2 + $0xea] sm:$0xff] }
 0x458   :  { %17186 = vmatprep.mubr.msk.f32.mxu0 %vm20418_vm2, %v20417_v1 }
 0x459   :  { %16297 = vmatmul.mubr.msk.f32.gmra.mrb[58].mxu1 %vm45_vm1, %v1811_v16  ;;  %v1844_v16 = vld [vmem:[#allocation2 + $0x1f2] sm:$0xff] }
 0x45a   :  { %16299 = vmatprep.mubr.msk.f32.mxu1 %vm20418_vm2, %v20417_v1 }
 0x45b   :  { %17187 = vmatmul.mubr.msk.f32.gmra.mrb[30].mxu0 %vm45_vm1, %v21908_v18  ;;  %v1812_v18 = vld [vmem:[#allocation2 + $0xf2] sm:$0xff] }
 0x45c   :  { %17189 = vmatprep.mubr.msk.f32.mxu0 %vm20418_vm2, %v20417_v1 }
 0x45d   :  { %16300 = vmatmul.mubr.msk.f32.gmra.mrb[60].mxu1 %vm45_vm1, %v1812_v18 }
 0x45e   :  { %16302 = vmatprep.mubr.msk.f32.mxu1 %vm20418_vm2, %v20417_v1 }
 0x45f   :  { %17190 = vmatmul.mubr.msk.f32.gmra.mrb[32].mxu0 %vm45_vm1, %v21917_v20  ;;  %v1813_v20 = vld [vmem:[#allocation2 + $0xfa] sm:$0xff] }
 0x460   :  { %17192 = vmatprep.mubr.msk.f32.mxu0 %vm20418_vm2, %v20417_v1 }
 0x461   :  { %16303 = vmatmul.mubr.msk.f32.gmra.mrb[62].mxu1 %vm45_vm1, %v1813_v20  ;;  %v1845_v20 = vld [vmem:[#allocation2 + $0x1fa] sm:$0xff] }
 0x462   :  { %16305 = vmatprep.mubr.msk.f32.mxu1 %vm20418_vm2, %v20417_v1 }
 0x463   :  { %17193 = vmatmul.mubr.msk.f32.gmra.mrb[34].mxu0 %vm45_vm1, %v21926_v22  ;;  %v1814_v22 = vld [vmem:[#allocation2 + $0x102] sm:$0xff] }
 0x464   :  { %17195 = vmatprep.mubr.msk.f32.mxu0 %vm20418_vm2, %v20417_v1 }
 0x465   :  { %16306 = vmatmul.mubr.msk.f32.gmra.mrb[64].mxu1 %vm45_vm1, %v1814_v22 }
 0x466   :  { %16308 = vmatprep.mubr.msk.f32.mxu1 %vm20418_vm2, %v20417_v1 }
 0x467   :  { %17196 = vmatmul.mubr.msk.f32.gmra.mrb[36].mxu0 %vm45_vm1, %v21935_v24  ;;  %v1815_v24 = vld [vmem:[#allocation2 + $0x10a] sm:$0xff] }
 0x468   :  { %17198 = vmatprep.mubr.msk.f32.mxu0 %vm20418_vm2, %v20417_v1 }
 0x469   :  { %16309 = vmatmul.mubr.msk.f32.gmra.mrb[66].mxu1 %vm45_vm1, %v1815_v24  ;;  %v1846_v24 = vld [vmem:[#allocation2 + $0x202] sm:$0xff] }
 0x46a   :  { %16311 = vmatprep.mubr.msk.f32.mxu1 %vm20418_vm2, %v20417_v1 }
 0x46b   :  { %17199 = vmatmul.mubr.msk.f32.gmra.mrb[38].mxu0 %vm45_vm1, %v21944_v26  ;;  %v1816_v26 = vld [vmem:[#allocation2 + $0x112] sm:$0xff] }
 0x46c   :  { %17201 = vmatprep.mubr.msk.f32.mxu0 %vm20418_vm2, %v20417_v1 }
 0x46d   :  { %16312 = vmatmul.mubr.msk.f32.gmra.mrb[68].mxu1 %vm45_vm1, %v1816_v26 }
 0x46e   :  { %16314 = vmatprep.mubr.msk.f32.mxu1 %vm20418_vm2, %v20417_v1 }
 0x46f   :  { %17202 = vmatmul.mubr.msk.f32.gmra.mrb[40].mxu0 %vm45_vm1, %v21953_v28  ;;  %v1817_v28 = vld [vmem:[#allocation2 + $0x11a] sm:$0xff] }
 0x470   :  { %17204 = vmatprep.mubr.msk.f32.mxu0 %vm20418_vm2, %v20417_v1 }
 0x471   :  { %16315 = vmatmul.mubr.msk.f32.gmra.mrb[70].mxu1 %vm45_vm1, %v1817_v28  ;;  %v1847_v28 = vld [vmem:[#allocation2 + $0x20a] sm:$0xff] }
 0x472   :  { %16317 = vmatprep.mubr.msk.f32.mxu1 %vm20418_vm2, %v20417_v1 }
 0x473   :  { %17205 = vmatmul.mubr.msk.f32.gmra.mrb[42].mxu0 %vm45_vm1, %v21962_v30  ;;  %v1818_v30 = vld [vmem:[#allocation2 + $0x122] sm:$0xff] }
 0x474   :  { %17207 = vmatprep.mubr.msk.f32.mxu0 %vm20418_vm2, %v20417_v1 }
 0x475   :  { %16318 = vmatmul.mubr.msk.f32.gmra.mrb[72].mxu1 %vm45_vm1, %v1818_v30 }
 0x476   :  { %16320 = vmatprep.mubr.msk.f32.mxu1 %vm20418_vm2, %v20417_v1 }
 0x477   :  { %17208 = vmatmul.mubr.msk.f32.gmra.mrb[44].mxu0 %vm45_vm1, %v21971_v32  ;;  %v1819_v32 = vld [vmem:[#allocation2 + $0x12a] sm:$0xff] }
 0x478   :  { %17210 = vmatprep.mubr.msk.f32.mxu0 %vm20418_vm2, %v20417_v1 }
 0x479   :  { %16321 = vmatmul.mubr.msk.f32.gmra.mrb[74].mxu1 %vm45_vm1, %v1819_v32  ;;  %v1848_v32 = vld [vmem:[#allocation2 + $0x212] sm:$0xff] }
 0x47a   :  { %16323 = vmatprep.mubr.msk.f32.mxu1 %vm20418_vm2, %v20417_v1 }
 0x47b   :  { %17211 = vmatmul.mubr.msk.f32.gmra.mrb[46].mxu0 %vm45_vm1, %v21980_v34  ;;  %v1820_v34 = vld [vmem:[#allocation2 + $0x132] sm:$0xff] }
 0x47c   :  { %17213 = vmatprep.mubr.msk.f32.mxu0 %vm20418_vm2, %v20417_v1 }
 0x47d   :  { %16324 = vmatmul.mubr.msk.f32.gmra.mrb[76].mxu1 %vm45_vm1, %v1820_v34 }
 0x47e   :  { %16326 = vmatprep.mubr.msk.f32.mxu1 %vm20418_vm2, %v20417_v1 }
 0x47f   :  { %17214 = vmatmul.mubr.msk.f32.gmra.mrb[48].mxu0 %vm45_vm1, %v21989_v36  ;;  %v1821_v36 = vld [vmem:[#allocation2 + $0x13a] sm:$0xff] }
 0x480   :  { %17216 = vmatprep.mubr.msk.f32.mxu0 %vm20418_vm2, %v20417_v1 }
 0x481   :  { %16327 = vmatmul.mubr.msk.f32.gmra.mrb[78].mxu1 %vm45_vm1, %v1821_v36  ;;  %v1849_v36 = vld [vmem:[#allocation2 + $0x21a] sm:$0xff] }
 0x482   :  { %16329 = vmatprep.mubr.msk.f32.mxu1 %vm20418_vm2, %v20417_v1 }
 0x483   :  { %17217 = vmatmul.mubr.msk.f32.gmra.mrb[50].mxu0 %vm45_vm1, %v21998_v38  ;;  %v1822_v38 = vld [vmem:[#allocation2 + $0x142] sm:$0xff] }
 0x484   :  { %17219 = vmatprep.mubr.msk.f32.mxu0 %vm20418_vm2, %v20417_v1 }
 0x485   :  { %16330 = vmatmul.mubr.msk.f32.gmra.mrb[80].mxu1 %vm45_vm1, %v1822_v38 }
 0x486   :  { %16332 = vmatprep.mubr.msk.f32.mxu1 %vm20418_vm2, %v20417_v1 }
 0x487   :  { %17220 = vmatmul.mubr.msk.f32.gmra.mrb[52].mxu0 %vm45_vm1, %v22007_v40  ;;  %v1823_v40 = vld [vmem:[#allocation2 + $0x14a] sm:$0xff] }
 0x488   :  { %17222 = vmatprep.mubr.msk.f32.mxu0 %vm20418_vm2, %v20417_v1 }
 0x489   :  { %16333 = vmatmul.mubr.msk.f32.gmra.mrb[82].mxu1 %vm45_vm1, %v1823_v40  ;;  %v1850_v40 = vld [vmem:[#allocation2 + $0x222] sm:$0xff] }
 0x48a   :  { %16335 = vmatprep.mubr.msk.f32.mxu1 %vm20418_vm2, %v20417_v1 }
 0x48b   :  { %17223 = vmatmul.mubr.msk.f32.gmra.mrb[54].mxu0 %vm45_vm1, %v22016_v42  ;;  %v1824_v42 = vld [vmem:[#allocation2 + $0x152] sm:$0xff] }
 0x48c   :  { %17225 = vmatprep.mubr.msk.f32.mxu0 %vm20418_vm2, %v20417_v1 }
 0x48d   :  { %16336 = vmatmul.mubr.msk.f32.gmra.mrb[84].mxu1 %vm45_vm1, %v1824_v42 }
 0x48e   :  { %16338 = vmatprep.mubr.msk.f32.mxu1 %vm20418_vm2, %v20417_v1 }
 0x48f   :  { %17226 = vmatmul.mubr.msk.f32.gmra.mrb[56].mxu0 %vm45_vm1, %v22025_v44  ;;  %v1825_v44 = vld [vmem:[#allocation2 + $0x15a] sm:$0xff] }
 0x490   :  { %17228 = vmatprep.mubr.msk.f32.mxu0 %vm20418_vm2, %v20417_v1 }
 0x491   :  { %16339 = vmatmul.mubr.msk.f32.gmra.mrb[86].mxu1 %vm45_vm1, %v1825_v44  ;;  %v1851_v44 = vld [vmem:[#allocation2 + $0x22a] sm:$0xff] }
 0x492   :  { %16341 = vmatprep.mubr.msk.f32.mxu1 %vm20418_vm2, %v20417_v1 }
 0x493   :  { %17229 = vmatmul.mubr.msk.f32.gmra.mrb[58].mxu0 %vm45_vm1, %v22034_v46  ;;  %v1826_v46 = vld [vmem:[#allocation2 + $0x162] sm:$0xff] }
 0x494   :  { %17231 = vmatprep.mubr.msk.f32.mxu0 %vm20418_vm2, %v20417_v1 }
 0x495   :  { %16342 = vmatmul.mubr.msk.f32.gmra.mrb[88].mxu1 %vm45_vm1, %v1826_v46 }
 0x496   :  { %16344 = vmatprep.mubr.msk.f32.mxu1 %vm20418_vm2, %v20417_v1 }
 0x497   :  { %17232 = vmatmul.mubr.msk.f32.gmra.mrb[60].mxu0 %vm45_vm1, %v22043_v48  ;;  %v1827_v48 = vld [vmem:[#allocation2 + $0x16a] sm:$0xff] }
 0x498   :  { %17234 = vmatprep.mubr.msk.f32.mxu0 %vm20418_vm2, %v20417_v1 }
 0x499   :  { %16345 = vmatmul.mubr.msk.f32.gmra.mrb[90].mxu1 %vm45_vm1, %v1827_v48  ;;  %v1852_v48 = vld [vmem:[#allocation2 + $0x232] sm:$0xff] }
 0x49a   :  { %16347 = vmatprep.mubr.msk.f32.mxu1 %vm20418_vm2, %v20417_v1 }
 0x49b   :  { %17235 = vmatmul.mubr.msk.f32.gmra.mrb[62].mxu0 %vm45_vm1, %v22052_v52  ;;  %v1828_v52 = vld [vmem:[#allocation2 + $0x172] sm:$0xff] }
 0x49c   :  { %17237 = vmatprep.mubr.msk.f32.mxu0 %vm20418_vm2, %v20417_v1 }
 0x49d   :  { %16348 = vmatmul.mubr.msk.f32.gmra.mrb[92].mxu1 %vm45_vm1, %v1828_v52  ;;  %v25146_v52 = vld [vmem:[#allocation13_spill] sm:$0xff] }
 0x49e   :  { %16350 = vmatprep.mubr.msk.f32.mxu1 %vm20418_vm2, %v20417_v1 }
 0x49f   :  { %17238 = vmatmul.mubr.msk.f32.gmra.mrb[64].mxu0 %vm45_vm1, %v22061_v56  ;;  %v1829_v56 = vld [vmem:[#allocation2 + $0x17a] sm:$0xff] }
 0x4a0   :  { %17240 = vmatprep.mubr.msk.f32.mxu0 %vm20418_vm2, %v20417_v1 }
 0x4a1   :  { %16351 = vmatmul.mubr.msk.f32.gmra.mrb[94].mxu1 %vm45_vm1, %v1829_v56 }
 0x4a2   :  { %16353 = vmatprep.mubr.msk.f32.mxu1 %vm20418_vm2, %v20417_v1 }
 0x4a3   :  { %17241 = vmatmul.mubr.msk.f32.gmra.mrb[66].mxu0 %vm45_vm1, %v22070_v60  ;;  %v1830_v60 = vld [vmem:[#allocation2 + $0x182] sm:$0xff] }
 0x4a4   :  { %17243 = vmatprep.mubr.msk.f32.mxu0 %vm20418_vm2, %v20417_v1 }
 0x4a5   :  { %16354 = vmatmul.mubr.msk.f32.gmra.mrb[96].mxu1 %vm45_vm1, %v1830_v60  ;;  %v1853_v60 = vld [vmem:[#allocation2 + $0x23a] sm:$0xff] }
 0x4a6   :  { %16356 = vmatprep.mubr.msk.f32.mxu1 %vm20418_vm2, %v20417_v1 }
 0x4a7   :  { %17244 = vmatmul.mubr.msk.f32.gmra.mrb[68].mxu0 %vm45_vm1, %v22079_v63  ;;  %v1831_v63 = vld [vmem:[#allocation2 + $0x18a] sm:$0xff] }
 0x4a8   :  { %17246 = vmatprep.mubr.msk.f32.mxu0 %vm20418_vm2, %v20417_v1 }
 0x4a9   :  { %16357 = vmatmul.mubr.msk.f32.gmra.mrb[98].mxu1 %vm45_vm1, %v1831_v63  ;;  %v25147_v63 = vld [vmem:[#allocation14_spill] sm:$0xff] }
 0x4aa   :  { %16359 = vmatprep.mubr.msk.f32.mxu1 %vm20418_vm2, %v20417_v1 }
 0x4ab   :  { %17247 = vmatmul.mubr.msk.f32.gmra.mrb[70].mxu0 %vm45_vm1, %v22088_v3  ;;  %v1832_v3 = vld [vmem:[#allocation2 + $0x192] sm:$0xff] }
 0x4ac   :  { %17249 = vmatprep.mubr.msk.f32.mxu0 %vm20418_vm2, %v20417_v1 }
 0x4ad   :  { %16360 = vmatmul.mubr.msk.f32.gmra.mrb[100].mxu1 %vm45_vm1, %v1832_v3 }
 0x4ae   :  { %16362 = vmatprep.mubr.msk.f32.mxu1 %vm20418_vm2, %v20417_v1 }
 0x4af   :  { %17250 = vmatmul.mubr.msk.f32.gmra.mrb[72].mxu0 %vm45_vm1, %v22097_v7  ;;  %v1833_v7 = vld [vmem:[#allocation2 + $0x19a] sm:$0xff] }
 0x4b0   :  { %17252 = vmatprep.mubr.msk.f32.mxu0 %vm20418_vm2, %v20417_v1 }
 0x4b1   :  { %16363 = vmatmul.mubr.msk.f32.gmra.mrb[102].mxu1 %vm45_vm1, %v1833_v7  ;;  %v1854_v7 = vld [vmem:[#allocation2 + $0x242] sm:$0xff] }
 0x4b2   :  { %16365 = vmatprep.mubr.msk.f32.mxu1 %vm20418_vm2, %v20417_v1 }
 0x4b3   :  { %17253 = vmatmul.mubr.msk.f32.gmra.mrb[74].mxu0 %vm45_vm1, %v22106_v11  ;;  %v1834_v11 = vld [vmem:[#allocation2 + $0x1a2] sm:$0xff] }
 0x4b4   :  { %17255 = vmatprep.mubr.msk.f32.mxu0 %vm20418_vm2, %v20417_v1 }
 0x4b5   :  { %16366 = vmatmul.mubr.msk.f32.gmra.mrb[104].mxu1 %vm45_vm1, %v1834_v11 }
 0x4b6   :  { %16368 = vmatprep.mubr.msk.f32.mxu1 %vm20418_vm2, %v20417_v1 }
 0x4b7   :  { %17256 = vmatmul.mubr.msk.f32.gmra.mrb[76].mxu0 %vm45_vm1, %v22115_v15  ;;  %v22735_v15 = vpop.f32.mrb[0].mxu1 }
 0x4b8   :  { %17258 = vmatprep.mubr.msk.f32.mxu0 %vm20418_vm2, %v20417_v1  ;;  %v15978_v50 = vpop.f32.mrb[1].mxu1 }
 0x4b9   :  { %16369 = vmatmul.mubr.msk.f32.gmra.mrb[106].mxu1 %vm45_vm1, %v1835_v33  ;;  %v25148_v33 = vld [vmem:[#allocation15_spill] sm:$0xff]  ;;  %v1855_v50 = vld [vmem:[#allocation2 + $0x24a] sm:$0xff] }
 0x4ba   :  { %16371 = vmatprep.mubr.msk.f32.mxu1 %vm20418_vm2, %v20417_v1 }
 0x4bb   :  { %17259 = vmatmul.mubr.msk.f32.gmra.mrb[78].mxu0 %vm45_vm1, %v22124_v19  ;;  %v22744_v19 = vpop.f32.mrb[2].mxu1 }
 0x4bc   :  { %17261 = vmatprep.mubr.msk.f32.mxu0 %vm20418_vm2, %v20417_v1 }
 0x4bd   :  { %16372 = vmatmul.mubr.msk.f32.gmra.mrb[108].mxu1 %vm45_vm1, %v1836_v17 }
 0x4be   :  { %16374 = vmatprep.mubr.msk.f32.mxu1 %vm20418_vm2, %v20417_v1 }
 0x4bf   :  { %17262 = vmatmul.mubr.msk.f32.gmra.mrb[80].mxu0 %vm45_vm1, %v22133_v23  ;;  %v15981_v23 = vpop.f32.mrb[3].mxu1 }
 0x4c0   :  { %17264 = vmatprep.mubr.msk.f32.mxu0 %vm20418_vm2, %v20417_v1  ;;  %v22753_v0 = vpop.f32.mrb[4].mxu1 }
 0x4c1   :  { %16375 = vmatmul.mubr.msk.f32.gmra.mrb[110].mxu1 %vm45_vm1, %v1837_v49  ;;  %v25149_v49 = vld [vmem:[#allocation16_spill] sm:$0xff] }
 0x4c2   :  { %16377 = vmatprep.mubr.msk.f32.mxu1 %vm20418_vm2, %v20417_v1 }
 0x4c3   :  { %17265 = vmatmul.mubr.msk.f32.gmra.mrb[82].mxu0 %vm45_vm1, %v22142_v27  ;;  %v15984_v27 = vpop.f32.mrb[5].mxu1 }
 0x4c4   :  { %17267 = vmatprep.mubr.msk.f32.mxu0 %vm20418_vm2, %v20417_v1  ;;  %v22762_v51 = vpop.f32.mrb[6].mxu1  ;;  %v1856_v27 = vld [vmem:[#allocation2 + $0x252] sm:$0xff] }
 0x4c5   :  { %16378 = vmatmul.mubr.msk.f32.gmra.mrb[112].mxu1 %vm45_vm1, %v1838_v53 }
 0x4c6   :  { %16380 = vmatprep.mubr.msk.f32.mxu1 %vm20418_vm2, %v20417_v1 }
 0x4c7   :  { %17268 = vmatmul.mubr.msk.f32.gmra.mrb[84].mxu0 %vm45_vm1, %v22151_v31  ;;  %v15987_v31 = vpop.f32.mrb[7].mxu1 }
 0x4c8   :  { %17270 = vmatprep.mubr.msk.f32.mxu0 %vm20418_vm2, %v20417_v1  ;;  %v22771_v55 = vpop.f32.mrb[8].mxu1 }
 0x4c9   :  { %16381 = vmatmul.mubr.msk.f32.gmra.mrb[114].mxu1 %vm45_vm1, %v1839_v57  ;;  %v25150_v57 = vld [vmem:[#allocation17_spill] sm:$0xff] }
 0x4ca   :  { %16383 = vmatprep.mubr.msk.f32.mxu1 %vm20418_vm2, %v20417_v1 }
 0x4cb   :  { %17271 = vmatmul.mubr.msk.f32.gmra.mrb[86].mxu0 %vm45_vm1, %v22160_v35  ;;  %v15990_v35 = vpop.f32.mrb[9].mxu1 }
 0x4cc   :  { %17273 = vmatprep.mubr.msk.f32.mxu0 %vm20418_vm2, %v20417_v1  ;;  %v22782_v59 = vpop.f32.mrb[10].mxu1  ;;  %v1857_v35 = vld [vmem:[#allocation2 + $0x25a] sm:$0xff] }
 0x4cd   :  { %v15993_v62 = vpop.f32.mrb[11].mxu1 }
 0x4ce   :  { %v22789_v2 = vpop.f32.mrb[12].mxu1 }
 0x4cf   :  { %17274 = vmatmul.mubr.msk.f32.gmra.mrb[88].mxu0 %vm45_vm1, %v22169_v37  ;;  %v1840_v37 = vld [vmem:[#allocation2 + $0x1d2] sm:$0xff] }
 0x4d0   :  { %17276 = vmatprep.mubr.msk.f32.mxu0 %vm20418_vm2, %v20417_v1  ;;  %16384 = vmatmul.mubr.msk.f32.gmra.mrb[116].mxu1 %vm45_vm1, %v1840_v37 }
 0x4d1   :  { %16386 = vmatprep.mubr.msk.f32.mxu1 %vm20418_vm2, %v20417_v1 }
 0x4d3   :  { %17277 = vmatmul.mubr.msk.f32.gmra.mrb[90].mxu0 %vm45_vm1, %v22178_v43  ;;  %v15996_v43 = vpop.f32.mrb[13].mxu1 }
 0x4d4   :  { %17279 = vmatprep.mubr.msk.f32.mxu0 %vm20418_vm2, %v20417_v1  ;;  %16387 = vmatmul.mubr.msk.f32.gmra.mrb[118].mxu1 %vm45_vm1, %v1841_v4  ;;  %v22798_v6 = vpop.f32.mrb[14].mxu1  ;;  %v25151_v4 = vld [vmem:[#allocation18_spill] sm:$0xff]  ;;  %v1858_v43 = vld [vmem:[#allocation2 + $0x262] sm:$0x3] }
 0x4d5   :  { %16389 = vmatprep.mubr.msk.f32.mxu1 %vm20418_vm2, %v20417_v1 }
 0x4d7   :  { %17280 = vmatmul.mubr.msk.f32.gmra.mrb[92].mxu0 %vm45_vm1, %v22187_v47  ;;  %v15999_v47 = vpop.f32.mrb[15].mxu1 }
 0x4d8   :  { %17282 = vmatprep.mubr.msk.f32.mxu0 %vm20418_vm2, %v20417_v1  ;;  %16390 = vmatmul.mubr.msk.f32.gmra.mrb[120].mxu1 %vm45_vm1, %v1842_v8  ;;  %v22807_v10 = vpop.f32.mrb[16].mxu1 }
 0x4d9   :  { %16392 = vmatprep.mubr.msk.f32.mxu1 %vm20418_vm2, %v20417_v1 }
 0x4db   :  { %17283 = vmatmul.mubr.msk.f32.gmra.mrb[94].mxu0 %vm45_vm1, %v22196_v54  ;;  %v16002_v54 = vpop.f32.mrb[17].mxu1 }
 0x4dc   :  { %17285 = vmatprep.mubr.msk.f32.mxu0 %vm20418_vm2, %v20417_v1  ;;  %16393 = vmatmul.mubr.msk.f32.gmra.mrb[122].mxu1 %vm45_vm1, %v1843_v12  ;;  %v22816_v14 = vpop.f32.mrb[18].mxu1  ;;  %v25152_v12 = vld [vmem:[#allocation19_spill] sm:$0xff] }
 0x4dd   :  { %16395 = vmatprep.mubr.msk.f32.mxu1 %vm20418_vm2, %v20417_v1 }
 0x4df   :  { %17286 = vmatmul.mubr.msk.f32.gmra.mrb[96].mxu0 %vm45_vm1, %v22205_v61  ;;  %v16005_v61 = vpop.f32.mrb[19].mxu1 }
 0x4e0   :  { %17288 = vmatprep.mubr.msk.f32.mxu0 %vm20418_vm2, %v20417_v1  ;;  %16396 = vmatmul.mubr.msk.f32.gmra.mrb[124].mxu1 %vm45_vm1, %v1844_v16  ;;  %v22825_v18 = vpop.f32.mrb[20].mxu1  ;;  %v25153_v61 = vld [vmem:[#allocation20_spill] sm:$0xff] }
 0x4e1   :  { %16398 = vmatprep.mubr.msk.f32.mxu1 %vm20418_vm2, %v20417_v1 }
 0x4e3   :  { %17289 = vmatmul.mubr.msk.f32.gmra.mrb[98].mxu0 %vm45_vm1, %v22214_v5  ;;  %v16008_v5 = vpop.f32.mrb[21].mxu1 }
 0x4e4   :  { %17291 = vmatprep.mubr.msk.f32.mxu0 %vm20418_vm2, %v20417_v1  ;;  %16399 = vmatmul.mubr.msk.f32.gmra.mrb[126].mxu1 %vm45_vm1, %v1845_v20  ;;  %v22834_v22 = vpop.f32.mrb[22].mxu1 }
 0x4e5   :  { %16401 = vmatprep.mubr.msk.f32.mxu1 %vm20418_vm2, %v20417_v1 }
 0x4e7   :  { %17292 = vmatmul.mubr.msk.f32.gmra.mrb[100].mxu0 %vm45_vm1, %v22223_v13  ;;  %v16011_v13 = vpop.f32.mrb[23].mxu1 }
 0x4e8   :  { %17294 = vmatprep.mubr.msk.f32.mxu0 %vm20418_vm2, %v20417_v1  ;;  %16402 = vmatmul.mubr.msk.f32.gmra.mrb[128].mxu1 %vm45_vm1, %v1846_v24  ;;  %v22843_v26 = vpop.f32.mrb[24].mxu1  ;;  %v25154_v24 = vld [vmem:[#allocation21_spill] sm:$0xff] }
 0x4e9   :  { %16404 = vmatprep.mubr.msk.f32.mxu1 %vm20418_vm2, %v20417_v1 }
 0x4eb   :  { %17295 = vmatmul.mubr.msk.f32.gmra.mrb[102].mxu0 %vm45_vm1, %v22232_v21  ;;  %v16014_v21 = vpop.f32.mrb[25].mxu1 }
 0x4ec   :  { %17297 = vmatprep.mubr.msk.f32.mxu0 %vm20418_vm2, %v20417_v1  ;;  %16405 = vmatmul.mubr.msk.f32.gmra.mrb[130].mxu1 %vm45_vm1, %v1847_v28  ;;  %v22852_v30 = vpop.f32.mrb[26].mxu1  ;;  %v25155_v21 = vld [vmem:[#allocation22_spill] sm:$0xff] }
 0x4ed   :  { %16407 = vmatprep.mubr.msk.f32.mxu1 %vm20418_vm2, %v20417_v1 }
 0x4ef   :  { %17298 = vmatmul.mubr.msk.f32.gmra.mrb[104].mxu0 %vm45_vm1, %v22241_v29  ;;  %v16017_v29 = vpop.f32.mrb[27].mxu1 }
 0x4f0   :  { %17300 = vmatprep.mubr.msk.f32.mxu0 %vm20418_vm2, %v20417_v1  ;;  %16408 = vmatmul.mubr.msk.f32.gmra.mrb[132].mxu1 %vm45_vm1, %v1848_v32  ;;  %v22861_v34 = vpop.f32.mrb[28].mxu1 }
 0x4f1   :  { %16410 = vmatprep.mubr.msk.f32.mxu1 %vm20418_vm2, %v20417_v1 }
 0x4f3   :  { %17301 = vmatmul.mubr.msk.f32.gmra.mrb[106].mxu0 %vm45_vm1, %v22250_v39  ;;  %v16020_v39 = vpop.f32.mrb[29].mxu1 }
 0x4f4   :  { %17303 = vmatprep.mubr.msk.f32.mxu0 %vm20418_vm2, %v20417_v1  ;;  %16411 = vmatmul.mubr.msk.f32.gmra.mrb[134].mxu1 %vm45_vm1, %v1849_v36  ;;  %v22870_v38 = vpop.f32.mrb[30].mxu1  ;;  %v25156_v36 = vld [vmem:[#allocation23_spill] sm:$0xff] }
 0x4f5   :  { %16413 = vmatprep.mubr.msk.f32.mxu1 %vm20418_vm2, %v20417_v1 }
 0x4f7   :  { %17304 = vmatmul.mubr.msk.f32.gmra.mrb[108].mxu0 %vm45_vm1, %v22259_v45  ;;  %v16023_v45 = vpop.f32.mrb[31].mxu1 }
 0x4f8   :  { %17306 = vmatprep.mubr.msk.f32.mxu0 %vm20418_vm2, %v20417_v1  ;;  %16414 = vmatmul.mubr.msk.f32.gmra.mrb[136].mxu1 %vm45_vm1, %v1850_v40  ;;  %v22879_v42 = vpop.f32.mrb[32].mxu1  ;;  %v25157_v45 = vld [vmem:[#allocation24_spill] sm:$0xff] }
 0x4f9   :  { %16416 = vmatprep.mubr.msk.f32.mxu1 %vm20418_vm2, %v20417_v1 }
 0x4fb   :  { %17307 = vmatmul.mubr.msk.f32.gmra.mrb[110].mxu0 %vm45_vm1, %v22268_v58  ;;  %v16026_v58 = vpop.f32.mrb[33].mxu1 }
 0x4fc   :  { %17309 = vmatprep.mubr.msk.f32.mxu0 %vm20418_vm2, %v20417_v1  ;;  %16417 = vmatmul.mubr.msk.f32.gmra.mrb[138].mxu1 %vm45_vm1, %v1851_v44  ;;  %v22888_v46 = vpop.f32.mrb[34].mxu1 }
 0x4fd   :  { %16419 = vmatprep.mubr.msk.f32.mxu1 %vm20418_vm2, %v20417_v1 }
 0x4ff   :  { %17310 = vmatmul.mubr.msk.f32.gmra.mrb[112].mxu0 %vm45_vm1, %v22277_v9  ;;  %v16029_v9 = vpop.f32.mrb[35].mxu1 }
 0x500   :  { %17312 = vmatprep.mubr.msk.f32.mxu0 %vm20418_vm2, %v20417_v1  ;;  %16420 = vmatmul.mubr.msk.f32.gmra.mrb[140].mxu1 %vm45_vm1, %v1852_v48  ;;  %v22897_v56 = vpop.f32.mrb[36].mxu1  ;;  %v25158_v48 = vld [vmem:[#allocation25_spill] sm:$0xff] }
 0x501   :  { %16422 = vmatprep.mubr.msk.f32.mxu1 %vm20418_vm2, %v20417_v1 }
 0x503   :  { %17313 = vmatmul.mubr.msk.f32.gmra.mrb[114].mxu0 %vm45_vm1, %v22286_v25  ;;  %v16032_v25 = vpop.f32.mrb[37].mxu1 }
 0x504   :  { %17315 = vmatprep.mubr.msk.f32.mxu0 %vm20418_vm2, %v20417_v1  ;;  %16423 = vmatmul.mubr.msk.f32.gmra.mrb[142].mxu1 %vm45_vm1, %v1853_v60  ;;  %v22906_v3 = vpop.f32.mrb[38].mxu1  ;;  %v25159_v60 = vld [vmem:[#allocation26_spill] sm:$0xff] }
 0x505   :  { %16425 = vmatprep.mubr.msk.f32.mxu1 %vm20418_vm2, %v20417_v1  ;;  %v16035_v11 = vpop.f32.mrb[39].mxu1 }
 0x507   :  { %17316 = vmatmul.mubr.msk.f32.gmra.mrb[116].mxu0 %vm45_vm1, %v25146_v52 }
 0x508   :  { %17318 = vmatprep.mubr.msk.f32.mxu0 %vm20418_vm2, %v20417_v1  ;;  %16426 = vmatmul.mubr.msk.f32.gmra.mrb[144].mxu1 %vm45_vm1, %v1854_v7  ;;  %v22917_v17 = vpop.f32.mrb[40].mxu1  ;;  %v25160_v7 = vld [vmem:[#allocation27_spill] sm:$0xff] }
 0x509   :  { %16428 = vmatprep.mubr.msk.f32.mxu1 %vm20418_vm2, %v20417_v1  ;;  %v16271_v23 = vpop.f32.mrb[41].mxu1 }
 0x50b   :  { %17319 = vmatmul.mubr.msk.f32.gmra.mrb[118].mxu0 %vm45_vm1, %v25147_v63 }
 0x50c   :  { %17321 = vmatprep.mubr.msk.f32.mxu0 %vm20418_vm2, %v20417_v1  ;;  %16429 = vmatmul.mubr.msk.f32.gmra.mrb[146].mxu1 %vm45_vm1, %v1855_v50  ;;  %v22926_v53 = vpop.f32.mrb[42].mxu1  ;;  %v5216_v50 = vld [vmem:[#allocation2 + $0x274] sm:$0xff] }
 0x50d   :  { %16431 = vmatprep.mubr.msk.f32.mxu1 %vm20418_vm2, %v20417_v1  ;;  %v16274_v31 = vpop.f32.mrb[43].mxu1 }
 0x50f   :  { %17322 = vmatmul.mubr.msk.f32.gmra.mrb[120].mxu0 %vm45_vm1, %v25148_v33 }
 0x510   :  { %17324 = vmatprep.mubr.msk.f32.mxu0 %vm20418_vm2, %v20417_v1  ;;  %16432 = vmatmul.mubr.msk.f32.gmra.mrb[148].mxu1 %vm45_vm1, %v1856_v27  ;;  %v22935_v37 = vpop.f32.mrb[44].mxu1  ;;  %v5217_v27 = vld [vmem:[#allocation2 + $0x27c] sm:$0xff] }
 0x511   :  { %16434 = vmatprep.mubr.msk.f32.mxu1 %vm20418_vm2, %v20417_v1  ;;  %v16277_v62 = vpop.f32.mrb[45].mxu1 }
 0x513   :  { %17325 = vmatmul.mubr.msk.f32.gmra.mrb[122].mxu0 %vm45_vm1, %v25149_v49 }
 0x514   :  { %17327 = vmatprep.mubr.msk.f32.mxu0 %vm20418_vm2, %v20417_v1  ;;  %16435 = vmatmul.mubr.msk.f32.gmra.mrb[150].mxu1 %vm45_vm1, %v1857_v35  ;;  %v22944_v8 = vpop.f32.mrb[46].mxu1 }
 0x515   :  { %16437 = vmatprep.mubr.msk.f32.mxu1 %vm20418_vm2, %v20417_v1  ;;  %v16280_v47 = vpop.f32.mrb[47].mxu1 }
 0x516   :  { %v14272_v47 = vld [vmem:[%s25103_s1 + $0x20] sm:$0xf] }
 0x517   :  { %17328 = vmatmul.mubr.msk.f32.gmra.mrb[124].mxu0 %vm45_vm1, %v25150_v57 }
 0x518   :  { %17330 = vmatprep.mubr.msk.f32.mxu0 %vm20418_vm2, %v20417_v1  ;;  %16438 = vmatmul.mubr.msk.f32.gmra.mrb[152].mxu1 %vm45_vm1, %v1858_v43  ;;  %v22953_v54 = vpop.f32.mrb[48].mxu1 }
 0x519   :  { %17840 = vmatprep.mubr.msk.f32.mxu1 %vm20418_vm2, %v20417_v1  ;;  %v16283_v16 = vpop.f32.mrb[49].mxu1 }
 0x51a   :  { %v5983_v16 = vld [vmem:[#allocation2 + $0x2d] sm:$0xff] }
 0x51b   :  { %17331 = vmatmul.mubr.msk.f32.gmra.mrb[126].mxu0 %vm45_vm1, %v25151_v4  ;;  %v5982_v4 = vld [vmem:[#allocation2 + $0x25] sm:$0xff] }
 0x51c   :  { %17333 = vmatprep.mubr.msk.f32.mxu0 %vm20418_vm2, %v20417_v1  ;;  %v22959_v20 = vpop.f32.mrb[50].mxu1 }
 0x51d   :  { %v16286_v5 = vpop.f32.mrb[51].mxu1 }
 0x51f   :  { %17334 = vmatmul.mubr.msk.f32.gmra.mrb[128].mxu0 %vm45_vm1, %v25152_v12 }
 0x520   :  { %17336 = vmatprep.mubr.msk.f32.mxu0 %vm20418_vm2, %v20417_v1  ;;  %v22965_v13 = vpop.f32.mrb[52].mxu1 }
 0x521   :  { %v16289_v28 = vpop.f32.mrb[53].mxu1 }
 0x523   :  { %17337 = vmatmul.mubr.msk.f32.gmra.mrb[130].mxu0 %vm45_vm1, %v25153_v61 }
 0x524   :  { %17339 = vmatprep.mubr.msk.f32.mxu0 %vm20418_vm2, %v20417_v1  ;;  %v22971_v32 = vpop.f32.mrb[54].mxu1 }
 0x525   :  { %v16292_v29 = vpop.f32.mrb[55].mxu1 }
 0x526   :  { %v5985_v29 = vld [vmem:[#allocation2 + $0x3d] sm:$0xff] }
 0x527   :  { %17340 = vmatmul.mubr.msk.f32.gmra.mrb[132].mxu0 %vm45_vm1, %v25154_v24  ;;  %v5984_v24 = vld [vmem:[#allocation2 + $0x35] sm:$0xff] }
 0x528   :  { %17342 = vmatprep.mubr.msk.f32.mxu0 %vm20418_vm2, %v20417_v1  ;;  %v22977_v39 = vpop.f32.mrb[56].mxu1 }
 0x529   :  { %v16295_v40 = vpop.f32.mrb[57].mxu1 }
 0x52b   :  { %17343 = vmatmul.mubr.msk.f32.gmra.mrb[134].mxu0 %vm45_vm1, %v25155_v21 }
 0x52c   :  { %17345 = vmatprep.mubr.msk.f32.mxu0 %vm20418_vm2, %v20417_v1  ;;  %v22983_v44 = vpop.f32.mrb[58].mxu1 }
 0x52d   :  { %v16298_v58 = vpop.f32.mrb[59].mxu1 }
 0x52f   :  { %17346 = vmatmul.mubr.msk.f32.gmra.mrb[136].mxu0 %vm45_vm1, %v25156_v36 }
 0x530   :  { %17348 = vmatprep.mubr.msk.f32.mxu0 %vm20418_vm2, %v20417_v1  ;;  %v22989_v9 = vpop.f32.mrb[60].mxu1 }
 0x531   :  { %v16301_v52 = vpop.f32.mrb[61].mxu1 }
 0x532   :  { %v5987_v52 = vld [vmem:[#allocation2 + $0x4d] sm:$0xff] }
 0x533   :  { %17349 = vmatmul.mubr.msk.f32.gmra.mrb[138].mxu0 %vm45_vm1, %v25157_v45  ;;  %v5986_v45 = vld [vmem:[#allocation2 + $0x45] sm:$0xff] }
 0x534   :  { %17351 = vmatprep.mubr.msk.f32.mxu0 %vm20418_vm2, %v20417_v1  ;;  %v22995_v25 = vpop.f32.mrb[62].mxu1 }
 0x535   :  { %v16304_v63 = vpop.f32.mrb[63].mxu1 }
 0x537   :  { %17352 = vmatmul.mubr.msk.f32.gmra.mrb[140].mxu0 %vm45_vm1, %v25158_v48 }
 0x538   :  { %17354 = vmatprep.mubr.msk.f32.mxu0 %vm20418_vm2, %v20417_v1  ;;  %v23001_v11 = vpop.f32.mrb[64].mxu1 }
 0x539   :  { %v16307_v33 = vpop.f32.mrb[65].mxu1 }
 0x53b   :  { %17355 = vmatmul.mubr.msk.f32.gmra.mrb[142].mxu0 %vm45_vm1, %v25159_v60 }
 0x53c   :  { %17357 = vmatprep.mubr.msk.f32.mxu0 %vm20418_vm2, %v20417_v1  ;;  %v23007_v23 = vpop.f32.mrb[66].mxu1 }
 0x53d   :  { %v16310_v49 = vpop.f32.mrb[67].mxu1 }
 0x53e   :  { %v5989_v49 = vld [vmem:[#allocation2 + $0x5d] sm:$0xff] }
 0x53f   :  { %17358 = vmatmul.mubr.msk.f32.gmra.mrb[144].mxu0 %vm45_vm1, %v25160_v7  ;;  %v5988_v7 = vld [vmem:[#allocation2 + $0x55] sm:$0xff] }
 0x540   :  { %17360 = vmatprep.mubr.msk.f32.mxu0 %vm20418_vm2, %v20417_v1  ;;  %v23012_v31 = vpop.f32.mrb[68].mxu1 }
 0x541   :  { %v16313_v57 = vpop.f32.mrb[69].mxu1 }
 0x543   :  { %17361 = vmatmul.mubr.msk.f32.gmra.mrb[146].mxu0 %vm45_vm1, %v22430_v41  ;;  %v5218_v41 = vld [vmem:[#allocation2 + $0x284] sm:$0x3] }
 0x544   :  { %17363 = vmatprep.mubr.msk.f32.mxu0 %vm20418_vm2, %v20417_v1  ;;  %v23017_v35 = vpop.f32.mrb[70].mxu1 }
 0x545   :  { %v16316_v62 = vpop.f32.mrb[71].mxu1 }
 0x547   :  { %17364 = vmatmul.mubr.msk.f32.gmra.mrb[148].mxu0 %vm45_vm1, %v5216_v50 }
 0x548   :  { %17366 = vmatprep.mubr.msk.f32.mxu0 %vm20418_vm2, %v20417_v1  ;;  %v2341_v43 = vpop.f32.mrb[72].mxu1 }
 0x549   :  { %v16319_v12 = vpop.f32.mrb[73].mxu1  ;;  %v5991_v43 = vld [vmem:[#allocation2 + $0x6d] sm:$0xff] }
 0x54b   :  { %17367 = vmatmul.mubr.msk.f32.gmra.mrb[150].mxu0 %vm45_vm1, %v5217_v27 }
 0x54c   :  { %17369 = vmatprep.mubr.msk.f32.mxu0 %vm20418_vm2, %v20417_v1  ;;  %v2346_v61 = vpop.f32.mrb[74].mxu1 }
 0x54d   :  { %v16322_v5 = vpop.f32.mrb[75].mxu1 }
 0x54f   :  { %17370 = vmatmul.mubr.msk.f32.gmra.mrb[152].mxu0 %vm45_vm1, %v5218_v41  ;;  %v5990_v41 = vld [vmem:[#allocation2 + $0x65] sm:$0xff] }
 0x550   :  { %17374 = vmatprep.mubr.msk.f32.mxu0 %vm20418_vm2, %v20417_v1  ;;  %v2351_v28 = vpop.f32.mrb[76].mxu1 }
 0x551   :  { %v16325_v21 = vpop.f32.mrb[77].mxu1 }
 0x553   :  { %17375 = vmatmul.mubr.msk.f32.vlgmr.msra.gmra.mrb[0].mxu0 %vm45_vm1, %v5982_v4 }
 0x554   :  { %17606 = vmatpush3.msk.msra.mxu0 %vm644_vm0, %v14272_v47  ;;  %17377 = vmatprep.mubr.msk.f32.mxu0 %vm20418_vm2, %v20417_v1  ;;  %v2356_v36 = vpop.f32.mrb[78].mxu1 }
 0x555   :  { %v16328_v40 = vpop.f32.mrb[79].mxu1 }
 0x557   :  { %17378 = vmatmul.mubr.msk.f32.gmra.mrb[2].mxu0 %vm45_vm1, %v5983_v16  ;;  %v5992_v16 = vld [vmem:[#allocation2 + $0x75] sm:$0xff] }
 0x558   :  { %17380 = vmatprep.mubr.msk.f32.mxu0 %vm20418_vm2, %v20417_v1  ;;  %v23038_v58 = vpop.f32.mrb[80].mxu1 }
 0x559   :  { %v16331_v48 = vpop.f32.mrb[81].mxu1 }
 0x55b   :  { %17381 = vmatmul.mubr.msk.f32.gmra.mrb[4].mxu0 %vm45_vm1, %v5984_v24  ;;  %v5993_v24 = vld [vmem:[#allocation2 + $0x7d] sm:$0xff] }
 0x55c   :  { %17383 = vmatprep.mubr.msk.f32.mxu0 %vm20418_vm2, %v20417_v1  ;;  %v23043_v60 = vpop.f32.mrb[82].mxu1 }
 0x55d   :  { %v16334_v63 = vpop.f32.mrb[83].mxu1 }
 0x55e   :  { %v5996_v63 = vld [vmem:[#allocation2 + $0x95] sm:$0xff] }
 0x55f   :  { %17384 = vmatmul.mubr.msk.f32.gmra.mrb[6].mxu0 %vm45_vm1, %v5985_v29  ;;  %v5994_v29 = vld [vmem:[#allocation2 + $0x85] sm:$0xff] }
 0x560   :  { %17386 = vmatprep.mubr.msk.f32.mxu0 %vm20418_vm2, %v20417_v1  ;;  %v23048_v33 = vpop.f32.mrb[84].mxu1 }
 0x561   :  { %v16337_v50 = vpop.f32.mrb[85].mxu1 }
 0x563   :  { %17387 = vmatmul.mubr.msk.f32.gmra.mrb[8].mxu0 %vm45_vm1, %v5986_v45  ;;  %v5995_v45 = vld [vmem:[#allocation2 + $0x8d] sm:$0xff] }
 0x564   :  { %17389 = vmatprep.mubr.msk.f32.mxu0 %vm20418_vm2, %v20417_v1  ;;  %v23053_v27 = vpop.f32.mrb[86].mxu1 }
 0x565   :  { %v16340_v57 = vpop.f32.mrb[87].mxu1 }
 0x567   :  { %17390 = vmatmul.mubr.msk.f32.gmra.mrb[10].mxu0 %vm45_vm1, %v5987_v52 }
 0x568   :  { %17392 = vmatprep.mubr.msk.f32.mxu0 %vm20418_vm2, %v20417_v1  ;;  %v23058_v62 = vpop.f32.mrb[88].mxu1 }
 0x569   :  { %v16343_v4 = vpop.f32.mrb[89].mxu1 }
 0x56a   :  { %v5998_v4 = vld [vmem:[#allocation2 + $0xa5] sm:$0xff] }
 0x56b   :  { %17393 = vmatmul.mubr.msk.f32.gmra.mrb[12].mxu0 %vm45_vm1, %v5988_v7 }
 0x56c   :  { %17395 = vmatprep.mubr.msk.f32.mxu0 %vm20418_vm2, %v20417_v1  ;;  %v23063_v47 = vpop.f32.mrb[90].mxu1 }
 0x56d   :  { %v16346_v12 = vpop.f32.mrb[91].mxu1 }
 0x56f   :  { %17396 = vmatmul.mubr.msk.f32.gmra.mrb[14].mxu0 %vm45_vm1, %v5989_v49  ;;  %v5997_v49 = vld [vmem:[#allocation2 + $0x9d] sm:$0xff] }
 0x570   :  { %17398 = vmatprep.mubr.msk.f32.mxu0 %vm20418_vm2, %v20417_v1  ;;  %v23068_v61 = vpop.f32.mrb[92].mxu1 }
 0x571   :  { %v16349_v5 = vpop.f32.mrb[93].mxu1 }
 0x573   :  { %17399 = vmatmul.mubr.msk.f32.gmra.mrb[16].mxu0 %vm45_vm1, %v5990_v41 }
 0x574   :  { %17401 = vmatprep.mubr.msk.f32.mxu0 %vm20418_vm2, %v20417_v1  ;;  %v23073_v28 = vpop.f32.mrb[94].mxu1 }
 0x575   :  { %v16352_v21 = vpop.f32.mrb[95].mxu1 }
 0x576   :  { %v6000_v21 = vld [vmem:[#allocation2 + $0xb5] sm:$0xff] }
 0x577   :  { %17402 = vmatmul.mubr.msk.f32.gmra.mrb[18].mxu0 %vm45_vm1, %v5991_v43 }
 0x578   :  { %17404 = vmatprep.mubr.msk.f32.mxu0 %vm20418_vm2, %v20417_v1  ;;  %v23078_v36 = vpop.f32.mrb[96].mxu1 }
 0x579   :  { %v16355_v40 = vpop.f32.mrb[97].mxu1 }
 0x57b   :  { %17405 = vmatmul.mubr.msk.f32.gmra.mrb[20].mxu0 %vm45_vm1, %v5992_v16  ;;  %v5999_v16 = vld [vmem:[#allocation2 + $0xad] sm:$0xff] }
 0x57c   :  { %17407 = vmatprep.mubr.msk.f32.mxu0 %vm20418_vm2, %v20417_v1  ;;  %v23083_v48 = vpop.f32.mrb[98].mxu1 }
 0x57d   :  { %v16358_v52 = vpop.f32.mrb[99].mxu1 }
 0x57f   :  { %17408 = vmatmul.mubr.msk.f32.gmra.mrb[22].mxu0 %vm45_vm1, %v5993_v24 }
 0x580   :  { %17410 = vmatprep.mubr.msk.f32.mxu0 %vm20418_vm2, %v20417_v1  ;;  %v23088_v7 = vpop.f32.mrb[100].mxu1 }
 0x581   :  { %v16361_v50 = vpop.f32.mrb[101].mxu1 }
 0x582   :  { %v6002_v50 = vld [vmem:[#allocation2 + $0xc5] sm:$0xff] }
 0x583   :  { %17411 = vmatmul.mubr.msk.f32.gmra.mrb[24].mxu0 %vm45_vm1, %v5994_v29 }
 0x584   :  { %17413 = vmatprep.mubr.msk.f32.mxu0 %vm20418_vm2, %v20417_v1  ;;  %v23093_v57 = vpop.f32.mrb[102].mxu1 }
 0x585   :  { %v16364_v41 = vpop.f32.mrb[103].mxu1 }
 0x587   :  { %17414 = vmatmul.mubr.msk.f32.gmra.mrb[26].mxu0 %vm45_vm1, %v5995_v45  ;;  %v6001_v45 = vld [vmem:[#allocation2 + $0xbd] sm:$0xff] }
 0x588   :  { %17416 = vmatprep.mubr.msk.f32.mxu0 %vm20418_vm2, %v20417_v1  ;;  %v23098_v43 = vpop.f32.mrb[104].mxu1 }
 0x589   :  { %v16367_v12 = vpop.f32.mrb[105].mxu1 }
 0x58b   :  { %17417 = vmatmul.mubr.msk.f32.gmra.mrb[28].mxu0 %vm45_vm1, %v5996_v63 }
 0x58c   :  { %17419 = vmatprep.mubr.msk.f32.mxu0 %vm20418_vm2, %v20417_v1  ;;  %v23103_v5 = vpop.f32.mrb[106].mxu1 }
 0x58d   :  { %25161 = vst [vmem:[#allocation13_spill] sm:$0xff] %v23103_v5  ;;  %v16370_v24 = vpop.f32.mrb[107].mxu1 }
 0x58e   :  { %v6004_v24 = vld [vmem:[#allocation2 + $0xd5] sm:$0xff] }
 0x58f   :  { %17420 = vmatmul.mubr.msk.f32.gmra.mrb[30].mxu0 %vm45_vm1, %v5997_v49 }
 0x590   :  { %17422 = vmatprep.mubr.msk.f32.mxu0 %vm20418_vm2, %v20417_v1  ;;  %v23108_v29 = vpop.f32.mrb[108].mxu1 }
 0x591   :  { %25162 = vst [vmem:[#allocation14_spill] sm:$0xff] %v23108_v29  ;;  %v16373_v40 = vpop.f32.mrb[109].mxu1 }
 0x593   :  { %17423 = vmatmul.mubr.msk.f32.gmra.mrb[32].mxu0 %vm45_vm1, %v5998_v4  ;;  %v6003_v4 = vld [vmem:[#allocation2 + $0xcd] sm:$0xff] }
 0x594   :  { %17425 = vmatprep.mubr.msk.f32.mxu0 %vm20418_vm2, %v20417_v1  ;;  %v23113_v52 = vpop.f32.mrb[110].mxu1 }
 0x595   :  { %25163 = vst [vmem:[#allocation15_spill] sm:$0xff] %v23113_v52  ;;  %v16376_v63 = vpop.f32.mrb[111].mxu1 }
 0x597   :  { %17426 = vmatmul.mubr.msk.f32.gmra.mrb[34].mxu0 %vm45_vm1, %v5999_v16 }
 0x598   :  { %17428 = vmatprep.mubr.msk.f32.mxu0 %vm20418_vm2, %v20417_v1  ;;  %v23118_v49 = vpop.f32.mrb[112].mxu1 }
 0x599   :  { %25164 = vst [vmem:[#allocation16_spill] sm:$0xff] %v23118_v49  ;;  %v16379_v41 = vpop.f32.mrb[113].mxu1 }
 0x59a   :  { %v6006_v41 = vld [vmem:[#allocation2 + $0xe5] sm:$0xff] }
 0x59b   :  { %17429 = vmatmul.mubr.msk.f32.gmra.mrb[36].mxu0 %vm45_vm1, %v6000_v21 }
 0x59c   :  { %17431 = vmatprep.mubr.msk.f32.mxu0 %vm20418_vm2, %v20417_v1  ;;  %v23123_v12 = vpop.f32.mrb[114].mxu1 }
 0x59d   :  { %25165 = vst [vmem:[#allocation17_spill] sm:$0xff] %v23123_v12  ;;  %v16382_v16 = vpop.f32.mrb[115].mxu1 }
 0x59f   :  { %17432 = vmatmul.mubr.msk.f32.gmra.mrb[38].mxu0 %vm45_vm1, %v6001_v45  ;;  %v6005_v45 = vld [vmem:[#allocation2 + $0xdd] sm:$0xff] }
 0x5a0   :  { %17434 = vmatprep.mubr.msk.f32.mxu0 %vm20418_vm2, %v20417_v1 }
 0x5a3   :  { %17435 = vmatmul.mubr.msk.f32.gmra.mrb[40].mxu0 %vm45_vm1, %v6002_v50  ;;  %v23128_v21 = vpop.f32.mrb[116].mxu1 }
 0x5a4   :  { %17437 = vmatprep.mubr.msk.f32.mxu0 %vm20418_vm2, %v20417_v1  ;;  %25166 = vst [vmem:[#allocation18_spill] sm:$0xff] %v23128_v21  ;;  %v16385_v40 = vpop.f32.mrb[117].mxu1 }
 0x5a7   :  { %17438 = vmatmul.mubr.msk.f32.gmra.mrb[42].mxu0 %vm45_vm1, %v6003_v4  ;;  %v23133_v63 = vpop.f32.mrb[118].mxu1 }
 0x5a8   :  { %17440 = vmatprep.mubr.msk.f32.mxu0 %vm20418_vm2, %v20417_v1  ;;  %25167 = vst [vmem:[#allocation19_spill] sm:$0xff] %v23133_v63  ;;  %v16388_v50 = vpop.f32.mrb[119].mxu1 }
 0x5ab   :  { %17441 = vmatmul.mubr.msk.f32.gmra.mrb[44].mxu0 %vm45_vm1, %v6004_v24  ;;  %v23138_v4 = vpop.f32.mrb[120].mxu1  ;;  %v6007_v24 = vld [vmem:[#allocation2 + $0xed] sm:$0xff] }
 0x5ac   :  { %17443 = vmatprep.mubr.msk.f32.mxu0 %vm20418_vm2, %v20417_v1  ;;  %25168 = vst [vmem:[#allocation20_spill] sm:$0xff] %v23138_v4  ;;  %v16391_v16 = vpop.f32.mrb[121].mxu1 }
 0x5af   :  { %17444 = vmatmul.mubr.msk.f32.gmra.mrb[46].mxu0 %vm45_vm1, %v6005_v45  ;;  %v23143_v40 = vpop.f32.mrb[122].mxu1  ;;  %v6008_v45 = vld [vmem:[#allocation2 + $0xf5] sm:$0xff] }
 0x5b0   :  { %17446 = vmatprep.mubr.msk.f32.mxu0 %vm20418_vm2, %v20417_v1  ;;  %25169 = vst [vmem:[#allocation21_spill] sm:$0xff] %v23143_v40  ;;  %v16394_v21 = vpop.f32.mrb[123].mxu1 }
 0x5b1   :  { %v6010_v21 = vld [vmem:[#allocation2 + $0x105] sm:$0xff] }
 0x5b3   :  { %17447 = vmatmul.mubr.msk.f32.gmra.mrb[48].mxu0 %vm45_vm1, %v6006_v41  ;;  %v23148_v50 = vpop.f32.mrb[124].mxu1  ;;  %v6009_v41 = vld [vmem:[#allocation2 + $0xfd] sm:$0xff] }
 0x5b4   :  { %17449 = vmatprep.mubr.msk.f32.mxu0 %vm20418_vm2, %v20417_v1  ;;  %25170 = vst [vmem:[#allocation22_spill] sm:$0xff] %v23148_v50  ;;  %v16397_v63 = vpop.f32.mrb[125].mxu1 }
 0x5b5   :  { %v6011_v63 = vld [vmem:[#allocation2 + $0x10d] sm:$0xff] }
 0x5b7   :  { %17450 = vmatmul.mubr.msk.f32.gmra.mrb[50].mxu0 %vm45_vm1, %v6007_v24  ;;  %v23153_v16 = vpop.f32.mrb[126].mxu1 }
 0x5b8   :  { %17452 = vmatprep.mubr.msk.f32.mxu0 %vm20418_vm2, %v20417_v1  ;;  %25171 = vst [vmem:[#allocation23_spill] sm:$0xff] %v23153_v16  ;;  %v16400_v4 = vpop.f32.mrb[127].mxu1 }
 0x5b9   :  { %v6012_v4 = vld [vmem:[#allocation2 + $0x115] sm:$0xff] }
 0x5bb   :  { %17453 = vmatmul.mubr.msk.f32.gmra.mrb[52].mxu0 %vm45_vm1, %v6008_v45  ;;  %v23158_v24 = vpop.f32.mrb[128].mxu1 }
 0x5bc   :  { %17455 = vmatprep.mubr.msk.f32.mxu0 %vm20418_vm2, %v20417_v1  ;;  %25172 = vst [vmem:[#allocation24_spill] sm:$0xff] %v23158_v24  ;;  %v16403_v40 = vpop.f32.mrb[129].mxu1 }
 0x5bd   :  { %v6013_v40 = vld [vmem:[#allocation2 + $0x11d] sm:$0xff] }
 0x5bf   :  { %17456 = vmatmul.mubr.msk.f32.gmra.mrb[54].mxu0 %vm45_vm1, %v6009_v41  ;;  %v23163_v45 = vpop.f32.mrb[130].mxu1 }
 0x5c0   :  { %17458 = vmatprep.mubr.msk.f32.mxu0 %vm20418_vm2, %v20417_v1  ;;  %25173 = vst [vmem:[#allocation25_spill] sm:$0xff] %v23163_v45  ;;  %v16406_v50 = vpop.f32.mrb[131].mxu1 }
 0x5c1   :  { %v6014_v50 = vld [vmem:[#allocation2 + $0x125] sm:$0xff] }
 0x5c3   :  { %17459 = vmatmul.mubr.msk.f32.gmra.mrb[56].mxu0 %vm45_vm1, %v6010_v21  ;;  %v23168_v41 = vpop.f32.mrb[132].mxu1 }
 0x5c4   :  { %17461 = vmatprep.mubr.msk.f32.mxu0 %vm20418_vm2, %v20417_v1  ;;  %25174 = vst [vmem:[#allocation26_spill] sm:$0xff] %v23168_v41  ;;  %v16409_v16 = vpop.f32.mrb[133].mxu1 }
 0x5c5   :  { %v6015_v16 = vld [vmem:[#allocation2 + $0x12d] sm:$0xff] }
 0x5c7   :  { %17462 = vmatmul.mubr.msk.f32.gmra.mrb[58].mxu0 %vm45_vm1, %v6011_v63  ;;  %v23173_v21 = vpop.f32.mrb[134].mxu1 }
 0x5c8   :  { %17464 = vmatprep.mubr.msk.f32.mxu0 %vm20418_vm2, %v20417_v1  ;;  %25175 = vst [vmem:[#allocation27_spill] sm:$0xff] %v23173_v21  ;;  %v16412_v24 = vpop.f32.mrb[135].mxu1 }
 0x5c9   :  { %v6016_v24 = vld [vmem:[#allocation2 + $0x135] sm:$0xff] }
 0x5cb   :  { %17465 = vmatmul.mubr.msk.f32.gmra.mrb[60].mxu0 %vm45_vm1, %v6012_v4  ;;  %v23178_v63 = vpop.f32.mrb[136].mxu1 }
 0x5cc   :  { %17467 = vmatprep.mubr.msk.f32.mxu0 %vm20418_vm2, %v20417_v1  ;;  %25176 = vst [vmem:[#allocation28_spill] sm:$0xff] %v23178_v63  ;;  %v16415_v45 = vpop.f32.mrb[137].mxu1 }
 0x5cd   :  { %v6017_v45 = vld [vmem:[#allocation2 + $0x13d] sm:$0xff] }
 0x5cf   :  { %17468 = vmatmul.mubr.msk.f32.gmra.mrb[62].mxu0 %vm45_vm1, %v6013_v40  ;;  %v23183_v4 = vpop.f32.mrb[138].mxu1 }
 0x5d0   :  { %17470 = vmatprep.mubr.msk.f32.mxu0 %vm20418_vm2, %v20417_v1  ;;  %25177 = vst [vmem:[#allocation29_spill] sm:$0xff] %v23183_v4  ;;  %v16418_v41 = vpop.f32.mrb[139].mxu1 }
 0x5d1   :  { %v6018_v41 = vld [vmem:[#allocation2 + $0x145] sm:$0xff] }
 0x5d3   :  { %17471 = vmatmul.mubr.msk.f32.gmra.mrb[64].mxu0 %vm45_vm1, %v6014_v50  ;;  %v23188_v40 = vpop.f32.mrb[140].mxu1 }
 0x5d4   :  { %17473 = vmatprep.mubr.msk.f32.mxu0 %vm20418_vm2, %v20417_v1  ;;  %25178 = vst [vmem:[#allocation30_spill] sm:$0xff] %v23188_v40  ;;  %v16421_v21 = vpop.f32.mrb[141].mxu1 }
 0x5d5   :  { %v6019_v21 = vld [vmem:[#allocation2 + $0x14d] sm:$0xff] }
 0x5d7   :  { %17474 = vmatmul.mubr.msk.f32.gmra.mrb[66].mxu0 %vm45_vm1, %v6015_v16  ;;  %v23193_v50 = vpop.f32.mrb[142].mxu1 }
 0x5d8   :  { %17476 = vmatprep.mubr.msk.f32.mxu0 %vm20418_vm2, %v20417_v1  ;;  %25179 = vst [vmem:[#allocation31_spill] sm:$0xff] %v23193_v50  ;;  %v16424_v63 = vpop.f32.mrb[143].mxu1 }
 0x5d9   :  { %v6020_v63 = vld [vmem:[#allocation2 + $0x155] sm:$0xff] }
 0x5db   :  { %17477 = vmatmul.mubr.msk.f32.gmra.mrb[68].mxu0 %vm45_vm1, %v6016_v24  ;;  %v23198_v16 = vpop.f32.mrb[144].mxu1 }
 0x5dc   :  { %17479 = vmatprep.mubr.msk.f32.mxu0 %vm20418_vm2, %v20417_v1  ;;  %25180 = vst [vmem:[#allocation32_spill] sm:$0xff] %v23198_v16  ;;  %v16427_v4 = vpop.f32.mrb[145].mxu1 }
 0x5dd   :  { %v6021_v4 = vld [vmem:[#allocation2 + $0x15d] sm:$0xff] }
 0x5df   :  { %17480 = vmatmul.mubr.msk.f32.gmra.mrb[70].mxu0 %vm45_vm1, %v6017_v45  ;;  %v23203_v24 = vpop.f32.mrb[146].mxu1 }
 0x5e0   :  { %17482 = vmatprep.mubr.msk.f32.mxu0 %vm20418_vm2, %v20417_v1  ;;  %25181 = vst [vmem:[#allocation33_spill] sm:$0xff] %v23203_v24  ;;  %v16430_v40 = vpop.f32.mrb[147].mxu1 }
 0x5e1   :  { %v6022_v40 = vld [vmem:[#allocation2 + $0x165] sm:$0xff] }
 0x5e3   :  { %17483 = vmatmul.mubr.msk.f32.gmra.mrb[72].mxu0 %vm45_vm1, %v6018_v41  ;;  %v23208_v45 = vpop.f32.mrb[148].mxu1 }
 0x5e4   :  { %17485 = vmatprep.mubr.msk.f32.mxu0 %vm20418_vm2, %v20417_v1  ;;  %25182 = vst [vmem:[#allocation34_spill] sm:$0xff] %v23208_v45  ;;  %v16433_v50 = vpop.f32.mrb[149].mxu1 }
 0x5e5   :  { %v6023_v50 = vld [vmem:[#allocation2 + $0x16d] sm:$0xff] }
 0x5e7   :  { %17486 = vmatmul.mubr.msk.f32.gmra.mrb[74].mxu0 %vm45_vm1, %v6019_v21  ;;  %v23213_v41 = vpop.f32.mrb[150].mxu1 }
 0x5e8   :  { %17488 = vmatprep.mubr.msk.f32.mxu0 %vm20418_vm2, %v20417_v1  ;;  %25183 = vst [vmem:[#allocation35_spill] sm:$0xff] %v23213_v41  ;;  %v16436_v16 = vpop.f32.mrb[151].mxu1 }
 0x5e9   :  { %v6024_v16 = vld [vmem:[#allocation2 + $0x175] sm:$0xff] }
 0x5eb   :  { %17489 = vmatmul.mubr.msk.f32.gmra.mrb[76].mxu0 %vm45_vm1, %v6020_v63  ;;  %v23218_v21 = vpop.f32.mrb[152].mxu1  ;;  %v6025_v63 = vld [vmem:[#allocation2 + $0x17d] sm:$0xff] }
 0x5ec   :  { %17491 = vmatprep.mubr.msk.f32.mxu0 %vm20418_vm2, %v20417_v1  ;;  %25184 = vst [vmem:[#allocation36_spill] sm:$0xff] %v23218_v21  ;;  %v16439_v24 = vpop.f32.mrb[153].mxu1 }
 0x5ed   :  { %v6026_v24 = vld [vmem:[#allocation2 + $0x185] sm:$0xff] }
 0x5ef   :  { %17492 = vmatmul.mubr.msk.f32.gmra.mrb[78].mxu0 %vm45_vm1, %v6021_v4  ;;  %v6027_v4 = vld [vmem:[#allocation2 + $0x18d] sm:$0xff] }
 0x5f0   :  { %17494 = vmatprep.mubr.msk.f32.mxu0 %vm20418_vm2, %v20417_v1 }
 0x5f3   :  { %17495 = vmatmul.mubr.msk.f32.gmra.mrb[80].mxu0 %vm45_vm1, %v6022_v40  ;;  %v6028_v40 = vld [vmem:[#allocation2 + $0x195] sm:$0xff] }
 0x5f4   :  { %17497 = vmatprep.mubr.msk.f32.mxu0 %vm20418_vm2, %v20417_v1 }
 0x5f7   :  { %17498 = vmatmul.mubr.msk.f32.gmra.mrb[82].mxu0 %vm45_vm1, %v6023_v50  ;;  %v6029_v50 = vld [vmem:[#allocation2 + $0x19d] sm:$0xff] }
 0x5f8   :  { %17500 = vmatprep.mubr.msk.f32.mxu0 %vm20418_vm2, %v20417_v1 }
 0x5fb   :  { %17501 = vmatmul.mubr.msk.f32.gmra.mrb[84].mxu0 %vm45_vm1, %v6024_v16  ;;  %v6030_v16 = vld [vmem:[#allocation2 + $0x1a5] sm:$0xff] }
 0x5fc   :  { %17503 = vmatprep.mubr.msk.f32.mxu0 %vm20418_vm2, %v20417_v1 }
 0x5ff   :  { %17504 = vmatmul.mubr.msk.f32.gmra.mrb[86].mxu0 %vm45_vm1, %v6025_v63  ;;  %v6031_v63 = vld [vmem:[#allocation2 + $0x1ad] sm:$0xff] }
 0x600   :  { %17506 = vmatprep.mubr.msk.f32.mxu0 %vm20418_vm2, %v20417_v1 }
 0x603   :  { %17507 = vmatmul.mubr.msk.f32.gmra.mrb[88].mxu0 %vm45_vm1, %v6026_v24  ;;  %v6032_v24 = vld [vmem:[#allocation2 + $0x1b5] sm:$0xff] }
 0x604   :  { %17509 = vmatprep.mubr.msk.f32.mxu0 %vm20418_vm2, %v20417_v1 }
 0x607   :  { %17510 = vmatmul.mubr.msk.f32.gmra.mrb[90].mxu0 %vm45_vm1, %v6027_v4  ;;  %v6033_v4 = vld [vmem:[#allocation2 + $0x1bd] sm:$0xff] }
 0x608   :  { %17512 = vmatprep.mubr.msk.f32.mxu0 %vm20418_vm2, %v20417_v1 }
 0x60b   :  { %17513 = vmatmul.mubr.msk.f32.gmra.mrb[92].mxu0 %vm45_vm1, %v6028_v40  ;;  %v6034_v40 = vld [vmem:[#allocation2 + $0x1c5] sm:$0xff] }
 0x60c   :  { %17515 = vmatprep.mubr.msk.f32.mxu0 %vm20418_vm2, %v20417_v1 }
 0x60f   :  { %17516 = vmatmul.mubr.msk.f32.gmra.mrb[94].mxu0 %vm45_vm1, %v6029_v50  ;;  %v6035_v50 = vld [vmem:[#allocation2 + $0x1cd] sm:$0xff] }
 0x610   :  { %17518 = vmatprep.mubr.msk.f32.mxu0 %vm20418_vm2, %v20417_v1 }
 0x613   :  { %17519 = vmatmul.mubr.msk.f32.gmra.mrb[96].mxu0 %vm45_vm1, %v6030_v16  ;;  %v6036_v16 = vld [vmem:[#allocation2 + $0x1d5] sm:$0xff] }
 0x614   :  { %17521 = vmatprep.mubr.msk.f32.mxu0 %vm20418_vm2, %v20417_v1 }
 0x617   :  { %17522 = vmatmul.mubr.msk.f32.gmra.mrb[98].mxu0 %vm45_vm1, %v6031_v63  ;;  %v6037_v63 = vld [vmem:[#allocation2 + $0x1dd] sm:$0xff] }
 0x618   :  { %17524 = vmatprep.mubr.msk.f32.mxu0 %vm20418_vm2, %v20417_v1 }
 0x61b   :  { %17525 = vmatmul.mubr.msk.f32.gmra.mrb[100].mxu0 %vm45_vm1, %v6032_v24  ;;  %v6038_v24 = vld [vmem:[#allocation2 + $0x1e5] sm:$0xff] }
 0x61c   :  { %17527 = vmatprep.mubr.msk.f32.mxu0 %vm20418_vm2, %v20417_v1 }
 0x61f   :  { %17528 = vmatmul.mubr.msk.f32.gmra.mrb[102].mxu0 %vm45_vm1, %v6033_v4  ;;  %v6039_v4 = vld [vmem:[#allocation2 + $0x1ed] sm:$0xff] }
 0x620   :  { %17530 = vmatprep.mubr.msk.f32.mxu0 %vm20418_vm2, %v20417_v1 }
 0x623   :  { %17531 = vmatmul.mubr.msk.f32.gmra.mrb[104].mxu0 %vm45_vm1, %v6034_v40  ;;  %v6040_v40 = vld [vmem:[#allocation2 + $0x1f5] sm:$0xff] }
 0x624   :  { %17533 = vmatprep.mubr.msk.f32.mxu0 %vm20418_vm2, %v20417_v1 }
 0x627   :  { %17534 = vmatmul.mubr.msk.f32.gmra.mrb[106].mxu0 %vm45_vm1, %v6035_v50  ;;  %v6041_v50 = vld [vmem:[#allocation2 + $0x1fd] sm:$0xff] }
 0x628   :  { %17536 = vmatprep.mubr.msk.f32.mxu0 %vm20418_vm2, %v20417_v1 }
 0x62b   :  { %17537 = vmatmul.mubr.msk.f32.gmra.mrb[108].mxu0 %vm45_vm1, %v6036_v16  ;;  %v6042_v16 = vld [vmem:[#allocation2 + $0x205] sm:$0xff] }
 0x62c   :  { %17539 = vmatprep.mubr.msk.f32.mxu0 %vm20418_vm2, %v20417_v1 }
 0x62f   :  { %17540 = vmatmul.mubr.msk.f32.gmra.mrb[110].mxu0 %vm45_vm1, %v6037_v63  ;;  %v6043_v63 = vld [vmem:[#allocation2 + $0x20d] sm:$0xff] }
 0x630   :  { %17542 = vmatprep.mubr.msk.f32.mxu0 %vm20418_vm2, %v20417_v1 }
 0x633   :  { %17543 = vmatmul.mubr.msk.f32.gmra.mrb[112].mxu0 %vm45_vm1, %v6038_v24  ;;  %v6044_v24 = vld [vmem:[#allocation2 + $0x215] sm:$0xff] }
 0x634   :  { %17545 = vmatprep.mubr.msk.f32.mxu0 %vm20418_vm2, %v20417_v1 }
 0x637   :  { %17546 = vmatmul.mubr.msk.f32.gmra.mrb[114].mxu0 %vm45_vm1, %v6039_v4  ;;  %v6045_v4 = vld [vmem:[#allocation2 + $0x21d] sm:$0xff] }
 0x638   :  { %17548 = vmatprep.mubr.msk.f32.mxu0 %vm20418_vm2, %v20417_v1 }
 0x63b   :  { %17549 = vmatmul.mubr.msk.f32.gmra.mrb[116].mxu0 %vm45_vm1, %v6040_v40  ;;  %v6046_v40 = vld [vmem:[#allocation2 + $0x225] sm:$0xff] }
 0x63c   :  { %17551 = vmatprep.mubr.msk.f32.mxu0 %vm20418_vm2, %v20417_v1 }
 0x63f   :  { %17552 = vmatmul.mubr.msk.f32.gmra.mrb[118].mxu0 %vm45_vm1, %v6041_v50  ;;  %v6047_v50 = vld [vmem:[#allocation2 + $0x22d] sm:$0xff] }
 0x640   :  { %17554 = vmatprep.mubr.msk.f32.mxu0 %vm20418_vm2, %v20417_v1 }
 0x643   :  { %17555 = vmatmul.mubr.msk.f32.gmra.mrb[120].mxu0 %vm45_vm1, %v6042_v16  ;;  %v6048_v16 = vld [vmem:[#allocation2 + $0x235] sm:$0xff] }
 0x644   :  { %17557 = vmatprep.mubr.msk.f32.mxu0 %vm20418_vm2, %v20417_v1 }
 0x647   :  { %17558 = vmatmul.mubr.msk.f32.gmra.mrb[122].mxu0 %vm45_vm1, %v6043_v63  ;;  %v6049_v63 = vld [vmem:[#allocation2 + $0x23d] sm:$0xff] }
 0x648   :  { %17560 = vmatprep.mubr.msk.f32.mxu0 %vm20418_vm2, %v20417_v1 }
 0x64b   :  { %17561 = vmatmul.mubr.msk.f32.gmra.mrb[124].mxu0 %vm45_vm1, %v6044_v24  ;;  %v6050_v24 = vld [vmem:[#allocation2 + $0x245] sm:$0xff] }
 0x64c   :  { %17563 = vmatprep.mubr.msk.f32.mxu0 %vm20418_vm2, %v20417_v1 }
 0x64f   :  { %17564 = vmatmul.mubr.msk.f32.gmra.mrb[126].mxu0 %vm45_vm1, %v6045_v4  ;;  %v6051_v4 = vld [vmem:[#allocation2 + $0x24d] sm:$0xff] }
 0x650   :  { %17566 = vmatprep.mubr.msk.f32.mxu0 %vm20418_vm2, %v20417_v1 }
 0x653   :  { %17567 = vmatmul.mubr.msk.f32.gmra.mrb[128].mxu0 %vm45_vm1, %v6046_v40  ;;  %v6052_v40 = vld [vmem:[#allocation2 + $0x255] sm:$0xff] }
 0x654   :  { %17569 = vmatprep.mubr.msk.f32.mxu0 %vm20418_vm2, %v20417_v1 }
 0x657   :  { %17570 = vmatmul.mubr.msk.f32.gmra.mrb[130].mxu0 %vm45_vm1, %v6047_v50  ;;  %v6053_v50 = vld [vmem:[#allocation2 + $0x25d] sm:$0xff] }
 0x658   :  { %17572 = vmatprep.mubr.msk.f32.mxu0 %vm20418_vm2, %v20417_v1 }
 0x65b   :  { %17573 = vmatmul.mubr.msk.f32.gmra.mrb[132].mxu0 %vm45_vm1, %v6048_v16  ;;  %v6054_v16 = vld [vmem:[#allocation2 + $0x265] sm:$0xff] }
 0x65c   :  { %17575 = vmatprep.mubr.msk.f32.mxu0 %vm20418_vm2, %v20417_v1 }
 0x65f   :  { %17576 = vmatmul.mubr.msk.f32.gmra.mrb[134].mxu0 %vm45_vm1, %v6049_v63  ;;  %v6055_v63 = vld [vmem:[#allocation2 + $0x26d] sm:$0xff] }
 0x660   :  { %17578 = vmatprep.mubr.msk.f32.mxu0 %vm20418_vm2, %v20417_v1 }
 0x663   :  { %17579 = vmatmul.mubr.msk.f32.gmra.mrb[136].mxu0 %vm45_vm1, %v6050_v24  ;;  %v6056_v24 = vld [vmem:[#allocation2 + $0x275] sm:$0xff] }
 0x664   :  { %17581 = vmatprep.mubr.msk.f32.mxu0 %vm20418_vm2, %v20417_v1 }
 0x667   :  { %17582 = vmatmul.mubr.msk.f32.gmra.mrb[138].mxu0 %vm45_vm1, %v6051_v4  ;;  %v6057_v4 = vld [vmem:[#allocation2 + $0x27d] sm:$0xff] }
 0x668   :  { %17584 = vmatprep.mubr.msk.f32.mxu0 %vm20418_vm2, %v20417_v1 }
 0x66b   :  { %17585 = vmatmul.mubr.msk.f32.gmra.mrb[140].mxu0 %vm45_vm1, %v6052_v40  ;;  %v6058_v40 = vld [vmem:[#allocation2 + $0x285] sm:$0x3] }
 0x66c   :  { %17587 = vmatprep.mubr.msk.f32.mxu0 %vm20418_vm2, %v20417_v1 }
 0x66f   :  { %17588 = vmatmul.mubr.msk.f32.gmra.mrb[142].mxu0 %vm45_vm1, %v6053_v50  ;;  %v6822_v50 = vld [vmem:[#allocation2 + $0x26] sm:$0xff] }
 0x670   :  { %17590 = vmatprep.mubr.msk.f32.mxu0 %vm20418_vm2, %v20417_v1 }
 0x673   :  { %17591 = vmatmul.mubr.msk.f32.gmra.mrb[144].mxu0 %vm45_vm1, %v6054_v16  ;;  %v6823_v16 = vld [vmem:[#allocation2 + $0x2e] sm:$0xff] }
 0x674   :  { %17593 = vmatprep.mubr.msk.f32.mxu0 %vm20418_vm2, %v20417_v1 }
 0x677   :  { %17594 = vmatmul.mubr.msk.f32.gmra.mrb[146].mxu0 %vm45_vm1, %v6055_v63  ;;  %v6824_v63 = vld [vmem:[#allocation2 + $0x36] sm:$0xff] }
 0x678   :  { %17596 = vmatprep.mubr.msk.f32.mxu0 %vm20418_vm2, %v20417_v1 }
 0x67b   :  { %17597 = vmatmul.mubr.msk.f32.gmra.mrb[148].mxu0 %vm45_vm1, %v6056_v24  ;;  %v6825_v24 = vld [vmem:[#allocation2 + $0x3e] sm:$0xff] }
 0x67c   :  { %17599 = vmatprep.mubr.msk.f32.mxu0 %vm20418_vm2, %v20417_v1 }
 0x67f   :  { %17600 = vmatmul.mubr.msk.f32.gmra.mrb[150].mxu0 %vm45_vm1, %v6057_v4  ;;  %v6826_v4 = vld [vmem:[#allocation2 + $0x46] sm:$0xff] }
 0x680   :  { %17602 = vmatprep.mubr.msk.f32.mxu0 %vm20418_vm2, %v20417_v1 }
 0x683   :  { %17603 = vmatmul.mubr.msk.f32.gmra.mrb[152].mxu0 %vm45_vm1, %v6058_v40  ;;  %v6827_v40 = vld [vmem:[#allocation2 + $0x4e] sm:$0xff] }
 0x684   :  { %17607 = vmatprep.mubr.msk.f32.mxu0 %vm20418_vm2, %v20417_v1 }
 0x687   :  { %17608 = vmatmul.mubr.msk.f32.vlgmr.msra.gmra.mrb[0].mxu0 %vm45_vm1, %v6822_v50  ;;  %v6828_v50 = vld [vmem:[#allocation2 + $0x56] sm:$0xff] }
 0x688   :  { %17610 = vmatprep.mubr.msk.f32.mxu0 %vm20418_vm2, %v20417_v1 }
 0x68b   :  { %17611 = vmatmul.mubr.msk.f32.gmra.mrb[2].mxu0 %vm45_vm1, %v6823_v16  ;;  %v6829_v16 = vld [vmem:[#allocation2 + $0x5e] sm:$0xff] }
 0x68c   :  { %17613 = vmatprep.mubr.msk.f32.mxu0 %vm20418_vm2, %v20417_v1 }
 0x68f   :  { %17614 = vmatmul.mubr.msk.f32.gmra.mrb[4].mxu0 %vm45_vm1, %v6824_v63  ;;  %v6830_v63 = vld [vmem:[#allocation2 + $0x66] sm:$0xff] }
 0x690   :  { %17616 = vmatprep.mubr.msk.f32.mxu0 %vm20418_vm2, %v20417_v1 }
 0x693   :  { %17617 = vmatmul.mubr.msk.f32.gmra.mrb[6].mxu0 %vm45_vm1, %v6825_v24  ;;  %v6831_v24 = vld [vmem:[#allocation2 + $0x6e] sm:$0xff] }
 0x694   :  { %17619 = vmatprep.mubr.msk.f32.mxu0 %vm20418_vm2, %v20417_v1 }
 0x697   :  { %17620 = vmatmul.mubr.msk.f32.gmra.mrb[8].mxu0 %vm45_vm1, %v6826_v4  ;;  %v6832_v4 = vld [vmem:[#allocation2 + $0x76] sm:$0xff] }
 0x698   :  { %17622 = vmatprep.mubr.msk.f32.mxu0 %vm20418_vm2, %v20417_v1 }
 0x69b   :  { %17623 = vmatmul.mubr.msk.f32.gmra.mrb[10].mxu0 %vm45_vm1, %v6827_v40  ;;  %v6833_v40 = vld [vmem:[#allocation2 + $0x7e] sm:$0xff] }
 0x69c   :  { %17625 = vmatprep.mubr.msk.f32.mxu0 %vm20418_vm2, %v20417_v1 }
 0x69f   :  { %17626 = vmatmul.mubr.msk.f32.gmra.mrb[12].mxu0 %vm45_vm1, %v6828_v50  ;;  %v6834_v50 = vld [vmem:[#allocation2 + $0x86] sm:$0xff] }
 0x6a0   :  { %17628 = vmatprep.mubr.msk.f32.mxu0 %vm20418_vm2, %v20417_v1 }
 0x6a3   :  { %17629 = vmatmul.mubr.msk.f32.gmra.mrb[14].mxu0 %vm45_vm1, %v6829_v16  ;;  %v6835_v16 = vld [vmem:[#allocation2 + $0x8e] sm:$0xff] }
 0x6a4   :  { %17631 = vmatprep.mubr.msk.f32.mxu0 %vm20418_vm2, %v20417_v1 }
 0x6a7   :  { %17632 = vmatmul.mubr.msk.f32.gmra.mrb[16].mxu0 %vm45_vm1, %v6830_v63  ;;  %v6836_v63 = vld [vmem:[#allocation2 + $0x96] sm:$0xff] }
 0x6a8   :  { %17634 = vmatprep.mubr.msk.f32.mxu0 %vm20418_vm2, %v20417_v1 }
 0x6ab   :  { %17635 = vmatmul.mubr.msk.f32.gmra.mrb[18].mxu0 %vm45_vm1, %v6831_v24  ;;  %v6837_v24 = vld [vmem:[#allocation2 + $0x9e] sm:$0xff] }
 0x6ac   :  { %17637 = vmatprep.mubr.msk.f32.mxu0 %vm20418_vm2, %v20417_v1 }
 0x6af   :  { %17638 = vmatmul.mubr.msk.f32.gmra.mrb[20].mxu0 %vm45_vm1, %v6832_v4  ;;  %v6838_v4 = vld [vmem:[#allocation2 + $0xa6] sm:$0xff] }
 0x6b0   :  { %17640 = vmatprep.mubr.msk.f32.mxu0 %vm20418_vm2, %v20417_v1 }
 0x6b3   :  { %17641 = vmatmul.mubr.msk.f32.gmra.mrb[22].mxu0 %vm45_vm1, %v6833_v40  ;;  %v6839_v40 = vld [vmem:[#allocation2 + $0xae] sm:$0xff] }
 0x6b4   :  { %17643 = vmatprep.mubr.msk.f32.mxu0 %vm20418_vm2, %v20417_v1 }
 0x6b7   :  { %17644 = vmatmul.mubr.msk.f32.gmra.mrb[24].mxu0 %vm45_vm1, %v6834_v50  ;;  %v6840_v50 = vld [vmem:[#allocation2 + $0xb6] sm:$0xff] }
 0x6b8   :  { %17646 = vmatprep.mubr.msk.f32.mxu0 %vm20418_vm2, %v20417_v1 }
 0x6bb   :  { %17647 = vmatmul.mubr.msk.f32.gmra.mrb[26].mxu0 %vm45_vm1, %v6835_v16  ;;  %v6841_v16 = vld [vmem:[#allocation2 + $0xbe] sm:$0xff] }
 0x6bc   :  { %17649 = vmatprep.mubr.msk.f32.mxu0 %vm20418_vm2, %v20417_v1 }
 0x6bf   :  { %17650 = vmatmul.mubr.msk.f32.gmra.mrb[28].mxu0 %vm45_vm1, %v6836_v63  ;;  %v6842_v63 = vld [vmem:[#allocation2 + $0xc6] sm:$0xff] }
 0x6c0   :  { %17652 = vmatprep.mubr.msk.f32.mxu0 %vm20418_vm2, %v20417_v1 }
 0x6c3   :  { %17653 = vmatmul.mubr.msk.f32.gmra.mrb[30].mxu0 %vm45_vm1, %v6837_v24  ;;  %v6843_v24 = vld [vmem:[#allocation2 + $0xce] sm:$0xff] }
 0x6c4   :  { %17655 = vmatprep.mubr.msk.f32.mxu0 %vm20418_vm2, %v20417_v1 }
 0x6c7   :  { %17656 = vmatmul.mubr.msk.f32.gmra.mrb[32].mxu0 %vm45_vm1, %v6838_v4  ;;  %v6844_v4 = vld [vmem:[#allocation2 + $0xd6] sm:$0xff] }
 0x6c8   :  { %17658 = vmatprep.mubr.msk.f32.mxu0 %vm20418_vm2, %v20417_v1 }
 0x6cb   :  { %17659 = vmatmul.mubr.msk.f32.gmra.mrb[34].mxu0 %vm45_vm1, %v6839_v40  ;;  %v6845_v40 = vld [vmem:[#allocation2 + $0xde] sm:$0xff] }
 0x6cc   :  { %17661 = vmatprep.mubr.msk.f32.mxu0 %vm20418_vm2, %v20417_v1 }
 0x6cf   :  { %17662 = vmatmul.mubr.msk.f32.gmra.mrb[36].mxu0 %vm45_vm1, %v6840_v50  ;;  %v6846_v50 = vld [vmem:[#allocation2 + $0xe6] sm:$0xff] }
 0x6d0   :  { %17664 = vmatprep.mubr.msk.f32.mxu0 %vm20418_vm2, %v20417_v1 }
 0x6d3   :  { %17665 = vmatmul.mubr.msk.f32.gmra.mrb[38].mxu0 %vm45_vm1, %v6841_v16  ;;  %v14353_v16 = vld [vmem:[%s25104_s2 + $0x8] sm:$0xff] }
 0x6d4   :  { %17667 = vmatprep.mubr.msk.f32.mxu0 %vm20418_vm2, %v20417_v1  ;;  %17839 = vmatpush3.msra.mxu1 %v14353_v16  ;;  %v6852_v16 = vld [vmem:[#allocation2 + $0x116] sm:$0xff] }
 0x6d5   :  { %17909 = vmatprep.subr.mxu1 %v20417_v1 }
 0x6d7   :  { %17668 = vmatmul.mubr.msk.f32.gmra.mrb[40].mxu0 %vm45_vm1, %v6842_v63  ;;  %v6847_v63 = vld [vmem:[#allocation2 + $0xee] sm:$0xff] }
 0x6d8   :  { %17670 = vmatprep.mubr.msk.f32.mxu0 %vm20418_vm2, %v20417_v1 }
 0x6db   :  { %17671 = vmatmul.mubr.msk.f32.gmra.mrb[42].mxu0 %vm45_vm1, %v6843_v24  ;;  %v6848_v24 = vld [vmem:[#allocation2 + $0xf6] sm:$0xff] }
 0x6dc   :  { %17673 = vmatprep.mubr.msk.f32.mxu0 %vm20418_vm2, %v20417_v1 }
 0x6df   :  { %17674 = vmatmul.mubr.msk.f32.gmra.mrb[44].mxu0 %vm45_vm1, %v6844_v4  ;;  %v6849_v4 = vld [vmem:[#allocation2 + $0xfe] sm:$0xff] }
 0x6e0   :  { %17676 = vmatprep.mubr.msk.f32.mxu0 %vm20418_vm2, %v20417_v1 }
 0x6e3   :  { %17677 = vmatmul.mubr.msk.f32.gmra.mrb[46].mxu0 %vm45_vm1, %v6845_v40  ;;  %v6850_v40 = vld [vmem:[#allocation2 + $0x106] sm:$0xff] }
 0x6e4   :  { %17679 = vmatprep.mubr.msk.f32.mxu0 %vm20418_vm2, %v20417_v1 }
 0x6e7   :  { %17680 = vmatmul.mubr.msk.f32.gmra.mrb[48].mxu0 %vm45_vm1, %v6846_v50  ;;  %v6851_v50 = vld [vmem:[#allocation2 + $0x10e] sm:$0xff] }
 0x6e8   :  { %17682 = vmatprep.mubr.msk.f32.mxu0 %vm20418_vm2, %v20417_v1 }
 0x6eb   :  { %17683 = vmatmul.mubr.msk.f32.gmra.mrb[50].mxu0 %vm45_vm1, %v6847_v63  ;;  %v6853_v63 = vld [vmem:[#allocation2 + $0x11e] sm:$0xff] }
 0x6ec   :  { %17685 = vmatprep.mubr.msk.f32.mxu0 %vm20418_vm2, %v20417_v1 }
 0x6ef   :  { %17686 = vmatmul.mubr.msk.f32.gmra.mrb[52].mxu0 %vm45_vm1, %v6848_v24  ;;  %v8380_v24 = vld [vmem:[#allocation3 + $0x1] sm:$0xff] }
 0x6f0   :  { %17688 = vmatprep.mubr.msk.f32.mxu0 %vm20418_vm2, %v20417_v1  ;;  %17841 = vmatmul.mubr.msk.f32.vlgmr.msra.gmra.mrb[154].mxu1 %vm8061_vm3, %v8380_v24  ;;  %v6859_v24 = vld [vmem:[#allocation2 + $0x14e] sm:$0xff] }
 0x6f1   :  { %17843 = vmatprep.mubr.msk.f32.mxu1 %vm20418_vm2, %v20417_v1 }
 0x6f3   :  { %17689 = vmatmul.mubr.msk.f32.gmra.mrb[54].mxu0 %vm45_vm1, %v6849_v4  ;;  %v6854_v4 = vld [vmem:[#allocation2 + $0x126] sm:$0xff] }
 0x6f4   :  { %17691 = vmatprep.mubr.msk.f32.mxu0 %vm20418_vm2, %v20417_v1 }
 0x6f7   :  { %17692 = vmatmul.mubr.msk.f32.gmra.mrb[56].mxu0 %vm45_vm1, %v6850_v40  ;;  %v6855_v40 = vld [vmem:[#allocation2 + $0x12e] sm:$0xff] }
 0x6f8   :  { %17694 = vmatprep.mubr.msk.f32.mxu0 %vm20418_vm2, %v20417_v1 }
 0x6fb   :  { %17695 = vmatmul.mubr.msk.f32.gmra.mrb[58].mxu0 %vm45_vm1, %v6851_v50  ;;  %v6856_v50 = vld [vmem:[#allocation2 + $0x136] sm:$0xff] }
 0x6fc   :  { %17697 = vmatprep.mubr.msk.f32.mxu0 %vm20418_vm2, %v20417_v1 }
 0x6ff   :  { %17698 = vmatmul.mubr.msk.f32.gmra.mrb[60].mxu0 %vm45_vm1, %v6852_v16  ;;  %v6857_v16 = vld [vmem:[#allocation2 + $0x13e] sm:$0xff] }
 0x700   :  { %17700 = vmatprep.mubr.msk.f32.mxu0 %vm20418_vm2, %v20417_v1 }
 0x703   :  { %17701 = vmatmul.mubr.msk.f32.gmra.mrb[62].mxu0 %vm45_vm1, %v6853_v63  ;;  %v6858_v63 = vld [vmem:[#allocation2 + $0x146] sm:$0xff] }
 0x704   :  { %17703 = vmatprep.mubr.msk.f32.mxu0 %vm20418_vm2, %v20417_v1 }
 0x707   :  { %17704 = vmatmul.mubr.msk.f32.gmra.mrb[64].mxu0 %vm45_vm1, %v6854_v4  ;;  %v6860_v4 = vld [vmem:[#allocation2 + $0x156] sm:$0xff] }
 0x708   :  { %17706 = vmatprep.mubr.msk.f32.mxu0 %vm20418_vm2, %v20417_v1 }
 0x70b   :  { %17707 = vmatmul.mubr.msk.f32.gmra.mrb[66].mxu0 %vm45_vm1, %v6855_v40  ;;  %v6861_v40 = vld [vmem:[#allocation2 + $0x15e] sm:$0xff] }
 0x70c   :  { %17709 = vmatprep.mubr.msk.f32.mxu0 %vm20418_vm2, %v20417_v1 }
 0x70f   :  { %17710 = vmatmul.mubr.msk.f32.gmra.mrb[68].mxu0 %vm45_vm1, %v6856_v50  ;;  %v6862_v50 = vld [vmem:[#allocation2 + $0x166] sm:$0xff] }
 0x710   :  { %17712 = vmatprep.mubr.msk.f32.mxu0 %vm20418_vm2, %v20417_v1 }
 0x713   :  { %17713 = vmatmul.mubr.msk.f32.gmra.mrb[70].mxu0 %vm45_vm1, %v6857_v16  ;;  %v6863_v16 = vld [vmem:[#allocation2 + $0x16e] sm:$0xff] }
 0x714   :  { %17715 = vmatprep.mubr.msk.f32.mxu0 %vm20418_vm2, %v20417_v1 }
 0x717   :  { %17716 = vmatmul.mubr.msk.f32.gmra.mrb[72].mxu0 %vm45_vm1, %v6858_v63  ;;  %v6864_v63 = vld [vmem:[#allocation2 + $0x176] sm:$0xff] }
 0x718   :  { %17718 = vmatprep.mubr.msk.f32.mxu0 %vm20418_vm2, %v20417_v1 }
 0x71b   :  { %17719 = vmatmul.mubr.msk.f32.gmra.mrb[74].mxu0 %vm45_vm1, %v6859_v24  ;;  %v6865_v24 = vld [vmem:[#allocation2 + $0x17e] sm:$0xff] }
 0x71c   :  { %17721 = vmatprep.mubr.msk.f32.mxu0 %vm20418_vm2, %v20417_v1 }
 0x71f   :  { %17722 = vmatmul.mubr.msk.f32.gmra.mrb[76].mxu0 %vm45_vm1, %v6860_v4  ;;  %v6866_v4 = vld [vmem:[#allocation2 + $0x186] sm:$0xff] }
 0x720   :  { %17724 = vmatprep.mubr.msk.f32.mxu0 %vm20418_vm2, %v20417_v1 }
 0x723   :  { %17725 = vmatmul.mubr.msk.f32.gmra.mrb[78].mxu0 %vm45_vm1, %v6861_v40  ;;  %v6867_v40 = vld [vmem:[#allocation2 + $0x18e] sm:$0xff] }
 0x724   :  { %17727 = vmatprep.mubr.msk.f32.mxu0 %vm20418_vm2, %v20417_v1 }
 0x727   :  { %17728 = vmatmul.mubr.msk.f32.gmra.mrb[80].mxu0 %vm45_vm1, %v6862_v50  ;;  %v6868_v50 = vld [vmem:[#allocation2 + $0x196] sm:$0xff] }
 0x728   :  { %17730 = vmatprep.mubr.msk.f32.mxu0 %vm20418_vm2, %v20417_v1 }
 0x72b   :  { %17731 = vmatmul.mubr.msk.f32.gmra.mrb[82].mxu0 %vm45_vm1, %v6863_v16  ;;  %v6869_v16 = vld [vmem:[#allocation2 + $0x19e] sm:$0xff] }
 0x72c   :  { %17733 = vmatprep.mubr.msk.f32.mxu0 %vm20418_vm2, %v20417_v1 }
 0x72f   :  { %17734 = vmatmul.mubr.msk.f32.gmra.mrb[84].mxu0 %vm45_vm1, %v6864_v63  ;;  %v6870_v63 = vld [vmem:[#allocation2 + $0x1a6] sm:$0xff] }
 0x730   :  { %17736 = vmatprep.mubr.msk.f32.mxu0 %vm20418_vm2, %v20417_v1 }
 0x733   :  { %17737 = vmatmul.mubr.msk.f32.gmra.mrb[86].mxu0 %vm45_vm1, %v6865_v24  ;;  %v6871_v24 = vld [vmem:[#allocation2 + $0x1ae] sm:$0xff] }
 0x734   :  { %17739 = vmatprep.mubr.msk.f32.mxu0 %vm20418_vm2, %v20417_v1 }
 0x737   :  { %17740 = vmatmul.mubr.msk.f32.gmra.mrb[88].mxu0 %vm45_vm1, %v6866_v4  ;;  %v6872_v4 = vld [vmem:[#allocation2 + $0x1b6] sm:$0xff] }
 0x738   :  { %17742 = vmatprep.mubr.msk.f32.mxu0 %vm20418_vm2, %v20417_v1 }
 0x73b   :  { %17743 = vmatmul.mubr.msk.f32.gmra.mrb[90].mxu0 %vm45_vm1, %v6867_v40  ;;  %v6873_v40 = vld [vmem:[#allocation2 + $0x1be] sm:$0xff] }
 0x73c   :  { %17745 = vmatprep.mubr.msk.f32.mxu0 %vm20418_vm2, %v20417_v1 }
 0x73f   :  { %17746 = vmatmul.mubr.msk.f32.gmra.mrb[92].mxu0 %vm45_vm1, %v6868_v50  ;;  %v6874_v50 = vld [vmem:[#allocation2 + $0x1c6] sm:$0xff] }
 0x740   :  { %17748 = vmatprep.mubr.msk.f32.mxu0 %vm20418_vm2, %v20417_v1 }
 0x743   :  { %17749 = vmatmul.mubr.msk.f32.gmra.mrb[94].mxu0 %vm45_vm1, %v6869_v16  ;;  %v6875_v16 = vld [vmem:[#allocation2 + $0x1ce] sm:$0xff] }
 0x744   :  { %17751 = vmatprep.mubr.msk.f32.mxu0 %vm20418_vm2, %v20417_v1 }
 0x747   :  { %17752 = vmatmul.mubr.msk.f32.gmra.mrb[96].mxu0 %vm45_vm1, %v6870_v63 }
 0x748   :  { %17754 = vmatprep.mubr.msk.f32.mxu0 %vm20418_vm2, %v20417_v1 }
 0x74b   :  { %17755 = vmatmul.mubr.msk.f32.gmra.mrb[98].mxu0 %vm45_vm1, %v6871_v24  ;;  %v23568_v24 = vld [vmem:[%s25107_s5] ss:$0 sm:$0xff] }
 0x74c   :  { %17757 = vmatprep.mubr.msk.f32.mxu0 %vm20418_vm2, %v20417_v1 }
 0x74f   :  { %17758 = vmatmul.mubr.msk.f32.gmra.mrb[100].mxu0 %vm45_vm1, %v6872_v4 }
 0x750   :  { %17760 = vmatprep.mubr.msk.f32.mxu0 %vm20418_vm2, %v20417_v1 }
 0x753   :  { %17761 = vmatmul.mubr.msk.f32.gmra.mrb[102].mxu0 %vm45_vm1, %v6873_v40  ;;  %v23575_v40 = vld [vmem:[%s25111_s9] ss:$0 sm:$0xff] }
 0x754   :  { %17763 = vmatprep.mubr.msk.f32.mxu0 %vm20418_vm2, %v20417_v1 }
 0x757   :  { %17764 = vmatmul.mubr.msk.f32.gmra.mrb[104].mxu0 %vm45_vm1, %v6874_v50  ;;  %v6876_v50 = vld [vmem:[#allocation2 + $0x1d6] sm:$0xff] }
 0x758   :  { %17766 = vmatprep.mubr.msk.f32.mxu0 %vm20418_vm2, %v20417_v1 }
 0x75a   :  { %v7201_v63 = vpop.f32.mrb[0].mxu0 }
 0x75b   :  { %v18749_v4 = vadd.f32 %v7201_v63, %v22735_v15  ;;  %v17609_v21 = vpop.f32.mrb[1].mxu0  ;;  %17767 = vmatmul.mubr.msk.f32.gmra.mrb[106].mxu0 %vm45_vm1, %v6875_v16 }
 0x75c   :  { %17769 = vmatprep.mubr.msk.f32.mxu0 %vm20418_vm2, %v20417_v1  ;;  %v6877_v21 = vld [vmem:[#allocation2 + $0x1de] sm:$0xff] }
 0x75d   :  { %v7669_v41 = vmul.f32 %v18749_v4, %v23568_v24 }
 0x75e   :  { %v7206_v45 = vpop.f32.mrb[2].mxu0 }
 0x75f   :  { %v7753_v12 = vadd.f32 %v23575_v40, %v7669_v41  ;;  %v18750_v49 = vadd.f32 %v7206_v45, %v22744_v19  ;;  %v17612_v15 = vpop.f32.mrb[3].mxu0  ;;  %17770 = vmatmul.mubr.msk.f32.gmra.mrb[108].mxu0 %vm45_vm1, %v6876_v50  ;;  %v6878_v19 = vld [vmem:[#allocation2 + $0x1e6] sm:$0xff] }
 0x760   :  { %17772 = vmatprep.mubr.msk.f32.mxu0 %vm20418_vm2, %v20417_v1 }
 0x761   :  { %vm7830_vm4 = vcmp.gt.f32.partialorder %v7753_v12, 0.0  ;;  %v7907_v16 = vmul.f32 0.01, %v7753_v12  ;;  %v7670_v63 = vmul.f32 %v18750_v49, %v23568_v24 }
 0x762   :  { %v7211_v52 = vpop.f32.mrb[4].mxu0 }
 0x763   :  { %v7984_v29 = vsel %vm7830_vm4, %v7753_v12, %v7907_v16  ;;  %v7754_v4 = vadd.f32 %v23575_v40, %v7670_v63  ;;  %v18751_v5 = vadd.f32 %v7211_v52, %v22753_v0  ;;  %v17615_v41 = vpop.f32.mrb[5].mxu0  ;;  %17773 = vmatmul.mubr.msk.f32.gmra.mrb[110].mxu0 %vm45_vm1, %v6877_v21 }
 0x764   :  { %8062 = vst.msk [vmem:[#allocation6] sm:$0xff] %vm8061_vm3, %v7984_v29  ;;  %17775 = vmatprep.mubr.msk.f32.mxu0 %vm20418_vm2, %v20417_v1  ;;  %v6879_v29 = vld [vmem:[#allocation2 + $0x1ee] sm:$0xff] }
 0x765   :  { %vm7831_vm5 = vcmp.gt.f32.partialorder %v7754_v4, 0.0  ;;  %v7908_v45 = vmul.f32 0.01, %v7754_v4  ;;  %v7671_v50 = vmul.f32 %v18751_v5, %v23568_v24 }
 0x766   :  { %v7216_v49 = vpop.f32.mrb[6].mxu0 }
 0x767   :  { %v7985_v15 = vsel %vm7831_vm5, %v7754_v4, %v7908_v45  ;;  %v7755_v12 = vadd.f32 %v23575_v40, %v7671_v50  ;;  %v18752_v16 = vadd.f32 %v7216_v49, %v22762_v51  ;;  %v17618_v0 = vpop.f32.mrb[7].mxu0  ;;  %17776 = vmatmul.mubr.msk.f32.gmra.mrb[112].mxu0 %vm45_vm1, %v6878_v19  ;;  %v6880_v19 = vld [vmem:[#allocation2 + $0x1f6] sm:$0xff] }
 0x768   :  { %8063 = vst.msk [vmem:[#allocation6 + $0x8] sm:$0xff] %vm8061_vm3, %v7985_v15  ;;  %17778 = vmatprep.mubr.msk.f32.mxu0 %vm20418_vm2, %v20417_v1  ;;  %v6881_v0 = vld [vmem:[#allocation2 + $0x1fe] sm:$0xff] }
 0x769   :  { %vm7832_vm6 = vcmp.gt.f32.partialorder %v7755_v12, 0.0  ;;  %v7909_v52 = vmul.f32 0.01, %v7755_v12  ;;  %v7672_v21 = vmul.f32 %v18752_v16, %v23568_v24 }
 0x76a   :  { %v7221_v5 = vpop.f32.mrb[8].mxu0 }
 0x76b   :  { %v7986_v63 = vsel %vm7832_vm6, %v7755_v12, %v7909_v52  ;;  %v7756_v4 = vadd.f32 %v23575_v40, %v7672_v21  ;;  %v18753_v41 = vadd.f32 %v7221_v5, %v22771_v55  ;;  %v17621_v51 = vpop.f32.mrb[9].mxu0  ;;  %17779 = vmatmul.mubr.msk.f32.gmra.mrb[114].mxu0 %vm45_vm1, %v6879_v29 }
 0x76c   :  { %8064 = vst.msk [vmem:[#allocation6 + $0x10] sm:$0xff] %vm8061_vm3, %v7986_v63  ;;  %17781 = vmatprep.mubr.msk.f32.mxu0 %vm20418_vm2, %v20417_v1 }
 0x76d   :  { %vm7833_vm7 = vcmp.gt.f32.partialorder %v7756_v4, 0.0  ;;  %v7910_v45 = vmul.f32 0.01, %v7756_v4  ;;  %v7673_v50 = vmul.f32 %v18753_v41, %v23568_v24  ;;  %v6882_v41 = vld [vmem:[#allocation2 + $0x206] sm:$0xff] }
 0x76e   :  { %v7226_v49 = vpop.f32.mrb[10].mxu0 }
 0x76f   :  { %v7987_v15 = vsel %vm7833_vm7, %v7756_v4, %v7910_v45  ;;  %v7757_v12 = vadd.f32 %v23575_v40, %v7673_v50  ;;  %v18754_v16 = vadd.f32 %v7226_v49, %v22782_v59  ;;  %v17624_v55 = vpop.f32.mrb[11].mxu0  ;;  %17782 = vmatmul.mubr.msk.f32.gmra.mrb[116].mxu0 %vm45_vm1, %v6880_v19 }
 0x770   :  { %8065 = vst.msk [vmem:[#allocation6 + $0x18] sm:$0xff] %vm8061_vm3, %v7987_v15  ;;  %17784 = vmatprep.mubr.msk.f32.mxu0 %vm20418_vm2, %v20417_v1  ;;  %v8167_v55 = vld [vmem:[#allocation6 + $0x1] ss:$2 sm:$0xff] }
 0x771   :  { %vm7834_vm8 = vcmp.gt.f32.partialorder %v7757_v12, 0.0  ;;  %v7911_v29 = vmul.f32 0.01, %v7757_v12  ;;  %v7674_v52 = vmul.f32 %v18754_v16, %v23568_v24  ;;  %v6883_v16 = vld [vmem:[#allocation2 + $0x20e] sm:$0xff] }
 0x772   :  { %v7231_v21 = vpop.f32.mrb[12].mxu0 }
 0x773   :  { %v7988_v5 = vsel %vm7834_vm8, %v7757_v12, %v7911_v29  ;;  %v7758_v63 = vadd.f32 %v23575_v40, %v7674_v52  ;;  %v18755_v4 = vadd.f32 %v7231_v21, %v22789_v2  ;;  %v17627_v59 = vpop.f32.mrb[13].mxu0  ;;  %17785 = vmatmul.mubr.msk.f32.gmra.mrb[118].mxu0 %vm45_vm1, %v6881_v0  ;;  %v8165_v12 = vld [vmem:[#allocation6] ss:$2 sm:$0xff] }
 0x774   :  { %8066 = vst.msk [vmem:[#allocation6 + $0x20] sm:$0xff] %vm8061_vm3, %v7988_v5  ;;  %17787 = vmatprep.mubr.msk.f32.mxu0 %vm20418_vm2, %v20417_v1 }
 0x775   :  { %vm7835_vm9 = vcmp.gt.f32.partialorder %v7758_v63, 0.0  ;;  %v7912_v51 = vmul.f32 0.01, %v7758_v63  ;;  %v7675_v19 = vmul.f32 %v18755_v4, %v23568_v24 }
 0x776   :  { %v7236_v45 = vpop.f32.mrb[14].mxu0 }
 0x777   :  { %v7989_v50 = vsel %vm7835_vm9, %v7758_v63, %v7912_v51  ;;  %v7759_v49 = vadd.f32 %v23575_v40, %v7675_v19  ;;  %v18756_v15 = vadd.f32 %v7236_v45, %v22798_v6  ;;  %v17630_v2 = vpop.f32.mrb[15].mxu0  ;;  %17788 = vmatmul.mubr.msk.f32.gmra.mrb[120].mxu0 %vm45_vm1, %v6882_v41  ;;  %v8172_v41 = vmax.f32 %v8165_v12, %v8167_v55  ;;  %v6884_v19 = vld [vmem:[#allocation2 + $0x216] sm:$0xff]  ;;  %v6885_v12 = vld [vmem:[#allocation2 + $0x21e] sm:$0xff] }
 0x778   :  { %8067 = vst.msk [vmem:[#allocation6 + $0x28] sm:$0xff] %vm8061_vm3, %v7989_v50  ;;  %17790 = vmatprep.mubr.msk.f32.mxu0 %vm20418_vm2, %v20417_v1 }
 0x779   :  { %vm7836_vm10 = vcmp.gt.f32.partialorder %v7759_v49, 0.0  ;;  %v7913_v0 = vmul.f32 0.01, %v7759_v49  ;;  %v7676_v29 = vmul.f32 %v18756_v15, %v23568_v24 }
 0x77a   :  { %v7241_v52 = vpop.f32.mrb[16].mxu0 }
 0x77b   :  { %v8169_v21 = vld [vmem:[#allocation6 + $0x12] ss:$2 sm:$0xff]  ;;  %v8171_v5 = vld [vmem:[#allocation6 + $0x13] ss:$2 sm:$0xff]  ;;  %v7990_v63 = vsel %vm7836_vm10, %v7759_v49, %v7913_v0  ;;  %v7760_v6 = vadd.f32 %v23575_v40, %v7676_v29  ;;  %v18757_v4 = vadd.f32 %v7241_v52, %v22807_v10  ;;  %v17633_v59 = vpop.f32.mrb[17].mxu0  ;;  %17791 = vmatmul.mubr.msk.f32.gmra.mrb[122].mxu0 %vm45_vm1, %v6883_v16 }
 0x77c   :  { %v8173_v51 = vmax.f32 %v8169_v21, %v8171_v5  ;;  %8068 = vst.msk [vmem:[#allocation6 + $0x30] sm:$0xff] %vm8061_vm3, %v7990_v63  ;;  %17793 = vmatprep.mubr.msk.f32.mxu0 %vm20418_vm2, %v20417_v1 }
 0x77d   :  { %vm7837_vm11 = vcmp.gt.f32.partialorder %v7760_v6, 0.0  ;;  %v7914_v45 = vmul.f32 0.01, %v7760_v6  ;;  %v7677_v50 = vmul.f32 %v18757_v4, %v23568_v24 }
 0x77e   :  { %v7246_v49 = vpop.f32.mrb[18].mxu0  ;;  %v8174_v15 = vmax.f32 %v8172_v41, %v8173_v51 }
 0x77f   :  { %v7991_v2 = vsel %vm7837_vm11, %v7760_v6, %v7914_v45  ;;  %v7761_v10 = vadd.f32 %v23575_v40, %v7677_v50  ;;  %v18758_v0 = vadd.f32 %v7246_v49, %v22816_v14  ;;  %v17636_v16 = vpop.f32.mrb[19].mxu0  ;;  %17794 = vmatmul.mubr.msk.f32.gmra.mrb[124].mxu0 %vm45_vm1, %v6884_v19  ;;  %v6886_v6 = vld [vmem:[#allocation2 + $0x226] sm:$0xff] }
 0x780   :  { %8069 = vst.msk [vmem:[#allocation6 + $0x38] sm:$0xff] %vm8061_vm3, %v7991_v2  ;;  %17796 = vmatprep.mubr.msk.f32.mxu0 %vm20418_vm2, %v20417_v1  ;;  %8175 = vst.msk [vmem:[#allocation3 + $0xb] sm:$0xff] %vm8061_vm3, %v8174_v15  ;;  %v6887_v15 = vld [vmem:[#allocation2 + $0x22e] sm:$0xff] }
 0x781   :  { %vm7838_vm12 = vcmp.gt.f32.partialorder %v7761_v10, 0.0  ;;  %v7915_v55 = vmul.f32 0.01, %v7761_v10  ;;  %v7678_v29 = vmul.f32 %v18758_v0, %v23568_v24 }
 0x782   :  { %v7251_v52 = vpop.f32.mrb[20].mxu0 }
 0x783   :  { %v7992_v21 = vsel %vm7838_vm12, %v7761_v10, %v7915_v55  ;;  %v7762_v5 = vadd.f32 %v23575_v40, %v7678_v29  ;;  %v18759_v14 = vadd.f32 %v7251_v52, %v22825_v18  ;;  %v17639_v63 = vpop.f32.mrb[21].mxu0  ;;  %17797 = vmatmul.mubr.msk.f32.gmra.mrb[126].mxu0 %vm45_vm1, %v6885_v12  ;;  %v8177_v49 = vld [vmem:[#allocation6 + $0x24] ss:$2 sm:$0xff]  ;;  %v8179_v2 = vld [vmem:[#allocation6 + $0x25] ss:$2 sm:$0xff] }
 0x784   :  { %8070 = vst.msk [vmem:[#allocation6 + $0x40] sm:$0xff] %vm8061_vm3, %v7992_v21  ;;  %17799 = vmatprep.mubr.msk.f32.mxu0 %vm20418_vm2, %v20417_v1  ;;  %v6888_v63 = vld [vmem:[#allocation2 + $0x236] sm:$0xff] }
 0x785   :  { %vm7839_vm13 = vcmp.gt.f32.partialorder %v7762_v5, 0.0  ;;  %v7916_v4 = vmul.f32 0.01, %v7762_v5  ;;  %v7679_v59 = vmul.f32 %v18759_v14, %v23568_v24 }
 0x786   :  { %v7256_v41 = vpop.f32.mrb[22].mxu0 }
 0x787   :  { %v7993_v51 = vsel %vm7839_vm13, %v7762_v5, %v7916_v4  ;;  %v7763_v19 = vadd.f32 %v23575_v40, %v7679_v59  ;;  %v18760_v45 = vadd.f32 %v7256_v41, %v22834_v22  ;;  %v17642_v18 = vpop.f32.mrb[23].mxu0  ;;  %17800 = vmatmul.mubr.msk.f32.gmra.mrb[128].mxu0 %vm45_vm1, %v6886_v6  ;;  %v8381_v50 = vld [vmem:[#allocation3 + $0x9] sm:$0xff]  ;;  %v8184_v5 = vmax.f32 %v8177_v49, %v8179_v2 }
 0x788   :  { %8071 = vst.msk [vmem:[#allocation6 + $0x48] sm:$0xff] %vm8061_vm3, %v7993_v51  ;;  %17844 = vmatmul.mubr.msk.f32.gmra.mrb[156].mxu1 %vm8061_vm3, %v8381_v50  ;;  %17802 = vmatprep.mubr.msk.f32.mxu0 %vm20418_vm2, %v20417_v1  ;;  %v6889_v18 = vld [vmem:[#allocation2 + $0x23e] sm:$0xff] }
 0x789   :  { %vm7840_vm14 = vcmp.gt.f32.partialorder %v7763_v19, 0.0  ;;  %v7917_v10 = vmul.f32 0.01, %v7763_v19  ;;  %v7680_v0 = vmul.f32 %v18760_v45, %v23568_v24  ;;  %17846 = vmatprep.mubr.msk.f32.mxu1 %vm20418_vm2, %v20417_v1 }
 0x78a   :  { %v7261_v22 = vpop.f32.mrb[24].mxu0 }
 0x78b   :  { %v8181_v16 = vld [vmem:[#allocation6 + $0x36] ss:$2 sm:$0xff]  ;;  %v8183_v12 = vld [vmem:[#allocation6 + $0x37] ss:$2 sm:$0xff]  ;;  %v7994_v55 = vsel %vm7840_vm14, %v7763_v19, %v7917_v10  ;;  %v7764_v29 = vadd.f32 %v23575_v40, %v7680_v0  ;;  %v18761_v52 = vadd.f32 %v7261_v22, %v22843_v26  ;;  %v17645_v21 = vpop.f32.mrb[25].mxu0  ;;  %17803 = vmatmul.mubr.msk.f32.gmra.mrb[130].mxu0 %vm45_vm1, %v6887_v15  ;;  %v6890_v22 = vld [vmem:[#allocation2 + $0x246] sm:$0xff] }
 0x78c   :  { %v8185_v14 = vmax.f32 %v8181_v16, %v8183_v12  ;;  %8072 = vst.msk [vmem:[#allocation6 + $0x50] sm:$0xff] %vm8061_vm3, %v7994_v55  ;;  %17805 = vmatprep.mubr.msk.f32.mxu0 %vm20418_vm2, %v20417_v1 }
 0x78d   :  { %vm7841_vm15 = vcmp.gt.f32.partialorder %v7764_v29, 0.0  ;;  %v7918_v6 = vmul.f32 0.01, %v7764_v29  ;;  %v7681_v4 = vmul.f32 %v18761_v52, %v23568_v24 }
 0x78e   :  { %v7266_v59 = vpop.f32.mrb[26].mxu0  ;;  %v8186_v41 = vmax.f32 %v8184_v5, %v8185_v14  ;;  %v6891_v14 = vld [vmem:[#allocation2 + $0x24e] sm:$0xff] }
 0x78f   :  { %v7995_v51 = vsel %vm7841_vm15, %v7764_v29, %v7918_v6  ;;  %v7765_v26 = vadd.f32 %v23575_v40, %v7681_v4  ;;  %v18762_v19 = vadd.f32 %v7266_v59, %v22852_v30  ;;  %v17648_v45 = vpop.f32.mrb[27].mxu0  ;;  %17806 = vmatmul.mubr.msk.f32.gmra.mrb[132].mxu0 %vm45_vm1, %v6888_v63 }
 0x790   :  { %8073 = vst.msk [vmem:[#allocation6 + $0x58] sm:$0xff] %vm8061_vm3, %v7995_v51  ;;  %17808 = vmatprep.mubr.msk.f32.mxu0 %vm20418_vm2, %v20417_v1  ;;  %8187 = vst.msk [vmem:[#allocation3 + $0x15] sm:$0xff] %vm8061_vm3, %v8186_v41 }
 0x791   :  { %vm7842_vm0 = vcmp.gt.f32.partialorder %v7765_v26, 0.0  ;;  %v7919_v50 = vmul.f32 0.01, %v7765_v26  ;;  %v7682_v49 = vmul.f32 %v18762_v19, %v23568_v24  ;;  %v6892_v19 = vld [vmem:[#allocation2 + $0x256] sm:$0xff] }
 0x792   :  { %v7271_v15 = vpop.f32.mrb[28].mxu0 }
 0x793   :  { %v7996_v2 = vsel %vm7842_vm0, %v7765_v26, %v7919_v50  ;;  %v7766_v10 = vadd.f32 %v23575_v40, %v7682_v49  ;;  %v18763_v30 = vadd.f32 %v7271_v15, %v22861_v34  ;;  %v17651_v0 = vpop.f32.mrb[29].mxu0  ;;  %17809 = vmatmul.mubr.msk.f32.gmra.mrb[134].mxu0 %vm45_vm1, %v6889_v18  ;;  %v8189_v26 = vld [vmem:[#allocation6 + $0x48] ss:$2 sm:$0xff]  ;;  %v8191_v45 = vld [vmem:[#allocation6 + $0x49] ss:$2 sm:$0xff] }
 0x794   :  { %8074 = vst.msk [vmem:[#allocation6 + $0x60] sm:$0xff] %vm8061_vm3, %v7996_v2  ;;  %17811 = vmatprep.mubr.msk.f32.mxu0 %vm20418_vm2, %v20417_v1 }
 0x795   :  { %vm7843_vm4 = vcmp.gt.f32.partialorder %v7766_v10, 0.0  ;;  %v7920_v16 = vmul.f32 0.01, %v7766_v10  ;;  %v7683_v12 = vmul.f32 %v18763_v30, %v23568_v24 }
 0x796   :  { %v7276_v55 = vpop.f32.mrb[30].mxu0 }
 0x797   :  { %v7997_v29 = vsel %vm7843_vm4, %v7766_v10, %v7920_v16  ;;  %v7767_v52 = vadd.f32 %v23575_v40, %v7683_v12  ;;  %v18764_v21 = vadd.f32 %v7276_v55, %v22870_v38  ;;  %v17654_v34 = vpop.f32.mrb[31].mxu0  ;;  %17812 = vmatmul.mubr.msk.f32.gmra.mrb[136].mxu0 %vm45_vm1, %v6890_v22  ;;  %v8382_v5 = vld [vmem:[#allocation3 + $0x11] sm:$0xff]  ;;  %v8196_v22 = vmax.f32 %v8189_v26, %v8191_v45  ;;  %v6895_v26 = vld [vmem:[#allocation2 + $0x26e] sm:$0xff] }
 0x798   :  { %8075 = vst.msk [vmem:[#allocation6 + $0x68] sm:$0xff] %vm8061_vm3, %v7997_v29  ;;  %17847 = vmatmul.mubr.msk.f32.gmra.mrb[158].mxu1 %vm8061_vm3, %v8382_v5  ;;  %17814 = vmatprep.mubr.msk.f32.mxu0 %vm20418_vm2, %v20417_v1  ;;  %v6893_v12 = vld [vmem:[#allocation2 + $0x25e] sm:$0xff] }
 0x799   :  { %vm7844_vm5 = vcmp.gt.f32.partialorder %v7767_v52, 0.0  ;;  %v7921_v63 = vmul.f32 0.01, %v7767_v52  ;;  %v7684_v6 = vmul.f32 %v18764_v21, %v23568_v24  ;;  %17849 = vmatprep.mubr.msk.f32.mxu1 %vm20418_vm2, %v20417_v1 }
 0x79a   :  { %v7281_v38 = vpop.f32.mrb[32].mxu0 }
 0x79b   :  { %v7998_v4 = vsel %vm7844_vm5, %v7767_v52, %v7921_v63  ;;  %v7768_v59 = vadd.f32 %v23575_v40, %v7684_v6  ;;  %v18765_v41 = vadd.f32 %v7281_v38, %v22879_v42  ;;  %v17657_v51 = vpop.f32.mrb[33].mxu0  ;;  %17815 = vmatmul.mubr.msk.f32.gmra.mrb[138].mxu0 %vm45_vm1, %v6891_v14  ;;  %v6894_v63 = vld [vmem:[#allocation2 + $0x266] sm:$0xff] }
 0x79c   :  { %8076 = vst.msk [vmem:[#allocation6 + $0x70] sm:$0xff] %vm8061_vm3, %v7998_v4  ;;  %17817 = vmatprep.mubr.msk.f32.mxu0 %vm20418_vm2, %v20417_v1 }
 0x79d   :  { %vm7845_vm6 = vcmp.gt.f32.partialorder %v7768_v59, 0.0  ;;  %v7922_v18 = vmul.f32 0.01, %v7768_v59  ;;  %v7685_v50 = vmul.f32 %v18765_v41, %v23568_v24 }
 0x79e   :  { %v7286_v49 = vpop.f32.mrb[34].mxu0 }
 0x79f   :  { %v8193_v15 = vld [vmem:[#allocation6 + $0x5a] ss:$2 sm:$0xff]  ;;  %v8195_v2 = vld [vmem:[#allocation6 + $0x5b] ss:$2 sm:$0xff]  ;;  %v7999_v10 = vsel %vm7845_vm6, %v7768_v59, %v7922_v18  ;;  %v7769_v42 = vadd.f32 %v23575_v40, %v7685_v50  ;;  %v18766_v30 = vadd.f32 %v7286_v49, %v22888_v46  ;;  %v17660_v0 = vpop.f32.mrb[35].mxu0  ;;  %17818 = vmatmul.mubr.msk.f32.gmra.mrb[140].mxu0 %vm45_vm1, %v6892_v19 }
 0x7a0   :  { %v8197_v16 = vmax.f32 %v8193_v15, %v8195_v2  ;;  %8077 = vst.msk [vmem:[#allocation6 + $0x78] sm:$0xff] %vm8061_vm3, %v7999_v10  ;;  %17820 = vmatprep.mubr.msk.f32.mxu0 %vm20418_vm2, %v20417_v1 }
 0x7a1   :  { %vm7846_vm7 = vcmp.gt.f32.partialorder %v7769_v42, 0.0  ;;  %v7923_v55 = vmul.f32 0.01, %v7769_v42  ;;  %v7686_v29 = vmul.f32 %v18766_v30, %v23568_v24 }
 0x7a2   :  { %v7291_v52 = vpop.f32.mrb[36].mxu0  ;;  %v8198_v21 = vmax.f32 %v8196_v22, %v8197_v16 }
 0x7a3   :  { %v8000_v34 = vsel %vm7846_vm7, %v7769_v42, %v7923_v55  ;;  %v7770_v46 = vadd.f32 %v23575_v40, %v7686_v29  ;;  %v18767_v5 = vadd.f32 %v7291_v52, %v22897_v56  ;;  %v17663_v14 = vpop.f32.mrb[37].mxu0  ;;  %17821 = vmatmul.mubr.msk.f32.gmra.mrb[142].mxu0 %vm45_vm1, %v6893_v12  ;;  %v6896_v42 = vld [vmem:[#allocation2 + $0x276] sm:$0xff] }
 0x7a4   :  { %8078 = vst.msk [vmem:[#allocation6 + $0x80] sm:$0xff] %vm8061_vm3, %v8000_v34  ;;  %17823 = vmatprep.mubr.msk.f32.mxu0 %vm20418_vm2, %v20417_v1  ;;  %8199 = vst.msk [vmem:[#allocation3 + $0x1f] sm:$0xff] %vm8061_vm3, %v8198_v21  ;;  %v6897_v14 = vld [vmem:[#allocation2 + $0x27e] sm:$0xff] }
 0x7a5   :  { %vm7847_vm8 = vcmp.gt.f32.partialorder %v7770_v46, 0.0  ;;  %v7924_v6 = vmul.f32 0.01, %v7770_v46  ;;  %v7687_v38 = vmul.f32 %v18767_v5, %v23568_v24 }
 0x7a6   :  { %v7296_v4 = vpop.f32.mrb[38].mxu0 }
 0x7a7   :  { %v8001_v59 = vsel %vm7847_vm8, %v7770_v46, %v7924_v6  ;;  %v7771_v41 = vadd.f32 %v23575_v40, %v7687_v38  ;;  %v18768_v56 = vadd.f32 %v7296_v4, %v22906_v3  ;;  %v17666_v51 = vpop.f32.mrb[39].mxu0  ;;  %17824 = vmatmul.mubr.msk.f32.gmra.mrb[144].mxu0 %vm45_vm1, %v6894_v63  ;;  %v8201_v10 = vld [vmem:[#allocation6 + $0x6c] ss:$2 sm:$0xff]  ;;  %v8203_v30 = vld [vmem:[#allocation6 + $0x6d] ss:$2 sm:$0xff] }
 0x7a8   :  { %8079 = vst.msk [vmem:[#allocation6 + $0x88] sm:$0xff] %vm8061_vm3, %v8001_v59  ;;  %17826 = vmatprep.mubr.msk.f32.mxu0 %vm20418_vm2, %v20417_v1  ;;  %v8208_v46 = vmax.f32 %v8201_v10, %v8203_v30  ;;  %v6898_v51 = vld [vmem:[#allocation2 + $0x286] sm:$0x3] }
 0x7a9   :  { %vm7848_vm9 = vcmp.gt.f32.partialorder %v7771_v41, 0.0  ;;  %v7925_v19 = vmul.f32 0.01, %v7771_v41  ;;  %v7688_v45 = vmul.f32 %v18768_v56, %v23568_v24 }
 0x7aa   :  { %v7301_v18 = vpop.f32.mrb[40].mxu0 }
 0x7ab   :  { %v8002_v50 = vsel %vm7848_vm9, %v7771_v41, %v7925_v19  ;;  %v7772_v49 = vadd.f32 %v23575_v40, %v7688_v45  ;;  %v18769_v15 = vadd.f32 %v7301_v18, %v22917_v17  ;;  %v17669_v3 = vpop.f32.mrb[41].mxu0  ;;  %17827 = vmatmul.mubr.msk.f32.gmra.mrb[146].mxu0 %vm45_vm1, %v6895_v26  ;;  %v8383_v2 = vld [vmem:[#allocation3 + $0x19] sm:$0xff]  ;;  %v8384_v34 = vld [vmem:[#allocation3 + $0x21] sm:$0xff] }
 0x7ac   :  { %8080 = vst.msk [vmem:[#allocation6 + $0x90] sm:$0xff] %vm8061_vm3, %v8002_v50  ;;  %17850 = vmatmul.mubr.msk.f32.gmra.mrb[160].mxu1 %vm8061_vm3, %v8383_v2  ;;  %17829 = vmatprep.mubr.msk.f32.mxu0 %vm20418_vm2, %v20417_v1 }
 0x7ad   :  { %vm7849_vm10 = vcmp.gt.f32.partialorder %v7772_v49, 0.0  ;;  %v7926_v0 = vmul.f32 0.01, %v7772_v49  ;;  %v7689_v22 = vmul.f32 %v18769_v15, %v23568_v24  ;;  %17852 = vmatprep.mubr.msk.f32.mxu1 %vm20418_vm2, %v20417_v1 }
 0x7ae   :  { %v7306_v17 = vpop.f32.mrb[42].mxu0 }
 0x7af   :  { %v8205_v16 = vld [vmem:[#allocation6 + $0x7e] ss:$2 sm:$0xff]  ;;  %v8207_v12 = vld [vmem:[#allocation6 + $0x7f] ss:$2 sm:$0xff]  ;;  %v8003_v55 = vsel %vm7849_vm10, %v7772_v49, %v7926_v0  ;;  %v7773_v29 = vadd.f32 %v23575_v40, %v7689_v22  ;;  %v18770_v52 = vadd.f32 %v7306_v17, %v22926_v53  ;;  %v17672_v21 = vpop.f32.mrb[43].mxu0  ;;  %17830 = vmatmul.mubr.msk.f32.gmra.mrb[148].mxu0 %vm45_vm1, %v6896_v42 }
 0x7b0   :  { %v8209_v5 = vmax.f32 %v8205_v16, %v8207_v12  ;;  %8081 = vst.msk [vmem:[#allocation6 + $0x98] sm:$0xff] %vm8061_vm3, %v8003_v55  ;;  %17853 = vmatmul.mubr.msk.f32.gmra.mrb[162].mxu1 %vm8061_vm3, %v8384_v34  ;;  %17832 = vmatprep.mubr.msk.f32.mxu0 %vm20418_vm2, %v20417_v1 }
 0x7b1   :  { %vm7850_vm11 = vcmp.gt.f32.partialorder %v7773_v29, 0.0  ;;  %v7927_v63 = vmul.f32 0.01, %v7773_v29  ;;  %v7690_v6 = vmul.f32 %v18770_v52, %v23568_v24  ;;  %17855 = vmatprep.mubr.msk.f32.mxu1 %vm20418_vm2, %v20417_v1 }
 0x7b2   :  { %v7311_v53 = vpop.f32.mrb[44].mxu0  ;;  %v8210_v38 = vmax.f32 %v8208_v46, %v8209_v5 }
 0x7b3   :  { %v8004_v4 = vsel %vm7850_vm11, %v7773_v29, %v7927_v63  ;;  %v7774_v59 = vadd.f32 %v23575_v40, %v7690_v6  ;;  %v18771_v41 = vadd.f32 %v7311_v53, %v22935_v37  ;;  %v17675_v56 = vpop.f32.mrb[45].mxu0  ;;  %17833 = vmatmul.mubr.msk.f32.gmra.mrb[150].mxu0 %vm45_vm1, %v6897_v14 }
 0x7b4   :  { %8082 = vst.msk [vmem:[#allocation6 + $0xa0] sm:$0xff] %vm8061_vm3, %v8004_v4  ;;  %17835 = vmatprep.mubr.msk.f32.mxu0 %vm20418_vm2, %v20417_v1  ;;  %8211 = vst.msk [vmem:[#allocation3 + $0x29] sm:$0xff] %vm8061_vm3, %v8210_v38 }
 0x7b5   :  { %vm7851_vm12 = vcmp.gt.f32.partialorder %v7774_v59, 0.0  ;;  %v7928_v26 = vmul.f32 0.01, %v7774_v59  ;;  %v7691_v19 = vmul.f32 %v18771_v41, %v23568_v24 }
 0x7b6   :  { %v7316_v45 = vpop.f32.mrb[46].mxu0 }
 0x7b7   :  { %v8005_v18 = vsel %vm7851_vm12, %v7774_v59, %v7928_v26  ;;  %v7775_v50 = vadd.f32 %v23575_v40, %v7691_v19  ;;  %v18772_v37 = vadd.f32 %v7316_v45, %v22944_v8  ;;  %v17678_v49 = vpop.f32.mrb[47].mxu0  ;;  %17836 = vmatmul.mubr.msk.f32.gmra.mrb[152].mxu0 %vm45_vm1, %v6898_v51  ;;  %v8213_v52 = vld [vmem:[#allocation6 + $0x90] ss:$2 sm:$0xff]  ;;  %v8215_v21 = vld [vmem:[#allocation6 + $0x91] ss:$2 sm:$0xff] }
 0x7b8   :  { %8083 = vst.msk [vmem:[#allocation6 + $0xa8] sm:$0xff] %vm8061_vm3, %v8005_v18  ;;  %v8220_v59 = vmax.f32 %v8213_v52, %v8215_v21 }
 0x7b9   :  { %vm7852_vm13 = vcmp.gt.f32.partialorder %v7775_v50, 0.0  ;;  %v7929_v15 = vmul.f32 0.01, %v7775_v50  ;;  %v7692_v3 = vmul.f32 %v18772_v37, %v23568_v24 }
 0x7ba   :  { %v7321_v2 = vpop.f32.mrb[48].mxu0 }
 0x7bb   :  { %v8006_v10 = vsel %vm7852_vm13, %v7775_v50, %v7929_v15  ;;  %v7776_v42 = vadd.f32 %v23575_v40, %v7692_v3  ;;  %v18773_v30 = vadd.f32 %v7321_v2, %v22953_v54  ;;  %v17681_v0 = vpop.f32.mrb[49].mxu0  ;;  %v8385_v22 = vld [vmem:[#allocation3 + $0x29] sm:$0xff] }
 0x7bc   :  { %8084 = vst.msk [vmem:[#allocation6 + $0xb0] sm:$0xff] %vm8061_vm3, %v8006_v10  ;;  %17856 = vmatmul.mubr.msk.f32.gmra.mrb[164].mxu1 %vm8061_vm3, %v8385_v22 }
 0x7bd   :  { %vm7853_vm14 = vcmp.gt.f32.partialorder %v7776_v42, 0.0  ;;  %v7930_v8 = vmul.f32 0.01, %v7776_v42  ;;  %v7693_v17 = vmul.f32 %v18773_v30, %v23568_v24  ;;  %17858 = vmatprep.mubr.msk.f32.mxu1 %vm20418_vm2, %v20417_v1 }
 0x7be   :  { %v7326_v16 = vpop.f32.mrb[50].mxu0 }
 0x7bf   :  { %v8007_v12 = vsel %vm7853_vm14, %v7776_v42, %v7930_v8  ;;  %v7777_v55 = vadd.f32 %v23575_v40, %v7693_v17  ;;  %v18774_v29 = vadd.f32 %v7326_v16, %v22959_v20  ;;  %v17684_v54 = vpop.f32.mrb[51].mxu0 }
 0x7c0   :  { %8085 = vst.msk [vmem:[#allocation6 + $0xb8] sm:$0xff] %vm8061_vm3, %v8007_v12 }
 0x7c1   :  { %vm7854_vm1 = vcmp.gt.f32.partialorder %v7777_v55, 0.0  ;;  %v7931_v34 = vmul.f32 0.01, %v7777_v55  ;;  %v7694_v46 = vmul.f32 %v18774_v29, %v23568_v24 }
 0x7c2   :  { %v7331_v5 = vpop.f32.mrb[52].mxu0 }
 0x7c3   :  { %v8217_v14 = vld [vmem:[#allocation6 + $0xa2] ss:$2 sm:$0xff]  ;;  %v8219_v63 = vld [vmem:[#allocation6 + $0xa3] ss:$2 sm:$0xff]  ;;  %v8008_v6 = vsel %vm7854_vm1, %v7777_v55, %v7931_v34  ;;  %v7778_v53 = vadd.f32 %v23575_v40, %v7694_v46  ;;  %v18775_v38 = vadd.f32 %v7331_v5, %v22965_v13  ;;  %v17687_v4 = vpop.f32.mrb[53].mxu0 }
 0x7c4   :  { %v8221_v20 = vmax.f32 %v8217_v14, %v8219_v63  ;;  %8086 = vst.msk [vmem:[#allocation6 + $0xc0] sm:$0xff] %vm8061_vm3, %v8008_v6  ;;  %v8379_v13 = vld [vmem:[%s25104_s2] sm:$0xff] }
 0x7c5   :  { %vm7855_vm15 = vcmp.gt.f32.partialorder %v7778_v53, 0.0  ;;  %v7932_v41 = vmul.f32 0.01, %v7778_v53  ;;  %v7695_v56 = vmul.f32 %v18775_v38, %v23568_v24  ;;  %17910 = vmatpush3.msra.mxu1 %v8379_v13 }
 0x7c6   :  { %v7336_v51 = vpop.f32.mrb[54].mxu0  ;;  %v8222_v26 = vmax.f32 %v8220_v59, %v8221_v20  ;;  %17980 = vmatprep.subr.mxu1 %v20417_v1 }
 0x7c7   :  { %v8009_v19 = vsel %vm7855_vm15, %v7778_v53, %v7932_v41  ;;  %v7779_v45 = vadd.f32 %v23575_v40, %v7695_v56  ;;  %v18776_v18 = vadd.f32 %v7336_v51, %v22971_v32  ;;  %v17690_v50 = vpop.f32.mrb[55].mxu0 }
 0x7c8   :  { %8087 = vst.msk [vmem:[#allocation6 + $0xc8] sm:$0xff] %vm8061_vm3, %v8009_v19  ;;  %8223 = vst.msk [vmem:[#allocation3 + $0x33] sm:$0xff] %vm8061_vm3, %v8222_v26 }
 0x7c9   :  { %vm7856_vm0 = vcmp.gt.f32.partialorder %v7779_v45, 0.0  ;;  %v7933_v37 = vmul.f32 0.01, %v7779_v45  ;;  %v7696_v49 = vmul.f32 %v18776_v18, %v23568_v24 }
 0x7ca   :  { %v7341_v15 = vpop.f32.mrb[56].mxu0 }
 0x7cb   :  { %v8010_v3 = vsel %vm7856_vm0, %v7779_v45, %v7933_v37  ;;  %v7780_v32 = vadd.f32 %v23575_v40, %v7696_v49  ;;  %v18777_v2 = vadd.f32 %v7341_v15, %v22977_v39  ;;  %v17693_v10 = vpop.f32.mrb[57].mxu0  ;;  %v8225_v55 = vld [vmem:[#allocation6 + $0xb4] ss:$2 sm:$0xff]  ;;  %v8227_v39 = vld [vmem:[#allocation6 + $0xb5] ss:$2 sm:$0xff] }
 0x7cc   :  { %8088 = vst.msk [vmem:[#allocation6 + $0xd0] sm:$0xff] %vm8061_vm3, %v8010_v3  ;;  %v8232_v63 = vmax.f32 %v8225_v55, %v8227_v39 }
 0x7cd   :  { %vm7857_vm4 = vcmp.gt.f32.partialorder %v7780_v32, 0.0  ;;  %v7934_v42 = vmul.f32 0.01, %v7780_v32  ;;  %v7697_v30 = vmul.f32 %v18777_v2, %v23568_v24 }
 0x7ce   :  { %v7346_v0 = vpop.f32.mrb[58].mxu0 }
 0x7cf   :  { %v8011_v22 = vsel %vm7857_vm4, %v7780_v32, %v7934_v42  ;;  %v7781_v8 = vadd.f32 %v23575_v40, %v7697_v30  ;;  %v18778_v17 = vadd.f32 %v7346_v0, %v22983_v44  ;;  %v17696_v16 = vpop.f32.mrb[59].mxu0  ;;  %v8386_v12 = vld [vmem:[#allocation3 + $0x31] sm:$0xff] }
 0x7d0   :  { %8089 = vst.msk [vmem:[#allocation6 + $0xd8] sm:$0xff] %vm8061_vm3, %v8011_v22  ;;  %17859 = vmatmul.mubr.msk.f32.gmra.mrb[166].mxu1 %vm8061_vm3, %v8386_v12 }
 0x7d1   :  { %vm7858_vm5 = vcmp.gt.f32.partialorder %v7781_v8, 0.0  ;;  %v7935_v29 = vmul.f32 0.01, %v7781_v8  ;;  %v7698_v54 = vmul.f32 %v18778_v17, %v23568_v24  ;;  %17861 = vmatprep.mubr.msk.f32.mxu1 %vm20418_vm2, %v20417_v1 }
 0x7d2   :  { %v7351_v52 = vpop.f32.mrb[60].mxu0 }
 0x7d3   :  { %v8229_v21 = vld [vmem:[#allocation6 + $0xc6] ss:$2 sm:$0xff]  ;;  %v8231_v34 = vld [vmem:[#allocation6 + $0xc7] ss:$2 sm:$0xff]  ;;  %v8012_v46 = vsel %vm7858_vm5, %v7781_v8, %v7935_v29  ;;  %v7782_v44 = vadd.f32 %v23575_v40, %v7698_v54  ;;  %v18779_v5 = vadd.f32 %v7351_v52, %v22989_v9  ;;  %v17699_v14 = vpop.f32.mrb[61].mxu0 }
 0x7d4   :  { %v8233_v6 = vmax.f32 %v8229_v21, %v8231_v34  ;;  %8090 = vst.msk [vmem:[#allocation6 + $0xe0] sm:$0xff] %vm8061_vm3, %v8012_v46 }
 0x7d5   :  { %vm7859_vm6 = vcmp.gt.f32.partialorder %v7782_v44, 0.0  ;;  %v7936_v53 = vmul.f32 0.01, %v7782_v44  ;;  %v7699_v38 = vmul.f32 %v18779_v5, %v23568_v24 }
 0x7d6   :  { %v7356_v4 = vpop.f32.mrb[62].mxu0  ;;  %v8234_v59 = vmax.f32 %v8232_v63, %v8233_v6 }
 0x7d7   :  { %v8013_v20 = vsel %vm7859_vm6, %v7782_v44, %v7936_v53  ;;  %v7783_v41 = vadd.f32 %v23575_v40, %v7699_v38  ;;  %v18780_v56 = vadd.f32 %v7356_v4, %v22995_v25  ;;  %v17702_v51 = vpop.f32.mrb[63].mxu0 }
 0x7d8   :  { %8091 = vst.msk [vmem:[#allocation6 + $0xe8] sm:$0xff] %vm8061_vm3, %v8013_v20  ;;  %8235 = vst.msk [vmem:[#allocation3 + $0x3d] sm:$0xff] %vm8061_vm3, %v8234_v59 }
 0x7d9   :  { %vm7860_vm7 = vcmp.gt.f32.partialorder %v7783_v41, 0.0  ;;  %v7937_v9 = vmul.f32 0.01, %v7783_v41  ;;  %v7700_v26 = vmul.f32 %v18780_v56, %v23568_v24 }
 0x7da   :  { %v7361_v19 = vpop.f32.mrb[64].mxu0 }
 0x7db   :  { %v8014_v45 = vsel %vm7860_vm7, %v7783_v41, %v7937_v9  ;;  %v7784_v18 = vadd.f32 %v23575_v40, %v7700_v26  ;;  %v18781_v50 = vadd.f32 %v7361_v19, %v23001_v11  ;;  %v17705_v13 = vpop.f32.mrb[65].mxu0  ;;  %v8237_v17 = vld [vmem:[#allocation6 + $0xd8] ss:$2 sm:$0xff]  ;;  %v8239_v16 = vld [vmem:[#allocation6 + $0xd9] ss:$2 sm:$0xff] }
 0x7dc   :  { %8092 = vst.msk [vmem:[#allocation6 + $0xf0] sm:$0xff] %vm8061_vm3, %v8014_v45  ;;  %v8244_v44 = vmax.f32 %v8237_v17, %v8239_v16 }
 0x7dd   :  { %vm7861_vm8 = vcmp.gt.f32.partialorder %v7784_v18, 0.0  ;;  %v7938_v25 = vmul.f32 0.01, %v7784_v18  ;;  %v7701_v37 = vmul.f32 %v18781_v50, %v23568_v24 }
 0x7de   :  { %v7366_v49 = vpop.f32.mrb[66].mxu0 }
 0x7df   :  { %v8015_v15 = vsel %vm7861_vm8, %v7784_v18, %v7938_v25  ;;  %v7785_v3 = vadd.f32 %v23575_v40, %v7701_v37  ;;  %v18782_v32 = vadd.f32 %v7366_v49, %v23007_v23  ;;  %v17708_v2 = vpop.f32.mrb[67].mxu0  ;;  %v8387_v10 = vld [vmem:[#allocation3 + $0x39] sm:$0xff]  ;;  %v23828_v37 = vld [vmem:[%s25107_s5] ss:$0 sm:$0xff] }
 0x7e0   :  { %8093 = vst.msk [vmem:[#allocation6 + $0xf8] sm:$0xff] %vm8061_vm3, %v8015_v15  ;;  %17862 = vmatmul.mubr.msk.f32.gmra.mrb[168].mxu1 %vm8061_vm3, %v8387_v10 }
 0x7e1   :  { %vm7862_vm9 = vcmp.gt.f32.partialorder %v7785_v3, 0.0  ;;  %v7939_v11 = vmul.f32 0.01, %v7785_v3  ;;  %v7702_v42 = vmul.f32 %v18782_v32, %v23568_v24  ;;  %17864 = vmatprep.mubr.msk.f32.mxu1 %vm20418_vm2, %v20417_v1 }
 0x7e2   :  { %v7371_v30 = vpop.f32.mrb[68].mxu0 }
 0x7e3   :  { %v8016_v0 = vsel %vm7862_vm9, %v7785_v3, %v7939_v11  ;;  %v7786_v22 = vadd.f32 %v23575_v40, %v7702_v42  ;;  %v18783_v8 = vadd.f32 %v7371_v30, %v23012_v31  ;;  %v17711_v23 = vpop.f32.mrb[69].mxu0  ;;  %v23835_v3 = vld [vmem:[%s25111_s9] ss:$0 sm:$0xff] }
 0x7e4   :  { %8094 = vst.msk [vmem:[#allocation6 + $0x100] sm:$0xff] %vm8061_vm3, %v8016_v0 }
 0x7e5   :  { %vm7863_vm10 = vcmp.gt.f32.partialorder %v7786_v22, 0.0  ;;  %v7940_v12 = vmul.f32 0.01, %v7786_v22  ;;  %v7703_v55 = vmul.f32 %v18783_v8, %v23568_v24 }
 0x7e6   :  { %v7376_v39 = vpop.f32.mrb[70].mxu0 }
 0x7e7   :  { %v8241_v29 = vld [vmem:[#allocation6 + $0xea] ss:$2 sm:$0xff]  ;;  %v8243_v54 = vld [vmem:[#allocation6 + $0xeb] ss:$2 sm:$0xff]  ;;  %v8017_v52 = vsel %vm7863_vm10, %v7786_v22, %v7940_v12  ;;  %v7787_v21 = vadd.f32 %v23575_v40, %v7703_v55  ;;  %v18784_v34 = vadd.f32 %v7376_v39, %v23017_v35  ;;  %v17714_v46 = vpop.f32.mrb[71].mxu0 }
 0x7e8   :  { %v8245_v31 = vmax.f32 %v8241_v29, %v8243_v54  ;;  %8095 = vst.msk [vmem:[#allocation6 + $0x108] sm:$0xff] %vm8061_vm3, %v8017_v52  ;;  %v8391_v29 = vld [vmem:[#allocation3 + $0x59] sm:$0xff] }
 0x7e9   :  { %vm7864_vm11 = vcmp.gt.f32.partialorder %v7787_v21, 0.0  ;;  %v7941_v5 = vmul.f32 0.01, %v7787_v21  ;;  %v7704_v14 = vmul.f32 %v18784_v34, %v23568_v24 }
 0x7ea   :  { %v7381_v63 = vpop.f32.mrb[72].mxu0  ;;  %v8246_v6 = vmax.f32 %v8244_v44, %v8245_v31  ;;  %v8392_v31 = vld [vmem:[#allocation3 + $0x61] sm:$0xff] }
 0x7eb   :  { %v8018_v53 = vsel %vm7864_vm11, %v7787_v21, %v7941_v5  ;;  %v7788_v38 = vadd.f32 %v23575_v40, %v7704_v14  ;;  %v17717_v4 = vpop.f32.mrb[73].mxu0 }
 0x7ec   :  { %8096 = vst.msk [vmem:[#allocation6 + $0x110] sm:$0xff] %vm8061_vm3, %v8018_v53  ;;  %8247 = vst.msk [vmem:[#allocation3 + $0x47] sm:$0xff] %vm8061_vm3, %v8246_v6 }
 0x7ed   :  { %vm7865_vm12 = vcmp.gt.f32.partialorder %v7788_v38, 0.0  ;;  %v7942_v35 = vmul.f32 0.01, %v7788_v38 }
 0x7ee   :  { %v7386_v59 = vpop.f32.mrb[74].mxu0 }
 0x7ef   :  { %v8019_v20 = vsel %vm7865_vm12, %v7788_v38, %v7942_v35  ;;  %v17720_v41 = vpop.f32.mrb[75].mxu0  ;;  %v8249_v9 = vld [vmem:[#allocation6 + $0xfc] ss:$2 sm:$0xff]  ;;  %v8251_v26 = vld [vmem:[#allocation6 + $0xfd] ss:$2 sm:$0xff] }
 0x7f0   :  { %8097 = vst.msk [vmem:[#allocation6 + $0x118] sm:$0xff] %vm8061_vm3, %v8019_v20  ;;  %v8256_v13 = vmax.f32 %v8249_v9, %v8251_v26 }
 0x7f2   :  { %v7391_v56 = vpop.f32.mrb[76].mxu0 }
 0x7f3   :  { %v17723_v51 = vpop.f32.mrb[77].mxu0  ;;  %v8388_v24 = vld [vmem:[#allocation3 + $0x41] sm:$0xff]  ;;  %v8389_v50 = vld [vmem:[#allocation3 + $0x49] sm:$0xff] }
 0x7f4   :  { %17865 = vmatmul.mubr.msk.f32.gmra.mrb[170].mxu1 %vm8061_vm3, %v8388_v24 }
 0x7f5   :  { %17867 = vmatprep.mubr.msk.f32.mxu1 %vm20418_vm2, %v20417_v1 }
 0x7f6   :  { %v7396_v40 = vpop.f32.mrb[78].mxu0 }
 0x7f7   :  { %v8253_v19 = vld [vmem:[#allocation6 + $0x10e] ss:$2 sm:$0xff]  ;;  %v8255_v45 = vld [vmem:[#allocation6 + $0x10f] ss:$2 sm:$0xff]  ;;  %v17726_v18 = vpop.f32.mrb[79].mxu0 }
 0x7f8   :  { %v8257_v25 = vmax.f32 %v8253_v19, %v8255_v45  ;;  %17868 = vmatmul.mubr.msk.f32.gmra.mrb[172].mxu1 %vm8061_vm3, %v8389_v50 }
 0x7f9   :  { %17870 = vmatprep.mubr.msk.f32.mxu1 %vm20418_vm2, %v20417_v1 }
 0x7fa   :  { %v7401_v49 = vpop.f32.mrb[80].mxu0  ;;  %v8258_v15 = vmax.f32 %v8256_v13, %v8257_v25 }
 0x7fb   :  { %v18789_v32 = vadd.f32 %v7401_v49, %v23038_v58  ;;  %v17729_v2 = vpop.f32.mrb[81].mxu0 }
 0x7fc   :  { %8259 = vst.msk [vmem:[#allocation3 + $0x51] sm:$0xff] %vm8061_vm3, %v8258_v15 }
 0x7fd   :  { %v7709_v10 = vmul.f32 %v23828_v37, %v18789_v32 }
 0x7fe   :  { %v7406_v11 = vpop.f32.mrb[82].mxu0 }
 0x7ff   :  { %v7793_v42 = vadd.f32 %v23835_v3, %v7709_v10  ;;  %v18790_v30 = vadd.f32 %v7406_v11, %v23043_v60  ;;  %v17732_v0 = vpop.f32.mrb[83].mxu0 }
 0x801   :  { %vm7870_vm13 = vcmp.gt.f32.partialorder %v7793_v42, 0.0  ;;  %v7947_v22 = vmul.f32 0.01, %v7793_v42  ;;  %v7710_v8 = vmul.f32 %v23828_v37, %v18790_v30 }
 0x802   :  { %v7411_v23 = vpop.f32.mrb[84].mxu0 }
 0x803   :  { %v8024_v17 = vsel %vm7870_vm13, %v7793_v42, %v7947_v22  ;;  %v7794_v16 = vadd.f32 %v23835_v3, %v7710_v8  ;;  %v18791_v58 = vadd.f32 %v7411_v23, %v23048_v33  ;;  %v17735_v12 = vpop.f32.mrb[85].mxu0  ;;  %v8390_v55 = vld [vmem:[#allocation3 + $0x51] sm:$0xff] }
 0x804   :  { %8102 = vst.msk [vmem:[#allocation6 + $0x140] sm:$0xff] %vm8061_vm3, %v8024_v17  ;;  %17871 = vmatmul.mubr.msk.f32.gmra.mrb[174].mxu1 %vm8061_vm3, %v8390_v55 }
 0x805   :  { %vm7871_vm14 = vcmp.gt.f32.partialorder %v7794_v16, 0.0  ;;  %v7948_v39 = vmul.f32 0.01, %v7794_v16  ;;  %v7711_v60 = vmul.f32 %v23828_v37, %v18791_v58  ;;  %17873 = vmatprep.mubr.msk.f32.mxu1 %vm20418_vm2, %v20417_v1 }
 0x806   :  { %v7416_v54 = vpop.f32.mrb[86].mxu0 }
 0x807   :  { %v8025_v52 = vsel %vm7871_vm14, %v7794_v16, %v7948_v39  ;;  %v7795_v21 = vadd.f32 %v23835_v3, %v7711_v60  ;;  %v18792_v33 = vadd.f32 %v7416_v54, %v23053_v27  ;;  %v17738_v34 = vpop.f32.mrb[87].mxu0 }
 0x808   :  { %8103 = vst.msk [vmem:[#allocation6 + $0x148] sm:$0xff] %vm8061_vm3, %v8025_v52  ;;  %17874 = vmatmul.mubr.msk.f32.gmra.mrb[176].mxu1 %vm8061_vm3, %v8391_v29 }
 0x809   :  { %vm7872_vm1 = vcmp.gt.f32.partialorder %v7795_v21, 0.0  ;;  %v7949_v46 = vmul.f32 0.01, %v7795_v21  ;;  %v7712_v44 = vmul.f32 %v23828_v37, %v18792_v33  ;;  %17876 = vmatprep.mubr.msk.f32.mxu1 %vm20418_vm2, %v20417_v1 }
 0x80a   :  { %v7421_v5 = vpop.f32.mrb[88].mxu0 }
 0x80b   :  { %v8026_v14 = vsel %vm7872_vm1, %v7795_v21, %v7949_v46  ;;  %v7796_v63 = vadd.f32 %v23835_v3, %v7712_v44  ;;  %v18793_v6 = vadd.f32 %v7421_v5, %v23058_v62  ;;  %v17741_v27 = vpop.f32.mrb[89].mxu0 }
 0x80c   :  { %8104 = vst.msk [vmem:[#allocation6 + $0x150] sm:$0xff] %vm8061_vm3, %v8026_v14  ;;  %17877 = vmatmul.mubr.msk.f32.gmra.mrb[178].mxu1 %vm8061_vm3, %v8392_v31 }
 0x80d   :  { %vm7873_vm15 = vcmp.gt.f32.partialorder %v7796_v63, 0.0  ;;  %v7950_v53 = vmul.f32 0.01, %v7796_v63  ;;  %v7713_v38 = vmul.f32 %v23828_v37, %v18793_v6  ;;  %17879 = vmatprep.mubr.msk.f32.mxu1 %vm20418_vm2, %v20417_v1 }
 0x80e   :  { %v7426_v4 = vpop.f32.mrb[90].mxu0 }
 0x80f   :  { %v8027_v35 = vsel %vm7873_vm15, %v7796_v63, %v7950_v53  ;;  %v7797_v59 = vadd.f32 %v23835_v3, %v7713_v38  ;;  %v18794_v20 = vadd.f32 %v7426_v4, %v23063_v47  ;;  %v17744_v41 = vpop.f32.mrb[91].mxu0 }
 0x810   :  { %8105 = vst.msk [vmem:[#allocation6 + $0x158] sm:$0xff] %vm8061_vm3, %v8027_v35 }
 0x811   :  { %vm7874_vm0 = vcmp.gt.f32.partialorder %v7797_v59, 0.0  ;;  %v7951_v62 = vmul.f32 0.01, %v7797_v59  ;;  %v7714_v56 = vmul.f32 %v23828_v37, %v18794_v20 }
 0x812   :  { %v7431_v51 = vpop.f32.mrb[92].mxu0 }
 0x813   :  { %v8028_v24 = vsel %vm7874_vm0, %v7797_v59, %v7951_v62  ;;  %v7798_v9 = vadd.f32 %v23835_v3, %v7714_v56  ;;  %v18795_v26 = vadd.f32 %v7431_v51, %v23068_v61  ;;  %v17747_v40 = vpop.f32.mrb[93].mxu0  ;;  %v8261_v49 = vld [vmem:[#allocation6 + $0x144] ss:$2 sm:$0xff]  ;;  %v8263_v15 = vld [vmem:[#allocation6 + $0x145] ss:$2 sm:$0xff] }
 0x814   :  { %8106 = vst.msk [vmem:[#allocation6 + $0x160] sm:$0xff] %vm8061_vm3, %v8028_v24  ;;  %v8268_v8 = vmax.f32 %v8261_v49, %v8263_v15  ;;  %v25185_v40 = vld [vmem:[#allocation13_spill] sm:$0xff] }
 0x815   :  { %vm7875_vm4 = vcmp.gt.f32.partialorder %v7798_v9, 0.0  ;;  %v7952_v19 = vmul.f32 0.01, %v7798_v9  ;;  %v7715_v47 = vmul.f32 %v23828_v37, %v18795_v26 }
 0x816   :  { %v7436_v45 = vpop.f32.mrb[94].mxu0 }
 0x817   :  { %v8029_v18 = vsel %vm7875_vm4, %v7798_v9, %v7952_v19  ;;  %v7799_v50 = vadd.f32 %v23835_v3, %v7715_v47  ;;  %v18796_v13 = vadd.f32 %v7436_v45, %v23073_v28  ;;  %v17750_v25 = vpop.f32.mrb[95].mxu0 }
 0x818   :  { %8107 = vst.msk [vmem:[#allocation6 + $0x168] sm:$0xff] %vm8061_vm3, %v8029_v18 }
 0x819   :  { %vm7876_vm5 = vcmp.gt.f32.partialorder %v7799_v50, 0.0  ;;  %v7953_v61 = vmul.f32 0.01, %v7799_v50  ;;  %v7716_v32 = vmul.f32 %v23828_v37, %v18796_v13 }
 0x81a   :  { %v7441_v2 = vpop.f32.mrb[96].mxu0 }
 0x81b   :  { %v8265_v10 = vld [vmem:[#allocation6 + $0x156] ss:$2 sm:$0xff]  ;;  %v8267_v11 = vld [vmem:[#allocation6 + $0x157] ss:$2 sm:$0xff]  ;;  %v8030_v42 = vsel %vm7876_vm5, %v7799_v50, %v7953_v61  ;;  %v7800_v30 = vadd.f32 %v23835_v3, %v7716_v32  ;;  %v18797_v0 = vadd.f32 %v7441_v2, %v23078_v36  ;;  %v17753_v22 = vpop.f32.mrb[97].mxu0 }
 0x81c   :  { %v8269_v28 = vmax.f32 %v8265_v10, %v8267_v11  ;;  %8108 = vst.msk [vmem:[#allocation6 + $0x170] sm:$0xff] %vm8061_vm3, %v8030_v42  ;;  %v25186_v32 = vld [vmem:[#allocation14_spill] sm:$0xff] }
 0x81d   :  { %vm7877_vm6 = vcmp.gt.f32.partialorder %v7800_v30, 0.0  ;;  %v7954_v23 = vmul.f32 0.01, %v7800_v30  ;;  %v7717_v17 = vmul.f32 %v23828_v37, %v18797_v0 }
 0x81e   :  { %v7446_v16 = vpop.f32.mrb[98].mxu0  ;;  %v8270_v58 = vmax.f32 %v8268_v8, %v8269_v28  ;;  %v25187_v8 = vld [vmem:[#allocation15_spill] sm:$0xff] }
 0x81f   :  { %v8031_v12 = vsel %vm7877_vm6, %v7800_v30, %v7954_v23  ;;  %v7801_v55 = vadd.f32 %v23835_v3, %v7717_v17  ;;  %v18798_v39 = vadd.f32 %v7446_v16, %v23083_v48  ;;  %v17756_v60 = vpop.f32.mrb[99].mxu0 }
 0x820   :  { %8109 = vst.msk [vmem:[#allocation6 + $0x178] sm:$0xff] %vm8061_vm3, %v8031_v12  ;;  %8271 = vst.msk [vmem:[#allocation3 + $0x6f] sm:$0xff] %vm8061_vm3, %v8270_v58 }
 0x821   :  { %vm7878_vm7 = vcmp.gt.f32.partialorder %v7801_v55, 0.0  ;;  %v7955_v36 = vmul.f32 0.01, %v7801_v55  ;;  %v7718_v29 = vmul.f32 %v23828_v37, %v18798_v39  ;;  %v25188_v39 = vld [vmem:[#allocation16_spill] sm:$0xff] }
 0x822   :  { %v7451_v54 = vpop.f32.mrb[100].mxu0 }
 0x823   :  { %v8032_v52 = vsel %vm7878_vm7, %v7801_v55, %v7955_v36  ;;  %v7802_v21 = vadd.f32 %v23835_v3, %v7718_v29  ;;  %v18799_v33 = vadd.f32 %v7451_v54, %v23088_v7  ;;  %v17759_v34 = vpop.f32.mrb[101].mxu0  ;;  %v8273_v20 = vld [vmem:[#allocation6 + $0x168] ss:$2 sm:$0xff]  ;;  %v8275_v41 = vld [vmem:[#allocation6 + $0x169] ss:$2 sm:$0xff] }
 0x824   :  { %8110 = vst.msk [vmem:[#allocation6 + $0x180] sm:$0xff] %vm8061_vm3, %v8032_v52  ;;  %v8280_v45 = vmax.f32 %v8273_v20, %v8275_v41 }
 0x825   :  { %vm7879_vm8 = vcmp.gt.f32.partialorder %v7802_v21, 0.0  ;;  %v7956_v48 = vmul.f32 0.01, %v7802_v21  ;;  %v7719_v46 = vmul.f32 %v23828_v37, %v18799_v33 }
 0x826   :  { %v7456_v44 = vpop.f32.mrb[102].mxu0 }
 0x827   :  { %v8033_v31 = vsel %vm7879_vm8, %v7802_v21, %v7956_v48  ;;  %v7803_v5 = vadd.f32 %v23835_v3, %v7719_v46  ;;  %v18800_v14 = vadd.f32 %v7456_v44, %v23093_v57  ;;  %v17762_v63 = vpop.f32.mrb[103].mxu0  ;;  %v8393_v6 = vld [vmem:[#allocation3 + $0x69] sm:$0xff]  ;;  %v8394_v59 = vld [vmem:[#allocation3 + $0x71] sm:$0xff] }
 0x828   :  { %8111 = vst.msk [vmem:[#allocation6 + $0x188] sm:$0xff] %vm8061_vm3, %v8033_v31  ;;  %17880 = vmatmul.mubr.msk.f32.gmra.mrb[180].mxu1 %vm8061_vm3, %v8393_v6 }
 0x829   :  { %vm7880_vm9 = vcmp.gt.f32.partialorder %v7803_v5, 0.0  ;;  %v7957_v7 = vmul.f32 0.01, %v7803_v5  ;;  %v7720_v27 = vmul.f32 %v23828_v37, %v18800_v14  ;;  %17882 = vmatprep.mubr.msk.f32.mxu1 %vm20418_vm2, %v20417_v1 }
 0x82a   :  { %v7461_v53 = vpop.f32.mrb[104].mxu0 }
 0x82b   :  { %v8034_v38 = vsel %vm7880_vm9, %v7803_v5, %v7957_v7  ;;  %v7804_v4 = vadd.f32 %v23835_v3, %v7720_v27  ;;  %v18801_v35 = vadd.f32 %v7461_v53, %v23098_v43  ;;  %v17765_v57 = vpop.f32.mrb[105].mxu0  ;;  %v25189_v5 = vld [vmem:[#allocation17_spill] sm:$0xff] }
 0x82c   :  { %8112 = vst.msk [vmem:[#allocation6 + $0x190] sm:$0xff] %vm8061_vm3, %v8034_v38  ;;  %17883 = vmatmul.mubr.msk.f32.gmra.mrb[182].mxu1 %vm8061_vm3, %v8394_v59  ;;  %v25190_v59 = vld [vmem:[#allocation18_spill] sm:$0xff] }
 0x82d   :  { %vm7881_vm10 = vcmp.gt.f32.partialorder %v7804_v4, 0.0  ;;  %v7958_v62 = vmul.f32 0.01, %v7804_v4  ;;  %v7721_v56 = vmul.f32 %v23828_v37, %v18801_v35  ;;  %17885 = vmatprep.mubr.msk.f32.mxu1 %vm20418_vm2, %v20417_v1 }
 0x82e   :  { %v7466_v51 = vpop.f32.mrb[106].mxu0 }
 0x82f   :  { %v8277_v24 = vld [vmem:[#allocation6 + $0x17a] ss:$2 sm:$0xff]  ;;  %v8279_v9 = vld [vmem:[#allocation6 + $0x17b] ss:$2 sm:$0xff]  ;;  %v8035_v26 = vsel %vm7881_vm10, %v7804_v4, %v7958_v62  ;;  %v7805_v43 = vadd.f32 %v23835_v3, %v7721_v56  ;;  %v18802_v19 = vadd.f32 %v7466_v51, %v25185_v40  ;;  %v17768_v47 = vpop.f32.mrb[107].mxu0 }
 0x830   :  { %v8281_v18 = vmax.f32 %v8277_v24, %v8279_v9  ;;  %8113 = vst.msk [vmem:[#allocation6 + $0x198] sm:$0xff] %vm8061_vm3, %v8035_v26  ;;  %v25191_v26 = vld [vmem:[#allocation19_spill] sm:$0xff] }
 0x831   :  { %vm7882_vm11 = vcmp.gt.f32.partialorder %v7805_v43, 0.0  ;;  %v7959_v50 = vmul.f32 0.01, %v7805_v43  ;;  %v7722_v13 = vmul.f32 %v23828_v37, %v18802_v19 }
 0x832   :  { %v7471_v25 = vpop.f32.mrb[108].mxu0  ;;  %v8282_v49 = vmax.f32 %v8280_v45, %v8281_v18 }
 0x833   :  { %v8036_v15 = vsel %vm7882_vm11, %v7805_v43, %v7959_v50  ;;  %v7806_v61 = vadd.f32 %v23835_v3, %v7722_v13  ;;  %v18803_v2 = vadd.f32 %v7471_v25, %v25186_v32  ;;  %v17771_v10 = vpop.f32.mrb[109].mxu0  ;;  %v25192_v13 = vld [vmem:[#allocation20_spill] sm:$0xff] }
 0x834   :  { %8114 = vst.msk [vmem:[#allocation6 + $0x1a0] sm:$0xff] %vm8061_vm3, %v8036_v15  ;;  %8283 = vst.msk [vmem:[#allocation3 + $0x79] sm:$0xff] %vm8061_vm3, %v8282_v49 }
 0x835   :  { %vm7883_vm12 = vcmp.gt.f32.partialorder %v7806_v61, 0.0  ;;  %v7960_v11 = vmul.f32 0.01, %v7806_v61  ;;  %v7723_v42 = vmul.f32 %v23828_v37, %v18803_v2 }
 0x836   :  { %v7476_v30 = vpop.f32.mrb[110].mxu0 }
 0x837   :  { %v8037_v0 = vsel %vm7883_vm12, %v7806_v61, %v7960_v11  ;;  %v7807_v22 = vadd.f32 %v23835_v3, %v7723_v42  ;;  %v18804_v28 = vadd.f32 %v7476_v30, %v25187_v8  ;;  %v17774_v23 = vpop.f32.mrb[111].mxu0  ;;  %v8285_v54 = vld [vmem:[#allocation6 + $0x18c] ss:$2 sm:$0xff]  ;;  %v8287_v52 = vld [vmem:[#allocation6 + $0x18d] ss:$2 sm:$0xff] }
 0x838   :  { %8115 = vst.msk [vmem:[#allocation6 + $0x1a8] sm:$0xff] %vm8061_vm3, %v8037_v0  ;;  %v8292_v6 = vmax.f32 %v8285_v54, %v8287_v52  ;;  %v25193_v42 = vld [vmem:[#allocation21_spill] sm:$0xff] }
 0x839   :  { %vm7884_vm13 = vcmp.gt.f32.partialorder %v7807_v22, 0.0  ;;  %v7961_v17 = vmul.f32 0.01, %v7807_v22  ;;  %v7724_v16 = vmul.f32 %v23828_v37, %v18804_v28 }
 0x83a   :  { %v7481_v58 = vpop.f32.mrb[112].mxu0 }
 0x83b   :  { %v8038_v12 = vsel %vm7884_vm13, %v7807_v22, %v7961_v17  ;;  %v7808_v55 = vadd.f32 %v23835_v3, %v7724_v16  ;;  %v18805_v60 = vadd.f32 %v7481_v58, %v25188_v39  ;;  %v17777_v36 = vpop.f32.mrb[113].mxu0  ;;  %v8395_v29 = vld [vmem:[#allocation3 + $0x79] sm:$0xff] }
 0x83c   :  { %8116 = vst.msk [vmem:[#allocation6 + $0x1b0] sm:$0xff] %vm8061_vm3, %v8038_v12  ;;  %17886 = vmatmul.mubr.msk.f32.gmra.mrb[184].mxu1 %vm8061_vm3, %v8395_v29  ;;  %v25194_v39 = vld [vmem:[#allocation22_spill] sm:$0xff] }
 0x83d   :  { %vm7885_vm14 = vcmp.gt.f32.partialorder %v7808_v55, 0.0  ;;  %v7962_v21 = vmul.f32 0.01, %v7808_v55  ;;  %v7725_v33 = vmul.f32 %v23828_v37, %v18805_v60  ;;  %17888 = vmatprep.mubr.msk.f32.mxu1 %vm20418_vm2, %v20417_v1 }
 0x83e   :  { %v7486_v34 = vpop.f32.mrb[114].mxu0 }
 0x83f   :  { %v8289_v48 = vld [vmem:[#allocation6 + $0x19e] ss:$2 sm:$0xff]  ;;  %v8291_v46 = vld [vmem:[#allocation6 + $0x19f] ss:$2 sm:$0xff]  ;;  %v8039_v44 = vsel %vm7885_vm14, %v7808_v55, %v7962_v21  ;;  %v7809_v31 = vadd.f32 %v23835_v3, %v7725_v33  ;;  %v18806_v14 = vadd.f32 %v7486_v34, %v25189_v5  ;;  %v17780_v63 = vpop.f32.mrb[115].mxu0 }
 0x840   :  { %v8293_v7 = vmax.f32 %v8289_v48, %v8291_v46  ;;  %8117 = vst.msk [vmem:[#allocation6 + $0x1b8] sm:$0xff] %vm8061_vm3, %v8039_v44  ;;  %v25195_v44 = vld [vmem:[#allocation23_spill] sm:$0xff] }
 0x841   :  { %vm7886_vm1 = vcmp.gt.f32.partialorder %v7809_v31, 0.0  ;;  %v7963_v27 = vmul.f32 0.01, %v7809_v31  ;;  %v7726_v53 = vmul.f32 %v23828_v37, %v18806_v14 }
 0x842   :  { %v7491_v38 = vpop.f32.mrb[116].mxu0  ;;  %v8294_v4 = vmax.f32 %v8292_v6, %v8293_v7 }
 0x843   :  { %v8040_v35 = vsel %vm7886_vm1, %v7809_v31, %v7963_v27  ;;  %v7810_v57 = vadd.f32 %v23835_v3, %v7726_v53  ;;  %v18807_v20 = vadd.f32 %v7491_v38, %v25190_v59  ;;  %v17783_v41 = vpop.f32.mrb[117].mxu0  ;;  %v25196_v53 = vld [vmem:[#allocation24_spill] sm:$0xff] }
 0x844   :  { %8118 = vst.msk [vmem:[#allocation6 + $0x1c0] sm:$0xff] %vm8061_vm3, %v8040_v35  ;;  %8295 = vst.msk [vmem:[#allocation3 + $0x83] sm:$0xff] %vm8061_vm3, %v8294_v4 }
 0x845   :  { %vm7887_vm15 = vcmp.gt.f32.partialorder %v7810_v57, 0.0  ;;  %v7964_v62 = vmul.f32 0.01, %v7810_v57  ;;  %v7727_v56 = vmul.f32 %v23828_v37, %v18807_v20 }
 0x846   :  { %v7496_v51 = vpop.f32.mrb[118].mxu0 }
 0x847   :  { %v8041_v24 = vsel %vm7887_vm15, %v7810_v57, %v7964_v62  ;;  %v7811_v9 = vadd.f32 %v23835_v3, %v7727_v56  ;;  %v18808_v43 = vadd.f32 %v7496_v51, %v25191_v26  ;;  %v17786_v40 = vpop.f32.mrb[119].mxu0  ;;  %v8297_v22 = vld [vmem:[#allocation6 + $0x1b0] ss:$2 sm:$0xff]  ;;  %v8299_v8 = vld [vmem:[#allocation6 + $0x1b1] ss:$2 sm:$0xff] }
 0x848   :  { %8119 = vst.msk [vmem:[#allocation6 + $0x1c8] sm:$0xff] %vm8061_vm3, %v8041_v24  ;;  %v8304_v29 = vmax.f32 %v8297_v22, %v8299_v8  ;;  %v25197_v62 = vld [vmem:[#allocation25_spill] sm:$0xff] }
 0x849   :  { %vm7888_vm0 = vcmp.gt.f32.partialorder %v7811_v9, 0.0  ;;  %v7965_v19 = vmul.f32 0.01, %v7811_v9  ;;  %v7728_v47 = vmul.f32 %v23828_v37, %v18808_v43 }
 0x84a   :  { %v7501_v45 = vpop.f32.mrb[120].mxu0 }
 0x84b   :  { %v8042_v18 = vsel %vm7888_vm0, %v7811_v9, %v7965_v19  ;;  %v7812_v50 = vadd.f32 %v23835_v3, %v7728_v47  ;;  %v18809_v25 = vadd.f32 %v7501_v45, %v25192_v13  ;;  %v17789_v49 = vpop.f32.mrb[121].mxu0  ;;  %v8396_v15 = vld [vmem:[#allocation3 + $0x81] sm:$0xff]  ;;  %v25198_v13 = vld [vmem:[#allocation26_spill] sm:$0xff] }
 0x84c   :  { %8120 = vst.msk [vmem:[#allocation6 + $0x1d0] sm:$0xff] %vm8061_vm3, %v8042_v18  ;;  %17889 = vmatmul.mubr.msk.f32.gmra.mrb[186].mxu1 %vm8061_vm3, %v8396_v15 }
 0x84d   :  { %vm7889_vm4 = vcmp.gt.f32.partialorder %v7812_v50, 0.0  ;;  %v7966_v61 = vmul.f32 0.01, %v7812_v50  ;;  %v7729_v32 = vmul.f32 %v23828_v37, %v18809_v25  ;;  %17891 = vmatprep.mubr.msk.f32.mxu1 %vm20418_vm2, %v20417_v1 }
 0x84e   :  { %v7506_v2 = vpop.f32.mrb[122].mxu0 }
 0x84f   :  { %v8043_v10 = vsel %vm7889_vm4, %v7812_v50, %v7966_v61  ;;  %v7813_v11 = vadd.f32 %v23835_v3, %v7729_v32  ;;  %v18810_v30 = vadd.f32 %v7506_v2, %v25193_v42  ;;  %v17792_v0 = vpop.f32.mrb[123].mxu0 }
 0x850   :  { %8121 = vst.msk [vmem:[#allocation6 + $0x1d8] sm:$0xff] %vm8061_vm3, %v8043_v10  ;;  %v25199_v0 = vld [vmem:[#allocation27_spill] sm:$0xff] }
 0x851   :  { %vm7890_vm5 = vcmp.gt.f32.partialorder %v7813_v11, 0.0  ;;  %v7967_v28 = vmul.f32 0.01, %v7813_v11  ;;  %v7730_v23 = vmul.f32 %v23828_v37, %v18810_v30 }
 0x852   :  { %v7511_v17 = vpop.f32.mrb[124].mxu0 }
 0x853   :  { %v8301_v16 = vld [vmem:[#allocation6 + $0x1c2] ss:$2 sm:$0xff]  ;;  %v8303_v58 = vld [vmem:[#allocation6 + $0x1c3] ss:$2 sm:$0xff]  ;;  %v8044_v12 = vsel %vm7890_vm5, %v7813_v11, %v7967_v28  ;;  %v7814_v55 = vadd.f32 %v23835_v3, %v7730_v23  ;;  %v18811_v60 = vadd.f32 %v7511_v17, %v25194_v39  ;;  %v17795_v36 = vpop.f32.mrb[125].mxu0 }
 0x854   :  { %v8305_v54 = vmax.f32 %v8301_v16, %v8303_v58  ;;  %8122 = vst.msk [vmem:[#allocation6 + $0x1e0] sm:$0xff] %vm8061_vm3, %v8044_v12  ;;  %v25200_v12 = vld [vmem:[#allocation28_spill] sm:$0xff] }
 0x855   :  { %vm7891_vm6 = vcmp.gt.f32.partialorder %v7814_v55, 0.0  ;;  %v7968_v52 = vmul.f32 0.01, %v7814_v55  ;;  %v7731_v21 = vmul.f32 %v23828_v37, %v18811_v60 }
 0x856   :  { %v7516_v33 = vpop.f32.mrb[126].mxu0  ;;  %v8306_v34 = vmax.f32 %v8304_v29, %v8305_v54 }
 0x857   :  { %v8045_v48 = vsel %vm7891_vm6, %v7814_v55, %v7968_v52  ;;  %v7815_v46 = vadd.f32 %v23835_v3, %v7731_v21  ;;  %v18812_v31 = vadd.f32 %v7516_v33, %v25195_v44  ;;  %v17798_v5 = vpop.f32.mrb[127].mxu0  ;;  %v25201_v21 = vld [vmem:[#allocation29_spill] sm:$0xff] }
 0x858   :  { %8123 = vst.msk [vmem:[#allocation6 + $0x1e8] sm:$0xff] %vm8061_vm3, %v8045_v48  ;;  %8307 = vst.msk [vmem:[#allocation3 + $0x8d] sm:$0xff] %vm8061_vm3, %v8306_v34 }
 0x859   :  { %vm7892_vm7 = vcmp.gt.f32.partialorder %v7815_v46, 0.0  ;;  %v7969_v14 = vmul.f32 0.01, %v7815_v46  ;;  %v7732_v63 = vmul.f32 %v23828_v37, %v18812_v31 }
 0x85a   :  { %v7521_v6 = vpop.f32.mrb[128].mxu0 }
 0x85b   :  { %v8046_v7 = vsel %vm7892_vm7, %v7815_v46, %v7969_v14  ;;  %v7816_v27 = vadd.f32 %v23835_v3, %v7732_v63  ;;  %v18813_v38 = vadd.f32 %v7521_v6, %v25196_v53  ;;  %v17801_v4 = vpop.f32.mrb[129].mxu0  ;;  %v8309_v9 = vld [vmem:[#allocation6 + $0x1d4] ss:$2 sm:$0xff]  ;;  %v8311_v26 = vld [vmem:[#allocation6 + $0x1d5] ss:$2 sm:$0xff] }
 0x85c   :  { %8124 = vst.msk [vmem:[#allocation6 + $0x1f0] sm:$0xff] %vm8061_vm3, %v8046_v7  ;;  %v8316_v15 = vmax.f32 %v8309_v9, %v8311_v26  ;;  %v25202_v63 = vld [vmem:[#allocation30_spill] sm:$0xff] }
 0x85d   :  { %vm7893_vm8 = vcmp.gt.f32.partialorder %v7816_v27, 0.0  ;;  %v7970_v35 = vmul.f32 0.01, %v7816_v27  ;;  %v7733_v57 = vmul.f32 %v23828_v37, %v18813_v38 }
 0x85e   :  { %v7526_v59 = vpop.f32.mrb[130].mxu0 }
 0x85f   :  { %v8047_v20 = vsel %vm7893_vm8, %v7816_v27, %v7970_v35  ;;  %v7817_v41 = vadd.f32 %v23835_v3, %v7733_v57  ;;  %v18814_v56 = vadd.f32 %v7526_v59, %v25197_v62  ;;  %v17804_v51 = vpop.f32.mrb[131].mxu0  ;;  %v8397_v24 = vld [vmem:[#allocation3 + $0x89] sm:$0xff]  ;;  %vm8138_vm8 = vcmask 58368  }
 0x860   :  { %8125 = vst.msk [vmem:[#allocation6 + $0x1f8] sm:$0xff] %vm8061_vm3, %v8047_v20  ;;  %17892 = vmatmul.mubr.msk.f32.gmra.mrb[188].mxu1 %vm8061_vm3, %v8397_v24 }
 0x861   :  { %vm7894_vm9 = vcmp.gt.f32.partialorder %v7817_v41, 0.0  ;;  %v7971_v43 = vmul.f32 0.01, %v7817_v41  ;;  %v7734_v40 = vmul.f32 %v23828_v37, %v18814_v56  ;;  %17894 = vmatprep.mubr.msk.f32.mxu1 %vm20418_vm2, %v20417_v1  ;;  %v25203_v56 = vld [vmem:[#allocation31_spill] sm:$0xff] }
 0x862   :  { %v7531_v19 = vpop.f32.mrb[132].mxu0 }
 0x863   :  { %v8313_v47 = vld [vmem:[#allocation6 + $0x1e6] ss:$2 sm:$0xff]  ;;  %v8315_v45 = vld [vmem:[#allocation6 + $0x1e7] ss:$2 sm:$0xff]  ;;  %v8048_v18 = vsel %vm7894_vm9, %v7817_v41, %v7971_v43  ;;  %v7818_v50 = vadd.f32 %v23835_v3, %v7734_v40  ;;  %v18815_v25 = vadd.f32 %v7531_v19, %v25198_v13  ;;  %v17807_v49 = vpop.f32.mrb[133].mxu0 }
 0x864   :  { %v8317_v61 = vmax.f32 %v8313_v47, %v8315_v45  ;;  %8126 = vst.msk [vmem:[#allocation6 + $0x200] sm:$0xff] %vm8061_vm3, %v8048_v18 }
 0x865   :  { %vm7895_vm10 = vcmp.gt.f32.partialorder %v7818_v50, 0.0  ;;  %v7972_v32 = vmul.f32 0.01, %v7818_v50  ;;  %v7735_v2 = vmul.f32 %v23828_v37, %v18815_v25 }
 0x866   :  { %v7536_v10 = vpop.f32.mrb[134].mxu0  ;;  %v8318_v11 = vmax.f32 %v8316_v15, %v8317_v61 }
 0x867   :  { %v8049_v42 = vsel %vm7895_vm10, %v7818_v50, %v7972_v32  ;;  %v7819_v30 = vadd.f32 %v23835_v3, %v7735_v2  ;;  %v18816_v22 = vadd.f32 %v7536_v10, %v25199_v0  ;;  %v17810_v8 = vpop.f32.mrb[135].mxu0  ;;  %v25204_v50 = vld [vmem:[#allocation32_spill] sm:$0xff]  ;;  %v25205_v10 = vld [vmem:[#allocation33_spill] sm:$0xff] }
 0x868   :  { %8127 = vst.msk [vmem:[#allocation6 + $0x208] sm:$0xff] %vm8061_vm3, %v8049_v42  ;;  %8319 = vst.msk [vmem:[#allocation3 + $0x97] sm:$0xff] %vm8061_vm3, %v8318_v11 }
 0x869   :  { %vm7896_vm11 = vcmp.gt.f32.partialorder %v7819_v30, 0.0  ;;  %v7973_v28 = vmul.f32 0.01, %v7819_v30  ;;  %v7736_v23 = vmul.f32 %v23828_v37, %v18816_v22 }
 0x86a   :  { %v7541_v17 = vpop.f32.mrb[136].mxu0 }
 0x86b   :  { %v8050_v16 = vsel %vm7896_vm11, %v7819_v30, %v7973_v28  ;;  %v7820_v58 = vadd.f32 %v23835_v3, %v7736_v23  ;;  %v18817_v55 = vadd.f32 %v7541_v17, %v25200_v12  ;;  %v17813_v39 = vpop.f32.mrb[137].mxu0  ;;  %v8321_v53 = vld [vmem:[#allocation6 + $0x1f8] ss:$2 sm:$0xff]  ;;  %v8323_v38 = vld [vmem:[#allocation6 + $0x1f9] ss:$2 sm:$0xff] }
 0x86c   :  { %8128 = vst.msk [vmem:[#allocation6 + $0x210] sm:$0xff] %vm8061_vm3, %v8050_v16  ;;  %v8328_v9 = vmax.f32 %v8321_v53, %v8323_v38  ;;  %v25206_v23 = vld [vmem:[#allocation34_spill] sm:$0xff] }
 0x86d   :  { %vm7897_vm12 = vcmp.gt.f32.partialorder %v7820_v58, 0.0  ;;  %v7974_v60 = vmul.f32 0.01, %v7820_v58  ;;  %v7737_v36 = vmul.f32 %v23828_v37, %v18817_v55 }
 0x86e   :  { %v7546_v29 = vpop.f32.mrb[138].mxu0 }
 0x86f   :  { %v8051_v54 = vsel %vm7897_vm12, %v7820_v58, %v7974_v60  ;;  %v7821_v52 = vadd.f32 %v23835_v3, %v7737_v36  ;;  %v18818_v33 = vadd.f32 %v7546_v29, %v25201_v21  ;;  %v17816_v34 = vpop.f32.mrb[139].mxu0  ;;  %v8398_v48 = vld [vmem:[#allocation3 + $0x91] sm:$0xff]  ;;  %v8399_v27 = vld [vmem:[#allocation3 + $0x99] sm:$0xff] }
 0x870   :  { %8129 = vst.msk [vmem:[#allocation6 + $0x218] sm:$0xff] %vm8061_vm3, %v8051_v54  ;;  %17895 = vmatmul.mubr.msk.f32.gmra.mrb[190].mxu1 %vm8061_vm3, %v8398_v48 }
 0x871   :  { %vm7898_vm13 = vcmp.gt.f32.partialorder %v7821_v52, 0.0  ;;  %v7975_v46 = vmul.f32 0.01, %v7821_v52  ;;  %v7738_v44 = vmul.f32 %v23828_v37, %v18818_v33  ;;  %17897 = vmatprep.mubr.msk.f32.mxu1 %vm20418_vm2, %v20417_v1  ;;  %v25207_v33 = vld [vmem:[#allocation35_spill] sm:$0xff] }
 0x872   :  { %v7551_v31 = vpop.f32.mrb[140].mxu0 }
 0x873   :  { %v8052_v5 = vsel %vm7898_vm13, %v7821_v52, %v7975_v46  ;;  %v7822_v14 = vadd.f32 %v23835_v3, %v7738_v44  ;;  %v18819_v6 = vadd.f32 %v7551_v31, %v25202_v63  ;;  %v17819_v7 = vpop.f32.mrb[141].mxu0 }
 0x874   :  { %8130 = vst.msk [vmem:[#allocation6 + $0x220] sm:$0xff] %vm8061_vm3, %v8052_v5  ;;  %17898 = vmatmul.mubr.msk.f32.gmra.mrb[192].mxu1 %vm8061_vm3, %v8399_v27  ;;  %v25208_v27 = vld [vmem:[#allocation36_spill] sm:$0xff] }
 0x875   :  { %vm7899_vm14 = vcmp.gt.f32.partialorder %v7822_v14, 0.0  ;;  %v7976_v4 = vmul.f32 0.01, %v7822_v14  ;;  %v7739_v35 = vmul.f32 %v23828_v37, %v18819_v6  ;;  %17900 = vmatprep.mubr.msk.f32.mxu1 %vm20418_vm2, %v20417_v1 }
 0x876   :  { %v7556_v57 = vpop.f32.mrb[142].mxu0 }
 0x877   :  { %v8325_v59 = vld [vmem:[#allocation6 + $0x20a] ss:$2 sm:$0xff]  ;;  %v8327_v20 = vld [vmem:[#allocation6 + $0x20b] ss:$2 sm:$0xff]  ;;  %v8053_v41 = vsel %vm7899_vm14, %v7822_v14, %v7976_v4  ;;  %v7823_v62 = vadd.f32 %v23835_v3, %v7739_v35  ;;  %v18820_v51 = vadd.f32 %v7556_v57, %v25203_v56  ;;  %v17822_v24 = vpop.f32.mrb[143].mxu0 }
 0x878   :  { %v8329_v26 = vmax.f32 %v8325_v59, %v8327_v20  ;;  %8131 = vst.msk [vmem:[#allocation6 + $0x228] sm:$0xff] %vm8061_vm3, %v8053_v41  ;;  %v14400_v24 = vld [vmem:[%s25104_s2 + $0x10] sm:$0xff] }
 0x879   :  { %vm7900_vm1 = vcmp.gt.f32.partialorder %v7823_v62, 0.0  ;;  %v7977_v43 = vmul.f32 0.01, %v7823_v62  ;;  %v7740_v40 = vmul.f32 %v23828_v37, %v18820_v51 }
 0x87a   :  { %v7561_v19 = vpop.f32.mrb[144].mxu0  ;;  %v8330_v47 = vmax.f32 %v8328_v9, %v8329_v26 }
 0x87b   :  { %v8054_v45 = vsel %vm7900_vm1, %v7823_v62, %v7977_v43  ;;  %v7824_v18 = vadd.f32 %v23835_v3, %v7740_v40  ;;  %v18821_v13 = vadd.f32 %v7561_v19, %v25204_v50  ;;  %v17825_v25 = vpop.f32.mrb[145].mxu0  ;;  %v8360_v50 = vld [vmem:[#allocation3 + $0x20] sm:$0xff]  ;;  %vm11153_vm1 = vcmask 60416  }
 0x87c   :  { %8132 = vst.msk [vmem:[#allocation6 + $0x230] sm:$0xff] %vm8061_vm3, %v8054_v45  ;;  %8331 = vst.msk [vmem:[#allocation3 + $0xa1] sm:$0xff] %vm8061_vm3, %v8330_v47  ;;  %v8357_v47 = vld [vmem:[#allocation3 + $0x8] sm:$0xff]  ;;  %v8358_v45 = vld [vmem:[#allocation3 + $0x10] sm:$0xff] }
 0x87d   :  { %vm7901_vm15 = vcmp.gt.f32.partialorder %v7824_v18, 0.0  ;;  %v7978_v49 = vmul.f32 0.01, %v7824_v18  ;;  %v7741_v15 = vmul.f32 %v23828_v37, %v18821_v13  ;;  %v8361_v13 = vld [vmem:[#allocation3 + $0x28] sm:$0xff]  ;;  %v8362_v25 = vld [vmem:[#allocation3 + $0x30] sm:$0xff] }
 0x87e   :  { %v7566_v61 = vpop.f32.mrb[146].mxu0 }
 0x87f   :  { %v8055_v32 = vsel %vm7901_vm15, %v7824_v18, %v7978_v49  ;;  %v7825_v2 = vadd.f32 %v23835_v3, %v7741_v15  ;;  %v18822_v11 = vadd.f32 %v7566_v61, %v25205_v10  ;;  %v17828_v42 = vpop.f32.mrb[147].mxu0  ;;  %v8333_v12 = vld [vmem:[#allocation6 + $0x21c] ss:$2 sm:$0xff]  ;;  %v8335_v55 = vld [vmem:[#allocation6 + $0x21d] ss:$2 sm:$0xff]  ;;  %v8364_v15 = vld [vmem:[#allocation3 + $0x40] sm:$0xff] }
 0x880   :  { %8133 = vst.msk [vmem:[#allocation6 + $0x238] sm:$0xff] %vm8061_vm3, %v8055_v32  ;;  %v8340_v46 = vmax.f32 %v8333_v12, %v8335_v55  ;;  %v8359_v18 = vld [vmem:[#allocation3 + $0x18] sm:$0xff]  ;;  %v8365_v61 = vld [vmem:[#allocation3 + $0x48] sm:$0xff]  ;;  %v8366_v32 = vld [vmem:[#allocation3 + $0x50] sm:$0xff] }
 0x881   :  { %vm7902_vm0 = vcmp.gt.f32.partialorder %v7825_v2, 0.0  ;;  %v7979_v30 = vmul.f32 0.01, %v7825_v2  ;;  %v7742_v0 = vmul.f32 %v23828_v37, %v18822_v11  ;;  %v8363_v49 = vld [vmem:[#allocation3 + $0x38] sm:$0xff]  ;;  %v8368_v10 = vld [vmem:[#allocation3 + $0x60] sm:$0xff]  ;;  %v8369_v11 = vld [vmem:[#allocation3 + $0x68] sm:$0xff] }
 0x882   :  { %v7571_v22 = vpop.f32.mrb[148].mxu0  ;;  %v8370_v42 = vld [vmem:[#allocation3 + $0x70] sm:$0xff] }
 0x883   :  { %v8056_v8 = vsel %vm7902_vm0, %v7825_v2, %v7979_v30  ;;  %v7826_v28 = vadd.f32 %v23835_v3, %v7742_v0  ;;  %v18823_v17 = vadd.f32 %v7571_v22, %v25206_v23  ;;  %v17831_v16 = vpop.f32.mrb[149].mxu0  ;;  %v8400_v58 = vld [vmem:[#allocation3 + $0xa1] sm:$0xff]  ;;  %v8367_v2 = vld [vmem:[#allocation3 + $0x58] sm:$0xff]  ;;  %v14424_v12 = vld [vmem:[%s25104_s2 + $0x18] sm:$0xff] }
 0x884   :  { %8134 = vst.msk [vmem:[#allocation6 + $0x240] sm:$0xff] %vm8061_vm3, %v8056_v8  ;;  %17901 = vmatmul.mubr.msk.f32.gmra.mrb[194].mxu1 %vm8061_vm3, %v8400_v58  ;;  %v8371_v30 = vld [vmem:[#allocation3 + $0x78] sm:$0xff]  ;;  %v8372_v0 = vld [vmem:[#allocation3 + $0x80] sm:$0xff]  ;;  %v8373_v22 = vld [vmem:[#allocation3 + $0x88] sm:$0xff] }
 0x885   :  { %vm7903_vm4 = vcmp.gt.f32.partialorder %v7826_v28, 0.0  ;;  %v7980_v39 = vmul.f32 0.01, %v7826_v28  ;;  %v7743_v60 = vmul.f32 %v23828_v37, %v18823_v17  ;;  %17903 = vmatprep.mubr.msk.f32.mxu1 %vm20418_vm2, %v20417_v1  ;;  %v8374_v8 = vld [vmem:[#allocation3 + $0x90] sm:$0xff]  ;;  %v8376_v23 = vld [vmem:[#allocation3 + $0xa0] sm:$0xff] }
 0x886   :  { %v7576_v36 = vpop.f32.mrb[150].mxu0  ;;  %v8903_v58 = vld [vmem:[#allocation3 + $0x2] sm:$0xff]  ;;  %v24113_v55 = vld [vmem:[#allocation3 + $0xa] sm:$0xff] }
 0x887   :  { %v8337_v29 = vld [vmem:[#allocation6 + $0x22e] ss:$2 sm:$0xff]  ;;  %v8339_v54 = vld [vmem:[#allocation6 + $0x22f] ss:$2 sm:$0xff]  ;;  %v8057_v52 = vsel %vm7903_vm4, %v7826_v28, %v7980_v39  ;;  %v7827_v21 = vadd.f32 %v23835_v3, %v7743_v60  ;;  %v18824_v34 = vadd.f32 %v7576_v36, %v25207_v33  ;;  %v17834_v48 = vpop.f32.mrb[151].mxu0  ;;  %v24119_v39 = vld [vmem:[#allocation3 + $0x12] sm:$0xff] }
 0x888   :  { %v8341_v44 = vmax.f32 %v8337_v29, %v8339_v54  ;;  %8135 = vst.msk [vmem:[#allocation6 + $0x248] sm:$0xff] %vm8061_vm3, %v8057_v52  ;;  %v8375_v28 = vld [vmem:[#allocation3 + $0x98] sm:$0xff]  ;;  %v24131_v36 = vld [vmem:[#allocation3 + $0x22] sm:$0xff]  ;;  %v24137_v29 = vld [vmem:[#allocation3 + $0x2a] sm:$0xff] }
 0x889   :  { %vm7904_vm5 = vcmp.gt.f32.partialorder %v7827_v21, 0.0  ;;  %v7981_v31 = vmul.f32 0.01, %v7827_v21  ;;  %v7744_v5 = vmul.f32 %v23828_v37, %v18824_v34  ;;  %v24125_v60 = vld [vmem:[#allocation3 + $0x1a] sm:$0xff]  ;;  %v24143_v54 = vld [vmem:[#allocation3 + $0x32] sm:$0xff]  ;;  %v8912_v33 = vld [vmem:[#allocation3 + $0x4a] sm:$0xff] }
 0x88a   :  { %v7581_v14 = vpop.f32.mrb[152].mxu0  ;;  %v8342_v63 = vmax.f32 %v8340_v46, %v8341_v44  ;;  %v24149_v52 = vld [vmem:[#allocation3 + $0x3a] sm:$0xff]  ;;  %v8913_v34 = vld [vmem:[#allocation3 + $0x52] sm:$0xff]  ;;  %v8915_v46 = vld [vmem:[#allocation3 + $0x62] sm:$0xff] }
 0x88b   :  { %v8058_v6 = vsel %vm7904_vm5, %v7827_v21, %v7981_v31  ;;  %v7828_v7 = vadd.f32 %v23835_v3, %v7744_v5  ;;  %v18825_v53 = vadd.f32 %v7581_v14, %v25208_v27  ;;  %v17837_v38 = vpop.f32.mrb[153].mxu0  ;;  %v8911_v21 = vld [vmem:[#allocation3 + $0x42] sm:$0xff]  ;;  %v8914_v48 = vld [vmem:[#allocation3 + $0x5a] sm:$0xff]  ;;  %v8916_v44 = vld [vmem:[#allocation3 + $0x6a] sm:$0xff] }
 0x88c   :  { %8136 = vst.msk [vmem:[#allocation6 + $0x250] sm:$0xff] %vm8061_vm3, %v8058_v6  ;;  %8343 = vst.msk [vmem:[#allocation3 + $0xab] sm:$0xff] %vm8061_vm3, %v8342_v63  ;;  %v8917_v31 = vld [vmem:[#allocation3 + $0x72] sm:$0xff]  ;;  %v8918_v5 = vld [vmem:[#allocation3 + $0x7a] sm:$0xff] }
 0x88d   :  { %vm7905_vm6 = vcmp.gt.f32.partialorder %v7828_v7, 0.0  ;;  %v7982_v4 = vmul.f32 0.01, %v7828_v7  ;;  %v7745_v35 = vmul.f32 %v23828_v37, %v18825_v53  ;;  %v8919_v14 = vld [vmem:[#allocation3 + $0x82] sm:$0xff]  ;;  %v8920_v63 = vld [vmem:[#allocation3 + $0x8a] sm:$0xff]  ;;  %v8921_v6 = vld [vmem:[#allocation3 + $0x92] sm:$0xff] }
 0x88e   :  { %v8923_v27 = vld [vmem:[#allocation3 + $0xa2] sm:$0xff] }
 0x88f   :  { %v8059_v57 = vsel %vm7905_vm6, %v7828_v7, %v7982_v4  ;;  %v7829_v59 = vadd.f32 %v23835_v3, %v7745_v35  ;;  %v8345_v37 = vld [vmem:[#allocation6 + $0x240] ss:$2 sm:$0xff]  ;;  %v8347_v51 = vld [vmem:[#allocation6 + $0x241] ss:$2 sm:$0xff]  ;;  %v8356_v3 = vld [vmem:[#allocation3] sm:$0xff] }
 0x890   :  { %8137 = vst.msk [vmem:[#allocation6 + $0x258] sm:$0xff] %vm8061_vm3, %v8059_v57  ;;  %v8352_v43 = vmax.f32 %v8345_v37, %v8347_v51  ;;  %v8922_v7 = vld [vmem:[#allocation3 + $0x9a] sm:$0xff]  ;;  %v9501_v37 = vld [vmem:[#allocation3 + $0x2b] sm:$0xff] }
 0x891   :  { %vm7906_vm7 = vcmp.gt.f32.partialorder %v7829_v59, 0.0  ;;  %v7983_v20 = vmul.f32 0.01, %v7829_v59  ;;  %v14448_v4 = vld [vmem:[%s25104_s2 + $0x20] sm:$0xff] }
 0x892   :  { %v9502_v51 = vld [vmem:[#allocation3 + $0x33] sm:$0xff] }
 0x893   :  { %v8060_v41 = vsel %vm7906_vm7, %v7829_v59, %v7983_v20  ;;  %v8401_v62 = vld [vmem:[#allocation3 + $0xa9] sm:$0xff]  ;;  %v8402_v56 = vld [vmem:[#allocation3 + $0xb1] sm:$0x3]  ;;  %v14472_v59 = vld [vmem:[%s25104_s2 + $0x28] sm:$0xff] }
 0x894   :  { %8139 = vst.msk [vmem:[#allocation6 + $0x260] sm:$0x3] %vm8138_vm8, %v8060_v41  ;;  %17904 = vmatmul.mubr.msk.f32.gmra.mrb[196].mxu1 %vm8061_vm3, %v8401_v62  ;;  %v8377_v17 = vld [vmem:[#allocation3 + $0xa8] sm:$0xff]  ;;  %v8378_v16 = vld [vmem:[#allocation3 + $0xb0] sm:$0x3]  ;;  %v9498_v41 = vld [vmem:[#allocation3 + $0x13] sm:$0xff] }
 0x895   :  { %17906 = vmatprep.mubr.msk.f32.mxu1 %vm20418_vm2, %v20417_v1  ;;  %v8924_v53 = vld [vmem:[#allocation3 + $0xaa] sm:$0xff]  ;;  %v8925_v38 = vld [vmem:[#allocation3 + $0xb2] sm:$0x3]  ;;  %v9499_v62 = vld [vmem:[#allocation3 + $0x1b] sm:$0xff] }
 0x896   :  { %v9497_v20 = vld [vmem:[#allocation3 + $0xb] sm:$0xff] }
 0x898   :  { %17907 = vmatmul.mubr.msk.f32.gmra.mrb[198].mxu1 %vm8061_vm3, %v8402_v56  ;;  %v9500_v56 = vld [vmem:[#allocation3 + $0x23] sm:$0xff] }
 0x899   :  { %17911 = vmatprep.mubr.msk.f32.mxu1 %vm20418_vm2, %v20417_v1 }
 0x89b   :  { %v8349_v9 = vld [vmem:[#allocation6 + $0x252] ss:$2 sm:$0xff]  ;;  %v8351_v26 = vld [vmem:[#allocation6 + $0x253] ss:$2 sm:$0xff] }
 0x89c   :  { %v8353_v40 = vmax.f32 %v8349_v9, %v8351_v26  ;;  %17912 = vmatmul.mubr.msk.f32.vlgmr.msra.gmra.mrb[154].mxu1 %vm8061_vm3, %v8356_v3  ;;  %v9503_v3 = vld [vmem:[#allocation3 + $0x3b] sm:$0xff]  ;;  %v9505_v9 = vld [vmem:[#allocation3 + $0x4b] sm:$0xff]  ;;  %v9506_v26 = vld [vmem:[#allocation3 + $0x53] sm:$0xff] }
 0x89d   :  { %17981 = vmatpush3.msra.mxu1 %v14400_v24  ;;  %17914 = vmatprep.mubr.msk.f32.mxu1 %vm20418_vm2, %v20417_v1  ;;  %v9504_v24 = vld [vmem:[#allocation3 + $0x43] sm:$0xff] }
 0x89e   :  { %18051 = vmatprep.subr.mxu1 %v20417_v1  ;;  %v8354_v19 = vmax.f32 %v8352_v43, %v8353_v40  ;;  %v9507_v43 = vld [vmem:[#allocation3 + $0x5b] sm:$0xff]  ;;  %v9508_v40 = vld [vmem:[#allocation3 + $0x63] sm:$0xff] }
 0x8a0   :  { %17915 = vmatmul.mubr.msk.f32.gmra.mrb[156].mxu1 %vm8061_vm3, %v8357_v47  ;;  %8355 = vst.msk [vmem:[#allocation3 + $0xb5] sm:$0xff] %vm8061_vm3, %v8354_v19  ;;  %v9509_v19 = vld [vmem:[#allocation3 + $0x6b] sm:$0xff]  ;;  %v9510_v47 = vld [vmem:[#allocation3 + $0x73] sm:$0xff] }
 0x8a1   :  { %17917 = vmatprep.mubr.msk.f32.mxu1 %vm20418_vm2, %v20417_v1 }
 0x8a4   :  { %17918 = vmatmul.mubr.msk.f32.gmra.mrb[158].mxu1 %vm8061_vm3, %v8358_v45  ;;  %v9511_v45 = vld [vmem:[#allocation3 + $0x7b] sm:$0xff] }
 0x8a5   :  { %17920 = vmatprep.mubr.msk.f32.mxu1 %vm20418_vm2, %v20417_v1 }
 0x8a7   :  { %v9221_v35 = vld [vmem:[#allocation3 + $0xb2] sm:$0xff]  ;;  %v9222_v57 = vld [vmem:[#allocation3 + $0xba] sm:$0x3] }
 0x8a8   :  { %17921 = vmatmul.mubr.msk.f32.gmra.mrb[160].mxu1 %vm8061_vm3, %v8359_v18  ;;  %v9512_v18 = vld [vmem:[#allocation3 + $0x83] sm:$0xff] }
 0x8a9   :  { %17923 = vmatprep.mubr.msk.f32.mxu1 %vm20418_vm2, %v20417_v1 }
 0x8ac   :  { %17924 = vmatmul.mubr.msk.f32.gmra.mrb[162].mxu1 %vm8061_vm3, %v8360_v50  ;;  %v9513_v50 = vld [vmem:[#allocation3 + $0x8b] sm:$0xff] }
 0x8ad   :  { %17926 = vmatprep.mubr.msk.f32.mxu1 %vm20418_vm2, %v20417_v1 }
 0x8b0   :  { %17927 = vmatmul.mubr.msk.f32.gmra.mrb[164].mxu1 %vm8061_vm3, %v8361_v13  ;;  %v9514_v13 = vld [vmem:[#allocation3 + $0x93] sm:$0xff] }
 0x8b1   :  { %17929 = vmatprep.mubr.msk.f32.mxu1 %vm20418_vm2, %v20417_v1 }
 0x8b4   :  { %17930 = vmatmul.mubr.msk.f32.gmra.mrb[166].mxu1 %vm8061_vm3, %v8362_v25  ;;  %v9515_v25 = vld [vmem:[#allocation3 + $0x9b] sm:$0xff] }
 0x8b5   :  { %17932 = vmatprep.mubr.msk.f32.mxu1 %vm20418_vm2, %v20417_v1 }
 0x8b8   :  { %17933 = vmatmul.mubr.msk.f32.gmra.mrb[168].mxu1 %vm8061_vm3, %v8363_v49  ;;  %v9516_v49 = vld [vmem:[#allocation3 + $0xa3] sm:$0xff] }
 0x8b9   :  { %17935 = vmatprep.mubr.msk.f32.mxu1 %vm20418_vm2, %v20417_v1 }
 0x8bc   :  { %17936 = vmatmul.mubr.msk.f32.gmra.mrb[170].mxu1 %vm8061_vm3, %v8364_v15  ;;  %v9517_v15 = vld [vmem:[#allocation3 + $0xab] sm:$0xff] }
 0x8bd   :  { %17938 = vmatprep.mubr.msk.f32.mxu1 %vm20418_vm2, %v20417_v1 }
 0x8c0   :  { %17939 = vmatmul.mubr.msk.f32.gmra.mrb[172].mxu1 %vm8061_vm3, %v8365_v61  ;;  %v9518_v61 = vld [vmem:[#allocation3 + $0xb3] sm:$0xff] }
 0x8c1   :  { %17941 = vmatprep.mubr.msk.f32.mxu1 %vm20418_vm2, %v20417_v1 }
 0x8c4   :  { %17942 = vmatmul.mubr.msk.f32.gmra.mrb[174].mxu1 %vm8061_vm3, %v8366_v32  ;;  %v9519_v32 = vld [vmem:[#allocation3 + $0xbb] sm:$0x3] }
 0x8c5   :  { %17944 = vmatprep.mubr.msk.f32.mxu1 %vm20418_vm2, %v20417_v1 }
 0x8c8   :  { %17945 = vmatmul.mubr.msk.f32.gmra.mrb[176].mxu1 %vm8061_vm3, %v8367_v2  ;;  %v14496_v2 = vld [vmem:[%s25104_s2 + $0x30] sm:$0xff] }
 0x8c9   :  { %17947 = vmatprep.mubr.msk.f32.mxu1 %vm20418_vm2, %v20417_v1 }
 0x8cc   :  { %17948 = vmatmul.mubr.msk.f32.gmra.mrb[178].mxu1 %vm8061_vm3, %v8368_v10  ;;  %v9794_v10 = vld [vmem:[#allocation3 + $0xc] sm:$0xff] }
 0x8cd   :  { %17950 = vmatprep.mubr.msk.f32.mxu1 %vm20418_vm2, %v20417_v1 }
 0x8d0   :  { %17951 = vmatmul.mubr.msk.f32.gmra.mrb[180].mxu1 %vm8061_vm3, %v8369_v11  ;;  %v24360_v11 = vld [vmem:[#allocation3 + $0x14] sm:$0xff] }
 0x8d1   :  { %17953 = vmatprep.mubr.msk.f32.mxu1 %vm20418_vm2, %v20417_v1 }
 0x8d4   :  { %17954 = vmatmul.mubr.msk.f32.gmra.mrb[182].mxu1 %vm8061_vm3, %v8370_v42  ;;  %v24366_v42 = vld [vmem:[#allocation3 + $0x1c] sm:$0xff] }
 0x8d5   :  { %17956 = vmatprep.mubr.msk.f32.mxu1 %vm20418_vm2, %v20417_v1 }
 0x8d8   :  { %17957 = vmatmul.mubr.msk.f32.gmra.mrb[184].mxu1 %vm8061_vm3, %v8371_v30  ;;  %v24372_v30 = vld [vmem:[#allocation3 + $0x24] sm:$0xff] }
 0x8d9   :  { %17959 = vmatprep.mubr.msk.f32.mxu1 %vm20418_vm2, %v20417_v1 }
 0x8dc   :  { %17960 = vmatmul.mubr.msk.f32.gmra.mrb[186].mxu1 %vm8061_vm3, %v8372_v0  ;;  %v24378_v0 = vld [vmem:[#allocation3 + $0x2c] sm:$0xff] }
 0x8dd   :  { %17962 = vmatprep.mubr.msk.f32.mxu1 %vm20418_vm2, %v20417_v1 }
 0x8e0   :  { %17963 = vmatmul.mubr.msk.f32.gmra.mrb[188].mxu1 %vm8061_vm3, %v8373_v22  ;;  %v24384_v22 = vld [vmem:[#allocation3 + $0x34] sm:$0xff] }
 0x8e1   :  { %17965 = vmatprep.mubr.msk.f32.mxu1 %vm20418_vm2, %v20417_v1 }
 0x8e4   :  { %17966 = vmatmul.mubr.msk.f32.gmra.mrb[190].mxu1 %vm8061_vm3, %v8374_v8  ;;  %v24390_v8 = vld [vmem:[#allocation3 + $0x3c] sm:$0xff] }
 0x8e5   :  { %17968 = vmatprep.mubr.msk.f32.mxu1 %vm20418_vm2, %v20417_v1 }
 0x8e8   :  { %17969 = vmatmul.mubr.msk.f32.gmra.mrb[192].mxu1 %vm8061_vm3, %v8375_v28  ;;  %v24396_v28 = vld [vmem:[#allocation3 + $0x44] sm:$0xff] }
 0x8e9   :  { %17971 = vmatprep.mubr.msk.f32.mxu1 %vm20418_vm2, %v20417_v1 }
 0x8ec   :  { %17972 = vmatmul.mubr.msk.f32.gmra.mrb[194].mxu1 %vm8061_vm3, %v8376_v23  ;;  %v9802_v23 = vld [vmem:[#allocation3 + $0x4c] sm:$0xff] }
 0x8ed   :  { %17974 = vmatprep.mubr.msk.f32.mxu1 %vm20418_vm2, %v20417_v1 }
 0x8f0   :  { %17975 = vmatmul.mubr.msk.f32.gmra.mrb[196].mxu1 %vm8061_vm3, %v8377_v17  ;;  %v9803_v17 = vld [vmem:[#allocation3 + $0x54] sm:$0xff] }
 0x8f1   :  { %17977 = vmatprep.mubr.msk.f32.mxu1 %vm20418_vm2, %v20417_v1 }
 0x8f4   :  { %17978 = vmatmul.mubr.msk.f32.gmra.mrb[198].mxu1 %vm8061_vm3, %v8378_v16  ;;  %v9804_v16 = vld [vmem:[#allocation3 + $0x5c] sm:$0xff] }
 0x8f5   :  { %17982 = vmatprep.mubr.msk.f32.mxu1 %vm20418_vm2, %v20417_v1 }
 0x8f8   :  { %17983 = vmatmul.mubr.msk.f32.vlgmr.msra.gmra.mrb[154].mxu1 %vm8061_vm3, %v8903_v58  ;;  %v9805_v58 = vld [vmem:[#allocation3 + $0x64] sm:$0xff] }
 0x8f9   :  { %18052 = vmatpush3.msra.mxu1 %v14424_v12  ;;  %17985 = vmatprep.mubr.msk.f32.mxu1 %vm20418_vm2, %v20417_v1  ;;  %v9806_v12 = vld [vmem:[#allocation3 + $0x6c] sm:$0xff] }
 0x8fa   :  { %18122 = vmatprep.subr.mxu1 %v20417_v1 }
 0x8fc   :  { %17986 = vmatmul.mubr.msk.f32.gmra.mrb[156].mxu1 %vm8061_vm3, %v24113_v55 }
 0x8fd   :  { %17988 = vmatprep.mubr.msk.f32.mxu1 %vm20418_vm2, %v20417_v1 }
 0x900   :  { %17989 = vmatmul.mubr.msk.f32.gmra.mrb[158].mxu1 %vm8061_vm3, %v24119_v39 }
 0x901   :  { %17991 = vmatprep.mubr.msk.f32.mxu1 %vm20418_vm2, %v20417_v1 }
 0x904   :  { %17992 = vmatmul.mubr.msk.f32.gmra.mrb[160].mxu1 %vm8061_vm3, %v24125_v60 }
 0x905   :  { %17994 = vmatprep.mubr.msk.f32.mxu1 %vm20418_vm2, %v20417_v1 }
 0x908   :  { %17995 = vmatmul.mubr.msk.f32.gmra.mrb[162].mxu1 %vm8061_vm3, %v24131_v36 }
 0x909   :  { %17997 = vmatprep.mubr.msk.f32.mxu1 %vm20418_vm2, %v20417_v1 }
 0x90c   :  { %17998 = vmatmul.mubr.msk.f32.gmra.mrb[164].mxu1 %vm8061_vm3, %v24137_v29 }
 0x90d   :  { %18000 = vmatprep.mubr.msk.f32.mxu1 %vm20418_vm2, %v20417_v1 }
 0x910   :  { %18001 = vmatmul.mubr.msk.f32.gmra.mrb[166].mxu1 %vm8061_vm3, %v24143_v54 }
 0x911   :  { %18003 = vmatprep.mubr.msk.f32.mxu1 %vm20418_vm2, %v20417_v1 }
 0x914   :  { %18004 = vmatmul.mubr.msk.f32.gmra.mrb[168].mxu1 %vm8061_vm3, %v24149_v52 }
 0x915   :  { %18006 = vmatprep.mubr.msk.f32.mxu1 %vm20418_vm2, %v20417_v1 }
 0x918   :  { %18007 = vmatmul.mubr.msk.f32.gmra.mrb[170].mxu1 %vm8061_vm3, %v8911_v21 }
 0x919   :  { %18009 = vmatprep.mubr.msk.f32.mxu1 %vm20418_vm2, %v20417_v1 }
 0x91c   :  { %18010 = vmatmul.mubr.msk.f32.gmra.mrb[172].mxu1 %vm8061_vm3, %v8912_v33 }
 0x91d   :  { %18012 = vmatprep.mubr.msk.f32.mxu1 %vm20418_vm2, %v20417_v1 }
 0x920   :  { %18013 = vmatmul.mubr.msk.f32.gmra.mrb[174].mxu1 %vm8061_vm3, %v8913_v34 }
 0x921   :  { %18015 = vmatprep.mubr.msk.f32.mxu1 %vm20418_vm2, %v20417_v1 }
 0x924   :  { %18016 = vmatmul.mubr.msk.f32.gmra.mrb[176].mxu1 %vm8061_vm3, %v8914_v48 }
 0x925   :  { %18018 = vmatprep.mubr.msk.f32.mxu1 %vm20418_vm2, %v20417_v1 }
 0x928   :  { %18019 = vmatmul.mubr.msk.f32.gmra.mrb[178].mxu1 %vm8061_vm3, %v8915_v46 }
 0x929   :  { %18021 = vmatprep.mubr.msk.f32.mxu1 %vm20418_vm2, %v20417_v1 }
 0x92c   :  { %18022 = vmatmul.mubr.msk.f32.gmra.mrb[180].mxu1 %vm8061_vm3, %v8916_v44 }
 0x92d   :  { %18024 = vmatprep.mubr.msk.f32.mxu1 %vm20418_vm2, %v20417_v1 }
 0x930   :  { %18025 = vmatmul.mubr.msk.f32.gmra.mrb[182].mxu1 %vm8061_vm3, %v8917_v31 }
 0x931   :  { %18027 = vmatprep.mubr.msk.f32.mxu1 %vm20418_vm2, %v20417_v1 }
 0x934   :  { %18028 = vmatmul.mubr.msk.f32.gmra.mrb[184].mxu1 %vm8061_vm3, %v8918_v5 }
 0x935   :  { %18030 = vmatprep.mubr.msk.f32.mxu1 %vm20418_vm2, %v20417_v1 }
 0x938   :  { %18031 = vmatmul.mubr.msk.f32.gmra.mrb[186].mxu1 %vm8061_vm3, %v8919_v14 }
 0x939   :  { %18033 = vmatprep.mubr.msk.f32.mxu1 %vm20418_vm2, %v20417_v1 }
 0x93c   :  { %18034 = vmatmul.mubr.msk.f32.gmra.mrb[188].mxu1 %vm8061_vm3, %v8920_v63 }
 0x93d   :  { %18036 = vmatprep.mubr.msk.f32.mxu1 %vm20418_vm2, %v20417_v1 }
 0x940   :  { %18037 = vmatmul.mubr.msk.f32.gmra.mrb[190].mxu1 %vm8061_vm3, %v8921_v6 }
 0x941   :  { %18039 = vmatprep.mubr.msk.f32.mxu1 %vm20418_vm2, %v20417_v1 }
 0x944   :  { %18040 = vmatmul.mubr.msk.f32.gmra.mrb[192].mxu1 %vm8061_vm3, %v8922_v7 }
 0x945   :  { %18042 = vmatprep.mubr.msk.f32.mxu1 %vm20418_vm2, %v20417_v1 }
 0x948   :  { %18043 = vmatmul.mubr.msk.f32.gmra.mrb[194].mxu1 %vm8061_vm3, %v8923_v27 }
 0x949   :  { %18045 = vmatprep.mubr.msk.f32.mxu1 %vm20418_vm2, %v20417_v1 }
 0x94c   :  { %18046 = vmatmul.mubr.msk.f32.gmra.mrb[196].mxu1 %vm8061_vm3, %v8924_v53 }
 0x94d   :  { %18048 = vmatprep.mubr.msk.f32.mxu1 %vm20418_vm2, %v20417_v1 }
 0x950   :  { %18049 = vmatmul.mubr.msk.f32.gmra.mrb[198].mxu1 %vm8061_vm3, %v8925_v38  ;;  %v10395_v38 = vld [vmem:[#allocation3 + $0x4d] sm:$0xff] }
 0x951   :  { %18053 = vmatprep.mubr.msk.f32.mxu1 %vm20418_vm2, %v20417_v1 }
 0x954   :  { %18054 = vmatmul.mubr.msk.f32.vlgmr.msra.gmra.mrb[154].mxu1 %vm8061_vm3, %v24113_v55  ;;  %v9807_v55 = vld [vmem:[#allocation3 + $0x74] sm:$0xff] }
 0x955   :  { %18123 = vmatpush3.msra.mxu1 %v14448_v4  ;;  %18056 = vmatprep.mubr.msk.f32.mxu1 %vm20418_vm2, %v20417_v1  ;;  %v10396_v4 = vld [vmem:[#allocation3 + $0x55] sm:$0xff] }
 0x956   :  { %18193 = vmatprep.subr.mxu1 %v20417_v1 }
 0x958   :  { %18057 = vmatmul.mubr.msk.f32.gmra.mrb[156].mxu1 %vm8061_vm3, %v24119_v39  ;;  %v9808_v39 = vld [vmem:[#allocation3 + $0x7c] sm:$0xff] }
 0x959   :  { %18059 = vmatprep.mubr.msk.f32.mxu1 %vm20418_vm2, %v20417_v1 }
 0x95c   :  { %18060 = vmatmul.mubr.msk.f32.gmra.mrb[158].mxu1 %vm8061_vm3, %v24125_v60  ;;  %v9809_v60 = vld [vmem:[#allocation3 + $0x84] sm:$0xff] }
 0x95d   :  { %18062 = vmatprep.mubr.msk.f32.mxu1 %vm20418_vm2, %v20417_v1 }
 0x960   :  { %18063 = vmatmul.mubr.msk.f32.gmra.mrb[160].mxu1 %vm8061_vm3, %v24131_v36  ;;  %v9810_v36 = vld [vmem:[#allocation3 + $0x8c] sm:$0xff] }
 0x961   :  { %18065 = vmatprep.mubr.msk.f32.mxu1 %vm20418_vm2, %v20417_v1 }
 0x964   :  { %18066 = vmatmul.mubr.msk.f32.gmra.mrb[162].mxu1 %vm8061_vm3, %v24137_v29  ;;  %v9811_v29 = vld [vmem:[#allocation3 + $0x94] sm:$0xff] }
 0x965   :  { %18068 = vmatprep.mubr.msk.f32.mxu1 %vm20418_vm2, %v20417_v1 }
 0x968   :  { %18069 = vmatmul.mubr.msk.f32.gmra.mrb[164].mxu1 %vm8061_vm3, %v24143_v54  ;;  %v9812_v54 = vld [vmem:[#allocation3 + $0x9c] sm:$0xff] }
 0x969   :  { %18071 = vmatprep.mubr.msk.f32.mxu1 %vm20418_vm2, %v20417_v1 }
 0x96c   :  { %18072 = vmatmul.mubr.msk.f32.gmra.mrb[166].mxu1 %vm8061_vm3, %v24149_v52  ;;  %v9813_v52 = vld [vmem:[#allocation3 + $0xa4] sm:$0xff] }
 0x96d   :  { %18074 = vmatprep.mubr.msk.f32.mxu1 %vm20418_vm2, %v20417_v1 }
 0x970   :  { %18075 = vmatmul.mubr.msk.f32.gmra.mrb[168].mxu1 %vm8061_vm3, %v8911_v21  ;;  %v9814_v21 = vld [vmem:[#allocation3 + $0xac] sm:$0xff] }
 0x971   :  { %18077 = vmatprep.mubr.msk.f32.mxu1 %vm20418_vm2, %v20417_v1 }
 0x974   :  { %18078 = vmatmul.mubr.msk.f32.gmra.mrb[170].mxu1 %vm8061_vm3, %v8912_v33  ;;  %v9815_v33 = vld [vmem:[#allocation3 + $0xb4] sm:$0xff] }
 0x975   :  { %18080 = vmatprep.mubr.msk.f32.mxu1 %vm20418_vm2, %v20417_v1 }
 0x978   :  { %18081 = vmatmul.mubr.msk.f32.gmra.mrb[172].mxu1 %vm8061_vm3, %v8913_v34  ;;  %v9816_v34 = vld [vmem:[#allocation3 + $0xbc] sm:$0x3] }
 0x979   :  { %18083 = vmatprep.mubr.msk.f32.mxu1 %vm20418_vm2, %v20417_v1 }
 0x97c   :  { %18084 = vmatmul.mubr.msk.f32.gmra.mrb[174].mxu1 %vm8061_vm3, %v8914_v48  ;;  %v14520_v48 = vld [vmem:[%s25104_s2 + $0x38] sm:$0xff] }
 0x97d   :  { %18086 = vmatprep.mubr.msk.f32.mxu1 %vm20418_vm2, %v20417_v1 }
 0x980   :  { %18087 = vmatmul.mubr.msk.f32.gmra.mrb[176].mxu1 %vm8061_vm3, %v8915_v46  ;;  %v10112_v46 = vld [vmem:[#allocation3 + $0xbc] sm:$0xff] }
 0x981   :  { %18089 = vmatprep.mubr.msk.f32.mxu1 %vm20418_vm2, %v20417_v1 }
 0x984   :  { %18090 = vmatmul.mubr.msk.f32.gmra.mrb[178].mxu1 %vm8061_vm3, %v8916_v44  ;;  %v10113_v44 = vld [vmem:[#allocation3 + $0xc4] sm:$0x3] }
 0x985   :  { %18092 = vmatprep.mubr.msk.f32.mxu1 %vm20418_vm2, %v20417_v1 }
 0x988   :  { %18093 = vmatmul.mubr.msk.f32.gmra.mrb[180].mxu1 %vm8061_vm3, %v8917_v31  ;;  %v14544_v31 = vld [vmem:[%s25104_s2 + $0x40] sm:$0xff] }
 0x989   :  { %18095 = vmatprep.mubr.msk.f32.mxu1 %vm20418_vm2, %v20417_v1 }
 0x98c   :  { %18096 = vmatmul.mubr.msk.f32.gmra.mrb[182].mxu1 %vm8061_vm3, %v8918_v5  ;;  %v10388_v5 = vld [vmem:[#allocation3 + $0x15] sm:$0xff] }
 0x98d   :  { %18098 = vmatprep.mubr.msk.f32.mxu1 %vm20418_vm2, %v20417_v1 }
 0x990   :  { %18099 = vmatmul.mubr.msk.f32.gmra.mrb[184].mxu1 %vm8061_vm3, %v8919_v14  ;;  %v10389_v14 = vld [vmem:[#allocation3 + $0x1d] sm:$0xff] }
 0x991   :  { %18101 = vmatprep.mubr.msk.f32.mxu1 %vm20418_vm2, %v20417_v1 }
 0x994   :  { %18102 = vmatmul.mubr.msk.f32.gmra.mrb[186].mxu1 %vm8061_vm3, %v8920_v63  ;;  %v10390_v63 = vld [vmem:[#allocation3 + $0x25] sm:$0xff] }
 0x995   :  { %18104 = vmatprep.mubr.msk.f32.mxu1 %vm20418_vm2, %v20417_v1 }
 0x998   :  { %18105 = vmatmul.mubr.msk.f32.gmra.mrb[188].mxu1 %vm8061_vm3, %v8921_v6  ;;  %v10391_v6 = vld [vmem:[#allocation3 + $0x2d] sm:$0xff] }
 0x999   :  { %18107 = vmatprep.mubr.msk.f32.mxu1 %vm20418_vm2, %v20417_v1 }
 0x99c   :  { %18108 = vmatmul.mubr.msk.f32.gmra.mrb[190].mxu1 %vm8061_vm3, %v8922_v7  ;;  %v10392_v7 = vld [vmem:[#allocation3 + $0x35] sm:$0xff] }
 0x99d   :  { %18110 = vmatprep.mubr.msk.f32.mxu1 %vm20418_vm2, %v20417_v1 }
 0x9a0   :  { %18111 = vmatmul.mubr.msk.f32.gmra.mrb[192].mxu1 %vm8061_vm3, %v8923_v27  ;;  %v10393_v27 = vld [vmem:[#allocation3 + $0x3d] sm:$0xff] }
 0x9a1   :  { %18113 = vmatprep.mubr.msk.f32.mxu1 %vm20418_vm2, %v20417_v1 }
 0x9a4   :  { %18114 = vmatmul.mubr.msk.f32.gmra.mrb[194].mxu1 %vm8061_vm3, %v8924_v53  ;;  %v10394_v53 = vld [vmem:[#allocation3 + $0x45] sm:$0xff] }
 0x9a5   :  { %18116 = vmatprep.mubr.msk.f32.mxu1 %vm20418_vm2, %v20417_v1 }
 0x9a8   :  { %18117 = vmatmul.mubr.msk.f32.gmra.mrb[196].mxu1 %vm8061_vm3, %v9221_v35  ;;  %v10397_v35 = vld [vmem:[#allocation3 + $0x5d] sm:$0xff] }
 0x9a9   :  { %18119 = vmatprep.mubr.msk.f32.mxu1 %vm20418_vm2, %v20417_v1 }
 0x9ac   :  { %18120 = vmatmul.mubr.msk.f32.gmra.mrb[198].mxu1 %vm8061_vm3, %v9222_v57  ;;  %v10398_v57 = vld [vmem:[#allocation3 + $0x65] sm:$0xff] }
 0x9ad   :  { %18124 = vmatprep.mubr.msk.f32.mxu1 %vm20418_vm2, %v20417_v1 }
 0x9b0   :  { %18125 = vmatmul.mubr.msk.f32.vlgmr.msra.gmra.mrb[154].mxu1 %vm8061_vm3, %v9497_v20  ;;  %v10400_v20 = vld [vmem:[#allocation3 + $0x75] sm:$0xff] }
 0x9b1   :  { %18194 = vmatpush3.msra.mxu1 %v14472_v59  ;;  %18127 = vmatprep.mubr.msk.f32.mxu1 %vm20418_vm2, %v20417_v1  ;;  %v10399_v59 = vld [vmem:[#allocation3 + $0x6d] sm:$0xff] }
 0x9b2   :  { %18264 = vmatprep.subr.mxu1 %v20417_v1 }
 0x9b4   :  { %18128 = vmatmul.mubr.msk.f32.gmra.mrb[156].mxu1 %vm8061_vm3, %v9498_v41  ;;  %v10401_v41 = vld [vmem:[#allocation3 + $0x7d] sm:$0xff] }
 0x9b5   :  { %18130 = vmatprep.mubr.msk.f32.mxu1 %vm20418_vm2, %v20417_v1 }
 0x9b8   :  { %18131 = vmatmul.mubr.msk.f32.gmra.mrb[158].mxu1 %vm8061_vm3, %v9499_v62  ;;  %v10402_v62 = vld [vmem:[#allocation3 + $0x85] sm:$0xff] }
 0x9b9   :  { %18133 = vmatprep.mubr.msk.f32.mxu1 %vm20418_vm2, %v20417_v1 }
 0x9bc   :  { %18134 = vmatmul.mubr.msk.f32.gmra.mrb[160].mxu1 %vm8061_vm3, %v9500_v56  ;;  %v10403_v56 = vld [vmem:[#allocation3 + $0x8d] sm:$0xff] }
 0x9bd   :  { %18136 = vmatprep.mubr.msk.f32.mxu1 %vm20418_vm2, %v20417_v1 }
 0x9c0   :  { %18137 = vmatmul.mubr.msk.f32.gmra.mrb[162].mxu1 %vm8061_vm3, %v9501_v37  ;;  %v10404_v37 = vld [vmem:[#allocation3 + $0x95] sm:$0xff] }
 0x9c1   :  { %18139 = vmatprep.mubr.msk.f32.mxu1 %vm20418_vm2, %v20417_v1 }
 0x9c4   :  { %18140 = vmatmul.mubr.msk.f32.gmra.mrb[164].mxu1 %vm8061_vm3, %v9502_v51  ;;  %v10405_v51 = vld [vmem:[#allocation3 + $0x9d] sm:$0xff] }
 0x9c5   :  { %18142 = vmatprep.mubr.msk.f32.mxu1 %vm20418_vm2, %v20417_v1 }
 0x9c8   :  { %18143 = vmatmul.mubr.msk.f32.gmra.mrb[166].mxu1 %vm8061_vm3, %v9503_v3  ;;  %v10406_v3 = vld [vmem:[#allocation3 + $0xa5] sm:$0xff] }
 0x9c9   :  { %18145 = vmatprep.mubr.msk.f32.mxu1 %vm20418_vm2, %v20417_v1 }
 0x9cc   :  { %18146 = vmatmul.mubr.msk.f32.gmra.mrb[168].mxu1 %vm8061_vm3, %v9504_v24  ;;  %v10407_v24 = vld [vmem:[#allocation3 + $0xad] sm:$0xff] }
 0x9cd   :  { %18148 = vmatprep.mubr.msk.f32.mxu1 %vm20418_vm2, %v20417_v1 }
 0x9d0   :  { %18149 = vmatmul.mubr.msk.f32.gmra.mrb[170].mxu1 %vm8061_vm3, %v9505_v9  ;;  %v10408_v9 = vld [vmem:[#allocation3 + $0xb5] sm:$0xff] }
 0x9d1   :  { %18151 = vmatprep.mubr.msk.f32.mxu1 %vm20418_vm2, %v20417_v1 }
 0x9d4   :  { %18152 = vmatmul.mubr.msk.f32.gmra.mrb[172].mxu1 %vm8061_vm3, %v9506_v26  ;;  %v10409_v26 = vld [vmem:[#allocation3 + $0xbd] sm:$0xff] }
 0x9d5   :  { %18154 = vmatprep.mubr.msk.f32.mxu1 %vm20418_vm2, %v20417_v1 }
 0x9d8   :  { %18155 = vmatmul.mubr.msk.f32.gmra.mrb[174].mxu1 %vm8061_vm3, %v9507_v43  ;;  %v10410_v43 = vld [vmem:[#allocation3 + $0xc5] sm:$0x3] }
 0x9d9   :  { %18157 = vmatprep.mubr.msk.f32.mxu1 %vm20418_vm2, %v20417_v1 }
 0x9dc   :  { %18158 = vmatmul.mubr.msk.f32.gmra.mrb[176].mxu1 %vm8061_vm3, %v9508_v40  ;;  %v10685_v40 = vld [vmem:[#allocation3 + $0x16] sm:$0xff] }
 0x9dd   :  { %18160 = vmatprep.mubr.msk.f32.mxu1 %vm20418_vm2, %v20417_v1 }
 0x9e0   :  { %18161 = vmatmul.mubr.msk.f32.gmra.mrb[178].mxu1 %vm8061_vm3, %v9509_v19  ;;  %v10686_v19 = vld [vmem:[#allocation3 + $0x1e] sm:$0xff] }
 0x9e1   :  { %18163 = vmatprep.mubr.msk.f32.mxu1 %vm20418_vm2, %v20417_v1 }
 0x9e4   :  { %18164 = vmatmul.mubr.msk.f32.gmra.mrb[180].mxu1 %vm8061_vm3, %v9510_v47  ;;  %v10687_v47 = vld [vmem:[#allocation3 + $0x26] sm:$0xff] }
 0x9e5   :  { %18166 = vmatprep.mubr.msk.f32.mxu1 %vm20418_vm2, %v20417_v1 }
 0x9e8   :  { %18167 = vmatmul.mubr.msk.f32.gmra.mrb[182].mxu1 %vm8061_vm3, %v9511_v45  ;;  %v10688_v45 = vld [vmem:[#allocation3 + $0x2e] sm:$0xff] }
 0x9e9   :  { %18169 = vmatprep.mubr.msk.f32.mxu1 %vm20418_vm2, %v20417_v1 }
 0x9ec   :  { %18170 = vmatmul.mubr.msk.f32.gmra.mrb[184].mxu1 %vm8061_vm3, %v9512_v18  ;;  %v10689_v18 = vld [vmem:[#allocation3 + $0x36] sm:$0xff] }
 0x9ed   :  { %18172 = vmatprep.mubr.msk.f32.mxu1 %vm20418_vm2, %v20417_v1 }
 0x9f0   :  { %18173 = vmatmul.mubr.msk.f32.gmra.mrb[186].mxu1 %vm8061_vm3, %v9513_v50  ;;  %v10690_v50 = vld [vmem:[#allocation3 + $0x3e] sm:$0xff] }
 0x9f1   :  { %18175 = vmatprep.mubr.msk.f32.mxu1 %vm20418_vm2, %v20417_v1 }
 0x9f4   :  { %18176 = vmatmul.mubr.msk.f32.gmra.mrb[188].mxu1 %vm8061_vm3, %v9514_v13  ;;  %v10691_v13 = vld [vmem:[#allocation3 + $0x46] sm:$0xff] }
 0x9f5   :  { %18178 = vmatprep.mubr.msk.f32.mxu1 %vm20418_vm2, %v20417_v1 }
 0x9f8   :  { %18179 = vmatmul.mubr.msk.f32.gmra.mrb[190].mxu1 %vm8061_vm3, %v9515_v25  ;;  %v10692_v25 = vld [vmem:[#allocation3 + $0x4e] sm:$0xff] }
 0x9f9   :  { %18181 = vmatprep.mubr.msk.f32.mxu1 %vm20418_vm2, %v20417_v1 }
 0x9fc   :  { %18182 = vmatmul.mubr.msk.f32.gmra.mrb[192].mxu1 %vm8061_vm3, %v9516_v49  ;;  %v10693_v49 = vld [vmem:[#allocation3 + $0x56] sm:$0xff] }
 0x9fd   :  { %18184 = vmatprep.mubr.msk.f32.mxu1 %vm20418_vm2, %v20417_v1 }
 0xa00   :  { %18185 = vmatmul.mubr.msk.f32.gmra.mrb[194].mxu1 %vm8061_vm3, %v9517_v15  ;;  %v10694_v15 = vld [vmem:[#allocation3 + $0x5e] sm:$0xff] }
 0xa01   :  { %18187 = vmatprep.mubr.msk.f32.mxu1 %vm20418_vm2, %v20417_v1 }
 0xa04   :  { %18188 = vmatmul.mubr.msk.f32.gmra.mrb[196].mxu1 %vm8061_vm3, %v9518_v61  ;;  %v10695_v61 = vld [vmem:[#allocation3 + $0x66] sm:$0xff] }
 0xa05   :  { %18190 = vmatprep.mubr.msk.f32.mxu1 %vm20418_vm2, %v20417_v1 }
 0xa08   :  { %18191 = vmatmul.mubr.msk.f32.gmra.mrb[198].mxu1 %vm8061_vm3, %v9519_v32  ;;  %v10696_v32 = vld [vmem:[#allocation3 + $0x6e] sm:$0xff] }
 0xa09   :  { %18195 = vmatprep.mubr.msk.f32.mxu1 %vm20418_vm2, %v20417_v1 }
 0xa0c   :  { %18196 = vmatmul.mubr.msk.f32.vlgmr.msra.gmra.mrb[154].mxu1 %vm8061_vm3, %v9794_v10  ;;  %v10698_v10 = vld [vmem:[#allocation3 + $0x7e] sm:$0xff] }
 0xa0d   :  { %18265 = vmatpush3.msra.mxu1 %v14496_v2  ;;  %18198 = vmatprep.mubr.msk.f32.mxu1 %vm20418_vm2, %v20417_v1  ;;  %v10697_v2 = vld [vmem:[#allocation3 + $0x76] sm:$0xff] }
 0xa0e   :  { %18335 = vmatprep.subr.mxu1 %v20417_v1 }
 0xa10   :  { %18199 = vmatmul.mubr.msk.f32.gmra.mrb[156].mxu1 %vm8061_vm3, %v24360_v11 }
 0xa11   :  { %18201 = vmatprep.mubr.msk.f32.mxu1 %vm20418_vm2, %v20417_v1 }
 0xa14   :  { %18202 = vmatmul.mubr.msk.f32.gmra.mrb[158].mxu1 %vm8061_vm3, %v24366_v42 }
 0xa15   :  { %18204 = vmatprep.mubr.msk.f32.mxu1 %vm20418_vm2, %v20417_v1 }
 0xa18   :  { %18205 = vmatmul.mubr.msk.f32.gmra.mrb[160].mxu1 %vm8061_vm3, %v24372_v30 }
 0xa19   :  { %18207 = vmatprep.mubr.msk.f32.mxu1 %vm20418_vm2, %v20417_v1 }
 0xa1c   :  { %18208 = vmatmul.mubr.msk.f32.gmra.mrb[162].mxu1 %vm8061_vm3, %v24378_v0 }
 0xa1d   :  { %18210 = vmatprep.mubr.msk.f32.mxu1 %vm20418_vm2, %v20417_v1 }
 0xa20   :  { %18211 = vmatmul.mubr.msk.f32.gmra.mrb[164].mxu1 %vm8061_vm3, %v24384_v22 }
 0xa21   :  { %18213 = vmatprep.mubr.msk.f32.mxu1 %vm20418_vm2, %v20417_v1 }
 0xa24   :  { %18214 = vmatmul.mubr.msk.f32.gmra.mrb[166].mxu1 %vm8061_vm3, %v24390_v8 }
 0xa25   :  { %18216 = vmatprep.mubr.msk.f32.mxu1 %vm20418_vm2, %v20417_v1 }
 0xa28   :  { %18217 = vmatmul.mubr.msk.f32.gmra.mrb[168].mxu1 %vm8061_vm3, %v24396_v28 }
 0xa29   :  { %18219 = vmatprep.mubr.msk.f32.mxu1 %vm20418_vm2, %v20417_v1 }
 0xa2c   :  { %18220 = vmatmul.mubr.msk.f32.gmra.mrb[170].mxu1 %vm8061_vm3, %v9802_v23 }
 0xa2d   :  { %18222 = vmatprep.mubr.msk.f32.mxu1 %vm20418_vm2, %v20417_v1 }
 0xa30   :  { %18223 = vmatmul.mubr.msk.f32.gmra.mrb[172].mxu1 %vm8061_vm3, %v9803_v17 }
 0xa31   :  { %18225 = vmatprep.mubr.msk.f32.mxu1 %vm20418_vm2, %v20417_v1 }
 0xa34   :  { %18226 = vmatmul.mubr.msk.f32.gmra.mrb[174].mxu1 %vm8061_vm3, %v9804_v16 }
 0xa35   :  { %18228 = vmatprep.mubr.msk.f32.mxu1 %vm20418_vm2, %v20417_v1 }
 0xa38   :  { %18229 = vmatmul.mubr.msk.f32.gmra.mrb[176].mxu1 %vm8061_vm3, %v9805_v58 }
 0xa39   :  { %18231 = vmatprep.mubr.msk.f32.mxu1 %vm20418_vm2, %v20417_v1 }
 0xa3c   :  { %18232 = vmatmul.mubr.msk.f32.gmra.mrb[178].mxu1 %vm8061_vm3, %v9806_v12 }
 0xa3d   :  { %18234 = vmatprep.mubr.msk.f32.mxu1 %vm20418_vm2, %v20417_v1 }
 0xa40   :  { %18235 = vmatmul.mubr.msk.f32.gmra.mrb[180].mxu1 %vm8061_vm3, %v9807_v55 }
 0xa41   :  { %18237 = vmatprep.mubr.msk.f32.mxu1 %vm20418_vm2, %v20417_v1 }
 0xa44   :  { %18238 = vmatmul.mubr.msk.f32.gmra.mrb[182].mxu1 %vm8061_vm3, %v9808_v39 }
 0xa45   :  { %18240 = vmatprep.mubr.msk.f32.mxu1 %vm20418_vm2, %v20417_v1 }
 0xa48   :  { %18241 = vmatmul.mubr.msk.f32.gmra.mrb[184].mxu1 %vm8061_vm3, %v9809_v60 }
 0xa49   :  { %18243 = vmatprep.mubr.msk.f32.mxu1 %vm20418_vm2, %v20417_v1 }
 0xa4c   :  { %18244 = vmatmul.mubr.msk.f32.gmra.mrb[186].mxu1 %vm8061_vm3, %v9810_v36 }
 0xa4d   :  { %18246 = vmatprep.mubr.msk.f32.mxu1 %vm20418_vm2, %v20417_v1 }
 0xa50   :  { %18247 = vmatmul.mubr.msk.f32.gmra.mrb[188].mxu1 %vm8061_vm3, %v9811_v29 }
 0xa51   :  { %18249 = vmatprep.mubr.msk.f32.mxu1 %vm20418_vm2, %v20417_v1 }
 0xa54   :  { %18250 = vmatmul.mubr.msk.f32.gmra.mrb[190].mxu1 %vm8061_vm3, %v9812_v54 }
 0xa55   :  { %18252 = vmatprep.mubr.msk.f32.mxu1 %vm20418_vm2, %v20417_v1 }
 0xa58   :  { %18253 = vmatmul.mubr.msk.f32.gmra.mrb[192].mxu1 %vm8061_vm3, %v9813_v52 }
 0xa59   :  { %18255 = vmatprep.mubr.msk.f32.mxu1 %vm20418_vm2, %v20417_v1 }
 0xa5c   :  { %18256 = vmatmul.mubr.msk.f32.gmra.mrb[194].mxu1 %vm8061_vm3, %v9814_v21 }
 0xa5d   :  { %18258 = vmatprep.mubr.msk.f32.mxu1 %vm20418_vm2, %v20417_v1 }
 0xa60   :  { %18259 = vmatmul.mubr.msk.f32.gmra.mrb[196].mxu1 %vm8061_vm3, %v9815_v33 }
 0xa61   :  { %18261 = vmatprep.mubr.msk.f32.mxu1 %vm20418_vm2, %v20417_v1 }
 0xa64   :  { %18262 = vmatmul.mubr.msk.f32.gmra.mrb[198].mxu1 %vm8061_vm3, %v9816_v34 }
 0xa65   :  { %18266 = vmatprep.mubr.msk.f32.mxu1 %vm20418_vm2, %v20417_v1 }
 0xa68   :  { %18267 = vmatmul.mubr.msk.f32.vlgmr.msra.gmra.mrb[154].mxu1 %vm8061_vm3, %v24360_v11  ;;  %v10699_v11 = vld [vmem:[#allocation3 + $0x86] sm:$0xff] }
 0xa69   :  { %18336 = vmatpush3.msra.mxu1 %v14520_v48  ;;  %18269 = vmatprep.mubr.msk.f32.mxu1 %vm20418_vm2, %v20417_v1 }
 0xa6a   :  { %18406 = vmatprep.subr.mxu1 %v20417_v1 }
 0xa6c   :  { %18270 = vmatmul.mubr.msk.f32.gmra.mrb[156].mxu1 %vm8061_vm3, %v24366_v42  ;;  %v10700_v42 = vld [vmem:[#allocation3 + $0x8e] sm:$0xff] }
 0xa6d   :  { %18272 = vmatprep.mubr.msk.f32.mxu1 %vm20418_vm2, %v20417_v1 }
 0xa70   :  { %18273 = vmatmul.mubr.msk.f32.gmra.mrb[158].mxu1 %vm8061_vm3, %v24372_v30  ;;  %v10701_v30 = vld [vmem:[#allocation3 + $0x96] sm:$0xff] }
 0xa71   :  { %18275 = vmatprep.mubr.msk.f32.mxu1 %vm20418_vm2, %v20417_v1 }
 0xa74   :  { %18276 = vmatmul.mubr.msk.f32.gmra.mrb[160].mxu1 %vm8061_vm3, %v24378_v0  ;;  %v10702_v0 = vld [vmem:[#allocation3 + $0x9e] sm:$0xff] }
 0xa75   :  { %18278 = vmatprep.mubr.msk.f32.mxu1 %vm20418_vm2, %v20417_v1 }
 0xa78   :  { %18279 = vmatmul.mubr.msk.f32.gmra.mrb[162].mxu1 %vm8061_vm3, %v24384_v22  ;;  %v10703_v22 = vld [vmem:[#allocation3 + $0xa6] sm:$0xff] }
 0xa79   :  { %18281 = vmatprep.mubr.msk.f32.mxu1 %vm20418_vm2, %v20417_v1 }
 0xa7c   :  { %18282 = vmatmul.mubr.msk.f32.gmra.mrb[164].mxu1 %vm8061_vm3, %v24390_v8  ;;  %v10704_v8 = vld [vmem:[#allocation3 + $0xae] sm:$0xff] }
 0xa7d   :  { %18284 = vmatprep.mubr.msk.f32.mxu1 %vm20418_vm2, %v20417_v1 }
 0xa80   :  { %18285 = vmatmul.mubr.msk.f32.gmra.mrb[166].mxu1 %vm8061_vm3, %v24396_v28  ;;  %v10705_v28 = vld [vmem:[#allocation3 + $0xb6] sm:$0xff] }
 0xa81   :  { %18287 = vmatprep.mubr.msk.f32.mxu1 %vm20418_vm2, %v20417_v1 }
 0xa84   :  { %18288 = vmatmul.mubr.msk.f32.gmra.mrb[168].mxu1 %vm8061_vm3, %v9802_v23  ;;  %v10706_v23 = vld [vmem:[#allocation3 + $0xbe] sm:$0xff] }
 0xa85   :  { %18290 = vmatprep.mubr.msk.f32.mxu1 %vm20418_vm2, %v20417_v1 }
 0xa88   :  { %18291 = vmatmul.mubr.msk.f32.gmra.mrb[170].mxu1 %vm8061_vm3, %v9803_v17  ;;  %v10707_v17 = vld [vmem:[#allocation3 + $0xc6] sm:$0x3] }
 0xa89   :  { %18293 = vmatprep.mubr.msk.f32.mxu1 %vm20418_vm2, %v20417_v1 }
 0xa8c   :  { %18294 = vmatmul.mubr.msk.f32.gmra.mrb[172].mxu1 %vm8061_vm3, %v9804_v16  ;;  %v14570_v16 = vld [vmem:[%s25105_s3 + $0x8] sm:$0xff] }
 0xa8d   :  { %18296 = vmatprep.mubr.msk.f32.mxu1 %vm20418_vm2, %v20417_v1 }
 0xa90   :  { %18297 = vmatmul.mubr.msk.f32.gmra.mrb[174].mxu1 %vm8061_vm3, %v9805_v58  ;;  %v24672_v58 = vld [vmem:[%s25105_s3] sm:$0xff] }
 0xa91   :  { %18299 = vmatprep.mubr.msk.f32.mxu1 %vm20418_vm2, %v20417_v1 }
 0xa94   :  { %18300 = vmatmul.mubr.msk.f32.gmra.mrb[176].mxu1 %vm8061_vm3, %v9806_v12  ;;  %v24678_v12 = vld [vmem:[%s25108_s6] ss:$0 sm:$0xff] }
 0xa95   :  { %18302 = vmatprep.mubr.msk.f32.mxu1 %vm20418_vm2, %v20417_v1 }
 0xa98   :  { %18303 = vmatmul.mubr.msk.f32.gmra.mrb[178].mxu1 %vm8061_vm3, %v9807_v55 }
 0xa99   :  { %18305 = vmatprep.mubr.msk.f32.mxu1 %vm20418_vm2, %v20417_v1 }
 0xa9c   :  { %18306 = vmatmul.mubr.msk.f32.gmra.mrb[180].mxu1 %vm8061_vm3, %v9808_v39  ;;  %v24683_v39 = vld [vmem:[%s25112_s10] ss:$0 sm:$0xff] }
 0xa9d   :  { %18308 = vmatprep.mubr.msk.f32.mxu1 %vm20418_vm2, %v20417_v1 }
 0xaa0   :  { %18309 = vmatmul.mubr.msk.f32.gmra.mrb[182].mxu1 %vm8061_vm3, %v9809_v60 }
 0xaa1   :  { %18311 = vmatprep.mubr.msk.f32.mxu1 %vm20418_vm2, %v20417_v1 }
 0xaa4   :  { %18312 = vmatmul.mubr.msk.f32.gmra.mrb[184].mxu1 %vm8061_vm3, %v9810_v36 }
 0xaa5   :  { %18314 = vmatprep.mubr.msk.f32.mxu1 %vm20418_vm2, %v20417_v1 }
 0xaa8   :  { %18315 = vmatmul.mubr.msk.f32.gmra.mrb[186].mxu1 %vm8061_vm3, %v9811_v29 }
 0xaa9   :  { %18317 = vmatprep.mubr.msk.f32.mxu1 %vm20418_vm2, %v20417_v1 }
 0xaac   :  { %18318 = vmatmul.mubr.msk.f32.gmra.mrb[188].mxu1 %vm8061_vm3, %v9812_v54 }
 0xaad   :  { %18320 = vmatprep.mubr.msk.f32.mxu1 %vm20418_vm2, %v20417_v1 }
 0xab0   :  { %18321 = vmatmul.mubr.msk.f32.gmra.mrb[190].mxu1 %vm8061_vm3, %v9813_v52 }
 0xab1   :  { %18323 = vmatprep.mubr.msk.f32.mxu1 %vm20418_vm2, %v20417_v1 }
 0xab4   :  { %18324 = vmatmul.mubr.msk.f32.gmra.mrb[192].mxu1 %vm8061_vm3, %v9814_v21 }
 0xab5   :  { %18326 = vmatprep.mubr.msk.f32.mxu1 %vm20418_vm2, %v20417_v1 }
 0xab8   :  { %18327 = vmatmul.mubr.msk.f32.gmra.mrb[194].mxu1 %vm8061_vm3, %v9815_v33 }
 0xab9   :  { %18329 = vmatprep.mubr.msk.f32.mxu1 %vm20418_vm2, %v20417_v1 }
 0xabc   :  { %18330 = vmatmul.mubr.msk.f32.gmra.mrb[196].mxu1 %vm8061_vm3, %v10112_v46 }
 0xabd   :  { %18332 = vmatprep.mubr.msk.f32.mxu1 %vm20418_vm2, %v20417_v1 }
 0xac0   :  { %18333 = vmatmul.mubr.msk.f32.gmra.mrb[198].mxu1 %vm8061_vm3, %v10113_v44 }
 0xac1   :  { %18337 = vmatprep.mubr.msk.f32.mxu1 %vm20418_vm2, %v20417_v1 }
 0xac4   :  { %18338 = vmatmul.mubr.msk.f32.vlgmr.msra.gmra.mrb[154].mxu1 %vm8061_vm3, %v10388_v5 }
 0xac5   :  { %18407 = vmatpush3.msra.mxu1 %v14544_v31  ;;  %18340 = vmatprep.mubr.msk.f32.mxu1 %vm20418_vm2, %v20417_v1 }
 0xac6   :  { %18477 = vmatprep.subr.mxu1 %v14570_v16 }
 0xac8   :  { %18341 = vmatmul.mubr.msk.f32.gmra.mrb[156].mxu1 %vm8061_vm3, %v10389_v14 }
 0xac9   :  { %18343 = vmatprep.mubr.msk.f32.mxu1 %vm20418_vm2, %v20417_v1 }
 0xacc   :  { %18344 = vmatmul.mubr.msk.f32.gmra.mrb[158].mxu1 %vm8061_vm3, %v10390_v63 }
 0xacd   :  { %18346 = vmatprep.mubr.msk.f32.mxu1 %vm20418_vm2, %v20417_v1 }
 0xad0   :  { %18347 = vmatmul.mubr.msk.f32.gmra.mrb[160].mxu1 %vm8061_vm3, %v10391_v6 }
 0xad1   :  { %18349 = vmatprep.mubr.msk.f32.mxu1 %vm20418_vm2, %v20417_v1 }
 0xad4   :  { %18350 = vmatmul.mubr.msk.f32.gmra.mrb[162].mxu1 %vm8061_vm3, %v10392_v7 }
 0xad5   :  { %18352 = vmatprep.mubr.msk.f32.mxu1 %vm20418_vm2, %v20417_v1 }
 0xad8   :  { %18353 = vmatmul.mubr.msk.f32.gmra.mrb[164].mxu1 %vm8061_vm3, %v10393_v27 }
 0xad9   :  { %18355 = vmatprep.mubr.msk.f32.mxu1 %vm20418_vm2, %v20417_v1 }
 0xadc   :  { %18356 = vmatmul.mubr.msk.f32.gmra.mrb[166].mxu1 %vm8061_vm3, %v10394_v53 }
 0xadd   :  { %18358 = vmatprep.mubr.msk.f32.mxu1 %vm20418_vm2, %v20417_v1 }
 0xae0   :  { %18359 = vmatmul.mubr.msk.f32.gmra.mrb[168].mxu1 %vm8061_vm3, %v10395_v38 }
 0xae1   :  { %18361 = vmatprep.mubr.msk.f32.mxu1 %vm20418_vm2, %v20417_v1 }
 0xae4   :  { %18362 = vmatmul.mubr.msk.f32.gmra.mrb[170].mxu1 %vm8061_vm3, %v10396_v4 }
 0xae5   :  { %18364 = vmatprep.mubr.msk.f32.mxu1 %vm20418_vm2, %v20417_v1 }
 0xae8   :  { %18365 = vmatmul.mubr.msk.f32.gmra.mrb[172].mxu1 %vm8061_vm3, %v10397_v35 }
 0xae9   :  { %18367 = vmatprep.mubr.msk.f32.mxu1 %vm20418_vm2, %v20417_v1 }
 0xaec   :  { %18368 = vmatmul.mubr.msk.f32.gmra.mrb[174].mxu1 %vm8061_vm3, %v10398_v57 }
 0xaed   :  { %18370 = vmatprep.mubr.msk.f32.mxu1 %vm20418_vm2, %v20417_v1 }
 0xaf0   :  { %18371 = vmatmul.mubr.msk.f32.gmra.mrb[176].mxu1 %vm8061_vm3, %v10399_v59 }
 0xaf1   :  { %18373 = vmatprep.mubr.msk.f32.mxu1 %vm20418_vm2, %v20417_v1 }
 0xaf4   :  { %18374 = vmatmul.mubr.msk.f32.gmra.mrb[178].mxu1 %vm8061_vm3, %v10400_v20 }
 0xaf5   :  { %18376 = vmatprep.mubr.msk.f32.mxu1 %vm20418_vm2, %v20417_v1 }
 0xaf8   :  { %18377 = vmatmul.mubr.msk.f32.gmra.mrb[180].mxu1 %vm8061_vm3, %v10401_v41 }
 0xaf9   :  { %18379 = vmatprep.mubr.msk.f32.mxu1 %vm20418_vm2, %v20417_v1 }
 0xafc   :  { %18380 = vmatmul.mubr.msk.f32.gmra.mrb[182].mxu1 %vm8061_vm3, %v10402_v62 }
 0xafd   :  { %18382 = vmatprep.mubr.msk.f32.mxu1 %vm20418_vm2, %v20417_v1 }
 0xb00   :  { %18383 = vmatmul.mubr.msk.f32.gmra.mrb[184].mxu1 %vm8061_vm3, %v10403_v56 }
 0xb01   :  { %18385 = vmatprep.mubr.msk.f32.mxu1 %vm20418_vm2, %v20417_v1 }
 0xb04   :  { %18386 = vmatmul.mubr.msk.f32.gmra.mrb[186].mxu1 %vm8061_vm3, %v10404_v37 }
 0xb05   :  { %18388 = vmatprep.mubr.msk.f32.mxu1 %vm20418_vm2, %v20417_v1 }
 0xb08   :  { %18389 = vmatmul.mubr.msk.f32.gmra.mrb[188].mxu1 %vm8061_vm3, %v10405_v51 }
 0xb09   :  { %18391 = vmatprep.mubr.msk.f32.mxu1 %vm20418_vm2, %v20417_v1 }
 0xb0c   :  { %18392 = vmatmul.mubr.msk.f32.gmra.mrb[190].mxu1 %vm8061_vm3, %v10406_v3 }
 0xb0d   :  { %18394 = vmatprep.mubr.msk.f32.mxu1 %vm20418_vm2, %v20417_v1 }
 0xb10   :  { %18395 = vmatmul.mubr.msk.f32.gmra.mrb[192].mxu1 %vm8061_vm3, %v10407_v24 }
 0xb11   :  { %18397 = vmatprep.mubr.msk.f32.mxu1 %vm20418_vm2, %v20417_v1 }
 0xb14   :  { %18398 = vmatmul.mubr.msk.f32.gmra.mrb[194].mxu1 %vm8061_vm3, %v10408_v9 }
 0xb15   :  { %18400 = vmatprep.mubr.msk.f32.mxu1 %vm20418_vm2, %v20417_v1 }
 0xb18   :  { %18401 = vmatmul.mubr.msk.f32.gmra.mrb[196].mxu1 %vm8061_vm3, %v10409_v26 }
 0xb19   :  { %18403 = vmatprep.mubr.msk.f32.mxu1 %vm20418_vm2, %v20417_v1 }
 0xb1c   :  { %18404 = vmatmul.mubr.msk.f32.gmra.mrb[198].mxu1 %vm8061_vm3, %v10410_v43 }
 0xb1d   :  { %18408 = vmatprep.mubr.msk.f32.mxu1 %vm20418_vm2, %v20417_v1 }
 0xb20   :  { %18409 = vmatmul.mubr.msk.f32.vlgmr.msra.gmra.mrb[154].mxu1 %vm8061_vm3, %v10685_v40 }
 0xb21   :  { %18411 = vmatprep.mubr.msk.f32.mxu1 %vm20418_vm2, %v20417_v1  ;;  %18478 = vmatpush3.msra.mxu1 %v14570_v16 }
 0xb22   :  { %18491 = vmatprep.subr.mxu1 %v24672_v58 }
 0xb24   :  { %18412 = vmatmul.mubr.msk.f32.gmra.mrb[156].mxu1 %vm8061_vm3, %v10686_v19 }
 0xb25   :  { %18414 = vmatprep.mubr.msk.f32.mxu1 %vm20418_vm2, %v20417_v1 }
 0xb28   :  { %18415 = vmatmul.mubr.msk.f32.gmra.mrb[158].mxu1 %vm8061_vm3, %v10687_v47 }
 0xb29   :  { %18417 = vmatprep.mubr.msk.f32.mxu1 %vm20418_vm2, %v20417_v1 }
 0xb2c   :  { %18418 = vmatmul.mubr.msk.f32.gmra.mrb[160].mxu1 %vm8061_vm3, %v10688_v45 }
 0xb2d   :  { %18420 = vmatprep.mubr.msk.f32.mxu1 %vm20418_vm2, %v20417_v1 }
 0xb30   :  { %18421 = vmatmul.mubr.msk.f32.gmra.mrb[162].mxu1 %vm8061_vm3, %v10689_v18 }
 0xb31   :  { %18423 = vmatprep.mubr.msk.f32.mxu1 %vm20418_vm2, %v20417_v1 }
 0xb34   :  { %18424 = vmatmul.mubr.msk.f32.gmra.mrb[164].mxu1 %vm8061_vm3, %v10690_v50 }
 0xb35   :  { %18426 = vmatprep.mubr.msk.f32.mxu1 %vm20418_vm2, %v20417_v1 }
 0xb38   :  { %18427 = vmatmul.mubr.msk.f32.gmra.mrb[166].mxu1 %vm8061_vm3, %v10691_v13 }
 0xb39   :  { %18429 = vmatprep.mubr.msk.f32.mxu1 %vm20418_vm2, %v20417_v1 }
 0xb3c   :  { %18430 = vmatmul.mubr.msk.f32.gmra.mrb[168].mxu1 %vm8061_vm3, %v10692_v25 }
 0xb3d   :  { %18432 = vmatprep.mubr.msk.f32.mxu1 %vm20418_vm2, %v20417_v1 }
 0xb40   :  { %18433 = vmatmul.mubr.msk.f32.gmra.mrb[170].mxu1 %vm8061_vm3, %v10693_v49 }
 0xb41   :  { %18435 = vmatprep.mubr.msk.f32.mxu1 %vm20418_vm2, %v20417_v1 }
 0xb44   :  { %18436 = vmatmul.mubr.msk.f32.gmra.mrb[172].mxu1 %vm8061_vm3, %v10694_v15 }
 0xb45   :  { %18438 = vmatprep.mubr.msk.f32.mxu1 %vm20418_vm2, %v20417_v1 }
 0xb48   :  { %18439 = vmatmul.mubr.msk.f32.gmra.mrb[174].mxu1 %vm8061_vm3, %v10695_v61 }
 0xb49   :  { %18441 = vmatprep.mubr.msk.f32.mxu1 %vm20418_vm2, %v20417_v1 }
 0xb4c   :  { %18442 = vmatmul.mubr.msk.f32.gmra.mrb[176].mxu1 %vm8061_vm3, %v10696_v32 }
 0xb4d   :  { %18444 = vmatprep.mubr.msk.f32.mxu1 %vm20418_vm2, %v20417_v1 }
 0xb50   :  { %18445 = vmatmul.mubr.msk.f32.gmra.mrb[178].mxu1 %vm8061_vm3, %v10697_v2 }
 0xb51   :  { %18447 = vmatprep.mubr.msk.f32.mxu1 %vm20418_vm2, %v20417_v1 }
 0xb54   :  { %18448 = vmatmul.mubr.msk.f32.gmra.mrb[180].mxu1 %vm8061_vm3, %v10698_v10 }
 0xb55   :  { %18450 = vmatprep.mubr.msk.f32.mxu1 %vm20418_vm2, %v20417_v1 }
 0xb58   :  { %18451 = vmatmul.mubr.msk.f32.gmra.mrb[182].mxu1 %vm8061_vm3, %v10699_v11 }
 0xb59   :  { %18453 = vmatprep.mubr.msk.f32.mxu1 %vm20418_vm2, %v20417_v1 }
 0xb5c   :  { %18454 = vmatmul.mubr.msk.f32.gmra.mrb[184].mxu1 %vm8061_vm3, %v10700_v42 }
 0xb5d   :  { %18456 = vmatprep.mubr.msk.f32.mxu1 %vm20418_vm2, %v20417_v1 }
 0xb60   :  { %18457 = vmatmul.mubr.msk.f32.gmra.mrb[186].mxu1 %vm8061_vm3, %v10701_v30 }
 0xb61   :  { %18459 = vmatprep.mubr.msk.f32.mxu1 %vm20418_vm2, %v20417_v1 }
 0xb64   :  { %18460 = vmatmul.mubr.msk.f32.gmra.mrb[188].mxu1 %vm8061_vm3, %v10702_v0 }
 0xb65   :  { %18462 = vmatprep.mubr.msk.f32.mxu1 %vm20418_vm2, %v20417_v1 }
 0xb68   :  { %18463 = vmatmul.mubr.msk.f32.gmra.mrb[190].mxu1 %vm8061_vm3, %v10703_v22 }
 0xb69   :  { %18465 = vmatprep.mubr.msk.f32.mxu1 %vm20418_vm2, %v20417_v1 }
 0xb6c   :  { %18466 = vmatmul.mubr.msk.f32.gmra.mrb[192].mxu1 %vm8061_vm3, %v10704_v8 }
 0xb6d   :  { %18468 = vmatprep.mubr.msk.f32.mxu1 %vm20418_vm2, %v20417_v1 }
 0xb70   :  { %18469 = vmatmul.mubr.msk.f32.gmra.mrb[194].mxu1 %vm8061_vm3, %v10705_v28 }
 0xb71   :  { %18471 = vmatprep.mubr.msk.f32.mxu1 %vm20418_vm2, %v20417_v1 }
 0xb74   :  { %18472 = vmatmul.mubr.msk.f32.gmra.mrb[196].mxu1 %vm8061_vm3, %v10706_v23 }
 0xb75   :  { %18474 = vmatprep.mubr.msk.f32.mxu1 %vm20418_vm2, %v20417_v1 }
 0xb78   :  { %18475 = vmatmul.mubr.msk.f32.gmra.mrb[198].mxu1 %vm8061_vm3, %v10707_v17 }
 0xbf3   :  { %v10845_v55 = vpop.f32.mrb[154].mxu1 }
 0xbf4   :  { %v10989_v60 = vmul.f32 %v24678_v12, %v10845_v55  ;;  %v18410_v36 = vpop.f32.mrb[155].mxu1 }
 0xbf6   :  { %v11019_v29 = vadd.f32 %v24683_v39, %v10989_v60 }
 0xbf7   :  { %v10850_v54 = vpop.f32.mrb[156].mxu1 }
 0xbf8   :  { %vm11042_vm9 = vcmp.gt.f32.partialorder %v11019_v29, 0.0  ;;  %v11065_v52 = vmul.f32 0.01, %v11019_v29  ;;  %v10990_v21 = vmul.f32 %v24678_v12, %v10850_v54  ;;  %v18413_v33 = vpop.f32.mrb[157].mxu1 }
 0xbfa   :  { %v11088_v34 = vsel %vm11042_vm9, %v11019_v29, %v11065_v52  ;;  %v11020_v48 = vadd.f32 %v24683_v39, %v10990_v21 }
 0xbfb   :  { %11111 = vst.msk [vmem:[#allocation7] sm:$0xff] %vm8061_vm3, %v11088_v34  ;;  %v10855_v46 = vpop.f32.mrb[158].mxu1 }
 0xbfc   :  { %vm11043_vm10 = vcmp.gt.f32.partialorder %v11020_v48, 0.0  ;;  %v11066_v44 = vmul.f32 0.01, %v11020_v48  ;;  %v10991_v31 = vmul.f32 %v24678_v12, %v10855_v46  ;;  %v18416_v5 = vpop.f32.mrb[159].mxu1 }
 0xbfe   :  { %v11089_v14 = vsel %vm11043_vm10, %v11020_v48, %v11066_v44  ;;  %v11021_v63 = vadd.f32 %v24683_v39, %v10991_v31 }
 0xbff   :  { %11112 = vst.msk [vmem:[#allocation7 + $0x8] sm:$0xff] %vm8061_vm3, %v11089_v14  ;;  %v10860_v6 = vpop.f32.mrb[160].mxu1 }
 0xc00   :  { %vm11044_vm11 = vcmp.gt.f32.partialorder %v11021_v63, 0.0  ;;  %v11067_v7 = vmul.f32 0.01, %v11021_v63  ;;  %v10992_v27 = vmul.f32 %v24678_v12, %v10860_v6  ;;  %v18419_v53 = vpop.f32.mrb[161].mxu1 }
 0xc02   :  { %v11090_v38 = vsel %vm11044_vm11, %v11021_v63, %v11067_v7  ;;  %v11022_v4 = vadd.f32 %v24683_v39, %v10992_v27  ;;  %v11143_v41 = vld [vmem:[#allocation7] ss:$2 sm:$0xf]  ;;  %v11145_v37 = vld [vmem:[#allocation7 + $0x1] ss:$2 sm:$0xf] }
 0xc03   :  { %11113 = vst.msk [vmem:[#allocation7 + $0x10] sm:$0xff] %vm8061_vm3, %v11090_v38  ;;  %v10865_v35 = vpop.f32.mrb[162].mxu1  ;;  %v11150_v47 = vmax.f32 %v11143_v41, %v11145_v37 }
 0xc04   :  { %vm11045_vm12 = vcmp.gt.f32.partialorder %v11022_v4, 0.0  ;;  %v11068_v57 = vmul.f32 0.01, %v11022_v4  ;;  %v10993_v59 = vmul.f32 %v24678_v12, %v10865_v35  ;;  %v18422_v20 = vpop.f32.mrb[163].mxu1 }
 0xc05   :  { %v24721_v20 = vld [vmem:[%s25105_s3 + $0x10] sm:$0xff] }
 0xc06   :  { %v11091_v62 = vsel %vm11045_vm12, %v11022_v4, %v11068_v57  ;;  %v11023_v56 = vadd.f32 %v24683_v39, %v10993_v59 }
 0xc07   :  { %11114 = vst.msk [vmem:[#allocation7 + $0x18] sm:$0xff] %vm8061_vm3, %v11091_v62  ;;  %v10870_v51 = vpop.f32.mrb[164].mxu1 }
 0xc08   :  { %vm11046_vm13 = vcmp.gt.f32.partialorder %v11023_v56, 0.0  ;;  %v11069_v3 = vmul.f32 0.01, %v11023_v56  ;;  %v10994_v24 = vmul.f32 %v24678_v12, %v10870_v51  ;;  %v18425_v9 = vpop.f32.mrb[165].mxu1 }
 0xc0a   :  { %v11147_v26 = vld [vmem:[#allocation7 + $0xa] ss:$2 sm:$0xf]  ;;  %v11149_v43 = vld [vmem:[#allocation7 + $0xb] ss:$2 sm:$0xf]  ;;  %v11092_v40 = vsel %vm11046_vm13, %v11023_v56, %v11069_v3  ;;  %v11024_v19 = vadd.f32 %v24683_v39, %v10994_v24 }
 0xc0b   :  { %v11151_v45 = vmax.f32 %v11147_v26, %v11149_v43  ;;  %11115 = vst.msk [vmem:[#allocation7 + $0x20] sm:$0xff] %vm8061_vm3, %v11092_v40  ;;  %v10875_v18 = vpop.f32.mrb[166].mxu1 }
 0xc0c   :  { %vm11047_vm14 = vcmp.gt.f32.partialorder %v11024_v19, 0.0  ;;  %v11070_v50 = vmul.f32 0.01, %v11024_v19  ;;  %v10995_v13 = vmul.f32 %v24678_v12, %v10875_v18  ;;  %v18428_v25 = vpop.f32.mrb[167].mxu1 }
 0xc0d   :  { %v11152_v49 = vmax.f32 %v11150_v47, %v11151_v45 }
 0xc0e   :  { %v11156_v15 = vld [vmem:[#allocation7 + $0x14] ss:$2 sm:$0xf]  ;;  %v11093_v61 = vsel %vm11047_vm14, %v11024_v19, %v11070_v50  ;;  %v11025_v32 = vadd.f32 %v24683_v39, %v10995_v13  ;;  %v11158_v2 = vld [vmem:[#allocation7 + $0x15] ss:$2 sm:$0xf] }
 0xc0f   :  { %11116 = vst.msk [vmem:[#allocation7 + $0x28] sm:$0xff] %vm8061_vm3, %v11093_v61  ;;  %v10880_v10 = vpop.f32.mrb[168].mxu1  ;;  %v11163_v23 = vmax.f32 %v11156_v15, %v11158_v2 }
 0xc10   :  { %11154 = vst.msk [vmem:[#allocation4 + $0x7] sm:$0xf] %vm11153_vm1, %v11152_v49  ;;  %vm11048_vm15 = vcmp.gt.f32.partialorder %v11025_v32, 0.0  ;;  %v11071_v11 = vmul.f32 0.01, %v11025_v32  ;;  %v10996_v42 = vmul.f32 %v24678_v12, %v10880_v10  ;;  %v18431_v30 = vpop.f32.mrb[169].mxu1 }
 0xc12   :  { %v11160_v0 = vld [vmem:[#allocation7 + $0x1e] ss:$2 sm:$0xf]  ;;  %v11162_v22 = vld [vmem:[#allocation7 + $0x1f] ss:$2 sm:$0xf]  ;;  %v11094_v8 = vsel %vm11048_vm15, %v11025_v32, %v11071_v11  ;;  %v11026_v28 = vadd.f32 %v24683_v39, %v10996_v42 }
 0xc13   :  { %v11164_v17 = vmax.f32 %v11160_v0, %v11162_v22  ;;  %11117 = vst.msk [vmem:[#allocation7 + $0x30] sm:$0xff] %vm8061_vm3, %v11094_v8  ;;  %v10885_v16 = vpop.f32.mrb[170].mxu1  ;;  %v11252_v8 = vld [vmem:[#allocation4 + $0x21] sm:$0xff] }
 0xc14   :  { %vm11049_vm0 = vcmp.gt.f32.partialorder %v11026_v28, 0.0  ;;  %v11072_v55 = vmul.f32 0.01, %v11026_v28  ;;  %v10997_v60 = vmul.f32 %v24678_v12, %v10885_v16  ;;  %v18434_v36 = vpop.f32.mrb[171].mxu1 }
 0xc15   :  { %v11165_v29 = vmax.f32 %v11163_v23, %v11164_v17 }
 0xc16   :  { %v11095_v54 = vsel %vm11049_vm0, %v11026_v28, %v11072_v55  ;;  %v11027_v52 = vadd.f32 %v24683_v39, %v10997_v60  ;;  %v11168_v44 = vld [vmem:[#allocation7 + $0x28] ss:$2 sm:$0xf]  ;;  %v11170_v14 = vld [vmem:[#allocation7 + $0x29] ss:$2 sm:$0xf] }
 0xc17   :  { %11118 = vst.msk [vmem:[#allocation7 + $0x38] sm:$0xff] %vm8061_vm3, %v11095_v54  ;;  %v10890_v21 = vpop.f32.mrb[172].mxu1  ;;  %v11248_v33 = vld [vmem:[#allocation4 + $0x1] sm:$0xff]  ;;  %v11175_v4 = vmax.f32 %v11168_v44, %v11170_v14 }
 0xc18   :  { %11166 = vst.msk [vmem:[#allocation4 + $0xd] sm:$0xf] %vm11153_vm1, %v11165_v29  ;;  %vm11050_vm4 = vcmp.gt.f32.partialorder %v11027_v52, 0.0  ;;  %v11073_v34 = vmul.f32 0.01, %v11027_v52  ;;  %v10998_v48 = vmul.f32 %v24678_v12, %v10890_v21  ;;  %18479 = vmatprep.mubr.msk.f32.mxu1 %vm8061_vm3, %v11248_v33  ;;  %v18437_v46 = vpop.f32.mrb[173].mxu1 }
 0xc1a   :  { %v11096_v31 = vsel %vm11050_vm4, %v11027_v52, %v11073_v34  ;;  %v11028_v5 = vadd.f32 %v24683_v39, %v10998_v48 }
 0xc1b   :  { %11119 = vst.msk [vmem:[#allocation7 + $0x40] sm:$0xff] %vm8061_vm3, %v11096_v31  ;;  %v10895_v63 = vpop.f32.mrb[174].mxu1 }
 0xc1c   :  { %vm11051_vm5 = vcmp.gt.f32.partialorder %v11028_v5, 0.0  ;;  %v11074_v6 = vmul.f32 0.01, %v11028_v5  ;;  %v18440_v7 = vpop.f32.mrb[175].mxu1 }
 0xc1e   :  { %v11172_v27 = vld [vmem:[#allocation7 + $0x32] ss:$2 sm:$0xf]  ;;  %v11174_v53 = vld [vmem:[#allocation7 + $0x33] ss:$2 sm:$0xf]  ;;  %v11097_v38 = vsel %vm11051_vm5, %v11028_v5, %v11074_v6 }
 0xc1f   :  { %v11176_v35 = vmax.f32 %v11172_v27, %v11174_v53  ;;  %11120 = vst.msk [vmem:[#allocation7 + $0x48] sm:$0xff] %vm8061_vm3, %v11097_v38  ;;  %v10900_v57 = vpop.f32.mrb[176].mxu1  ;;  %v11249_v59 = vld [vmem:[#allocation4 + $0x9] sm:$0xff] }
 0xc20   :  { %18480 = vmatmul.mubr.msk.f32.vlgmr.msra.gmra.mrb[200].mxu1 %vm8061_vm3, %v11249_v59  ;;  %v18443_v41 = vpop.f32.mrb[177].mxu1 }
 0xc21   :  { %v11177_v62 = vmax.f32 %v11175_v4, %v11176_v35  ;;  %18492 = vmatpush3.msra.mxu1 %v24672_v58 }
 0xc22   :  { %v11180_v56 = vld [vmem:[#allocation7 + $0x3c] ss:$2 sm:$0xf]  ;;  %18505 = vmatprep.subr.mxu1 %v24721_v20  ;;  %v11182_v37 = vld [vmem:[#allocation7 + $0x3d] ss:$2 sm:$0xf] }
 0xc23   :  { %v10905_v51 = vpop.f32.mrb[178].mxu1  ;;  %11178 = vst.msk [vmem:[#allocation4 + $0x13] sm:$0xf] %vm11153_vm1, %v11177_v62  ;;  %v11187_v40 = vmax.f32 %v11180_v56, %v11182_v37 }
 0xc24   :  { %v11001_v3 = vmul.f32 %v24678_v12, %v10905_v51  ;;  %v18446_v24 = vpop.f32.mrb[179].mxu1 }
 0xc26   :  { %v11184_v9 = vld [vmem:[#allocation7 + $0x46] ss:$2 sm:$0xf]  ;;  %v11186_v26 = vld [vmem:[#allocation7 + $0x47] ss:$2 sm:$0xf]  ;;  %v11031_v43 = vadd.f32 %v24683_v39, %v11001_v3 }
 0xc27   :  { %v11188_v19 = vmax.f32 %v11184_v9, %v11186_v26  ;;  %v10910_v47 = vpop.f32.mrb[180].mxu1 }
 0xc28   :  { %vm11054_vm6 = vcmp.gt.f32.partialorder %v11031_v43, 0.0  ;;  %v11077_v45 = vmul.f32 0.01, %v11031_v43  ;;  %v11002_v58 = vmul.f32 %v24678_v12, %v10910_v47  ;;  %v18449_v18 = vpop.f32.mrb[181].mxu1 }
 0xc29   :  { %v11189_v50 = vmax.f32 %v11187_v40, %v11188_v19 }
 0xc2a   :  { %v11100_v13 = vsel %vm11054_vm6, %v11031_v43, %v11077_v45  ;;  %v11032_v25 = vadd.f32 %v24683_v39, %v11002_v58  ;;  %v11250_v49 = vld [vmem:[#allocation4 + $0x11] sm:$0xff] }
 0xc2b   :  { %11123 = vst.msk [vmem:[#allocation7 + $0x60] sm:$0xff] %vm8061_vm3, %v11100_v13  ;;  %v10915_v15 = vpop.f32.mrb[182].mxu1  ;;  %18482 = vmatprep.mubr.msk.f32.mxu1 %vm8061_vm3, %v11250_v49 }
 0xc2c   :  { %11190 = vst.msk [vmem:[#allocation4 + $0x19] sm:$0xf] %vm11153_vm1, %v11189_v50  ;;  %vm11055_vm7 = vcmp.gt.f32.partialorder %v11032_v25, 0.0  ;;  %v11078_v61 = vmul.f32 0.01, %v11032_v25  ;;  %v11003_v32 = vmul.f32 %v24678_v12, %v10915_v15  ;;  %v18452_v2 = vpop.f32.mrb[183].mxu1 }
 0xc2e   :  { %v11101_v10 = vsel %vm11055_vm7, %v11032_v25, %v11078_v61  ;;  %v11033_v11 = vadd.f32 %v24683_v39, %v11003_v32 }
 0xc2f   :  { %11124 = vst.msk [vmem:[#allocation7 + $0x68] sm:$0xff] %vm8061_vm3, %v11101_v10  ;;  %v10920_v42 = vpop.f32.mrb[184].mxu1 }
 0xc30   :  { %vm11056_vm9 = vcmp.gt.f32.partialorder %v11033_v11, 0.0  ;;  %v11079_v30 = vmul.f32 0.01, %v11033_v11  ;;  %v11004_v0 = vmul.f32 %v24678_v12, %v10920_v42  ;;  %v18455_v22 = vpop.f32.mrb[185].mxu1 }
 0xc32   :  { %v11102_v28 = vsel %vm11056_vm9, %v11033_v11, %v11079_v30  ;;  %v11034_v23 = vadd.f32 %v24683_v39, %v11004_v0  ;;  %vm12607_vm9 = vcmask 123904  }
 0xc33   :  { %v11251_v17 = vld [vmem:[#allocation4 + $0x19] sm:$0xff]  ;;  %11125 = vst.msk [vmem:[#allocation7 + $0x70] sm:$0xff] %vm8061_vm3, %v11102_v28  ;;  %v10925_v16 = vpop.f32.mrb[186].mxu1 }
 0xc34   :  { %18483 = vmatmul.mubr.msk.f32.gmra.mrb[202].mxu1 %vm8061_vm3, %v11251_v17  ;;  %vm11057_vm10 = vcmp.gt.f32.partialorder %v11034_v23, 0.0  ;;  %v11080_v55 = vmul.f32 0.01, %v11034_v23  ;;  %v11005_v60 = vmul.f32 %v24678_v12, %v10925_v16  ;;  %v18458_v36 = vpop.f32.mrb[187].mxu1 }
 0xc35   :  { %18485 = vmatprep.mubr.msk.f32.mxu1 %vm8061_vm3, %v11252_v8 }
 0xc36   :  { %v11192_v29 = vld [vmem:[#allocation7 + $0x64] ss:$2 sm:$0xf]  ;;  %v11103_v54 = vsel %vm11057_vm10, %v11034_v23, %v11080_v55  ;;  %v11035_v52 = vadd.f32 %v24683_v39, %v11005_v60  ;;  %v11194_v21 = vld [vmem:[#allocation7 + $0x65] ss:$2 sm:$0xf] }
 0xc37   :  { %11126 = vst.msk [vmem:[#allocation7 + $0x78] sm:$0xff] %vm8061_vm3, %v11103_v54  ;;  %v10930_v33 = vpop.f32.mrb[188].mxu1  ;;  %v11199_v63 = vmax.f32 %v11192_v29, %v11194_v21 }
 0xc38   :  { %vm11058_vm11 = vcmp.gt.f32.partialorder %v11035_v52, 0.0  ;;  %v11081_v34 = vmul.f32 0.01, %v11035_v52  ;;  %v11006_v48 = vmul.f32 %v24678_v12, %v10930_v33  ;;  %v18461_v46 = vpop.f32.mrb[189].mxu1 }
 0xc3a   :  { %v11196_v44 = vld [vmem:[#allocation7 + $0x6e] ss:$2 sm:$0xf]  ;;  %v11198_v31 = vld [vmem:[#allocation7 + $0x6f] ss:$2 sm:$0xf]  ;;  %v11104_v5 = vsel %vm11058_vm11, %v11035_v52, %v11081_v34  ;;  %v11036_v14 = vadd.f32 %v24683_v39, %v11006_v48 }
 0xc3b   :  { %v11200_v6 = vmax.f32 %v11196_v44, %v11198_v31  ;;  %11127 = vst.msk [vmem:[#allocation7 + $0x80] sm:$0xff] %vm8061_vm3, %v11104_v5  ;;  %v10935_v7 = vpop.f32.mrb[190].mxu1  ;;  %v11239_v31 = vld [vmem:[#allocation4] sm:$0xff]  ;;  %v24772_v5 = vld [vmem:[#allocation4 + $0x8] sm:$0xff] }
 0xc3c   :  { %vm11059_vm12 = vcmp.gt.f32.partialorder %v11036_v14, 0.0  ;;  %v11082_v27 = vmul.f32 0.01, %v11036_v14  ;;  %v11007_v53 = vmul.f32 %v24678_v12, %v10935_v7  ;;  %v18464_v38 = vpop.f32.mrb[191].mxu1  ;;  %v24786_v7 = vld [vmem:[#allocation4 + $0x18] sm:$0xff] }
 0xc3d   :  { %v11201_v4 = vmax.f32 %v11199_v63, %v11200_v6  ;;  %v24779_v63 = vld [vmem:[#allocation4 + $0x10] sm:$0xff]  ;;  %v24784_v6 = vld [vmem:[#allocation4 + $0x20] sm:$0xff] }
 0xc3e   :  { %v11105_v35 = vsel %vm11059_vm12, %v11036_v14, %v11082_v27  ;;  %v11037_v57 = vadd.f32 %v24683_v39, %v11007_v53  ;;  %v11204_v37 = vld [vmem:[#allocation7 + $0x78] ss:$2 sm:$0xf]  ;;  %v11206_v24 = vld [vmem:[#allocation7 + $0x79] ss:$2 sm:$0xf] }
 0xc3f   :  { %11128 = vst.msk [vmem:[#allocation7 + $0x88] sm:$0xff] %vm8061_vm3, %v11105_v35  ;;  %v10940_v59 = vpop.f32.mrb[192].mxu1  ;;  %v11211_v18 = vmax.f32 %v11204_v37, %v11206_v24  ;;  %v14596_v14 = vld [vmem:[%s25105_s3 + $0x18] sm:$0xff]  ;;  %v14605_v35 = vld [vmem:[%s25105_s3 + $0x20] sm:$0xff]  ;;  %v14614_v24 = vld [vmem:[%s25105_s3 + $0x28] sm:$0xff] }
 0xc40   :  { %11202 = vst.msk [vmem:[#allocation4 + $0x2b] sm:$0xf] %vm11153_vm1, %v11201_v4  ;;  %vm11060_vm13 = vcmp.gt.f32.partialorder %v11037_v57, 0.0  ;;  %v11083_v41 = vmul.f32 0.01, %v11037_v57  ;;  %v11008_v62 = vmul.f32 %v24678_v12, %v10940_v59  ;;  %v18467_v56 = vpop.f32.mrb[193].mxu1 }
 0xc41   :  { %v11516_v38 = vld [vmem:[#allocation4 + $0x2] sm:$0xff]  ;;  %v11517_v4 = vld [vmem:[#allocation4 + $0xa] sm:$0xff] }
 0xc42   :  { %v11106_v51 = vsel %vm11060_vm13, %v11037_v57, %v11083_v41  ;;  %v11038_v3 = vadd.f32 %v24683_v39, %v11008_v62  ;;  %v11518_v57 = vld [vmem:[#allocation4 + $0x12] sm:$0xff]  ;;  %v11520_v59 = vld [vmem:[#allocation4 + $0x22] sm:$0xff]  ;;  %v11519_v41 = vld [vmem:[#allocation4 + $0x1a] sm:$0xff]  ;;  %vm13566_vm13 = vcmask 128000  }
 0xc43   :  { %11129 = vst.msk [vmem:[#allocation7 + $0x90] sm:$0xff] %vm8061_vm3, %v11106_v51  ;;  %v10945_v9 = vpop.f32.mrb[194].mxu1  ;;  %v11663_v51 = vld [vmem:[#allocation4 + $0x6] sm:$0xff] }
 0xc44   :  { %vm11061_vm14 = vcmp.gt.f32.partialorder %v11038_v3, 0.0  ;;  %v11084_v26 = vmul.f32 0.01, %v11038_v3  ;;  %v11009_v43 = vmul.f32 %v24678_v12, %v10945_v9  ;;  %v18470_v40 = vpop.f32.mrb[195].mxu1  ;;  %v24820_v9 = vld [vmem:[#allocation4 + $0x16] sm:$0xff] }
 0xc46   :  { %v11208_v19 = vld [vmem:[#allocation7 + $0x82] ss:$2 sm:$0xf]  ;;  %v11210_v47 = vld [vmem:[#allocation7 + $0x83] ss:$2 sm:$0xf]  ;;  %v11107_v45 = vsel %vm11061_vm14, %v11038_v3, %v11084_v26  ;;  %v11039_v58 = vadd.f32 %v24683_v39, %v11009_v43 }
 0xc47   :  { %v11212_v50 = vmax.f32 %v11208_v19, %v11210_v47  ;;  %11130 = vst.msk [vmem:[#allocation7 + $0x98] sm:$0xff] %vm8061_vm3, %v11107_v45  ;;  %v10950_v13 = vpop.f32.mrb[196].mxu1  ;;  %v11253_v25 = vld [vmem:[#allocation4 + $0x29] sm:$0xff]  ;;  %v24824_v26 = vld [vmem:[#allocation4 + $0x1e] sm:$0xff]  ;;  %vm13578_vm14 = vcmask 122880  }
 0xc48   :  { %vm11062_vm15 = vcmp.gt.f32.partialorder %v11039_v58, 0.0  ;;  %v11085_v49 = vmul.f32 0.01, %v11039_v58  ;;  %v11010_v15 = vmul.f32 %v24678_v12, %v10950_v13  ;;  %18486 = vmatmul.mubr.msk.f32.gmra.mrb[204].mxu1 %vm8061_vm3, %v11253_v25  ;;  %v18473_v61 = vpop.f32.mrb[197].mxu1  ;;  %v24792_v27 = vld [vmem:[#allocation4 + $0x28] sm:$0xff]  ;;  %v11813_v13 = vld [vmem:[#allocation4 + $0x1f] sm:$0xff] }
 0xc49   :  { %v11213_v32 = vmax.f32 %v11211_v18, %v11212_v50  ;;  %v24813_v3 = vld [vmem:[#allocation4 + $0xe] sm:$0xff]  ;;  %v24828_v43 = vld [vmem:[#allocation4 + $0x26] sm:$0xff]  ;;  %v11812_v50 = vld [vmem:[#allocation4 + $0x17] sm:$0xff] }
 0xc4a   :  { %v11216_v2 = vld [vmem:[#allocation7 + $0x8c] ss:$2 sm:$0xf]  ;;  %v11108_v10 = vsel %vm11062_vm15, %v11039_v58, %v11085_v49  ;;  %v11040_v11 = vadd.f32 %v24683_v39, %v11010_v15  ;;  %v11218_v42 = vld [vmem:[#allocation7 + $0x8d] ss:$2 sm:$0xf] }
 0xc4b   :  { %11131 = vst.msk [vmem:[#allocation7 + $0xa0] sm:$0xff] %vm8061_vm3, %v11108_v10  ;;  %v10955_v30 = vpop.f32.mrb[198].mxu1  ;;  %v11223_v55 = vmax.f32 %v11216_v2, %v11218_v42  ;;  %v11810_v45 = vld [vmem:[#allocation4 + $0x7] sm:$0xff]  ;;  %v11811_v58 = vld [vmem:[#allocation4 + $0xf] sm:$0xff] }
 0xc4c   :  { %11214 = vst.msk [vmem:[#allocation4 + $0x31] sm:$0xf] %vm11153_vm1, %v11213_v32  ;;  %vm11063_vm0 = vcmp.gt.f32.partialorder %v11040_v11, 0.0  ;;  %v11086_v0 = vmul.f32 0.01, %v11040_v11  ;;  %v11011_v22 = vmul.f32 %v24678_v12, %v10955_v30  ;;  %v18476_v8 = vpop.f32.mrb[199].mxu1 }
 0xc4d   :  { %v14623_v18 = vld [vmem:[%s25105_s3 + $0x30] sm:$0xff]  ;;  %v14632_v32 = vld [vmem:[%s25105_s3 + $0x38] sm:$0xff]  ;;  %v12105_v42 = vld [vmem:[#allocation4 + $0x14] sm:$0xff] }
 0xc4e   :  { %v11220_v28 = vld [vmem:[#allocation7 + $0x96] ss:$2 sm:$0xf]  ;;  %v11222_v23 = vld [vmem:[#allocation7 + $0x97] ss:$2 sm:$0xf]  ;;  %v11109_v17 = vsel %vm11063_vm0, %v11040_v11, %v11086_v0  ;;  %v11041_v16 = vadd.f32 %v24683_v39, %v11011_v22 }
 0xc4f   :  { %v11224_v60 = vmax.f32 %v11220_v28, %v11222_v23  ;;  %11132 = vst.msk [vmem:[#allocation7 + $0xa8] sm:$0xff] %vm8061_vm3, %v11109_v17  ;;  %v11814_v25 = vld [vmem:[#allocation4 + $0x27] sm:$0xff]  ;;  %v14641_v30 = vld [vmem:[%s25105_s3 + $0x40] sm:$0xff]  ;;  %v12106_v0 = vld [vmem:[#allocation4 + $0x1c] sm:$0xff] }
 0xc50   :  { %vm11064_vm4 = vcmp.gt.f32.partialorder %v11041_v16, 0.0  ;;  %v11087_v36 = vmul.f32 0.01, %v11041_v16  ;;  %v12104_v11 = vld [vmem:[#allocation4 + $0xc] sm:$0xff]  ;;  %v12107_v22 = vld [vmem:[#allocation4 + $0x24] sm:$0xff] }
 0xc51   :  { %v11225_v29 = vmax.f32 %v11223_v55, %v11224_v60  ;;  %v12111_v17 = vld [vmem:[#allocation4 + $0x44] sm:$0x3]  ;;  %v12252_v60 = vld [vmem:[#allocation4 + $0x15] sm:$0xff] }
 0xc52   :  { %v11110_v54 = vsel %vm11064_vm4, %v11041_v16, %v11087_v36  ;;  %v11228_v52 = vld [vmem:[#allocation7 + $0xa0] ss:$2 sm:$0xf]  ;;  %v11230_v12 = vld [vmem:[#allocation7 + $0xa1] ss:$2 sm:$0xf] }
 0xc53   :  { %11226 = vst.msk [vmem:[#allocation4 + $0x37] sm:$0xf] %vm11153_vm1, %v11225_v29  ;;  %v11235_v34 = vmax.f32 %v11228_v52, %v11230_v12  ;;  %v11521_v62 = vld [vmem:[#allocation4 + $0x2a] sm:$0xff]  ;;  %v12253_v55 = vld [vmem:[#allocation4 + $0x1d] sm:$0xff]  ;;  %v12258_v12 = vld [vmem:[#allocation4 + $0x45] sm:$0x3] }
 0xc54   :  { %11133 = vst.msk [vmem:[#allocation7 + $0xb0] sm:$0x3] %vm8138_vm8, %v11110_v54  ;;  %v24832_v40 = vld [vmem:[#allocation4 + $0x2e] sm:$0xff]  ;;  %v12254_v36 = vld [vmem:[#allocation4 + $0x25] sm:$0xff]  ;;  %vm12599_vm8 = vcmask 130048  }
 0xc55   :  { %v11815_v49 = vld [vmem:[#allocation4 + $0x2f] sm:$0xff]  ;;  %12609 = vst.msk [vmem:[#allocation5] sm:$0xff] %vm12599_vm8, %v20417_v1  ;;  %12610 = vst.msk [vmem:[#allocation5 + $0x8] sm:$0xff] %vm12599_vm8, %v20417_v1 }
 0xc56   :  { %v12108_v8 = vld [vmem:[#allocation4 + $0x2c] sm:$0xff]  ;;  %12611 = vst.msk [vmem:[#allocation5 + $0x10] sm:$0xff] %vm12599_vm8, %v20417_v1  ;;  %12612 = vst.msk [vmem:[#allocation5 + $0x18] sm:$0xff] %vm12599_vm8, %v20417_v1 }
 0xc57   :  { %v12251_v16 = vld [vmem:[#allocation4 + $0xd] sm:$0xff] }
 0xc58   :  { %v12255_v29 = vld [vmem:[#allocation4 + $0x2d] sm:$0xff] }
 0xc5a   :  { %v11254_v46 = vld [vmem:[#allocation4 + $0x31] sm:$0xff]  ;;  %v11255_v39 = vld [vmem:[#allocation4 + $0x39] sm:$0x3] }
 0xc5b   :  { %v11232_v21 = vld [vmem:[#allocation7 + $0xaa] ss:$2 sm:$0xf]  ;;  %v11234_v33 = vld [vmem:[#allocation7 + $0xab] ss:$2 sm:$0xf]  ;;  %18488 = vmatprep.mubr.msk.f32.mxu1 %vm8061_vm3, %v11254_v46 }
 0xc5c   :  { %v11236_v48 = vmax.f32 %v11232_v21, %v11234_v33  ;;  %18489 = vmatmul.mubr.msk.f32.gmra.mrb[206].mxu1 %vm8061_vm3, %v11255_v39  ;;  %v11246_v53 = vld [vmem:[#allocation4 + $0x38] sm:$0x3]  ;;  %v11523_v37 = vld [vmem:[#allocation4 + $0x3a] sm:$0x3]  ;;  %v12405_v33 = vld [vmem:[#allocation4 + $0x46] sm:$0x3] }
 0xc5d   :  { %18493 = vmatprep.mubr.msk.f32.mxu1 %vm8061_vm3, %v11239_v31  ;;  %v11522_v56 = vld [vmem:[#allocation4 + $0x32] sm:$0xff]  ;;  %v20419_v39 = vmov 0.0|0.0  }
 0xc5e   :  { %v11237_v44 = vmax.f32 %v11235_v34, %v11236_v48  ;;  %v12109_v28 = vld [vmem:[#allocation4 + $0x34] sm:$0xff]  ;;  %v14652_v34 = vld [vmem:[%s25106_s4 + $0x10] sm:$0xff]  ;;  %v14653_v48 = vld [vmem:[%s25106_s4 + $0x18] sm:$0xff] }
 0xc5f   :  { %v12256_v54 = vld [vmem:[#allocation4 + $0x35] sm:$0xff]  ;;  %v18721_v46 = vpack.c.bf16 %v14653_v48, %v14652_v34 }
 0xc60   :  { %11238 = vst.msk [vmem:[#allocation4 + $0x3d] sm:$0xf] %vm11153_vm1, %v11237_v44  ;;  %18494 = vmatmul.mubr.msk.f32.vlgmr.msra.gmra.mrb[200].mxu1 %vm8061_vm3, %v24772_v5  ;;  %v14650_v44 = vld [vmem:[%s25109_s7] ss:$0 sm:$0xff]  ;;  %v12664_v34 = vld [vmem:[%s25106_s4 + $0x8] sm:$0xff] }
 0xc61   :  { %18506 = vmatpush3.msra.mxu1 %v24721_v20  ;;  %18496 = vmatprep.mubr.msk.f32.mxu1 %vm8061_vm3, %v24779_v63  ;;  %v24796_v20 = vld [vmem:[#allocation4 + $0x30] sm:$0xff] }
 0xc62   :  { %18519 = vmatprep.subr.mxu1 %v14596_v14 }
 0xc64   :  { %18497 = vmatmul.mubr.msk.f32.gmra.mrb[202].mxu1 %vm8061_vm3, %v24786_v7 }
 0xc65   :  { %18499 = vmatprep.mubr.msk.f32.mxu1 %vm8061_vm3, %v24784_v6 }
 0xc67   :  { %v24836_v19 = vld [vmem:[#allocation4 + $0x36] sm:$0xff]  ;;  %v11670_v47 = vld [vmem:[#allocation4 + $0x3e] sm:$0x3]  ;;  %v11964_v10 = vld [vmem:[#allocation4 + $0x40] sm:$0x3] }
 0xc68   :  { %18500 = vmatmul.mubr.msk.f32.gmra.mrb[204].mxu1 %vm8061_vm3, %v24792_v27  ;;  %v11816_v15 = vld [vmem:[#allocation4 + $0x37] sm:$0xff]  ;;  %v11817_v61 = vld [vmem:[#allocation4 + $0x3f] sm:$0x3] }
 0xc69   :  { %18502 = vmatprep.mubr.msk.f32.mxu1 %vm8061_vm3, %v24796_v20  ;;  %v11963_v2 = vld [vmem:[#allocation4 + $0x38] sm:$0xff] }
 0xc6a   :  { %v12110_v23 = vld [vmem:[#allocation4 + $0x3c] sm:$0xff] }
 0xc6b   :  { %v12257_v52 = vld [vmem:[#allocation4 + $0x3d] sm:$0xff] }
 0xc6c   :  { %18503 = vmatmul.mubr.msk.f32.gmra.mrb[206].mxu1 %vm8061_vm3, %v11246_v53  ;;  %v12404_v21 = vld [vmem:[#allocation4 + $0x3e] sm:$0xff] }
 0xc6d   :  { %18507 = vmatprep.mubr.msk.f32.mxu1 %vm8061_vm3, %v11516_v38 }
 0xc70   :  { %18508 = vmatmul.mubr.msk.f32.vlgmr.msra.gmra.mrb[200].mxu1 %vm8061_vm3, %v11517_v4 }
 0xc71   :  { %18520 = vmatpush3.msra.mxu1 %v14596_v14  ;;  %18510 = vmatprep.mubr.msk.f32.mxu1 %vm8061_vm3, %v11518_v57 }
 0xc72   :  { %18533 = vmatprep.subr.mxu1 %v14605_v35 }
 0xc74   :  { %18511 = vmatmul.mubr.msk.f32.gmra.mrb[202].mxu1 %vm8061_vm3, %v11519_v41 }
 0xc75   :  { %18513 = vmatprep.mubr.msk.f32.mxu1 %vm8061_vm3, %v11520_v59 }
 0xc78   :  { %18514 = vmatmul.mubr.msk.f32.gmra.mrb[204].mxu1 %vm8061_vm3, %v11521_v62 }
 0xc79   :  { %18516 = vmatprep.mubr.msk.f32.mxu1 %vm8061_vm3, %v11522_v56 }
 0xc7c   :  { %18517 = vmatmul.mubr.msk.f32.gmra.mrb[206].mxu1 %vm8061_vm3, %v11523_v37 }
 0xc7d   :  { %18521 = vmatprep.mubr.msk.f32.mxu1 %vm8061_vm3, %v11663_v51 }
 0xc80   :  { %18522 = vmatmul.mubr.msk.f32.vlgmr.msra.gmra.mrb[200].mxu1 %vm8061_vm3, %v24813_v3 }
 0xc81   :  { %18534 = vmatpush3.msra.mxu1 %v14605_v35  ;;  %18524 = vmatprep.mubr.msk.f32.mxu1 %vm8061_vm3, %v24820_v9 }
 0xc82   :  { %18547 = vmatprep.subr.mxu1 %v14614_v24 }
 0xc84   :  { %18525 = vmatmul.mubr.msk.f32.gmra.mrb[202].mxu1 %vm8061_vm3, %v24824_v26 }
 0xc85   :  { %18527 = vmatprep.mubr.msk.f32.mxu1 %vm8061_vm3, %v24828_v43 }
 0xc88   :  { %18528 = vmatmul.mubr.msk.f32.gmra.mrb[204].mxu1 %vm8061_vm3, %v24832_v40 }
 0xc89   :  { %18530 = vmatprep.mubr.msk.f32.mxu1 %vm8061_vm3, %v24836_v19 }
 0xc8c   :  { %18531 = vmatmul.mubr.msk.f32.gmra.mrb[206].mxu1 %vm8061_vm3, %v11670_v47 }
 0xc8d   :  { %18535 = vmatprep.mubr.msk.f32.mxu1 %vm8061_vm3, %v11810_v45 }
 0xc90   :  { %18536 = vmatmul.mubr.msk.f32.vlgmr.msra.gmra.mrb[200].mxu1 %vm8061_vm3, %v11811_v58 }
 0xc91   :  { %18548 = vmatpush3.msra.mxu1 %v14614_v24  ;;  %18538 = vmatprep.mubr.msk.f32.mxu1 %vm8061_vm3, %v11812_v50 }
 0xc92   :  { %18561 = vmatprep.subr.mxu1 %v14623_v18 }
 0xc94   :  { %18539 = vmatmul.mubr.msk.f32.gmra.mrb[202].mxu1 %vm8061_vm3, %v11813_v13 }
 0xc95   :  { %18541 = vmatprep.mubr.msk.f32.mxu1 %vm8061_vm3, %v11814_v25 }
 0xc98   :  { %18542 = vmatmul.mubr.msk.f32.gmra.mrb[204].mxu1 %vm8061_vm3, %v11815_v49 }
 0xc99   :  { %18544 = vmatprep.mubr.msk.f32.mxu1 %vm8061_vm3, %v11816_v15 }
 0xc9c   :  { %18545 = vmatmul.mubr.msk.f32.gmra.mrb[206].mxu1 %vm8061_vm3, %v11817_v61 }
 0xc9d   :  { %18549 = vmatprep.mubr.msk.f32.mxu1 %vm8061_vm3, %v24772_v5  ;;  %v14651_v5 = vld [vmem:[%s25113_s11] ss:$0 sm:$0xff] }
 0xca0   :  { %18550 = vmatmul.mubr.msk.f32.vlgmr.msra.gmra.mrb[200].mxu1 %vm8061_vm3, %v24779_v63 }
 0xca1   :  { %18562 = vmatpush3.msra.mxu1 %v14623_v18  ;;  %18552 = vmatprep.mubr.msk.f32.mxu1 %vm8061_vm3, %v24786_v7 }
 0xca2   :  { %18575 = vmatprep.subr.mxu1 %v14632_v32 }
 0xca4   :  { %18553 = vmatmul.mubr.msk.f32.gmra.mrb[202].mxu1 %vm8061_vm3, %v24784_v6 }
 0xca5   :  { %18555 = vmatprep.mubr.msk.f32.mxu1 %vm8061_vm3, %v24792_v27 }
 0xca8   :  { %18556 = vmatmul.mubr.msk.f32.gmra.mrb[204].mxu1 %vm8061_vm3, %v24796_v20 }
 0xca9   :  { %18558 = vmatprep.mubr.msk.f32.mxu1 %vm8061_vm3, %v11963_v2 }
 0xcac   :  { %18559 = vmatmul.mubr.msk.f32.gmra.mrb[206].mxu1 %vm8061_vm3, %v11964_v10 }
 0xcad   :  { %18563 = vmatprep.mubr.msk.f32.mxu1 %vm8061_vm3, %v12104_v11 }
 0xcb0   :  { %18564 = vmatmul.mubr.msk.f32.vlgmr.msra.gmra.mrb[200].mxu1 %vm8061_vm3, %v12105_v42 }
 0xcb1   :  { %18576 = vmatpush3.msra.mxu1 %v14632_v32  ;;  %18566 = vmatprep.mubr.msk.f32.mxu1 %vm8061_vm3, %v12106_v0 }
 0xcb2   :  { %18589 = vmatprep.subr.mxu1 %v14641_v30 }
 0xcb4   :  { %18567 = vmatmul.mubr.msk.f32.gmra.mrb[202].mxu1 %vm8061_vm3, %v12107_v22 }
 0xcb5   :  { %18569 = vmatprep.mubr.msk.f32.mxu1 %vm8061_vm3, %v12108_v8 }
 0xcb8   :  { %18570 = vmatmul.mubr.msk.f32.gmra.mrb[204].mxu1 %vm8061_vm3, %v12109_v28 }
 0xcb9   :  { %18572 = vmatprep.mubr.msk.f32.mxu1 %vm8061_vm3, %v12110_v23 }
 0xcbc   :  { %18573 = vmatmul.mubr.msk.f32.gmra.mrb[206].mxu1 %vm8061_vm3, %v12111_v17 }
 0xcbd   :  { %18577 = vmatprep.mubr.msk.f32.mxu1 %vm8061_vm3, %v12251_v16 }
 0xcc0   :  { %18578 = vmatmul.mubr.msk.f32.vlgmr.msra.gmra.mrb[200].mxu1 %vm8061_vm3, %v12252_v60 }
 0xcc1   :  { %18590 = vmatpush3.msra.mxu1 %v14641_v30  ;;  %18580 = vmatprep.mubr.msk.f32.mxu1 %vm8061_vm3, %v12253_v55 }
 0xcc2   :  { %18720 = vmatprep.subr.bf16.mxu1 %v20419_v39 }
 0xcc4   :  { %18581 = vmatmul.mubr.msk.f32.gmra.mrb[202].mxu1 %vm8061_vm3, %v12254_v36 }
 0xcc5   :  { %18583 = vmatprep.mubr.msk.f32.mxu1 %vm8061_vm3, %v12255_v29 }
 0xcc8   :  { %18584 = vmatmul.mubr.msk.f32.gmra.mrb[204].mxu1 %vm8061_vm3, %v12256_v54 }
 0xcc9   :  { %18586 = vmatprep.mubr.msk.f32.mxu1 %vm8061_vm3, %v12257_v52 }
 0xccc   :  { %18587 = vmatmul.mubr.msk.f32.gmra.mrb[206].mxu1 %vm8061_vm3, %v12258_v12 }
 0xccd   :  { %18591 = vmatprep.mubr.msk.f32.mxu1 %vm8061_vm3, %v24813_v3 }
 0xcd0   :  { %18592 = vmatmul.mubr.msk.f32.vlgmr.msra.gmra.mrb[200].mxu1 %vm8061_vm3, %v24820_v9 }
 0xcd1   :  { %18594 = vmatprep.mubr.msk.f32.mxu1 %vm8061_vm3, %v24824_v26  ;;  %18722 = vmatpush3.bf16.msra.mxu1 %v18721_v46 }
 0xcd2   :  { %18723 = vmatprep.subr.bf16.mxu1 %v20419_v39 }
 0xcd4   :  { %18595 = vmatmul.mubr.msk.f32.gmra.mrb[202].mxu1 %vm8061_vm3, %v24828_v43 }
 0xcd5   :  { %18597 = vmatprep.mubr.msk.f32.mxu1 %vm8061_vm3, %v24832_v40 }
 0xcd8   :  { %18598 = vmatmul.mubr.msk.f32.gmra.mrb[204].mxu1 %vm8061_vm3, %v24836_v19 }
 0xcd9   :  { %18600 = vmatprep.mubr.msk.f32.mxu1 %vm8061_vm3, %v12404_v21 }
 0xcdc   :  { %18601 = vmatmul.mubr.msk.f32.gmra.mrb[206].mxu1 %vm8061_vm3, %v12405_v33  ;;  %v12663_v33 = vld [vmem:[%s25106_s4] sm:$0xff] }
 0xcdd   :  { %18607 = vmatprep.mubr.msk.f32.mxu1 %vm20418_vm2, %v20417_v1 }
 0xda3   :  { %v18593_v31 = vpop.f32.mrb[200].mxu1 }
 0xda4   :  { %v12553_v14 = vmul.f32 %v18593_v31, %v14650_v44  ;;  %v12498_v63 = vpop.f32.mrb[201].mxu1  ;;  %v18724_v31 = vpack.c.bf16 %v12664_v34, %v12663_v33 }
 0xda5   :  { %v12552_v6 = vmul.f32 %v14650_v44, %v12498_v63 }
 0xda6   :  { %v12568_v7 = vadd.f32 %v14651_v5, %v12553_v14 }
 0xda7   :  { %v12567_v27 = vadd.f32 %v14651_v5, %v12552_v6  ;;  %v18596_v20 = vpop.f32.mrb[202].mxu1 }
 0xda8   :  { %vm12576_vm3 = vcmp.gt.f32.partialorder %v12568_v7, 0.0  ;;  %v12584_v53 = vmul.f32 0.01, %v12568_v7  ;;  %v12508_v38 = vpop.f32.mrb[203].mxu1 }
 0xda9   :  { %vm12575_vm1 = vcmp.gt.f32.partialorder %v12567_v27, 0.0  ;;  %v12583_v4 = vmul.f32 0.01, %v12567_v27  ;;  %v12554_v35 = vmul.f32 %v14650_v44, %v12508_v38  ;;  %v14660_v38 = vld [vmem:[%s25106_s4 + $0x20] sm:$0xff] }
 0xdaa   :  { %v12592_v57 = vsel %vm12576_vm3, %v12568_v7, %v12584_v53 }
 0xdab   :  { %12601 = vst.msk [vmem:[#allocation8 + $0x8] sm:$0xff] %vm12599_vm8, %v12592_v57  ;;  %v12591_v59 = vsel %vm12575_vm1, %v12567_v27, %v12583_v4  ;;  %v12569_v41 = vadd.f32 %v14651_v5, %v12554_v35  ;;  %v18599_v62 = vpop.f32.mrb[204].mxu1  ;;  %v14661_v4 = vld [vmem:[%s25106_s4 + $0x28] sm:$0xff] }
 0xdac   :  { %12600 = vst.msk [vmem:[#allocation8] sm:$0xff] %vm12599_vm8, %v12591_v59  ;;  %v12557_v56 = vmul.f32 %v18599_v62, %v14650_v44  ;;  %v12518_v37 = vpop.f32.mrb[205].mxu1  ;;  %v18727_v35 = vpack.c.bf16 %v14661_v4, %v14660_v38  ;;  %v14666_v62 = vld [vmem:[%s25106_s4 + $0x38] sm:$0xff] }
 0xdad   :  { %vm12577_vm5 = vcmp.gt.f32.partialorder %v12569_v41, 0.0  ;;  %v12585_v51 = vmul.f32 0.01, %v12569_v41  ;;  %v12556_v3 = vmul.f32 %v14650_v44, %v12518_v37 }
 0xdae   :  { %v12572_v24 = vadd.f32 %v14651_v5, %v12557_v56 }
 0xdaf   :  { %v12593_v9 = vsel %vm12577_vm5, %v12569_v41, %v12585_v51  ;;  %v12571_v26 = vadd.f32 %v14651_v5, %v12556_v3  ;;  %v18602_v43 = vpop.f32.mrb[206].mxu1  ;;  %v14665_v41 = vld [vmem:[%s25106_s4 + $0x30] sm:$0xff] }
 0xdb0   :  { %12602 = vst.msk [vmem:[#allocation8 + $0x10] sm:$0xff] %vm12599_vm8, %v12593_v9  ;;  %vm12580_vm6 = vcmp.gt.f32.partialorder %v12572_v24, 0.0  ;;  %v12588_v40 = vmul.f32 0.01, %v12572_v24  ;;  %v12559_v19 = vmul.f32 %v18602_v43, %v14650_v44  ;;  %v12528_v47 = vpop.f32.mrb[207].mxu1  ;;  %v18730_v37 = vpack.c.bf16 %v14666_v62, %v14665_v41  ;;  %v14671_v9 = vld [vmem:[%s25106_s4 + $0x48] sm:$0xff] }
 0xdb1   :  { %vm12579_vm7 = vcmp.gt.f32.partialorder %v12571_v26, 0.0  ;;  %v12587_v45 = vmul.f32 0.01, %v12571_v26  ;;  %v12558_v58 = vmul.f32 %v14650_v44, %v12528_v47  ;;  %v14675_v47 = vld [vmem:[%s25106_s4 + $0x50] sm:$0xff] }
 0xdb2   :  { %v12596_v18 = vsel %vm12580_vm6, %v12572_v24, %v12588_v40  ;;  %v12574_v50 = vadd.f32 %v14651_v5, %v12559_v19  ;;  %v12625_v15 = vld [vmem:[#allocation8 + $0xc] ss:$2 sm:$0x3]  ;;  %v12627_v61 = vld [vmem:[#allocation8 + $0xd] ss:$2 sm:$0x3] }
 0xdb3   :  { %12605 = vst.msk [vmem:[#allocation8 + $0x28] sm:$0xff] %vm12599_vm8, %v12596_v18  ;;  %v12595_v13 = vsel %vm12579_vm7, %v12571_v26, %v12587_v45  ;;  %v12613_v25 = vld [vmem:[#allocation8] ss:$2 sm:$0x3]  ;;  %v12573_v32 = vadd.f32 %v14651_v5, %v12558_v58  ;;  %v12632_v16 = vmax.f32 %v12625_v15, %v12627_v61  ;;  %v14670_v24 = vld [vmem:[%s25106_s4 + $0x40] sm:$0xff] }
 0xdb4   :  { %v12615_v49 = vld [vmem:[#allocation8 + $0x1] ss:$2 sm:$0x3]  ;;  %12604 = vst.msk [vmem:[#allocation8 + $0x20] sm:$0xff] %vm12599_vm8, %v12595_v13  ;;  %vm12582_vm10 = vcmp.gt.f32.partialorder %v12574_v50, 0.0  ;;  %v18733_v43 = vpack.c.bf16 %v14671_v9, %v14670_v24  ;;  %v12948_v19 = vld [vmem:[#allocation5 + $0xc] sm:$0xff] }
 0xdb5   :  { %v12590_v2 = vmul.f32 0.01, %v12574_v50  ;;  %v12617_v10 = vld [vmem:[#allocation8 + $0x6] ss:$2 sm:$0x3]  ;;  %v12620_v11 = vmax.f32 %v12613_v25, %v12615_v49  ;;  %vm12581_vm11 = vcmp.gt.f32.partialorder %v12573_v32, 0.0 }
 0xdb6   :  { %v12619_v42 = vld [vmem:[#allocation8 + $0x7] ss:$2 sm:$0x3]  ;;  %v12589_v30 = vmul.f32 0.01, %v12573_v32  ;;  %v13046_v13 = vld [vmem:[#allocation5 + $0xd] sm:$0xff] }
 0xdb7   :  { %v12598_v0 = vsel %vm12582_vm10, %v12574_v50, %v12590_v2  ;;  %v12621_v22 = vmax.f32 %v12617_v10, %v12619_v42  ;;  %v12629_v8 = vld [vmem:[#allocation8 + $0x12] ss:$2 sm:$0x3]  ;;  %v12631_v28 = vld [vmem:[#allocation8 + $0x13] ss:$2 sm:$0x3] }
 0xdb8   :  { %12608 = vst.msk [vmem:[#allocation8 + $0x38] sm:$0x3] %vm12607_vm9, %v12598_v0  ;;  %v12597_v23 = vsel %vm12581_vm11, %v12573_v32, %v12589_v30  ;;  %v12633_v55 = vmax.f32 %v12629_v8, %v12631_v28  ;;  %v14676_v45 = vld [vmem:[%s25106_s4 + $0x58] sm:$0xff]  ;;  %v14680_v25 = vld [vmem:[%s25106_s4 + $0x60] sm:$0xff]  ;;  %v14681_v49 = vld [vmem:[%s25106_s4 + $0x68] sm:$0xff] }
 0xdb9   :  { %v12622_v17 = vmax.f32 %v12620_v11, %v12621_v22  ;;  %12606 = vst.msk [vmem:[#allocation8 + $0x30] sm:$0xff] %vm12599_vm8, %v12597_v23  ;;  %v18736_v18 = vpack.c.bf16 %v14676_v45, %v14675_v47  ;;  %v18739_v61 = vpack.c.bf16 %v14681_v49, %v14680_v25  ;;  %v14685_v10 = vld [vmem:[%s25106_s4 + $0x70] sm:$0xff]  ;;  %v14686_v11 = vld [vmem:[%s25106_s4 + $0x78] sm:$0xff]  ;;  %v14690_v22 = vld [vmem:[%s25106_s4 + $0x80] sm:$0xff] }
 0xdba   :  { %v12634_v60 = vmax.f32 %v12632_v16, %v12633_v55  ;;  %v12641_v36 = vld [vmem:[#allocation8 + $0x2a] ss:$2 sm:$0x3]  ;;  %v12643_v29 = vld [vmem:[#allocation8 + $0x2b] ss:$2 sm:$0x3]  ;;  %v18742_v30 = vpack.c.bf16 %v14686_v11, %v14685_v10 }
 0xdbb   :  { %12623 = vst.msk [vmem:[#allocation5 + $0x5] sm:$0x3] %vm12607_vm9, %v12622_v17  ;;  %v12637_v54 = vld [vmem:[#allocation8 + $0x24] ss:$2 sm:$0x3]  ;;  %v12645_v12 = vmax.f32 %v12641_v36, %v12643_v29  ;;  %v14691_v8 = vld [vmem:[%s25106_s4 + $0x88] sm:$0xff] }
 0xdbc   :  { %v12639_v52 = vld [vmem:[#allocation8 + $0x25] ss:$2 sm:$0x3]  ;;  %12635 = vst.msk [vmem:[#allocation5 + $0x9] sm:$0x3] %vm12607_vm9, %v12634_v60 }
 0xdbd   :  { %v12644_v21 = vmax.f32 %v12637_v54, %v12639_v52  ;;  %v14695_v60 = vld [vmem:[%s25110_s8] ss:$0 sm:$0xff]  ;;  %s20420_s8 = smov [#allocation10]  }
 0xdbe   :  { %v14696_v29 = vld [vmem:[%s25114_s12] ss:$0 sm:$0xff]  ;;  %s13598_s12 = sshll.u32 %s20420_s8, 4  ;;  %s13599_s12 = int_to_ptr.vmem [resolvable:$true] %s13598_s12 }
 0xdbf   :  { %v12646_v48 = vmax.f32 %v12644_v21, %v12645_v12  ;;  %s20393_s9 = scalar_lea.vmem %s13599_s12, 32  ;;  %p20398_p1 = scmp.lt.s32.totalorder %s13599_s12, %s13599_s12 }
 0xdc0   :  { %v12649_v46 = vld [vmem:[#allocation8 + $0x30] ss:$2 sm:$0x3]  ;;  %v12651_v44 = vld [vmem:[#allocation8 + $0x31] ss:$2 sm:$0x3]  ;;  %p20394_p0 = scmp.ne.s32.totalorder %s13599_s12, %s20393_s9  ;;  %p20399_p2 = scmp.lt.s32.totalorder %s20393_s9, %s20393_s9 }
 0xdc1   :  { %12647 = vst.msk [vmem:[#allocation5 + $0x15] sm:$0x3] %vm12607_vm9, %v12646_v48  ;;  %v12653_v5 = vld [vmem:[#allocation8 + $0x36] ss:$2 sm:$0x3]  ;;  %v12656_v63 = vmax.f32 %v12649_v46, %v12651_v44 }
 0xdc2   :  { %v12655_v14 = vld [vmem:[#allocation8 + $0x37] ss:$2 sm:$0x3]  ;;  %v12665_v7 = vld [vmem:[#allocation5 + $0x1] sm:$0xff]  ;;  %p20400_p3 = por %p20399_p2, %p20398_p1 }
 0xdc3   :  { %v12657_v6 = vmax.f32 %v12653_v5, %v12655_v14  ;;  %18608 = vmatmul.mubr.msk.f32.vlgmr.msra.gmra.mrb[208].mxu1 %vm12599_vm8, %v12665_v7  ;;  %v24945_v27 = vld [vmem:[#allocation5 + $0x9] sm:$0xff]  ;;  %v12660_v57 = vld [vmem:[#allocation5] sm:$0xff] }
 0xdc4   :  { %18725 = vmatpush3.bf16.msra.mxu1 %v18724_v31  ;;  %18610 = vmatprep.mubr.msk.f32.mxu1 %vm20418_vm2, %v20417_v1  ;;  %v24966_v59 = vld [vmem:[#allocation5 + $0x8] sm:$0xff]  ;;  %p20401_p4 = pnand %p20400_p3, %p20394_p0 }
 0xdc5   :  { %v12658_v20 = vmax.f32 %v12656_v63, %v12657_v6  ;;  %18726 = vmatprep.subr.bf16.mxu1 %v20419_v39  ;;  %v12849_v51 = vld [vmem:[#allocation5 + $0x2] sm:$0xff]  ;;  %v24985_v3 = vld [vmem:[#allocation5 + $0xa] sm:$0xff] }
 0xdc6   :  { %v12947_v40 = vld [vmem:[#allocation5 + $0x4] sm:$0xff] }
 0xdc7   :  { %12659 = vst.msk [vmem:[#allocation5 + $0x19] sm:$0x3] %vm12607_vm9, %v12658_v20  ;;  %18611 = vmatmul.mubr.msk.f32.gmra.mrb[210].mxu1 %vm12599_vm8, %v24945_v27  ;;  %v13045_v50 = vld [vmem:[#allocation5 + $0x5] sm:$0xff] }
 0xdc8   :  { %18613 = vmatprep.mubr.msk.f32.mxu1 %vm20418_vm2, %v20417_v1  ;;  %v12667_v53 = vld [vmem:[#allocation5 + $0x11] sm:$0x3f]  ;;  %v13143_v32 = vld [vmem:[#allocation5 + $0x6] sm:$0xff] }
 0xdc9   :  { %v12662_v56 = vld [vmem:[#allocation5 + $0x10] sm:$0x3f] }
 0xdca   :  { %v12851_v26 = vld [vmem:[#allocation5 + $0x12] sm:$0x3f] }
 0xdcb   :  { %18614 = vmatmul.mubr.msk.f32.gmra.mrb[212].mxu1 %vm12599_vm8, %v12667_v53  ;;  %v13144_v2 = vld [vmem:[#allocation5 + $0xe] sm:$0xff] }
 0xdcc   :  { %18620 = vmatprep.mubr.msk.f32.mxu1 %vm20418_vm2, %v20417_v1  ;;  %v13242_v0 = vld [vmem:[#allocation5 + $0x10] sm:$0xff] }
 0xdcd   :  { %v13340_v23 = vld [vmem:[#allocation5 + $0x11] sm:$0xff] }
 0xdce   :  { %v12949_v58 = vld [vmem:[#allocation5 + $0x14] sm:$0x3f]  ;;  %v13439_v55 = vld [vmem:[#allocation5 + $0x1a] sm:$0x3f] }
 0xdcf   :  { %18621 = vmatmul.mubr.msk.f32.vlgmr.msra.gmra.mrb[208].mxu1 %vm12599_vm8, %v12660_v57  ;;  %v13047_v15 = vld [vmem:[#allocation5 + $0x15] sm:$0x3f] }
 0xdd0   :  { %18728 = vmatpush3.bf16.msra.mxu1 %v18727_v35  ;;  %18623 = vmatprep.mubr.msk.f32.mxu1 %vm20418_vm2, %v20417_v1  ;;  %v13145_v42 = vld [vmem:[#allocation5 + $0x16] sm:$0x3f] }
 0xdd1   :  { %18729 = vmatprep.subr.bf16.mxu1 %v20419_v39  ;;  %v13243_v28 = vld [vmem:[#allocation5 + $0x18] sm:$0x3f] }
 0xdd2   :  { %v13341_v17 = vld [vmem:[#allocation5 + $0x19] sm:$0x3f] }
 0xdd3   :  { %18624 = vmatmul.mubr.msk.f32.gmra.mrb[210].mxu1 %vm12599_vm8, %v24966_v59  ;;  %v13438_v16 = vld [vmem:[#allocation5 + $0x12] sm:$0xff] }
 0xdd4   :  { %18626 = vmatprep.mubr.msk.f32.mxu1 %vm20418_vm2, %v20417_v1 }
 0xdd7   :  { %18627 = vmatmul.mubr.msk.f32.gmra.mrb[212].mxu1 %vm12599_vm8, %v12662_v56 }
 0xdd8   :  { %18633 = vmatprep.mubr.msk.f32.mxu1 %vm20418_vm2, %v20417_v1 }
 0xddb   :  { %18634 = vmatmul.mubr.msk.f32.vlgmr.msra.gmra.mrb[208].mxu1 %vm12599_vm8, %v12849_v51 }
 0xddc   :  { %18731 = vmatpush3.bf16.msra.mxu1 %v18730_v37  ;;  %18636 = vmatprep.mubr.msk.f32.mxu1 %vm20418_vm2, %v20417_v1 }
 0xddd   :  { %18732 = vmatprep.subr.bf16.mxu1 %v20419_v39 }
 0xddf   :  { %18637 = vmatmul.mubr.msk.f32.gmra.mrb[210].mxu1 %vm12599_vm8, %v24985_v3 }
 0xde0   :  { %18639 = vmatprep.mubr.msk.f32.mxu1 %vm20418_vm2, %v20417_v1 }
 0xde3   :  { %18640 = vmatmul.mubr.msk.f32.gmra.mrb[212].mxu1 %vm12599_vm8, %v12851_v26 }
 0xde4   :  { %18646 = vmatprep.mubr.msk.f32.mxu1 %vm20418_vm2, %v20417_v1 }
 0xde7   :  { %18647 = vmatmul.mubr.msk.f32.vlgmr.msra.gmra.mrb[208].mxu1 %vm12599_vm8, %v12947_v40 }
 0xde8   :  { %18734 = vmatpush3.bf16.msra.mxu1 %v18733_v43  ;;  %18649 = vmatprep.mubr.msk.f32.mxu1 %vm20418_vm2, %v20417_v1 }
 0xde9   :  { %18735 = vmatprep.subr.bf16.mxu1 %v20419_v39 }
 0xdeb   :  { %18650 = vmatmul.mubr.msk.f32.gmra.mrb[210].mxu1 %vm12599_vm8, %v12948_v19 }
 0xdec   :  { %18652 = vmatprep.mubr.msk.f32.mxu1 %vm20418_vm2, %v20417_v1 }
 0xdef   :  { %18653 = vmatmul.mubr.msk.f32.gmra.mrb[212].mxu1 %vm12599_vm8, %v12949_v58 }
 0xdf0   :  { %18659 = vmatprep.mubr.msk.f32.mxu1 %vm20418_vm2, %v20417_v1 }
 0xdf3   :  { %18660 = vmatmul.mubr.msk.f32.vlgmr.msra.gmra.mrb[208].mxu1 %vm12599_vm8, %v13045_v50 }
 0xdf4   :  { %18737 = vmatpush3.bf16.msra.mxu1 %v18736_v18  ;;  %18662 = vmatprep.mubr.msk.f32.mxu1 %vm20418_vm2, %v20417_v1 }
 0xdf5   :  { %18738 = vmatprep.subr.bf16.mxu1 %v20419_v39 }
 0xdf7   :  { %18663 = vmatmul.mubr.msk.f32.gmra.mrb[210].mxu1 %vm12599_vm8, %v13046_v13 }
 0xdf8   :  { %18665 = vmatprep.mubr.msk.f32.mxu1 %vm20418_vm2, %v20417_v1 }
 0xdfb   :  { %18666 = vmatmul.mubr.msk.f32.gmra.mrb[212].mxu1 %vm12599_vm8, %v13047_v15 }
 0xdfc   :  { %18672 = vmatprep.mubr.msk.f32.mxu1 %vm20418_vm2, %v20417_v1 }
 0xdff   :  { %18673 = vmatmul.mubr.msk.f32.vlgmr.msra.gmra.mrb[208].mxu1 %vm12599_vm8, %v13143_v32 }
 0xe00   :  { %18740 = vmatpush3.bf16.msra.mxu1 %v18739_v61  ;;  %18675 = vmatprep.mubr.msk.f32.mxu1 %vm20418_vm2, %v20417_v1 }
 0xe01   :  { %18741 = vmatprep.subr.bf16.mxu1 %v20419_v39 }
 0xe03   :  { %18676 = vmatmul.mubr.msk.f32.gmra.mrb[210].mxu1 %vm12599_vm8, %v13144_v2 }
 0xe04   :  { %18678 = vmatprep.mubr.msk.f32.mxu1 %vm20418_vm2, %v20417_v1 }
 0xe07   :  { %18679 = vmatmul.mubr.msk.f32.gmra.mrb[212].mxu1 %vm12599_vm8, %v13145_v42 }
 0xe08   :  { %18685 = vmatprep.mubr.msk.f32.mxu1 %vm20418_vm2, %v20417_v1 }
 0xe0b   :  { %18686 = vmatmul.mubr.msk.f32.vlgmr.msra.gmra.mrb[208].mxu1 %vm12599_vm8, %v24966_v59 }
 0xe0c   :  { %18743 = vmatpush3.bf16.msra.mxu1 %v18742_v30  ;;  %18688 = vmatprep.mubr.msk.f32.mxu1 %vm20418_vm2, %v20417_v1 }
 0xe0d   :  { %18744 = vmatprep.subr.bf16.mxu1 %v20419_v39  ;;  %v18745_v39 = vpack.c.bf16 %v14691_v8, %v14690_v22 }
 0xe0f   :  { %18689 = vmatmul.mubr.msk.f32.gmra.mrb[210].mxu1 %vm12599_vm8, %v13242_v0 }
 0xe10   :  { %18691 = vmatprep.mubr.msk.f32.mxu1 %vm20418_vm2, %v20417_v1 }
 0xe13   :  { %18692 = vmatmul.mubr.msk.f32.gmra.mrb[212].mxu1 %vm12599_vm8, %v13243_v28 }
 0xe14   :  { %18698 = vmatprep.mubr.msk.f32.mxu1 %vm20418_vm2, %v20417_v1 }
 0xe17   :  { %18699 = vmatmul.mubr.msk.f32.vlgmr.msra.gmra.mrb[208].mxu1 %vm12599_vm8, %v24945_v27 }
 0xe18   :  { %18746 = vmatpush3.bf16.msra.mxu1 %v18745_v39  ;;  %18701 = vmatprep.mubr.msk.f32.mxu1 %vm20418_vm2, %v20417_v1 }
 0xe1b   :  { %18702 = vmatmul.mubr.msk.f32.gmra.mrb[210].mxu1 %vm12599_vm8, %v13340_v23 }
 0xe1c   :  { %18704 = vmatprep.mubr.msk.f32.mxu1 %vm20418_vm2, %v20417_v1 }
 0xe1f   :  { %18705 = vmatmul.mubr.msk.f32.gmra.mrb[212].mxu1 %vm12599_vm8, %v13341_v17 }
 0xe20   :  { %18711 = vmatprep.mubr.msk.f32.mxu1 %vm20418_vm2, %v20417_v1 }
 0xe23   :  { %18712 = vmatmul.mubr.msk.f32.vlgmr.msra.gmra.mrb[208].mxu1 %vm12599_vm8, %v24985_v3 }
 0xe24   :  { %18714 = vmatprep.mubr.msk.f32.mxu1 %vm20418_vm2, %v20417_v1 }
 0xe27   :  { %18715 = vmatmul.mubr.msk.f32.gmra.mrb[210].mxu1 %vm12599_vm8, %v13438_v16 }
 0xe28   :  { %18717 = vmatprep.mubr.msk.f32.mxu1 %vm20418_vm2, %v20417_v1 }
 0xe2b   :  { %18718 = vmatmul.mubr.msk.f32.gmra.mrb[212].mxu1 %vm12599_vm8, %v13439_v55 }
 0xef6   :  { %v13518_v36 = vpop.f32.mrb[208].mxu1 }
 0xef7   :  { %v13542_v54 = vmul.f32 %v14695_v60, %v13518_v36  ;;  %v18713_v52 = vpop.f32.mrb[209].mxu1 }
 0xef9   :  { %v13552_v12 = vadd.f32 %v14696_v29, %v13542_v54 }
 0xefa   :  { %v13523_v21 = vpop.f32.mrb[210].mxu1 }
 0xefb   :  { %vm13555_vm12 = vcmp.gt.f32.partialorder %v13552_v12, 0.0  ;;  %v13558_v33 = vmul.f32 0.01, %v13552_v12  ;;  %v18716_v34 = vpop.f32.mrb[211].mxu1 }
 0xefd   :  { %v13561_v1 = vsel %vm13555_vm12, %v13552_v12, %v13558_v33 }
 0xefe   :  { %13564 = vst.msk [vmem:[#allocation9] sm:$0xff] %vm12599_vm8, %v13561_v1  ;;  %v13528_v48 = vpop.f32.mrb[212].mxu1 }
 0xeff   :  { %v13544_v46 = vmul.f32 %v14695_v60, %v13528_v48  ;;  %v18719_v44 = vpop.f32.mrb[213].mxu1 }
 0xf01   :  { %v13554_v31 = vadd.f32 %v14696_v29, %v13544_v46 }
 0xf03   :  { %vm13557_vm2 = vcmp.gt.f32.partialorder %v13554_v31, 0.0  ;;  %v13560_v5 = vmul.f32 0.01, %v13554_v31 }
 0xf05   :  { %v13563_v14 = vsel %vm13557_vm2, %v13554_v31, %v13560_v5  ;;  %v13568_v63 = vld [vmem:[#allocation9] ss:$2 sm:$0x1]  ;;  %v13570_v6 = vld [vmem:[#allocation9 + $0x1] ss:$2 sm:$0x1] }
 0xf06   :  { %13567 = vst.msk [vmem:[#allocation9 + $0x10] sm:$0x3f] %vm13566_vm13, %v13563_v14  ;;  %v13572_v7 = vld [vmem:[#allocation9 + $0x4] ss:$2 sm:$0x1]  ;;  %v13575_v20 = vmax.f32 %v13568_v63, %v13570_v6 }
 0xf07   :  { %v13574_v27 = vld [vmem:[#allocation9 + $0x5] ss:$2 sm:$0x1] }
 0xf08   :  { %v13576_v53 = vmax.f32 %v13572_v7, %v13574_v27 }
 0xf0a   :  { %v13577_v38 = vmax.f32 %v13575_v20, %v13576_v53 }
 0xf0c   :  { %13579 = vst.msk [vmem:[#allocation10] sm:$0x1] %vm13578_vm14, %v13577_v38 }
 0xf0d   :  { %v13581_v4 = vld [vmem:[#allocation9 + $0x10] ss:$2 sm:$0x1]  ;;  %v13583_v35 = vld [vmem:[#allocation9 + $0x11] ss:$2 sm:$0x1] }
 0xf0e   :  { %v13585_v57 = vld [vmem:[#allocation9 + $0x14] ss:$2 sm:$0x1]  ;;  %v13587_v59 = vld [vmem:[#allocation9 + $0x15] ss:$2 sm:$0x1]  ;;  %v13588_v41 = vmax.f32 %v13581_v4, %v13583_v35 }
 0xf0f   :  { %v13589_v62 = vmax.f32 %v13585_v57, %v13587_v59 }
 0xf11   :  { %v13590_v56 = vmax.f32 %v13588_v41, %v13589_v62 }
 0xf13   :  { %13592 = vst.msk [vmem:[#allocation10 + $0x1] sm:$0x1] %vm13578_vm14, %v13590_v56 }
 0xf14   :  { %20404 = shalt.err (!%p20401_p4)
}
 0xf15   :  { %s20405_s14 = scalar_lea.hbm %s25115_s13, 32 }
 0xf16   :  { %p20406_p5 = scmp.ne.s32.totalorder %s25115_s13, %s20405_s14  ;;  %p20409_p6 = scmp.lt.u32.totalorder %s20405_s14, %s25115_s13 }
 0xf18   :  { %p20411_p7 = pnand %p20409_p6, %p20406_p5 }
 0xf1a   :  { %20414 = shalt.err (!%p20411_p7)
}
 0xf1b   :  { %s20421_s1 = smov 16   ;;  %s20422_s19 = smov 1  }
 0xf1c   :  { %13604 = dma.vmem_to_hbm [thread:$0]  %s13599_s12, 32, %s25115_s13, [#allocation11], %s20421_s1, %s20421_s1, %s20422_s19  }
 0xf1d   :  { %20415 = dma.done.wait [#allocation11], 32  }
 0xf1e   :  { %20416 = vsyncadd [#allocation11], 4294967264 }
 0xf1f   :  { %13608 = vsyncpa [#allocation11], 1 }

</bundles_post_ra>
